<compile_context>
chip_gen: v7x
topology: tpu7x:2x2x1
jax: 0.10.0
libtpu: 0.0.40
codegen_flags: <defaults>
</compile_context>

<pallas_src>
import functools

import jax
import jax.numpy as jnp
from jax.experimental import pallas as pl
from jax.experimental.pallas import tpu as pltpu


def _round_up(x, m):
    return (x + m - 1) // m * m


# ----------------------------------------------------------------------------
# Pallas kernels
# ----------------------------------------------------------------------------
def _conv3x3x3_bias_act_kernel(x0_ref, x1_ref, x2_ref, w_ref, b_ref, o_ref, *,
                               wp, act):
    """One output depth-plane of a 3x3x3 / stride-1 conv, bias + act fused.

    x{k}_ref : [1, 1, Lpad, Cin]   padded flattened input plane d+k   (f32)
    w_ref    : [3, 9, Cin, Cout]   weights as (kd, kh*3+kw, ci, co)   (bf16)
    b_ref    : [1, Cout]           bias                               (f32)
    o_ref    : [1, 1, Mwin, Cout]  output window, Mwin = H*(W+2)      (bf16)
    """
    mwin = o_ref.shape[2]
    planes = (x0_ref, x1_ref, x2_ref)

    acc = None
    for kd in range(3):
        xr = planes[kd]
        for kh in range(3):
            for kw in range(3):
                off = kh * wp + kw                      # static tap offset
                a = xr[0, 0, off:off + mwin, :].astype(jnp.bfloat16)
                wt = w_ref[kd, kh * 3 + kw]             # [Cin, Cout] bf16
                d = jnp.dot(a, wt, preferred_element_type=jnp.float32)
                acc = d if acc is None else acc + d

    acc = acc + b_ref[...]                              # [Mwin,Cout] + [1,Cout]
    if act == "relu":
        acc = jnp.maximum(acc, 0.0)
    else:
        acc = jnp.tanh(acc)                             # EUP
    o_ref[0, 0] = acc.astype(o_ref.dtype)


def _pool_2x2x2_kernel(x_ref, sel_ref, o_ref, *, pool_max):
    """2x2x2 / stride-2 Max or Avg pooling of one (sample, depth-pair) block.

    x_ref   : [1, 2, H, Wp, C]   conv output window (bf16); valid cols < W
    sel_ref : [2, Wo, Wp]        exact 0/1 even/odd column selectors (f32)
    o_ref   : [1, 1, Ho, Wo, C]  pooled output (f32)
    """
    ho_n = o_ref.shape[2]
    sel_even = sel_ref[0]
    sel_odd = sel_ref[1]
    for ho in range(ho_n):
        acc = None
        for dz in range(2):
            for dy in range(2):
                r = x_ref[0, dz, 2 * ho + dy].astype(jnp.float32)   # [Wp, C]
                if acc is None:
                    acc = r
                elif pool_max:
                    acc = jnp.maximum(acc, r)
                else:
                    acc = acc + r
        # Exact 0/1 selection matmuls pick even / odd columns (< W only).
        even = jnp.dot(sel_even, acc, preferred_element_type=jnp.float32)
        odd = jnp.dot(sel_odd, acc, preferred_element_type=jnp.float32)
        res = jnp.maximum(even, odd) if pool_max else (even + odd) * 0.125
        o_ref[0, 0, ho] = res.astype(o_ref.dtype)


# ----------------------------------------------------------------------------
# Wrappers (layout prep is plain XLA glue; all FLOPs run inside Pallas)
# ----------------------------------------------------------------------------
def _pad_to_flat_planes(x_ndhwc):
    """[N,D,H,W,C] -> zero-padded, flattened-plane layout [N, D+2, Lpad, C] f32."""
    n, d, h, w, c = x_ndhwc.shape
    hp, wp = h + 2, w + 2
    xp = jnp.pad(x_ndhwc, ((0, 0), (1, 1), (1, 1), (1, 1), (0, 0)))
    xp = xp.reshape(n, d + 2, hp * wp, c)
    lpad = _round_up(hp * wp + 2, 8)            # room for the largest tap slice
    xp = jnp.pad(xp, ((0, 0), (0, 0), (0, lpad - hp * wp), (0, 0)))
    return xp.astype(jnp.float32)


def conv3d_3x3_bias_act(x_flat, w, b, act, *, h, w_sp):
    """Conv3d(k=3,s=1,p=1) + bias + activation as a single Pallas kernel.

    x_flat : [N, D+2, Lpad, Cin]  padded flattened-plane input (f32)
    w      : [Cout, Cin, 3, 3, 3] PyTorch Conv3d weight layout
    b      : [Cout]
    Returns the "output window" [N, D, H*(W+2), Cout] (bf16); window columns
    >= W of each row are don't-care values that are never consumed downstream.
    """
    n, dp, lpad, cin = x_flat.shape
    d = dp - 2
    wp = w_sp + 2
    mwin = h * wp
    cout = w.shape[0]

    wr = jnp.transpose(w, (2, 3, 4, 1, 0)).reshape(3, 9, cin, cout)
    wr = wr.astype(jnp.bfloat16)
    br = b.reshape(1, cout).astype(jnp.float32)

    kernel = functools.partial(_conv3x3x3_bias_act_kernel, wp=wp, act=act)
    flops = 2 * n * d * mwin * 27 * cin * cout
    transc = n * d * mwin * cout if act == "tanh" else 0
    bytes_accessed = (3 * n * dp * lpad * cin * 4      # activation reads (depth halo)
                      + wr.size * 2                    # weights
                      + n * d * mwin * cout * 2)       # bf16 output writes

    out = pl.pallas_call(
        kernel,
        out_shape=jax.ShapeDtypeStruct((n, d, mwin, cout), jnp.bfloat16),
        grid_spec=pltpu.PrefetchScalarGridSpec(
            num_scalar_prefetch=0,
            grid=(n, d),
            in_specs=[
                # three views of the same array: depth taps d, d+1, d+2
                pl.BlockSpec((1, 1, lpad, cin), lambda i, j: (i, j, 0, 0)),
                pl.BlockSpec((1, 1, lpad, cin), lambda i, j: (i, j + 1, 0, 0)),
                pl.BlockSpec((1, 1, lpad, cin), lambda i, j: (i, j + 2, 0, 0)),
                pl.BlockSpec((3, 9, cin, cout), lambda i, j: (0, 0, 0, 0)),
                pl.BlockSpec((1, cout), lambda i, j: (0, 0)),
            ],
            out_specs=pl.BlockSpec((1, 1, mwin, cout),
                                   lambda i, j: (i, j, 0, 0)),
        ),
        compiler_params=pltpu.CompilerParams(
            dimension_semantics=("parallel", "parallel")),
        cost_estimate=pl.CostEstimate(flops=int(flops),
                                      transcendentals=int(transc),
                                      bytes_accessed=int(bytes_accessed)),
    )(x_flat, x_flat, x_flat, wr, br)
    return out


def pool3d_2x2x2(y_win, *, h, w_sp, pool_max):
    """2x2x2 stride-2 Max/Avg pooling of the conv output window [N,D,H*(W+2),C]."""
    n, d, _, c = y_win.shape
    wp = w_sp + 2
    do, ho, wo = d // 2, h // 2, w_sp // 2
    y5 = y_win.reshape(n, d, h, wp, c)

    cols = jnp.arange(wp)[None, :]
    sel_even = (cols == (2 * jnp.arange(wo))[:, None]).astype(jnp.float32)
    sel_odd = (cols == (2 * jnp.arange(wo) + 1)[:, None]).astype(jnp.float32)
    sel = jnp.stack([sel_even, sel_odd], axis=0)        # [2, Wo, Wp]

    kernel = functools.partial(_pool_2x2x2_kernel, pool_max=pool_max)
    return pl.pallas_call(
        kernel,
        out_shape=jax.ShapeDtypeStruct((n, do, ho, wo, c), jnp.float32),
        grid_spec=pltpu.PrefetchScalarGridSpec(
            num_scalar_prefetch=0,
            grid=(n, do),
            in_specs=[
                pl.BlockSpec((1, 2, h, wp, c), lambda i, j: (i, j, 0, 0, 0)),
                pl.BlockSpec((2, wo, wp), lambda i, j: (0, 0, 0)),
            ],
            out_specs=pl.BlockSpec((1, 1, ho, wo, c),
                                   lambda i, j: (i, j, 0, 0, 0)),
        ),
        compiler_params=pltpu.CompilerParams(
            dimension_semantics=("parallel", "parallel")),
    )(y5, sel)


def vgg3d_block_2(x_ncdhw, params, *, maxpool=True, activation=True):
    """Forward of VGG3dBlock_2.  x: [N, Cin, D, H, W] -> [N, Cout, D/2, H/2, W/2]."""
    act = "relu" if activation else "tanh"
    w1, b1 = params["conv1"]
    w2, b2 = params["conv2"]

    x = jnp.transpose(x_ncdhw, (0, 2, 3, 4, 1)).astype(jnp.float32)   # -> NDHWC
    n, d, h, w_sp, _ = x.shape
    wp = w_sp + 2

    xf1 = _pad_to_flat_planes(x)
    y1 = conv3d_3x3_bias_act(xf1, w1, b1, act, h=h, w_sp=w_sp)

    # Re-embed conv1's output window into conv2's zero-padded flat layout
    # (one small XLA copy; see TODO(synk) at top of file).
    y1v = y1.reshape(n, d, h, wp, -1)[:, :, :, :w_sp, :].astype(jnp.float32)
    xf2 = _pad_to_flat_planes(y1v)
    y2 = conv3d_3x3_bias_act(xf2, w2, b2, act, h=h, w_sp=w_sp)

    pooled = pool3d_2x2x2(y2, h=h, w_sp=w_sp, pool_max=maxpool)  # [N,Do,Ho,Wo,C]
    return jnp.transpose(pooled, (0, 4, 1, 2, 3))                # -> NCDHW


# ----------------------------------------------------------------------------
# Pure-JAX reference (for validation only)
# ----------------------------------------------------------------------------
def _reference_forward(x, params, *, maxpool, activation):
    w1, b1 = params["conv1"]
    w2, b2 = params["conv2"]
    act = jax.nn.relu if activation else jnp.tanh

    def conv(inp, w, b):
        dn = jax.lax.conv_dimension_numbers(inp.shape, w.shape,
                                            ("NCDHW", "OIDHW", "NCDHW"))
        y = jax.lax.conv_general_dilated(
            inp, w, window_strides=(1, 1, 1),
            padding=((1, 1), (1, 1), (1, 1)), dimension_numbers=dn,
            precision=jax.lax.Precision.HIGHEST)
        return y + b.reshape(1, -1, 1, 1, 1)

    y = act(conv(x, w1, b1))
    y = act(conv(y, w2, b2))
    if maxpool:
        return jax.lax.reduce_window(y, -jnp.inf, jax.lax.max,
                                     (1, 1, 2, 2, 2), (1, 1, 2, 2, 2), "VALID")
    s = jax.lax.reduce_window(y, 0.0, jax.lax.add,
                              (1, 1, 2, 2, 2), (1, 1, 2, 2, 2), "VALID")
    return s / 8.0


# ----------------------------------------------------------------------------
# Main
# ----------------------------------------------------------------------------
if __name__ == "__main__":
    key = jax.random.PRNGKey(0)
    kx, kw1, kb1, kw2, kb2 = jax.random.split(key, 5)

    batch, in_channels, out_channels, spatial = 2, 4, 8, 16
    x = jax.random.normal(kx, (batch, in_channels, spatial, spatial, spatial),
                          jnp.float32)
    params = {
        "conv1": (0.1 * jax.random.normal(
                      kw1, (out_channels, in_channels, 3, 3, 3), jnp.float32),
                  0.1 * jax.random.normal(kb1, (out_channels,), jnp.float32)),
        "conv2": (0.1 * jax.random.normal(
                      kw2, (out_channels, out_channels, 3, 3, 3), jnp.float32),
                  0.1 * jax.random.normal(kb2, (out_channels,), jnp.float32)),
    }

    # ReLU + MaxPool3d(2) configuration.
    fwd = jax.jit(functools.partial(vgg3d_block_2, maxpool=True, activation=True))
    out = jax.block_until_ready(fwd(x, params))
    assert out.shape == (batch, out_channels, spatial // 2, spatial // 2,
                         spatial // 2), out.shape
    ref = _reference_forward(x, params, maxpool=True, activation=True)
    err = float(jnp.max(jnp.abs(out - ref)))
    assert err < 0.15, f"max abs err (relu/maxpool) = {err}"

    # Tanh + AvgPool3d(2) configuration (other branch of the module).
    fwd2 = jax.jit(functools.partial(vgg3d_block_2, maxpool=False,
                                     activation=False))
    out2 = jax.block_until_ready(fwd2(x, params))
    assert out2.shape == out.shape, out2.shape
    ref2 = _reference_forward(x, params, maxpool=False, activation=False)
    err2 = float(jnp.max(jnp.abs(out2 - ref2)))
    assert err2 < 0.15, f"max abs err (tanh/avgpool) = {err2}"

    assert bool(jnp.all(jnp.isfinite(out))) and bool(jnp.all(jnp.isfinite(out2)))
    print("KERNEL_OK")
</pallas_src>

<mosaic_0001>
module attributes {stable_mosaic.version = 11 : i64} {
  func.func @_conv3x3x3_bias_act_kernel(%arg0: i32, %arg1: i32, %arg2: memref<1x1x328x4xf32, #tpu.memory_space<vmem>>, %arg3: memref<1x1x328x4xf32, #tpu.memory_space<vmem>>, %arg4: memref<1x1x328x4xf32, #tpu.memory_space<vmem>>, %arg5: memref<3x9x4x8xbf16, #tpu.memory_space<vmem>>, %arg6: memref<1x8xf32, #tpu.memory_space<vmem>>, %arg7: memref<1x1x288x8xbf16, #tpu.memory_space<vmem>>) attributes {dimension_semantics = [#tpu.dimension_semantics<parallel>, #tpu.dimension_semantics<parallel>], iteration_bounds = array<i64: 2, 16>, scalar_prefetch = 0 : i64, scratch_operands = 0 : i64, tpu.core_type = #tpu.core_type<tc>, window_params = [{transform_indices = @transform_0, window_bounds = array<i64: 1, 1, 328, 4>}, {transform_indices = @transform_1, window_bounds = array<i64: 1, 1, 328, 4>}, {transform_indices = @transform_2, window_bounds = array<i64: 1, 1, 328, 4>}, {pipeline_mode = #tpu.pipeline_mode<synchronous>, transform_indices = @transform_3, window_bounds = array<i64: 3, 9, 4, 8>}, {pipeline_mode = #tpu.pipeline_mode<synchronous>, transform_indices = @transform_4, window_bounds = array<i64: 1, 8>}, {transform_indices = @transform_5, window_bounds = array<i64: 1, 1, 288, 8>}]} {
    %c0 = arith.constant 0 : index
    %c0_0 = arith.constant 0 : index
    %c0_1 = arith.constant 0 : index
    %c0_2 = arith.constant 0 : index
    %0 = vector.load %arg2[%c0, %c0_0, %c0_1, %c0_2] : memref<1x1x328x4xf32, #tpu.memory_space<vmem>>, vector<1x1x288x4xf32>
    %1 = vector.shape_cast %0 : vector<1x1x288x4xf32> to vector<288x4xf32>
    %2 = arith.truncf %1 : vector<288x4xf32> to vector<288x4xbf16>
    %c0_3 = arith.constant 0 : index
    %c0_4 = arith.constant 0 : index
    %c0_5 = arith.constant 0 : index
    %c0_6 = arith.constant 0 : index
    %3 = vector.load %arg5[%c0_3, %c0_4, %c0_5, %c0_6] : memref<3x9x4x8xbf16, #tpu.memory_space<vmem>>, vector<1x1x4x8xbf16>
    %4 = vector.shape_cast %3 : vector<1x1x4x8xbf16> to vector<4x8xbf16>
    %cst = arith.constant dense<0.000000e+00> : vector<288x8xf32>
    %5 = tpu.matmul %2, %4, %cst {dimension_numbers = #tpu.dot_dimension_numbers<[1], [0], [0], [1], [0, 0, 1, 1], [], []>} : vector<288x4xbf16>, vector<4x8xbf16>, vector<288x8xf32> -> vector<288x8xf32>
    %c0_7 = arith.constant 0 : index
    %c0_8 = arith.constant 0 : index
    %c1 = arith.constant 1 : index
    %c0_9 = arith.constant 0 : index
    %6 = vector.load %arg2[%c0_7, %c0_8, %c1, %c0_9] : memref<1x1x328x4xf32, #tpu.memory_space<vmem>>, vector<1x1x288x4xf32>
    %7 = vector.shape_cast %6 : vector<1x1x288x4xf32> to vector<288x4xf32>
    %8 = arith.truncf %7 : vector<288x4xf32> to vector<288x4xbf16>
    %c0_10 = arith.constant 0 : index
    %c1_11 = arith.constant 1 : index
    %c0_12 = arith.constant 0 : index
    %c0_13 = arith.constant 0 : index
    %9 = vector.load %arg5[%c0_10, %c1_11, %c0_12, %c0_13] : memref<3x9x4x8xbf16, #tpu.memory_space<vmem>>, vector<1x1x4x8xbf16>
    %10 = vector.shape_cast %9 : vector<1x1x4x8xbf16> to vector<4x8xbf16>
    %cst_14 = arith.constant dense<0.000000e+00> : vector<288x8xf32>
    %11 = tpu.matmul %8, %10, %cst_14 {dimension_numbers = #tpu.dot_dimension_numbers<[1], [0], [0], [1], [0, 0, 1, 1], [], []>} : vector<288x4xbf16>, vector<4x8xbf16>, vector<288x8xf32> -> vector<288x8xf32>
    %12 = arith.addf %5, %11 : vector<288x8xf32>
    %c0_15 = arith.constant 0 : index
    %c0_16 = arith.constant 0 : index
    %c2 = arith.constant 2 : index
    %c0_17 = arith.constant 0 : index
    %13 = vector.load %arg2[%c0_15, %c0_16, %c2, %c0_17] : memref<1x1x328x4xf32, #tpu.memory_space<vmem>>, vector<1x1x288x4xf32>
    %14 = vector.shape_cast %13 : vector<1x1x288x4xf32> to vector<288x4xf32>
    %15 = arith.truncf %14 : vector<288x4xf32> to vector<288x4xbf16>
    %c0_18 = arith.constant 0 : index
    %c2_19 = arith.constant 2 : index
    %c0_20 = arith.constant 0 : index
    %c0_21 = arith.constant 0 : index
    %16 = vector.load %arg5[%c0_18, %c2_19, %c0_20, %c0_21] : memref<3x9x4x8xbf16, #tpu.memory_space<vmem>>, vector<1x1x4x8xbf16>
    %17 = vector.shape_cast %16 : vector<1x1x4x8xbf16> to vector<4x8xbf16>
    %cst_22 = arith.constant dense<0.000000e+00> : vector<288x8xf32>
    %18 = tpu.matmul %15, %17, %cst_22 {dimension_numbers = #tpu.dot_dimension_numbers<[1], [0], [0], [1], [0, 0, 1, 1], [], []>} : vector<288x4xbf16>, vector<4x8xbf16>, vector<288x8xf32> -> vector<288x8xf32>
    %19 = arith.addf %12, %18 : vector<288x8xf32>
    %c0_23 = arith.constant 0 : index
    %c0_24 = arith.constant 0 : index
    %c18 = arith.constant 18 : index
    %c0_25 = arith.constant 0 : index
    %20 = vector.load %arg2[%c0_23, %c0_24, %c18, %c0_25] : memref<1x1x328x4xf32, #tpu.memory_space<vmem>>, vector<1x1x288x4xf32>
    %21 = vector.shape_cast %20 : vector<1x1x288x4xf32> to vector<288x4xf32>
    %22 = arith.truncf %21 : vector<288x4xf32> to vector<288x4xbf16>
    %c0_26 = arith.constant 0 : index
    %c3 = arith.constant 3 : index
    %c0_27 = arith.constant 0 : index
    %c0_28 = arith.constant 0 : index
    %23 = vector.load %arg5[%c0_26, %c3, %c0_27, %c0_28] : memref<3x9x4x8xbf16, #tpu.memory_space<vmem>>, vector<1x1x4x8xbf16>
    %24 = vector.shape_cast %23 : vector<1x1x4x8xbf16> to vector<4x8xbf16>
    %cst_29 = arith.constant dense<0.000000e+00> : vector<288x8xf32>
    %25 = tpu.matmul %22, %24, %cst_29 {dimension_numbers = #tpu.dot_dimension_numbers<[1], [0], [0], [1], [0, 0, 1, 1], [], []>} : vector<288x4xbf16>, vector<4x8xbf16>, vector<288x8xf32> -> vector<288x8xf32>
    %26 = arith.addf %19, %25 : vector<288x8xf32>
    %c0_30 = arith.constant 0 : index
    %c0_31 = arith.constant 0 : index
    %c19 = arith.constant 19 : index
    %c0_32 = arith.constant 0 : index
    %27 = vector.load %arg2[%c0_30, %c0_31, %c19, %c0_32] : memref<1x1x328x4xf32, #tpu.memory_space<vmem>>, vector<1x1x288x4xf32>
    %28 = vector.shape_cast %27 : vector<1x1x288x4xf32> to vector<288x4xf32>
    %29 = arith.truncf %28 : vector<288x4xf32> to vector<288x4xbf16>
    %c0_33 = arith.constant 0 : index
    %c4 = arith.constant 4 : index
    %c0_34 = arith.constant 0 : index
    %c0_35 = arith.constant 0 : index
    %30 = vector.load %arg5[%c0_33, %c4, %c0_34, %c0_35] : memref<3x9x4x8xbf16, #tpu.memory_space<vmem>>, vector<1x1x4x8xbf16>
    %31 = vector.shape_cast %30 : vector<1x1x4x8xbf16> to vector<4x8xbf16>
    %cst_36 = arith.constant dense<0.000000e+00> : vector<288x8xf32>
    %32 = tpu.matmul %29, %31, %cst_36 {dimension_numbers = #tpu.dot_dimension_numbers<[1], [0], [0], [1], [0, 0, 1, 1], [], []>} : vector<288x4xbf16>, vector<4x8xbf16>, vector<288x8xf32> -> vector<288x8xf32>
    %33 = arith.addf %26, %32 : vector<288x8xf32>
    %c0_37 = arith.constant 0 : index
    %c0_38 = arith.constant 0 : index
    %c20 = arith.constant 20 : index
    %c0_39 = arith.constant 0 : index
    %34 = vector.load %arg2[%c0_37, %c0_38, %c20, %c0_39] : memref<1x1x328x4xf32, #tpu.memory_space<vmem>>, vector<1x1x288x4xf32>
    %35 = vector.shape_cast %34 : vector<1x1x288x4xf32> to vector<288x4xf32>
    %36 = arith.truncf %35 : vector<288x4xf32> to vector<288x4xbf16>
    %c0_40 = arith.constant 0 : index
    %c5 = arith.constant 5 : index
    %c0_41 = arith.constant 0 : index
    %c0_42 = arith.constant 0 : index
    %37 = vector.load %arg5[%c0_40, %c5, %c0_41, %c0_42] : memref<3x9x4x8xbf16, #tpu.memory_space<vmem>>, vector<1x1x4x8xbf16>
    %38 = vector.shape_cast %37 : vector<1x1x4x8xbf16> to vector<4x8xbf16>
    %cst_43 = arith.constant dense<0.000000e+00> : vector<288x8xf32>
    %39 = tpu.matmul %36, %38, %cst_43 {dimension_numbers = #tpu.dot_dimension_numbers<[1], [0], [0], [1], [0, 0, 1, 1], [], []>} : vector<288x4xbf16>, vector<4x8xbf16>, vector<288x8xf32> -> vector<288x8xf32>
    %40 = arith.addf %33, %39 : vector<288x8xf32>
    %c0_44 = arith.constant 0 : index
    %c0_45 = arith.constant 0 : index
    %c36 = arith.constant 36 : index
    %c0_46 = arith.constant 0 : index
    %41 = vector.load %arg2[%c0_44, %c0_45, %c36, %c0_46] : memref<1x1x328x4xf32, #tpu.memory_space<vmem>>, vector<1x1x288x4xf32>
    %42 = vector.shape_cast %41 : vector<1x1x288x4xf32> to vector<288x4xf32>
    %43 = arith.truncf %42 : vector<288x4xf32> to vector<288x4xbf16>
    %c0_47 = arith.constant 0 : index
    %c6 = arith.constant 6 : index
    %c0_48 = arith.constant 0 : index
    %c0_49 = arith.constant 0 : index
    %44 = vector.load %arg5[%c0_47, %c6, %c0_48, %c0_49] : memref<3x9x4x8xbf16, #tpu.memory_space<vmem>>, vector<1x1x4x8xbf16>
    %45 = vector.shape_cast %44 : vector<1x1x4x8xbf16> to vector<4x8xbf16>
    %cst_50 = arith.constant dense<0.000000e+00> : vector<288x8xf32>
    %46 = tpu.matmul %43, %45, %cst_50 {dimension_numbers = #tpu.dot_dimension_numbers<[1], [0], [0], [1], [0, 0, 1, 1], [], []>} : vector<288x4xbf16>, vector<4x8xbf16>, vector<288x8xf32> -> vector<288x8xf32>
    %47 = arith.addf %40, %46 : vector<288x8xf32>
    %c0_51 = arith.constant 0 : index
    %c0_52 = arith.constant 0 : index
    %c37 = arith.constant 37 : index
    %c0_53 = arith.constant 0 : index
    %48 = vector.load %arg2[%c0_51, %c0_52, %c37, %c0_53] : memref<1x1x328x4xf32, #tpu.memory_space<vmem>>, vector<1x1x288x4xf32>
    %49 = vector.shape_cast %48 : vector<1x1x288x4xf32> to vector<288x4xf32>
    %50 = arith.truncf %49 : vector<288x4xf32> to vector<288x4xbf16>
    %c0_54 = arith.constant 0 : index
    %c7 = arith.constant 7 : index
    %c0_55 = arith.constant 0 : index
    %c0_56 = arith.constant 0 : index
    %51 = vector.load %arg5[%c0_54, %c7, %c0_55, %c0_56] : memref<3x9x4x8xbf16, #tpu.memory_space<vmem>>, vector<1x1x4x8xbf16>
    %52 = vector.shape_cast %51 : vector<1x1x4x8xbf16> to vector<4x8xbf16>
    %cst_57 = arith.constant dense<0.000000e+00> : vector<288x8xf32>
    %53 = tpu.matmul %50, %52, %cst_57 {dimension_numbers = #tpu.dot_dimension_numbers<[1], [0], [0], [1], [0, 0, 1, 1], [], []>} : vector<288x4xbf16>, vector<4x8xbf16>, vector<288x8xf32> -> vector<288x8xf32>
    %54 = arith.addf %47, %53 : vector<288x8xf32>
    %c0_58 = arith.constant 0 : index
    %c0_59 = arith.constant 0 : index
    %c38 = arith.constant 38 : index
    %c0_60 = arith.constant 0 : index
    %55 = vector.load %arg2[%c0_58, %c0_59, %c38, %c0_60] : memref<1x1x328x4xf32, #tpu.memory_space<vmem>>, vector<1x1x288x4xf32>
    %56 = vector.shape_cast %55 : vector<1x1x288x4xf32> to vector<288x4xf32>
    %57 = arith.truncf %56 : vector<288x4xf32> to vector<288x4xbf16>
    %c0_61 = arith.constant 0 : index
    %c8 = arith.constant 8 : index
    %c0_62 = arith.constant 0 : index
    %c0_63 = arith.constant 0 : index
    %58 = vector.load %arg5[%c0_61, %c8, %c0_62, %c0_63] : memref<3x9x4x8xbf16, #tpu.memory_space<vmem>>, vector<1x1x4x8xbf16>
    %59 = vector.shape_cast %58 : vector<1x1x4x8xbf16> to vector<4x8xbf16>
    %cst_64 = arith.constant dense<0.000000e+00> : vector<288x8xf32>
    %60 = tpu.matmul %57, %59, %cst_64 {dimension_numbers = #tpu.dot_dimension_numbers<[1], [0], [0], [1], [0, 0, 1, 1], [], []>} : vector<288x4xbf16>, vector<4x8xbf16>, vector<288x8xf32> -> vector<288x8xf32>
    %61 = arith.addf %54, %60 : vector<288x8xf32>
    %c0_65 = arith.constant 0 : index
    %c0_66 = arith.constant 0 : index
    %c0_67 = arith.constant 0 : index
    %c0_68 = arith.constant 0 : index
    %62 = vector.load %arg3[%c0_65, %c0_66, %c0_67, %c0_68] : memref<1x1x328x4xf32, #tpu.memory_space<vmem>>, vector<1x1x288x4xf32>
    %63 = vector.shape_cast %62 : vector<1x1x288x4xf32> to vector<288x4xf32>
    %64 = arith.truncf %63 : vector<288x4xf32> to vector<288x4xbf16>
    %c1_69 = arith.constant 1 : index
    %c0_70 = arith.constant 0 : index
    %c0_71 = arith.constant 0 : index
    %c0_72 = arith.constant 0 : index
    %65 = vector.load %arg5[%c1_69, %c0_70, %c0_71, %c0_72] : memref<3x9x4x8xbf16, #tpu.memory_space<vmem>>, vector<1x1x4x8xbf16>
    %66 = vector.shape_cast %65 : vector<1x1x4x8xbf16> to vector<4x8xbf16>
    %cst_73 = arith.constant dense<0.000000e+00> : vector<288x8xf32>
    %67 = tpu.matmul %64, %66, %cst_73 {dimension_numbers = #tpu.dot_dimension_numbers<[1], [0], [0], [1], [0, 0, 1, 1], [], []>} : vector<288x4xbf16>, vector<4x8xbf16>, vector<288x8xf32> -> vector<288x8xf32>
    %68 = arith.addf %61, %67 : vector<288x8xf32>
    %c0_74 = arith.constant 0 : index
    %c0_75 = arith.constant 0 : index
    %c1_76 = arith.constant 1 : index
    %c0_77 = arith.constant 0 : index
    %69 = vector.load %arg3[%c0_74, %c0_75, %c1_76, %c0_77] : memref<1x1x328x4xf32, #tpu.memory_space<vmem>>, vector<1x1x288x4xf32>
    %70 = vector.shape_cast %69 : vector<1x1x288x4xf32> to vector<288x4xf32>
    %71 = arith.truncf %70 : vector<288x4xf32> to vector<288x4xbf16>
    %c1_78 = arith.constant 1 : index
    %c1_79 = arith.constant 1 : index
    %c0_80 = arith.constant 0 : index
    %c0_81 = arith.constant 0 : index
    %72 = vector.load %arg5[%c1_78, %c1_79, %c0_80, %c0_81] : memref<3x9x4x8xbf16, #tpu.memory_space<vmem>>, vector<1x1x4x8xbf16>
    %73 = vector.shape_cast %72 : vector<1x1x4x8xbf16> to vector<4x8xbf16>
    %cst_82 = arith.constant dense<0.000000e+00> : vector<288x8xf32>
    %74 = tpu.matmul %71, %73, %cst_82 {dimension_numbers = #tpu.dot_dimension_numbers<[1], [0], [0], [1], [0, 0, 1, 1], [], []>} : vector<288x4xbf16>, vector<4x8xbf16>, vector<288x8xf32> -> vector<288x8xf32>
    %75 = arith.addf %68, %74 : vector<288x8xf32>
    %c0_83 = arith.constant 0 : index
    %c0_84 = arith.constant 0 : index
    %c2_85 = arith.constant 2 : index
    %c0_86 = arith.constant 0 : index
    %76 = vector.load %arg3[%c0_83, %c0_84, %c2_85, %c0_86] : memref<1x1x328x4xf32, #tpu.memory_space<vmem>>, vector<1x1x288x4xf32>
    %77 = vector.shape_cast %76 : vector<1x1x288x4xf32> to vector<288x4xf32>
    %78 = arith.truncf %77 : vector<288x4xf32> to vector<288x4xbf16>
    %c1_87 = arith.constant 1 : index
    %c2_88 = arith.constant 2 : index
    %c0_89 = arith.constant 0 : index
    %c0_90 = arith.constant 0 : index
    %79 = vector.load %arg5[%c1_87, %c2_88, %c0_89, %c0_90] : memref<3x9x4x8xbf16, #tpu.memory_space<vmem>>, vector<1x1x4x8xbf16>
    %80 = vector.shape_cast %79 : vector<1x1x4x8xbf16> to vector<4x8xbf16>
    %cst_91 = arith.constant dense<0.000000e+00> : vector<288x8xf32>
    %81 = tpu.matmul %78, %80, %cst_91 {dimension_numbers = #tpu.dot_dimension_numbers<[1], [0], [0], [1], [0, 0, 1, 1], [], []>} : vector<288x4xbf16>, vector<4x8xbf16>, vector<288x8xf32> -> vector<288x8xf32>
    %82 = arith.addf %75, %81 : vector<288x8xf32>
    %c0_92 = arith.constant 0 : index
    %c0_93 = arith.constant 0 : index
    %c18_94 = arith.constant 18 : index
    %c0_95 = arith.constant 0 : index
    %83 = vector.load %arg3[%c0_92, %c0_93, %c18_94, %c0_95] : memref<1x1x328x4xf32, #tpu.memory_space<vmem>>, vector<1x1x288x4xf32>
    %84 = vector.shape_cast %83 : vector<1x1x288x4xf32> to vector<288x4xf32>
    %85 = arith.truncf %84 : vector<288x4xf32> to vector<288x4xbf16>
    %c1_96 = arith.constant 1 : index
    %c3_97 = arith.constant 3 : index
    %c0_98 = arith.constant 0 : index
    %c0_99 = arith.constant 0 : index
    %86 = vector.load %arg5[%c1_96, %c3_97, %c0_98, %c0_99] : memref<3x9x4x8xbf16, #tpu.memory_space<vmem>>, vector<1x1x4x8xbf16>
    %87 = vector.shape_cast %86 : vector<1x1x4x8xbf16> to vector<4x8xbf16>
    %cst_100 = arith.constant dense<0.000000e+00> : vector<288x8xf32>
    %88 = tpu.matmul %85, %87, %cst_100 {dimension_numbers = #tpu.dot_dimension_numbers<[1], [0], [0], [1], [0, 0, 1, 1], [], []>} : vector<288x4xbf16>, vector<4x8xbf16>, vector<288x8xf32> -> vector<288x8xf32>
    %89 = arith.addf %82, %88 : vector<288x8xf32>
    %c0_101 = arith.constant 0 : index
    %c0_102 = arith.constant 0 : index
    %c19_103 = arith.constant 19 : index
    %c0_104 = arith.constant 0 : index
    %90 = vector.load %arg3[%c0_101, %c0_102, %c19_103, %c0_104] : memref<1x1x328x4xf32, #tpu.memory_space<vmem>>, vector<1x1x288x4xf32>
    %91 = vector.shape_cast %90 : vector<1x1x288x4xf32> to vector<288x4xf32>
    %92 = arith.truncf %91 : vector<288x4xf32> to vector<288x4xbf16>
    %c1_105 = arith.constant 1 : index
    %c4_106 = arith.constant 4 : index
    %c0_107 = arith.constant 0 : index
    %c0_108 = arith.constant 0 : index
    %93 = vector.load %arg5[%c1_105, %c4_106, %c0_107, %c0_108] : memref<3x9x4x8xbf16, #tpu.memory_space<vmem>>, vector<1x1x4x8xbf16>
    %94 = vector.shape_cast %93 : vector<1x1x4x8xbf16> to vector<4x8xbf16>
    %cst_109 = arith.constant dense<0.000000e+00> : vector<288x8xf32>
    %95 = tpu.matmul %92, %94, %cst_109 {dimension_numbers = #tpu.dot_dimension_numbers<[1], [0], [0], [1], [0, 0, 1, 1], [], []>} : vector<288x4xbf16>, vector<4x8xbf16>, vector<288x8xf32> -> vector<288x8xf32>
    %96 = arith.addf %89, %95 : vector<288x8xf32>
    %c0_110 = arith.constant 0 : index
    %c0_111 = arith.constant 0 : index
    %c20_112 = arith.constant 20 : index
    %c0_113 = arith.constant 0 : index
    %97 = vector.load %arg3[%c0_110, %c0_111, %c20_112, %c0_113] : memref<1x1x328x4xf32, #tpu.memory_space<vmem>>, vector<1x1x288x4xf32>
    %98 = vector.shape_cast %97 : vector<1x1x288x4xf32> to vector<288x4xf32>
    %99 = arith.truncf %98 : vector<288x4xf32> to vector<288x4xbf16>
    %c1_114 = arith.constant 1 : index
    %c5_115 = arith.constant 5 : index
    %c0_116 = arith.constant 0 : index
    %c0_117 = arith.constant 0 : index
    %100 = vector.load %arg5[%c1_114, %c5_115, %c0_116, %c0_117] : memref<3x9x4x8xbf16, #tpu.memory_space<vmem>>, vector<1x1x4x8xbf16>
    %101 = vector.shape_cast %100 : vector<1x1x4x8xbf16> to vector<4x8xbf16>
    %cst_118 = arith.constant dense<0.000000e+00> : vector<288x8xf32>
    %102 = tpu.matmul %99, %101, %cst_118 {dimension_numbers = #tpu.dot_dimension_numbers<[1], [0], [0], [1], [0, 0, 1, 1], [], []>} : vector<288x4xbf16>, vector<4x8xbf16>, vector<288x8xf32> -> vector<288x8xf32>
    %103 = arith.addf %96, %102 : vector<288x8xf32>
    %c0_119 = arith.constant 0 : index
    %c0_120 = arith.constant 0 : index
    %c36_121 = arith.constant 36 : index
    %c0_122 = arith.constant 0 : index
    %104 = vector.load %arg3[%c0_119, %c0_120, %c36_121, %c0_122] : memref<1x1x328x4xf32, #tpu.memory_space<vmem>>, vector<1x1x288x4xf32>
    %105 = vector.shape_cast %104 : vector<1x1x288x4xf32> to vector<288x4xf32>
    %106 = arith.truncf %105 : vector<288x4xf32> to vector<288x4xbf16>
    %c1_123 = arith.constant 1 : index
    %c6_124 = arith.constant 6 : index
    %c0_125 = arith.constant 0 : index
    %c0_126 = arith.constant 0 : index
    %107 = vector.load %arg5[%c1_123, %c6_124, %c0_125, %c0_126] : memref<3x9x4x8xbf16, #tpu.memory_space<vmem>>, vector<1x1x4x8xbf16>
    %108 = vector.shape_cast %107 : vector<1x1x4x8xbf16> to vector<4x8xbf16>
    %cst_127 = arith.constant dense<0.000000e+00> : vector<288x8xf32>
    %109 = tpu.matmul %106, %108, %cst_127 {dimension_numbers = #tpu.dot_dimension_numbers<[1], [0], [0], [1], [0, 0, 1, 1], [], []>} : vector<288x4xbf16>, vector<4x8xbf16>, vector<288x8xf32> -> vector<288x8xf32>
    %110 = arith.addf %103, %109 : vector<288x8xf32>
    %c0_128 = arith.constant 0 : index
    %c0_129 = arith.constant 0 : index
    %c37_130 = arith.constant 37 : index
    %c0_131 = arith.constant 0 : index
    %111 = vector.load %arg3[%c0_128, %c0_129, %c37_130, %c0_131] : memref<1x1x328x4xf32, #tpu.memory_space<vmem>>, vector<1x1x288x4xf32>
    %112 = vector.shape_cast %111 : vector<1x1x288x4xf32> to vector<288x4xf32>
    %113 = arith.truncf %112 : vector<288x4xf32> to vector<288x4xbf16>
    %c1_132 = arith.constant 1 : index
    %c7_133 = arith.constant 7 : index
    %c0_134 = arith.constant 0 : index
    %c0_135 = arith.constant 0 : index
    %114 = vector.load %arg5[%c1_132, %c7_133, %c0_134, %c0_135] : memref<3x9x4x8xbf16, #tpu.memory_space<vmem>>, vector<1x1x4x8xbf16>
    %115 = vector.shape_cast %114 : vector<1x1x4x8xbf16> to vector<4x8xbf16>
    %cst_136 = arith.constant dense<0.000000e+00> : vector<288x8xf32>
    %116 = tpu.matmul %113, %115, %cst_136 {dimension_numbers = #tpu.dot_dimension_numbers<[1], [0], [0], [1], [0, 0, 1, 1], [], []>} : vector<288x4xbf16>, vector<4x8xbf16>, vector<288x8xf32> -> vector<288x8xf32>
    %117 = arith.addf %110, %116 : vector<288x8xf32>
    %c0_137 = arith.constant 0 : index
    %c0_138 = arith.constant 0 : index
    %c38_139 = arith.constant 38 : index
    %c0_140 = arith.constant 0 : index
    %118 = vector.load %arg3[%c0_137, %c0_138, %c38_139, %c0_140] : memref<1x1x328x4xf32, #tpu.memory_space<vmem>>, vector<1x1x288x4xf32>
    %119 = vector.shape_cast %118 : vector<1x1x288x4xf32> to vector<288x4xf32>
    %120 = arith.truncf %119 : vector<288x4xf32> to vector<288x4xbf16>
    %c1_141 = arith.constant 1 : index
    %c8_142 = arith.constant 8 : index
    %c0_143 = arith.constant 0 : index
    %c0_144 = arith.constant 0 : index
    %121 = vector.load %arg5[%c1_141, %c8_142, %c0_143, %c0_144] : memref<3x9x4x8xbf16, #tpu.memory_space<vmem>>, vector<1x1x4x8xbf16>
    %122 = vector.shape_cast %121 : vector<1x1x4x8xbf16> to vector<4x8xbf16>
    %cst_145 = arith.constant dense<0.000000e+00> : vector<288x8xf32>
    %123 = tpu.matmul %120, %122, %cst_145 {dimension_numbers = #tpu.dot_dimension_numbers<[1], [0], [0], [1], [0, 0, 1, 1], [], []>} : vector<288x4xbf16>, vector<4x8xbf16>, vector<288x8xf32> -> vector<288x8xf32>
    %124 = arith.addf %117, %123 : vector<288x8xf32>
    %c0_146 = arith.constant 0 : index
    %c0_147 = arith.constant 0 : index
    %c0_148 = arith.constant 0 : index
    %c0_149 = arith.constant 0 : index
    %125 = vector.load %arg4[%c0_146, %c0_147, %c0_148, %c0_149] : memref<1x1x328x4xf32, #tpu.memory_space<vmem>>, vector<1x1x288x4xf32>
    %126 = vector.shape_cast %125 : vector<1x1x288x4xf32> to vector<288x4xf32>
    %127 = arith.truncf %126 : vector<288x4xf32> to vector<288x4xbf16>
    %c2_150 = arith.constant 2 : index
    %c0_151 = arith.constant 0 : index
    %c0_152 = arith.constant 0 : index
    %c0_153 = arith.constant 0 : index
    %128 = vector.load %arg5[%c2_150, %c0_151, %c0_152, %c0_153] : memref<3x9x4x8xbf16, #tpu.memory_space<vmem>>, vector<1x1x4x8xbf16>
    %129 = vector.shape_cast %128 : vector<1x1x4x8xbf16> to vector<4x8xbf16>
    %cst_154 = arith.constant dense<0.000000e+00> : vector<288x8xf32>
    %130 = tpu.matmul %127, %129, %cst_154 {dimension_numbers = #tpu.dot_dimension_numbers<[1], [0], [0], [1], [0, 0, 1, 1], [], []>} : vector<288x4xbf16>, vector<4x8xbf16>, vector<288x8xf32> -> vector<288x8xf32>
    %131 = arith.addf %124, %130 : vector<288x8xf32>
    %c0_155 = arith.constant 0 : index
    %c0_156 = arith.constant 0 : index
    %c1_157 = arith.constant 1 : index
    %c0_158 = arith.constant 0 : index
    %132 = vector.load %arg4[%c0_155, %c0_156, %c1_157, %c0_158] : memref<1x1x328x4xf32, #tpu.memory_space<vmem>>, vector<1x1x288x4xf32>
    %133 = vector.shape_cast %132 : vector<1x1x288x4xf32> to vector<288x4xf32>
    %134 = arith.truncf %133 : vector<288x4xf32> to vector<288x4xbf16>
    %c2_159 = arith.constant 2 : index
    %c1_160 = arith.constant 1 : index
    %c0_161 = arith.constant 0 : index
    %c0_162 = arith.constant 0 : index
    %135 = vector.load %arg5[%c2_159, %c1_160, %c0_161, %c0_162] : memref<3x9x4x8xbf16, #tpu.memory_space<vmem>>, vector<1x1x4x8xbf16>
    %136 = vector.shape_cast %135 : vector<1x1x4x8xbf16> to vector<4x8xbf16>
    %cst_163 = arith.constant dense<0.000000e+00> : vector<288x8xf32>
    %137 = tpu.matmul %134, %136, %cst_163 {dimension_numbers = #tpu.dot_dimension_numbers<[1], [0], [0], [1], [0, 0, 1, 1], [], []>} : vector<288x4xbf16>, vector<4x8xbf16>, vector<288x8xf32> -> vector<288x8xf32>
    %138 = arith.addf %131, %137 : vector<288x8xf32>
    %c0_164 = arith.constant 0 : index
    %c0_165 = arith.constant 0 : index
    %c2_166 = arith.constant 2 : index
    %c0_167 = arith.constant 0 : index
    %139 = vector.load %arg4[%c0_164, %c0_165, %c2_166, %c0_167] : memref<1x1x328x4xf32, #tpu.memory_space<vmem>>, vector<1x1x288x4xf32>
    %140 = vector.shape_cast %139 : vector<1x1x288x4xf32> to vector<288x4xf32>
    %141 = arith.truncf %140 : vector<288x4xf32> to vector<288x4xbf16>
    %c2_168 = arith.constant 2 : index
    %c2_169 = arith.constant 2 : index
    %c0_170 = arith.constant 0 : index
    %c0_171 = arith.constant 0 : index
    %142 = vector.load %arg5[%c2_168, %c2_169, %c0_170, %c0_171] : memref<3x9x4x8xbf16, #tpu.memory_space<vmem>>, vector<1x1x4x8xbf16>
    %143 = vector.shape_cast %142 : vector<1x1x4x8xbf16> to vector<4x8xbf16>
    %cst_172 = arith.constant dense<0.000000e+00> : vector<288x8xf32>
    %144 = tpu.matmul %141, %143, %cst_172 {dimension_numbers = #tpu.dot_dimension_numbers<[1], [0], [0], [1], [0, 0, 1, 1], [], []>} : vector<288x4xbf16>, vector<4x8xbf16>, vector<288x8xf32> -> vector<288x8xf32>
    %145 = arith.addf %138, %144 : vector<288x8xf32>
    %c0_173 = arith.constant 0 : index
    %c0_174 = arith.constant 0 : index
    %c18_175 = arith.constant 18 : index
    %c0_176 = arith.constant 0 : index
    %146 = vector.load %arg4[%c0_173, %c0_174, %c18_175, %c0_176] : memref<1x1x328x4xf32, #tpu.memory_space<vmem>>, vector<1x1x288x4xf32>
    %147 = vector.shape_cast %146 : vector<1x1x288x4xf32> to vector<288x4xf32>
    %148 = arith.truncf %147 : vector<288x4xf32> to vector<288x4xbf16>
    %c2_177 = arith.constant 2 : index
    %c3_178 = arith.constant 3 : index
    %c0_179 = arith.constant 0 : index
    %c0_180 = arith.constant 0 : index
    %149 = vector.load %arg5[%c2_177, %c3_178, %c0_179, %c0_180] : memref<3x9x4x8xbf16, #tpu.memory_space<vmem>>, vector<1x1x4x8xbf16>
    %150 = vector.shape_cast %149 : vector<1x1x4x8xbf16> to vector<4x8xbf16>
    %cst_181 = arith.constant dense<0.000000e+00> : vector<288x8xf32>
    %151 = tpu.matmul %148, %150, %cst_181 {dimension_numbers = #tpu.dot_dimension_numbers<[1], [0], [0], [1], [0, 0, 1, 1], [], []>} : vector<288x4xbf16>, vector<4x8xbf16>, vector<288x8xf32> -> vector<288x8xf32>
    %152 = arith.addf %145, %151 : vector<288x8xf32>
    %c0_182 = arith.constant 0 : index
    %c0_183 = arith.constant 0 : index
    %c19_184 = arith.constant 19 : index
    %c0_185 = arith.constant 0 : index
    %153 = vector.load %arg4[%c0_182, %c0_183, %c19_184, %c0_185] : memref<1x1x328x4xf32, #tpu.memory_space<vmem>>, vector<1x1x288x4xf32>
    %154 = vector.shape_cast %153 : vector<1x1x288x4xf32> to vector<288x4xf32>
    %155 = arith.truncf %154 : vector<288x4xf32> to vector<288x4xbf16>
    %c2_186 = arith.constant 2 : index
    %c4_187 = arith.constant 4 : index
    %c0_188 = arith.constant 0 : index
    %c0_189 = arith.constant 0 : index
    %156 = vector.load %arg5[%c2_186, %c4_187, %c0_188, %c0_189] : memref<3x9x4x8xbf16, #tpu.memory_space<vmem>>, vector<1x1x4x8xbf16>
    %157 = vector.shape_cast %156 : vector<1x1x4x8xbf16> to vector<4x8xbf16>
    %cst_190 = arith.constant dense<0.000000e+00> : vector<288x8xf32>
    %158 = tpu.matmul %155, %157, %cst_190 {dimension_numbers = #tpu.dot_dimension_numbers<[1], [0], [0], [1], [0, 0, 1, 1], [], []>} : vector<288x4xbf16>, vector<4x8xbf16>, vector<288x8xf32> -> vector<288x8xf32>
    %159 = arith.addf %152, %158 : vector<288x8xf32>
    %c0_191 = arith.constant 0 : index
    %c0_192 = arith.constant 0 : index
    %c20_193 = arith.constant 20 : index
    %c0_194 = arith.constant 0 : index
    %160 = vector.load %arg4[%c0_191, %c0_192, %c20_193, %c0_194] : memref<1x1x328x4xf32, #tpu.memory_space<vmem>>, vector<1x1x288x4xf32>
    %161 = vector.shape_cast %160 : vector<1x1x288x4xf32> to vector<288x4xf32>
    %162 = arith.truncf %161 : vector<288x4xf32> to vector<288x4xbf16>
    %c2_195 = arith.constant 2 : index
    %c5_196 = arith.constant 5 : index
    %c0_197 = arith.constant 0 : index
    %c0_198 = arith.constant 0 : index
    %163 = vector.load %arg5[%c2_195, %c5_196, %c0_197, %c0_198] : memref<3x9x4x8xbf16, #tpu.memory_space<vmem>>, vector<1x1x4x8xbf16>
    %164 = vector.shape_cast %163 : vector<1x1x4x8xbf16> to vector<4x8xbf16>
    %cst_199 = arith.constant dense<0.000000e+00> : vector<288x8xf32>
    %165 = tpu.matmul %162, %164, %cst_199 {dimension_numbers = #tpu.dot_dimension_numbers<[1], [0], [0], [1], [0, 0, 1, 1], [], []>} : vector<288x4xbf16>, vector<4x8xbf16>, vector<288x8xf32> -> vector<288x8xf32>
    %166 = arith.addf %159, %165 : vector<288x8xf32>
    %c0_200 = arith.constant 0 : index
    %c0_201 = arith.constant 0 : index
    %c36_202 = arith.constant 36 : index
    %c0_203 = arith.constant 0 : index
    %167 = vector.load %arg4[%c0_200, %c0_201, %c36_202, %c0_203] : memref<1x1x328x4xf32, #tpu.memory_space<vmem>>, vector<1x1x288x4xf32>
    %168 = vector.shape_cast %167 : vector<1x1x288x4xf32> to vector<288x4xf32>
    %169 = arith.truncf %168 : vector<288x4xf32> to vector<288x4xbf16>
    %c2_204 = arith.constant 2 : index
    %c6_205 = arith.constant 6 : index
    %c0_206 = arith.constant 0 : index
    %c0_207 = arith.constant 0 : index
    %170 = vector.load %arg5[%c2_204, %c6_205, %c0_206, %c0_207] : memref<3x9x4x8xbf16, #tpu.memory_space<vmem>>, vector<1x1x4x8xbf16>
    %171 = vector.shape_cast %170 : vector<1x1x4x8xbf16> to vector<4x8xbf16>
    %cst_208 = arith.constant dense<0.000000e+00> : vector<288x8xf32>
    %172 = tpu.matmul %169, %171, %cst_208 {dimension_numbers = #tpu.dot_dimension_numbers<[1], [0], [0], [1], [0, 0, 1, 1], [], []>} : vector<288x4xbf16>, vector<4x8xbf16>, vector<288x8xf32> -> vector<288x8xf32>
    %173 = arith.addf %166, %172 : vector<288x8xf32>
    %c0_209 = arith.constant 0 : index
    %c0_210 = arith.constant 0 : index
    %c37_211 = arith.constant 37 : index
    %c0_212 = arith.constant 0 : index
    %174 = vector.load %arg4[%c0_209, %c0_210, %c37_211, %c0_212] : memref<1x1x328x4xf32, #tpu.memory_space<vmem>>, vector<1x1x288x4xf32>
    %175 = vector.shape_cast %174 : vector<1x1x288x4xf32> to vector<288x4xf32>
    %176 = arith.truncf %175 : vector<288x4xf32> to vector<288x4xbf16>
    %c2_213 = arith.constant 2 : index
    %c7_214 = arith.constant 7 : index
    %c0_215 = arith.constant 0 : index
    %c0_216 = arith.constant 0 : index
    %177 = vector.load %arg5[%c2_213, %c7_214, %c0_215, %c0_216] : memref<3x9x4x8xbf16, #tpu.memory_space<vmem>>, vector<1x1x4x8xbf16>
    %178 = vector.shape_cast %177 : vector<1x1x4x8xbf16> to vector<4x8xbf16>
    %cst_217 = arith.constant dense<0.000000e+00> : vector<288x8xf32>
    %179 = tpu.matmul %176, %178, %cst_217 {dimension_numbers = #tpu.dot_dimension_numbers<[1], [0], [0], [1], [0, 0, 1, 1], [], []>} : vector<288x4xbf16>, vector<4x8xbf16>, vector<288x8xf32> -> vector<288x8xf32>
    %180 = arith.addf %173, %179 : vector<288x8xf32>
    %c0_218 = arith.constant 0 : index
    %c0_219 = arith.constant 0 : index
    %c38_220 = arith.constant 38 : index
    %c0_221 = arith.constant 0 : index
    %181 = vector.load %arg4[%c0_218, %c0_219, %c38_220, %c0_221] : memref<1x1x328x4xf32, #tpu.memory_space<vmem>>, vector<1x1x288x4xf32>
    %182 = vector.shape_cast %181 : vector<1x1x288x4xf32> to vector<288x4xf32>
    %183 = arith.truncf %182 : vector<288x4xf32> to vector<288x4xbf16>
    %c2_222 = arith.constant 2 : index
    %c8_223 = arith.constant 8 : index
    %c0_224 = arith.constant 0 : index
    %c0_225 = arith.constant 0 : index
    %184 = vector.load %arg5[%c2_222, %c8_223, %c0_224, %c0_225] : memref<3x9x4x8xbf16, #tpu.memory_space<vmem>>, vector<1x1x4x8xbf16>
    %185 = vector.shape_cast %184 : vector<1x1x4x8xbf16> to vector<4x8xbf16>
    %cst_226 = arith.constant dense<0.000000e+00> : vector<288x8xf32>
    %186 = tpu.matmul %183, %185, %cst_226 {dimension_numbers = #tpu.dot_dimension_numbers<[1], [0], [0], [1], [0, 0, 1, 1], [], []>} : vector<288x4xbf16>, vector<4x8xbf16>, vector<288x8xf32> -> vector<288x8xf32>
    %187 = arith.addf %180, %186 : vector<288x8xf32>
    %c0_227 = arith.constant 0 : index
    %c0_228 = arith.constant 0 : index
    %188 = vector.load %arg6[%c0_227, %c0_228] : memref<1x8xf32, #tpu.memory_space<vmem>>, vector<1x8xf32>
    %189 = vector.broadcast %188 : vector<1x8xf32> to vector<288x8xf32>
    %190 = arith.addf %187, %189 : vector<288x8xf32>
    %cst_229 = arith.constant 0.000000e+00 : f32
    %191 = vector.broadcast %cst_229 : f32 to vector<288x8xf32>
    %192 = arith.maximumf %190, %191 : vector<288x8xf32>
    %193 = arith.truncf %192 : vector<288x8xf32> to vector<288x8xbf16>
    %c0_230 = arith.constant 0 : index
    %c0_231 = arith.constant 0 : index
    %c0_232 = arith.constant 0 : index
    %c0_233 = arith.constant 0 : index
    %194 = vector.load %arg7[%c0_230, %c0_231, %c0_232, %c0_233] : memref<1x1x288x8xbf16, #tpu.memory_space<vmem>>, vector<1x1x288x8xbf16>
    %195 = vector.shape_cast %194 : vector<1x1x288x8xbf16> to vector<288x8xbf16>
    %196 = vector.shape_cast %193 : vector<288x8xbf16> to vector<1x1x288x8xbf16>
    tpu.vector_store %arg7[%c0_230, %c0_231, %c0_232, %c0_233], %196 {strides = array<i32>} : memref<1x1x288x8xbf16, #tpu.memory_space<vmem>>, vector<1x1x288x8xbf16>,
    return
  }
  func.func @transform_0(%arg0: i32, %arg1: i32) -> (i32, i32, i32, i32) {
    %c0_i32 = arith.constant 0 : i32
    %c0_i32_0 = arith.constant 0 : i32
    %c0_i32_1 = arith.constant 0 : i32
    return %arg0, %arg1, %c0_i32, %c0_i32_0 : i32, i32, i32, i32
  }
  func.func @transform_1(%arg0: i32, %arg1: i32) -> (i32, i32, i32, i32) {
    %c1_i32 = arith.constant 1 : i32
    %0 = arith.addi %arg1, %c1_i32 : i32
    %c0_i32 = arith.constant 0 : i32
    %c0_i32_0 = arith.constant 0 : i32
    %c0_i32_1 = arith.constant 0 : i32
    return %arg0, %0, %c0_i32, %c0_i32_0 : i32, i32, i32, i32
  }
  func.func @transform_2(%arg0: i32, %arg1: i32) -> (i32, i32, i32, i32) {
    %c2_i32 = arith.constant 2 : i32
    %0 = arith.addi %arg1, %c2_i32 : i32
    %c0_i32 = arith.constant 0 : i32
    %c0_i32_0 = arith.constant 0 : i32
    %c0_i32_1 = arith.constant 0 : i32
    return %arg0, %0, %c0_i32, %c0_i32_0 : i32, i32, i32, i32
  }
  func.func @transform_3(%arg0: i32, %arg1: i32) -> (i32, i32, i32, i32) {
    %c0_i32 = arith.constant 0 : i32
    %c0_i32_0 = arith.constant 0 : i32
    %c0_i32_1 = arith.constant 0 : i32
    %c0_i32_2 = arith.constant 0 : i32
    %c0_i32_3 = arith.constant 0 : i32
    return %c0_i32, %c0_i32_0, %c0_i32_1, %c0_i32_2 : i32, i32, i32, i32
  }
  func.func @transform_4(%arg0: i32, %arg1: i32) -> (i32, i32) {
    %c0_i32 = arith.constant 0 : i32
    %c0_i32_0 = arith.constant 0 : i32
    %c0_i32_1 = arith.constant 0 : i32
    return %c0_i32, %c0_i32_0 : i32, i32
  }
  func.func @transform_5(%arg0: i32, %arg1: i32) -> (i32, i32, i32, i32) {
    %c0_i32 = arith.constant 0 : i32
    %c0_i32_0 = arith.constant 0 : i32
    %c0_i32_1 = arith.constant 0 : i32
    return %arg0, %arg1, %c0_i32, %c0_i32_0 : i32, i32, i32, i32
  }
}

module attributes {stable_mosaic.version = 11 : i64} {
  func.func @_conv3x3x3_bias_act_kernel(%arg0: i32, %arg1: i32, %arg2: memref<1x1x328x8xf32, #tpu.memory_space<vmem>>, %arg3: memref<1x1x328x8xf32, #tpu.memory_space<vmem>>, %arg4: memref<1x1x328x8xf32, #tpu.memory_space<vmem>>, %arg5: memref<3x9x8x8xbf16, #tpu.memory_space<vmem>>, %arg6: memref<1x8xf32, #tpu.memory_space<vmem>>, %arg7: memref<1x1x288x8xbf16, #tpu.memory_space<vmem>>) attributes {dimension_semantics = [#tpu.dimension_semantics<parallel>, #tpu.dimension_semantics<parallel>], iteration_bounds = array<i64: 2, 16>, scalar_prefetch = 0 : i64, scratch_operands = 0 : i64, tpu.core_type = #tpu.core_type<tc>, window_params = [{transform_indices = @transform_0, window_bounds = array<i64: 1, 1, 328, 8>}, {transform_indices = @transform_1, window_bounds = array<i64: 1, 1, 328, 8>}, {transform_indices = @transform_2, window_bounds = array<i64: 1, 1, 328, 8>}, {pipeline_mode = #tpu.pipeline_mode<synchronous>, transform_indices = @transform_3, window_bounds = array<i64: 3, 9, 8, 8>}, {pipeline_mode = #tpu.pipeline_mode<synchronous>, transform_indices = @transform_4, window_bounds = array<i64: 1, 8>}, {transform_indices = @transform_5, window_bounds = array<i64: 1, 1, 288, 8>}]} {
    %c0 = arith.constant 0 : index
    %c0_0 = arith.constant 0 : index
    %c0_1 = arith.constant 0 : index
    %c0_2 = arith.constant 0 : index
    %0 = vector.load %arg2[%c0, %c0_0, %c0_1, %c0_2] : memref<1x1x328x8xf32, #tpu.memory_space<vmem>>, vector<1x1x288x8xf32>
    %1 = vector.shape_cast %0 : vector<1x1x288x8xf32> to vector<288x8xf32>
    %2 = arith.truncf %1 : vector<288x8xf32> to vector<288x8xbf16>
    %c0_3 = arith.constant 0 : index
    %c0_4 = arith.constant 0 : index
    %c0_5 = arith.constant 0 : index
    %c0_6 = arith.constant 0 : index
    %3 = vector.load %arg5[%c0_3, %c0_4, %c0_5, %c0_6] : memref<3x9x8x8xbf16, #tpu.memory_space<vmem>>, vector<1x1x8x8xbf16>
    %4 = vector.shape_cast %3 : vector<1x1x8x8xbf16> to vector<8x8xbf16>
    %cst = arith.constant dense<0.000000e+00> : vector<288x8xf32>
    %5 = tpu.matmul %2, %4, %cst {dimension_numbers = #tpu.dot_dimension_numbers<[1], [0], [0], [1], [0, 0, 1, 1], [], []>} : vector<288x8xbf16>, vector<8x8xbf16>, vector<288x8xf32> -> vector<288x8xf32>
    %c0_7 = arith.constant 0 : index
    %c0_8 = arith.constant 0 : index
    %c1 = arith.constant 1 : index
    %c0_9 = arith.constant 0 : index
    %6 = vector.load %arg2[%c0_7, %c0_8, %c1, %c0_9] : memref<1x1x328x8xf32, #tpu.memory_space<vmem>>, vector<1x1x288x8xf32>
    %7 = vector.shape_cast %6 : vector<1x1x288x8xf32> to vector<288x8xf32>
    %8 = arith.truncf %7 : vector<288x8xf32> to vector<288x8xbf16>
    %c0_10 = arith.constant 0 : index
    %c1_11 = arith.constant 1 : index
    %c0_12 = arith.constant 0 : index
    %c0_13 = arith.constant 0 : index
    %9 = vector.load %arg5[%c0_10, %c1_11, %c0_12, %c0_13] : memref<3x9x8x8xbf16, #tpu.memory_space<vmem>>, vector<1x1x8x8xbf16>
    %10 = vector.shape_cast %9 : vector<1x1x8x8xbf16> to vector<8x8xbf16>
    %cst_14 = arith.constant dense<0.000000e+00> : vector<288x8xf32>
    %11 = tpu.matmul %8, %10, %cst_14 {dimension_numbers = #tpu.dot_dimension_numbers<[1], [0], [0], [1], [0, 0, 1, 1], [], []>} : vector<288x8xbf16>, vector<8x8xbf16>, vector<288x8xf32> -> vector<288x8xf32>
    %12 = arith.addf %5, %11 : vector<288x8xf32>
    %c0_15 = arith.constant 0 : index
    %c0_16 = arith.constant 0 : index
    %c2 = arith.constant 2 : index
    %c0_17 = arith.constant 0 : index
    %13 = vector.load %arg2[%c0_15, %c0_16, %c2, %c0_17] : memref<1x1x328x8xf32, #tpu.memory_space<vmem>>, vector<1x1x288x8xf32>
    %14 = vector.shape_cast %13 : vector<1x1x288x8xf32> to vector<288x8xf32>
    %15 = arith.truncf %14 : vector<288x8xf32> to vector<288x8xbf16>
    %c0_18 = arith.constant 0 : index
    %c2_19 = arith.constant 2 : index
    %c0_20 = arith.constant 0 : index
    %c0_21 = arith.constant 0 : index
    %16 = vector.load %arg5[%c0_18, %c2_19, %c0_20, %c0_21] : memref<3x9x8x8xbf16, #tpu.memory_space<vmem>>, vector<1x1x8x8xbf16>
    %17 = vector.shape_cast %16 : vector<1x1x8x8xbf16> to vector<8x8xbf16>
    %cst_22 = arith.constant dense<0.000000e+00> : vector<288x8xf32>
    %18 = tpu.matmul %15, %17, %cst_22 {dimension_numbers = #tpu.dot_dimension_numbers<[1], [0], [0], [1], [0, 0, 1, 1], [], []>} : vector<288x8xbf16>, vector<8x8xbf16>, vector<288x8xf32> -> vector<288x8xf32>
    %19 = arith.addf %12, %18 : vector<288x8xf32>
    %c0_23 = arith.constant 0 : index
    %c0_24 = arith.constant 0 : index
    %c18 = arith.constant 18 : index
    %c0_25 = arith.constant 0 : index
    %20 = vector.load %arg2[%c0_23, %c0_24, %c18, %c0_25] : memref<1x1x328x8xf32, #tpu.memory_space<vmem>>, vector<1x1x288x8xf32>
    %21 = vector.shape_cast %20 : vector<1x1x288x8xf32> to vector<288x8xf32>
    %22 = arith.truncf %21 : vector<288x8xf32> to vector<288x8xbf16>
    %c0_26 = arith.constant 0 : index
    %c3 = arith.constant 3 : index
    %c0_27 = arith.constant 0 : index
    %c0_28 = arith.constant 0 : index
    %23 = vector.load %arg5[%c0_26, %c3, %c0_27, %c0_28] : memref<3x9x8x8xbf16, #tpu.memory_space<vmem>>, vector<1x1x8x8xbf16>
    %24 = vector.shape_cast %23 : vector<1x1x8x8xbf16> to vector<8x8xbf16>
    %cst_29 = arith.constant dense<0.000000e+00> : vector<288x8xf32>
    %25 = tpu.matmul %22, %24, %cst_29 {dimension_numbers = #tpu.dot_dimension_numbers<[1], [0], [0], [1], [0, 0, 1, 1], [], []>} : vector<288x8xbf16>, vector<8x8xbf16>, vector<288x8xf32> -> vector<288x8xf32>
    %26 = arith.addf %19, %25 : vector<288x8xf32>
    %c0_30 = arith.constant 0 : index
    %c0_31 = arith.constant 0 : index
    %c19 = arith.constant 19 : index
    %c0_32 = arith.constant 0 : index
    %27 = vector.load %arg2[%c0_30, %c0_31, %c19, %c0_32] : memref<1x1x328x8xf32, #tpu.memory_space<vmem>>, vector<1x1x288x8xf32>
    %28 = vector.shape_cast %27 : vector<1x1x288x8xf32> to vector<288x8xf32>
    %29 = arith.truncf %28 : vector<288x8xf32> to vector<288x8xbf16>
    %c0_33 = arith.constant 0 : index
    %c4 = arith.constant 4 : index
    %c0_34 = arith.constant 0 : index
    %c0_35 = arith.constant 0 : index
    %30 = vector.load %arg5[%c0_33, %c4, %c0_34, %c0_35] : memref<3x9x8x8xbf16, #tpu.memory_space<vmem>>, vector<1x1x8x8xbf16>
    %31 = vector.shape_cast %30 : vector<1x1x8x8xbf16> to vector<8x8xbf16>
    %cst_36 = arith.constant dense<0.000000e+00> : vector<288x8xf32>
    %32 = tpu.matmul %29, %31, %cst_36 {dimension_numbers = #tpu.dot_dimension_numbers<[1], [0], [0], [1], [0, 0, 1, 1], [], []>} : vector<288x8xbf16>, vector<8x8xbf16>, vector<288x8xf32> -> vector<288x8xf32>
    %33 = arith.addf %26, %32 : vector<288x8xf32>
    %c0_37 = arith.constant 0 : index
    %c0_38 = arith.constant 0 : index
    %c20 = arith.constant 20 : index
    %c0_39 = arith.constant 0 : index
    %34 = vector.load %arg2[%c0_37, %c0_38, %c20, %c0_39] : memref<1x1x328x8xf32, #tpu.memory_space<vmem>>, vector<1x1x288x8xf32>
    %35 = vector.shape_cast %34 : vector<1x1x288x8xf32> to vector<288x8xf32>
    %36 = arith.truncf %35 : vector<288x8xf32> to vector<288x8xbf16>
    %c0_40 = arith.constant 0 : index
    %c5 = arith.constant 5 : index
    %c0_41 = arith.constant 0 : index
    %c0_42 = arith.constant 0 : index
    %37 = vector.load %arg5[%c0_40, %c5, %c0_41, %c0_42] : memref<3x9x8x8xbf16, #tpu.memory_space<vmem>>, vector<1x1x8x8xbf16>
    %38 = vector.shape_cast %37 : vector<1x1x8x8xbf16> to vector<8x8xbf16>
    %cst_43 = arith.constant dense<0.000000e+00> : vector<288x8xf32>
    %39 = tpu.matmul %36, %38, %cst_43 {dimension_numbers = #tpu.dot_dimension_numbers<[1], [0], [0], [1], [0, 0, 1, 1], [], []>} : vector<288x8xbf16>, vector<8x8xbf16>, vector<288x8xf32> -> vector<288x8xf32>
    %40 = arith.addf %33, %39 : vector<288x8xf32>
    %c0_44 = arith.constant 0 : index
    %c0_45 = arith.constant 0 : index
    %c36 = arith.constant 36 : index
    %c0_46 = arith.constant 0 : index
    %41 = vector.load %arg2[%c0_44, %c0_45, %c36, %c0_46] : memref<1x1x328x8xf32, #tpu.memory_space<vmem>>, vector<1x1x288x8xf32>
    %42 = vector.shape_cast %41 : vector<1x1x288x8xf32> to vector<288x8xf32>
    %43 = arith.truncf %42 : vector<288x8xf32> to vector<288x8xbf16>
    %c0_47 = arith.constant 0 : index
    %c6 = arith.constant 6 : index
    %c0_48 = arith.constant 0 : index
    %c0_49 = arith.constant 0 : index
    %44 = vector.load %arg5[%c0_47, %c6, %c0_48, %c0_49] : memref<3x9x8x8xbf16, #tpu.memory_space<vmem>>, vector<1x1x8x8xbf16>
    %45 = vector.shape_cast %44 : vector<1x1x8x8xbf16> to vector<8x8xbf16>
    %cst_50 = arith.constant dense<0.000000e+00> : vector<288x8xf32>
    %46 = tpu.matmul %43, %45, %cst_50 {dimension_numbers = #tpu.dot_dimension_numbers<[1], [0], [0], [1], [0, 0, 1, 1], [], []>} : vector<288x8xbf16>, vector<8x8xbf16>, vector<288x8xf32> -> vector<288x8xf32>
    %47 = arith.addf %40, %46 : vector<288x8xf32>
    %c0_51 = arith.constant 0 : index
    %c0_52 = arith.constant 0 : index
    %c37 = arith.constant 37 : index
    %c0_53 = arith.constant 0 : index
    %48 = vector.load %arg2[%c0_51, %c0_52, %c37, %c0_53] : memref<1x1x328x8xf32, #tpu.memory_space<vmem>>, vector<1x1x288x8xf32>
    %49 = vector.shape_cast %48 : vector<1x1x288x8xf32> to vector<288x8xf32>
    %50 = arith.truncf %49 : vector<288x8xf32> to vector<288x8xbf16>
    %c0_54 = arith.constant 0 : index
    %c7 = arith.constant 7 : index
    %c0_55 = arith.constant 0 : index
    %c0_56 = arith.constant 0 : index
    %51 = vector.load %arg5[%c0_54, %c7, %c0_55, %c0_56] : memref<3x9x8x8xbf16, #tpu.memory_space<vmem>>, vector<1x1x8x8xbf16>
    %52 = vector.shape_cast %51 : vector<1x1x8x8xbf16> to vector<8x8xbf16>
    %cst_57 = arith.constant dense<0.000000e+00> : vector<288x8xf32>
    %53 = tpu.matmul %50, %52, %cst_57 {dimension_numbers = #tpu.dot_dimension_numbers<[1], [0], [0], [1], [0, 0, 1, 1], [], []>} : vector<288x8xbf16>, vector<8x8xbf16>, vector<288x8xf32> -> vector<288x8xf32>
    %54 = arith.addf %47, %53 : vector<288x8xf32>
    %c0_58 = arith.constant 0 : index
    %c0_59 = arith.constant 0 : index
    %c38 = arith.constant 38 : index
    %c0_60 = arith.constant 0 : index
    %55 = vector.load %arg2[%c0_58, %c0_59, %c38, %c0_60] : memref<1x1x328x8xf32, #tpu.memory_space<vmem>>, vector<1x1x288x8xf32>
    %56 = vector.shape_cast %55 : vector<1x1x288x8xf32> to vector<288x8xf32>
    %57 = arith.truncf %56 : vector<288x8xf32> to vector<288x8xbf16>
    %c0_61 = arith.constant 0 : index
    %c8 = arith.constant 8 : index
    %c0_62 = arith.constant 0 : index
    %c0_63 = arith.constant 0 : index
    %58 = vector.load %arg5[%c0_61, %c8, %c0_62, %c0_63] : memref<3x9x8x8xbf16, #tpu.memory_space<vmem>>, vector<1x1x8x8xbf16>
    %59 = vector.shape_cast %58 : vector<1x1x8x8xbf16> to vector<8x8xbf16>
    %cst_64 = arith.constant dense<0.000000e+00> : vector<288x8xf32>
    %60 = tpu.matmul %57, %59, %cst_64 {dimension_numbers = #tpu.dot_dimension_numbers<[1], [0], [0], [1], [0, 0, 1, 1], [], []>} : vector<288x8xbf16>, vector<8x8xbf16>, vector<288x8xf32> -> vector<288x8xf32>
    %61 = arith.addf %54, %60 : vector<288x8xf32>
    %c0_65 = arith.constant 0 : index
    %c0_66 = arith.constant 0 : index
    %c0_67 = arith.constant 0 : index
    %c0_68 = arith.constant 0 : index
    %62 = vector.load %arg3[%c0_65, %c0_66, %c0_67, %c0_68] : memref<1x1x328x8xf32, #tpu.memory_space<vmem>>, vector<1x1x288x8xf32>
    %63 = vector.shape_cast %62 : vector<1x1x288x8xf32> to vector<288x8xf32>
    %64 = arith.truncf %63 : vector<288x8xf32> to vector<288x8xbf16>
    %c1_69 = arith.constant 1 : index
    %c0_70 = arith.constant 0 : index
    %c0_71 = arith.constant 0 : index
    %c0_72 = arith.constant 0 : index
    %65 = vector.load %arg5[%c1_69, %c0_70, %c0_71, %c0_72] : memref<3x9x8x8xbf16, #tpu.memory_space<vmem>>, vector<1x1x8x8xbf16>
    %66 = vector.shape_cast %65 : vector<1x1x8x8xbf16> to vector<8x8xbf16>
    %cst_73 = arith.constant dense<0.000000e+00> : vector<288x8xf32>
    %67 = tpu.matmul %64, %66, %cst_73 {dimension_numbers = #tpu.dot_dimension_numbers<[1], [0], [0], [1], [0, 0, 1, 1], [], []>} : vector<288x8xbf16>, vector<8x8xbf16>, vector<288x8xf32> -> vector<288x8xf32>
    %68 = arith.addf %61, %67 : vector<288x8xf32>
    %c0_74 = arith.constant 0 : index
    %c0_75 = arith.constant 0 : index
    %c1_76 = arith.constant 1 : index
    %c0_77 = arith.constant 0 : index
    %69 = vector.load %arg3[%c0_74, %c0_75, %c1_76, %c0_77] : memref<1x1x328x8xf32, #tpu.memory_space<vmem>>, vector<1x1x288x8xf32>
    %70 = vector.shape_cast %69 : vector<1x1x288x8xf32> to vector<288x8xf32>
    %71 = arith.truncf %70 : vector<288x8xf32> to vector<288x8xbf16>
    %c1_78 = arith.constant 1 : index
    %c1_79 = arith.constant 1 : index
    %c0_80 = arith.constant 0 : index
    %c0_81 = arith.constant 0 : index
    %72 = vector.load %arg5[%c1_78, %c1_79, %c0_80, %c0_81] : memref<3x9x8x8xbf16, #tpu.memory_space<vmem>>, vector<1x1x8x8xbf16>
    %73 = vector.shape_cast %72 : vector<1x1x8x8xbf16> to vector<8x8xbf16>
    %cst_82 = arith.constant dense<0.000000e+00> : vector<288x8xf32>
    %74 = tpu.matmul %71, %73, %cst_82 {dimension_numbers = #tpu.dot_dimension_numbers<[1], [0], [0], [1], [0, 0, 1, 1], [], []>} : vector<288x8xbf16>, vector<8x8xbf16>, vector<288x8xf32> -> vector<288x8xf32>
    %75 = arith.addf %68, %74 : vector<288x8xf32>
    %c0_83 = arith.constant 0 : index
    %c0_84 = arith.constant 0 : index
    %c2_85 = arith.constant 2 : index
    %c0_86 = arith.constant 0 : index
    %76 = vector.load %arg3[%c0_83, %c0_84, %c2_85, %c0_86] : memref<1x1x328x8xf32, #tpu.memory_space<vmem>>, vector<1x1x288x8xf32>
    %77 = vector.shape_cast %76 : vector<1x1x288x8xf32> to vector<288x8xf32>
    %78 = arith.truncf %77 : vector<288x8xf32> to vector<288x8xbf16>
    %c1_87 = arith.constant 1 : index
    %c2_88 = arith.constant 2 : index
    %c0_89 = arith.constant 0 : index
    %c0_90 = arith.constant 0 : index
    %79 = vector.load %arg5[%c1_87, %c2_88, %c0_89, %c0_90] : memref<3x9x8x8xbf16, #tpu.memory_space<vmem>>, vector<1x1x8x8xbf16>
    %80 = vector.shape_cast %79 : vector<1x1x8x8xbf16> to vector<8x8xbf16>
    %cst_91 = arith.constant dense<0.000000e+00> : vector<288x8xf32>
    %81 = tpu.matmul %78, %80, %cst_91 {dimension_numbers = #tpu.dot_dimension_numbers<[1], [0], [0], [1], [0, 0, 1, 1], [], []>} : vector<288x8xbf16>, vector<8x8xbf16>, vector<288x8xf32> -> vector<288x8xf32>
    %82 = arith.addf %75, %81 : vector<288x8xf32>
    %c0_92 = arith.constant 0 : index
    %c0_93 = arith.constant 0 : index
    %c18_94 = arith.constant 18 : index
    %c0_95 = arith.constant 0 : index
    %83 = vector.load %arg3[%c0_92, %c0_93, %c18_94, %c0_95] : memref<1x1x328x8xf32, #tpu.memory_space<vmem>>, vector<1x1x288x8xf32>
    %84 = vector.shape_cast %83 : vector<1x1x288x8xf32> to vector<288x8xf32>
    %85 = arith.truncf %84 : vector<288x8xf32> to vector<288x8xbf16>
    %c1_96 = arith.constant 1 : index
    %c3_97 = arith.constant 3 : index
    %c0_98 = arith.constant 0 : index
    %c0_99 = arith.constant 0 : index
    %86 = vector.load %arg5[%c1_96, %c3_97, %c0_98, %c0_99] : memref<3x9x8x8xbf16, #tpu.memory_space<vmem>>, vector<1x1x8x8xbf16>
    %87 = vector.shape_cast %86 : vector<1x1x8x8xbf16> to vector<8x8xbf16>
    %cst_100 = arith.constant dense<0.000000e+00> : vector<288x8xf32>
    %88 = tpu.matmul %85, %87, %cst_100 {dimension_numbers = #tpu.dot_dimension_numbers<[1], [0], [0], [1], [0, 0, 1, 1], [], []>} : vector<288x8xbf16>, vector<8x8xbf16>, vector<288x8xf32> -> vector<288x8xf32>
    %89 = arith.addf %82, %88 : vector<288x8xf32>
    %c0_101 = arith.constant 0 : index
    %c0_102 = arith.constant 0 : index
    %c19_103 = arith.constant 19 : index
    %c0_104 = arith.constant 0 : index
    %90 = vector.load %arg3[%c0_101, %c0_102, %c19_103, %c0_104] : memref<1x1x328x8xf32, #tpu.memory_space<vmem>>, vector<1x1x288x8xf32>
    %91 = vector.shape_cast %90 : vector<1x1x288x8xf32> to vector<288x8xf32>
    %92 = arith.truncf %91 : vector<288x8xf32> to vector<288x8xbf16>
    %c1_105 = arith.constant 1 : index
    %c4_106 = arith.constant 4 : index
    %c0_107 = arith.constant 0 : index
    %c0_108 = arith.constant 0 : index
    %93 = vector.load %arg5[%c1_105, %c4_106, %c0_107, %c0_108] : memref<3x9x8x8xbf16, #tpu.memory_space<vmem>>, vector<1x1x8x8xbf16>
    %94 = vector.shape_cast %93 : vector<1x1x8x8xbf16> to vector<8x8xbf16>
    %cst_109 = arith.constant dense<0.000000e+00> : vector<288x8xf32>
    %95 = tpu.matmul %92, %94, %cst_109 {dimension_numbers = #tpu.dot_dimension_numbers<[1], [0], [0], [1], [0, 0, 1, 1], [], []>} : vector<288x8xbf16>, vector<8x8xbf16>, vector<288x8xf32> -> vector<288x8xf32>
    %96 = arith.addf %89, %95 : vector<288x8xf32>
    %c0_110 = arith.constant 0 : index
    %c0_111 = arith.constant 0 : index
    %c20_112 = arith.constant 20 : index
    %c0_113 = arith.constant 0 : index
    %97 = vector.load %arg3[%c0_110, %c0_111, %c20_112, %c0_113] : memref<1x1x328x8xf32, #tpu.memory_space<vmem>>, vector<1x1x288x8xf32>
    %98 = vector.shape_cast %97 : vector<1x1x288x8xf32> to vector<288x8xf32>
    %99 = arith.truncf %98 : vector<288x8xf32> to vector<288x8xbf16>
    %c1_114 = arith.constant 1 : index
    %c5_115 = arith.constant 5 : index
    %c0_116 = arith.constant 0 : index
    %c0_117 = arith.constant 0 : index
    %100 = vector.load %arg5[%c1_114, %c5_115, %c0_116, %c0_117] : memref<3x9x8x8xbf16, #tpu.memory_space<vmem>>, vector<1x1x8x8xbf16>
    %101 = vector.shape_cast %100 : vector<1x1x8x8xbf16> to vector<8x8xbf16>
    %cst_118 = arith.constant dense<0.000000e+00> : vector<288x8xf32>
    %102 = tpu.matmul %99, %101, %cst_118 {dimension_numbers = #tpu.dot_dimension_numbers<[1], [0], [0], [1], [0, 0, 1, 1], [], []>} : vector<288x8xbf16>, vector<8x8xbf16>, vector<288x8xf32> -> vector<288x8xf32>
    %103 = arith.addf %96, %102 : vector<288x8xf32>
    %c0_119 = arith.constant 0 : index
    %c0_120 = arith.constant 0 : index
    %c36_121 = arith.constant 36 : index
    %c0_122 = arith.constant 0 : index
    %104 = vector.load %arg3[%c0_119, %c0_120, %c36_121, %c0_122] : memref<1x1x328x8xf32, #tpu.memory_space<vmem>>, vector<1x1x288x8xf32>
    %105 = vector.shape_cast %104 : vector<1x1x288x8xf32> to vector<288x8xf32>
    %106 = arith.truncf %105 : vector<288x8xf32> to vector<288x8xbf16>
    %c1_123 = arith.constant 1 : index
    %c6_124 = arith.constant 6 : index
    %c0_125 = arith.constant 0 : index
    %c0_126 = arith.constant 0 : index
    %107 = vector.load %arg5[%c1_123, %c6_124, %c0_125, %c0_126] : memref<3x9x8x8xbf16, #tpu.memory_space<vmem>>, vector<1x1x8x8xbf16>
    %108 = vector.shape_cast %107 : vector<1x1x8x8xbf16> to vector<8x8xbf16>
    %cst_127 = arith.constant dense<0.000000e+00> : vector<288x8xf32>
    %109 = tpu.matmul %106, %108, %cst_127 {dimension_numbers = #tpu.dot_dimension_numbers<[1], [0], [0], [1], [0, 0, 1, 1], [], []>} : vector<288x8xbf16>, vector<8x8xbf16>, vector<288x8xf32> -> vector<288x8xf32>
    %110 = arith.addf %103, %109 : vector<288x8xf32>
    %c0_128 = arith.constant 0 : index
    %c0_129 = arith.constant 0 : index
    %c37_130 = arith.constant 37 : index
    %c0_131 = arith.constant 0 : index
    %111 = vector.load %arg3[%c0_128, %c0_129, %c37_130, %c0_131] : memref<1x1x328x8xf32, #tpu.memory_space<vmem>>, vector<1x1x288x8xf32>
    %112 = vector.shape_cast %111 : vector<1x1x288x8xf32> to vector<288x8xf32>
    %113 = arith.truncf %112 : vector<288x8xf32> to vector<288x8xbf16>
    %c1_132 = arith.constant 1 : index
    %c7_133 = arith.constant 7 : index
    %c0_134 = arith.constant 0 : index
    %c0_135 = arith.constant 0 : index
    %114 = vector.load %arg5[%c1_132, %c7_133, %c0_134, %c0_135] : memref<3x9x8x8xbf16, #tpu.memory_space<vmem>>, vector<1x1x8x8xbf16>
    %115 = vector.shape_cast %114 : vector<1x1x8x8xbf16> to vector<8x8xbf16>
    %cst_136 = arith.constant dense<0.000000e+00> : vector<288x8xf32>
    %116 = tpu.matmul %113, %115, %cst_136 {dimension_numbers = #tpu.dot_dimension_numbers<[1], [0], [0], [1], [0, 0, 1, 1], [], []>} : vector<288x8xbf16>, vector<8x8xbf16>, vector<288x8xf32> -> vector<288x8xf32>
    %117 = arith.addf %110, %116 : vector<288x8xf32>
    %c0_137 = arith.constant 0 : index
    %c0_138 = arith.constant 0 : index
    %c38_139 = arith.constant 38 : index
    %c0_140 = arith.constant 0 : index
    %118 = vector.load %arg3[%c0_137, %c0_138, %c38_139, %c0_140] : memref<1x1x328x8xf32, #tpu.memory_space<vmem>>, vector<1x1x288x8xf32>
    %119 = vector.shape_cast %118 : vector<1x1x288x8xf32> to vector<288x8xf32>
    %120 = arith.truncf %119 : vector<288x8xf32> to vector<288x8xbf16>
    %c1_141 = arith.constant 1 : index
    %c8_142 = arith.constant 8 : index
    %c0_143 = arith.constant 0 : index
    %c0_144 = arith.constant 0 : index
    %121 = vector.load %arg5[%c1_141, %c8_142, %c0_143, %c0_144] : memref<3x9x8x8xbf16, #tpu.memory_space<vmem>>, vector<1x1x8x8xbf16>
    %122 = vector.shape_cast %121 : vector<1x1x8x8xbf16> to vector<8x8xbf16>
    %cst_145 = arith.constant dense<0.000000e+00> : vector<288x8xf32>
    %123 = tpu.matmul %120, %122, %cst_145 {dimension_numbers = #tpu.dot_dimension_numbers<[1], [0], [0], [1], [0, 0, 1, 1], [], []>} : vector<288x8xbf16>, vector<8x8xbf16>, vector<288x8xf32> -> vector<288x8xf32>
    %124 = arith.addf %117, %123 : vector<288x8xf32>
    %c0_146 = arith.constant 0 : index
    %c0_147 = arith.constant 0 : index
    %c0_148 = arith.constant 0 : index
    %c0_149 = arith.constant 0 : index
    %125 = vector.load %arg4[%c0_146, %c0_147, %c0_148, %c0_149] : memref<1x1x328x8xf32, #tpu.memory_space<vmem>>, vector<1x1x288x8xf32>
    %126 = vector.shape_cast %125 : vector<1x1x288x8xf32> to vector<288x8xf32>
    %127 = arith.truncf %126 : vector<288x8xf32> to vector<288x8xbf16>
    %c2_150 = arith.constant 2 : index
    %c0_151 = arith.constant 0 : index
    %c0_152 = arith.constant 0 : index
    %c0_153 = arith.constant 0 : index
    %128 = vector.load %arg5[%c2_150, %c0_151, %c0_152, %c0_153] : memref<3x9x8x8xbf16, #tpu.memory_space<vmem>>, vector<1x1x8x8xbf16>
    %129 = vector.shape_cast %128 : vector<1x1x8x8xbf16> to vector<8x8xbf16>
    %cst_154 = arith.constant dense<0.000000e+00> : vector<288x8xf32>
    %130 = tpu.matmul %127, %129, %cst_154 {dimension_numbers = #tpu.dot_dimension_numbers<[1], [0], [0], [1], [0, 0, 1, 1], [], []>} : vector<288x8xbf16>, vector<8x8xbf16>, vector<288x8xf32> -> vector<288x8xf32>
    %131 = arith.addf %124, %130 : vector<288x8xf32>
    %c0_155 = arith.constant 0 : index
    %c0_156 = arith.constant 0 : index
    %c1_157 = arith.constant 1 : index
    %c0_158 = arith.constant 0 : index
    %132 = vector.load %arg4[%c0_155, %c0_156, %c1_157, %c0_158] : memref<1x1x328x8xf32, #tpu.memory_space<vmem>>, vector<1x1x288x8xf32>
    %133 = vector.shape_cast %132 : vector<1x1x288x8xf32> to vector<288x8xf32>
    %134 = arith.truncf %133 : vector<288x8xf32> to vector<288x8xbf16>
    %c2_159 = arith.constant 2 : index
    %c1_160 = arith.constant 1 : index
    %c0_161 = arith.constant 0 : index
    %c0_162 = arith.constant 0 : index
    %135 = vector.load %arg5[%c2_159, %c1_160, %c0_161, %c0_162] : memref<3x9x8x8xbf16, #tpu.memory_space<vmem>>, vector<1x1x8x8xbf16>
    %136 = vector.shape_cast %135 : vector<1x1x8x8xbf16> to vector<8x8xbf16>
    %cst_163 = arith.constant dense<0.000000e+00> : vector<288x8xf32>
    %137 = tpu.matmul %134, %136, %cst_163 {dimension_numbers = #tpu.dot_dimension_numbers<[1], [0], [0], [1], [0, 0, 1, 1], [], []>} : vector<288x8xbf16>, vector<8x8xbf16>, vector<288x8xf32> -> vector<288x8xf32>
    %138 = arith.addf %131, %137 : vector<288x8xf32>
    %c0_164 = arith.constant 0 : index
    %c0_165 = arith.constant 0 : index
    %c2_166 = arith.constant 2 : index
    %c0_167 = arith.constant 0 : index
    %139 = vector.load %arg4[%c0_164, %c0_165, %c2_166, %c0_167] : memref<1x1x328x8xf32, #tpu.memory_space<vmem>>, vector<1x1x288x8xf32>
    %140 = vector.shape_cast %139 : vector<1x1x288x8xf32> to vector<288x8xf32>
    %141 = arith.truncf %140 : vector<288x8xf32> to vector<288x8xbf16>
    %c2_168 = arith.constant 2 : index
    %c2_169 = arith.constant 2 : index
    %c0_170 = arith.constant 0 : index
    %c0_171 = arith.constant 0 : index
    %142 = vector.load %arg5[%c2_168, %c2_169, %c0_170, %c0_171] : memref<3x9x8x8xbf16, #tpu.memory_space<vmem>>, vector<1x1x8x8xbf16>
    %143 = vector.shape_cast %142 : vector<1x1x8x8xbf16> to vector<8x8xbf16>
    %cst_172 = arith.constant dense<0.000000e+00> : vector<288x8xf32>
    %144 = tpu.matmul %141, %143, %cst_172 {dimension_numbers = #tpu.dot_dimension_numbers<[1], [0], [0], [1], [0, 0, 1, 1], [], []>} : vector<288x8xbf16>, vector<8x8xbf16>, vector<288x8xf32> -> vector<288x8xf32>
    %145 = arith.addf %138, %144 : vector<288x8xf32>
    %c0_173 = arith.constant 0 : index
    %c0_174 = arith.constant 0 : index
    %c18_175 = arith.constant 18 : index
    %c0_176 = arith.constant 0 : index
    %146 = vector.load %arg4[%c0_173, %c0_174, %c18_175, %c0_176] : memref<1x1x328x8xf32, #tpu.memory_space<vmem>>, vector<1x1x288x8xf32>
    %147 = vector.shape_cast %146 : vector<1x1x288x8xf32> to vector<288x8xf32>
    %148 = arith.truncf %147 : vector<288x8xf32> to vector<288x8xbf16>
    %c2_177 = arith.constant 2 : index
    %c3_178 = arith.constant 3 : index
    %c0_179 = arith.constant 0 : index
    %c0_180 = arith.constant 0 : index
    %149 = vector.load %arg5[%c2_177, %c3_178, %c0_179, %c0_180] : memref<3x9x8x8xbf16, #tpu.memory_space<vmem>>, vector<1x1x8x8xbf16>
    %150 = vector.shape_cast %149 : vector<1x1x8x8xbf16> to vector<8x8xbf16>
    %cst_181 = arith.constant dense<0.000000e+00> : vector<288x8xf32>
    %151 = tpu.matmul %148, %150, %cst_181 {dimension_numbers = #tpu.dot_dimension_numbers<[1], [0], [0], [1], [0, 0, 1, 1], [], []>} : vector<288x8xbf16>, vector<8x8xbf16>, vector<288x8xf32> -> vector<288x8xf32>
    %152 = arith.addf %145, %151 : vector<288x8xf32>
    %c0_182 = arith.constant 0 : index
    %c0_183 = arith.constant 0 : index
    %c19_184 = arith.constant 19 : index
    %c0_185 = arith.constant 0 : index
    %153 = vector.load %arg4[%c0_182, %c0_183, %c19_184, %c0_185] : memref<1x1x328x8xf32, #tpu.memory_space<vmem>>, vector<1x1x288x8xf32>
    %154 = vector.shape_cast %153 : vector<1x1x288x8xf32> to vector<288x8xf32>
    %155 = arith.truncf %154 : vector<288x8xf32> to vector<288x8xbf16>
    %c2_186 = arith.constant 2 : index
    %c4_187 = arith.constant 4 : index
    %c0_188 = arith.constant 0 : index
    %c0_189 = arith.constant 0 : index
    %156 = vector.load %arg5[%c2_186, %c4_187, %c0_188, %c0_189] : memref<3x9x8x8xbf16, #tpu.memory_space<vmem>>, vector<1x1x8x8xbf16>
    %157 = vector.shape_cast %156 : vector<1x1x8x8xbf16> to vector<8x8xbf16>
    %cst_190 = arith.constant dense<0.000000e+00> : vector<288x8xf32>
    %158 = tpu.matmul %155, %157, %cst_190 {dimension_numbers = #tpu.dot_dimension_numbers<[1], [0], [0], [1], [0, 0, 1, 1], [], []>} : vector<288x8xbf16>, vector<8x8xbf16>, vector<288x8xf32> -> vector<288x8xf32>
    %159 = arith.addf %152, %158 : vector<288x8xf32>
    %c0_191 = arith.constant 0 : index
    %c0_192 = arith.constant 0 : index
    %c20_193 = arith.constant 20 : index
    %c0_194 = arith.constant 0 : index
    %160 = vector.load %arg4[%c0_191, %c0_192, %c20_193, %c0_194] : memref<1x1x328x8xf32, #tpu.memory_space<vmem>>, vector<1x1x288x8xf32>
    %161 = vector.shape_cast %160 : vector<1x1x288x8xf32> to vector<288x8xf32>
    %162 = arith.truncf %161 : vector<288x8xf32> to vector<288x8xbf16>
    %c2_195 = arith.constant 2 : index
    %c5_196 = arith.constant 5 : index
    %c0_197 = arith.constant 0 : index
    %c0_198 = arith.constant 0 : index
    %163 = vector.load %arg5[%c2_195, %c5_196, %c0_197, %c0_198] : memref<3x9x8x8xbf16, #tpu.memory_space<vmem>>, vector<1x1x8x8xbf16>
    %164 = vector.shape_cast %163 : vector<1x1x8x8xbf16> to vector<8x8xbf16>
    %cst_199 = arith.constant dense<0.000000e+00> : vector<288x8xf32>
    %165 = tpu.matmul %162, %164, %cst_199 {dimension_numbers = #tpu.dot_dimension_numbers<[1], [0], [0], [1], [0, 0, 1, 1], [], []>} : vector<288x8xbf16>, vector<8x8xbf16>, vector<288x8xf32> -> vector<288x8xf32>
    %166 = arith.addf %159, %165 : vector<288x8xf32>
    %c0_200 = arith.constant 0 : index
    %c0_201 = arith.constant 0 : index
    %c36_202 = arith.constant 36 : index
    %c0_203 = arith.constant 0 : index
    %167 = vector.load %arg4[%c0_200, %c0_201, %c36_202, %c0_203] : memref<1x1x328x8xf32, #tpu.memory_space<vmem>>, vector<1x1x288x8xf32>
    %168 = vector.shape_cast %167 : vector<1x1x288x8xf32> to vector<288x8xf32>
    %169 = arith.truncf %168 : vector<288x8xf32> to vector<288x8xbf16>
    %c2_204 = arith.constant 2 : index
    %c6_205 = arith.constant 6 : index
    %c0_206 = arith.constant 0 : index
    %c0_207 = arith.constant 0 : index
    %170 = vector.load %arg5[%c2_204, %c6_205, %c0_206, %c0_207] : memref<3x9x8x8xbf16, #tpu.memory_space<vmem>>, vector<1x1x8x8xbf16>
    %171 = vector.shape_cast %170 : vector<1x1x8x8xbf16> to vector<8x8xbf16>
    %cst_208 = arith.constant dense<0.000000e+00> : vector<288x8xf32>
    %172 = tpu.matmul %169, %171, %cst_208 {dimension_numbers = #tpu.dot_dimension_numbers<[1], [0], [0], [1], [0, 0, 1, 1], [], []>} : vector<288x8xbf16>, vector<8x8xbf16>, vector<288x8xf32> -> vector<288x8xf32>
    %173 = arith.addf %166, %172 : vector<288x8xf32>
    %c0_209 = arith.constant 0 : index
    %c0_210 = arith.constant 0 : index
    %c37_211 = arith.constant 37 : index
    %c0_212 = arith.constant 0 : index
    %174 = vector.load %arg4[%c0_209, %c0_210, %c37_211, %c0_212] : memref<1x1x328x8xf32, #tpu.memory_space<vmem>>, vector<1x1x288x8xf32>
    %175 = vector.shape_cast %174 : vector<1x1x288x8xf32> to vector<288x8xf32>
    %176 = arith.truncf %175 : vector<288x8xf32> to vector<288x8xbf16>
    %c2_213 = arith.constant 2 : index
    %c7_214 = arith.constant 7 : index
    %c0_215 = arith.constant 0 : index
    %c0_216 = arith.constant 0 : index
    %177 = vector.load %arg5[%c2_213, %c7_214, %c0_215, %c0_216] : memref<3x9x8x8xbf16, #tpu.memory_space<vmem>>, vector<1x1x8x8xbf16>
    %178 = vector.shape_cast %177 : vector<1x1x8x8xbf16> to vector<8x8xbf16>
    %cst_217 = arith.constant dense<0.000000e+00> : vector<288x8xf32>
    %179 = tpu.matmul %176, %178, %cst_217 {dimension_numbers = #tpu.dot_dimension_numbers<[1], [0], [0], [1], [0, 0, 1, 1], [], []>} : vector<288x8xbf16>, vector<8x8xbf16>, vector<288x8xf32> -> vector<288x8xf32>
    %180 = arith.addf %173, %179 : vector<288x8xf32>
    %c0_218 = arith.constant 0 : index
    %c0_219 = arith.constant 0 : index
    %c38_220 = arith.constant 38 : index
    %c0_221 = arith.constant 0 : index
    %181 = vector.load %arg4[%c0_218, %c0_219, %c38_220, %c0_221] : memref<1x1x328x8xf32, #tpu.memory_space<vmem>>, vector<1x1x288x8xf32>
    %182 = vector.shape_cast %181 : vector<1x1x288x8xf32> to vector<288x8xf32>
    %183 = arith.truncf %182 : vector<288x8xf32> to vector<288x8xbf16>
    %c2_222 = arith.constant 2 : index
    %c8_223 = arith.constant 8 : index
    %c0_224 = arith.constant 0 : index
    %c0_225 = arith.constant 0 : index
    %184 = vector.load %arg5[%c2_222, %c8_223, %c0_224, %c0_225] : memref<3x9x8x8xbf16, #tpu.memory_space<vmem>>, vector<1x1x8x8xbf16>
    %185 = vector.shape_cast %184 : vector<1x1x8x8xbf16> to vector<8x8xbf16>
    %cst_226 = arith.constant dense<0.000000e+00> : vector<288x8xf32>
    %186 = tpu.matmul %183, %185, %cst_226 {dimension_numbers = #tpu.dot_dimension_numbers<[1], [0], [0], [1], [0, 0, 1, 1], [], []>} : vector<288x8xbf16>, vector<8x8xbf16>, vector<288x8xf32> -> vector<288x8xf32>
    %187 = arith.addf %180, %186 : vector<288x8xf32>
    %c0_227 = arith.constant 0 : index
    %c0_228 = arith.constant 0 : index
    %188 = vector.load %arg6[%c0_227, %c0_228] : memref<1x8xf32, #tpu.memory_space<vmem>>, vector<1x8xf32>
    %189 = vector.broadcast %188 : vector<1x8xf32> to vector<288x8xf32>
    %190 = arith.addf %187, %189 : vector<288x8xf32>
    %cst_229 = arith.constant 0.000000e+00 : f32
    %191 = vector.broadcast %cst_229 : f32 to vector<288x8xf32>
    %192 = arith.maximumf %190, %191 : vector<288x8xf32>
    %193 = arith.truncf %192 : vector<288x8xf32> to vector<288x8xbf16>
    %c0_230 = arith.constant 0 : index
    %c0_231 = arith.constant 0 : index
    %c0_232 = arith.constant 0 : index
    %c0_233 = arith.constant 0 : index
    %194 = vector.load %arg7[%c0_230, %c0_231, %c0_232, %c0_233] : memref<1x1x288x8xbf16, #tpu.memory_space<vmem>>, vector<1x1x288x8xbf16>
    %195 = vector.shape_cast %194 : vector<1x1x288x8xbf16> to vector<288x8xbf16>
    %196 = vector.shape_cast %193 : vector<288x8xbf16> to vector<1x1x288x8xbf16>
    tpu.vector_store %arg7[%c0_230, %c0_231, %c0_232, %c0_233], %196 {strides = array<i32>} : memref<1x1x288x8xbf16, #tpu.memory_space<vmem>>, vector<1x1x288x8xbf16>,
    return
  }
  func.func @transform_0(%arg0: i32, %arg1: i32) -> (i32, i32, i32, i32) {
    %c0_i32 = arith.constant 0 : i32
    %c0_i32_0 = arith.constant 0 : i32
    %c0_i32_1 = arith.constant 0 : i32
    return %arg0, %arg1, %c0_i32, %c0_i32_0 : i32, i32, i32, i32
  }
  func.func @transform_1(%arg0: i32, %arg1: i32) -> (i32, i32, i32, i32) {
    %c1_i32 = arith.constant 1 : i32
    %0 = arith.addi %arg1, %c1_i32 : i32
    %c0_i32 = arith.constant 0 : i32
    %c0_i32_0 = arith.constant 0 : i32
    %c0_i32_1 = arith.constant 0 : i32
    return %arg0, %0, %c0_i32, %c0_i32_0 : i32, i32, i32, i32
  }
  func.func @transform_2(%arg0: i32, %arg1: i32) -> (i32, i32, i32, i32) {
    %c2_i32 = arith.constant 2 : i32
    %0 = arith.addi %arg1, %c2_i32 : i32
    %c0_i32 = arith.constant 0 : i32
    %c0_i32_0 = arith.constant 0 : i32
    %c0_i32_1 = arith.constant 0 : i32
    return %arg0, %0, %c0_i32, %c0_i32_0 : i32, i32, i32, i32
  }
  func.func @transform_3(%arg0: i32, %arg1: i32) -> (i32, i32, i32, i32) {
    %c0_i32 = arith.constant 0 : i32
    %c0_i32_0 = arith.constant 0 : i32
    %c0_i32_1 = arith.constant 0 : i32
    %c0_i32_2 = arith.constant 0 : i32
    %c0_i32_3 = arith.constant 0 : i32
    return %c0_i32, %c0_i32_0, %c0_i32_1, %c0_i32_2 : i32, i32, i32, i32
  }
  func.func @transform_4(%arg0: i32, %arg1: i32) -> (i32, i32) {
    %c0_i32 = arith.constant 0 : i32
    %c0_i32_0 = arith.constant 0 : i32
    %c0_i32_1 = arith.constant 0 : i32
    return %c0_i32, %c0_i32_0 : i32, i32
  }
  func.func @transform_5(%arg0: i32, %arg1: i32) -> (i32, i32, i32, i32) {
    %c0_i32 = arith.constant 0 : i32
    %c0_i32_0 = arith.constant 0 : i32
    %c0_i32_1 = arith.constant 0 : i32
    return %arg0, %arg1, %c0_i32, %c0_i32_0 : i32, i32, i32, i32
  }
}

module attributes {stable_mosaic.version = 11 : i64} {
  func.func @_pool_2x2x2_kernel(%arg0: i32, %arg1: i32, %arg2: memref<1x2x16x18x8xbf16, #tpu.memory_space<vmem>>, %arg3: memref<2x8x18xf32, #tpu.memory_space<vmem>>, %arg4: memref<1x1x8x8x8xf32, #tpu.memory_space<vmem>>) attributes {dimension_semantics = [#tpu.dimension_semantics<parallel>, #tpu.dimension_semantics<parallel>], iteration_bounds = array<i64: 2, 8>, scalar_prefetch = 0 : i64, scratch_operands = 0 : i64, tpu.core_type = #tpu.core_type<tc>, window_params = [{transform_indices = @transform_0, window_bounds = array<i64: 1, 2, 16, 18, 8>}, {pipeline_mode = #tpu.pipeline_mode<synchronous>, transform_indices = @transform_1, window_bounds = array<i64: 2, 8, 18>}, {transform_indices = @transform_2, window_bounds = array<i64: 1, 1, 8, 8, 8>}]} {
    %c0 = arith.constant 0 : index
    %c0_0 = arith.constant 0 : index
    %c0_1 = arith.constant 0 : index
    %0 = vector.load %arg3[%c0, %c0_0, %c0_1] : memref<2x8x18xf32, #tpu.memory_space<vmem>>, vector<1x8x18xf32>
    %1 = vector.shape_cast %0 : vector<1x8x18xf32> to vector<8x18xf32>
    %c1 = arith.constant 1 : index
    %c0_2 = arith.constant 0 : index
    %c0_3 = arith.constant 0 : index
    %2 = vector.load %arg3[%c1, %c0_2, %c0_3] : memref<2x8x18xf32, #tpu.memory_space<vmem>>, vector<1x8x18xf32>
    %3 = vector.shape_cast %2 : vector<1x8x18xf32> to vector<8x18xf32>
    %c0_4 = arith.constant 0 : index
    %c0_5 = arith.constant 0 : index
    %c0_6 = arith.constant 0 : index
    %c0_7 = arith.constant 0 : index
    %c0_8 = arith.constant 0 : index
    %4 = vector.load %arg2[%c0_4, %c0_5, %c0_6, %c0_7, %c0_8] : memref<1x2x16x18x8xbf16, #tpu.memory_space<vmem>>, vector<1x1x1x18x8xbf16>
    %5 = vector.shape_cast %4 : vector<1x1x1x18x8xbf16> to vector<18x8xbf16>
    %6 = arith.extf %5 : vector<18x8xbf16> to vector<18x8xf32>
    %c0_9 = arith.constant 0 : index
    %c0_10 = arith.constant 0 : index
    %c1_11 = arith.constant 1 : index
    %c0_12 = arith.constant 0 : index
    %c0_13 = arith.constant 0 : index
    %7 = vector.load %arg2[%c0_9, %c0_10, %c1_11, %c0_12, %c0_13] : memref<1x2x16x18x8xbf16, #tpu.memory_space<vmem>>, vector<1x1x1x18x8xbf16>
    %8 = vector.shape_cast %7 : vector<1x1x1x18x8xbf16> to vector<18x8xbf16>
    %9 = arith.extf %8 : vector<18x8xbf16> to vector<18x8xf32>
    %10 = arith.maximumf %6, %9 : vector<18x8xf32>
    %c0_14 = arith.constant 0 : index
    %c1_15 = arith.constant 1 : index
    %c0_16 = arith.constant 0 : index
    %c0_17 = arith.constant 0 : index
    %c0_18 = arith.constant 0 : index
    %11 = vector.load %arg2[%c0_14, %c1_15, %c0_16, %c0_17, %c0_18] : memref<1x2x16x18x8xbf16, #tpu.memory_space<vmem>>, vector<1x1x1x18x8xbf16>
    %12 = vector.shape_cast %11 : vector<1x1x1x18x8xbf16> to vector<18x8xbf16>
    %13 = arith.extf %12 : vector<18x8xbf16> to vector<18x8xf32>
    %14 = arith.maximumf %10, %13 : vector<18x8xf32>
    %c0_19 = arith.constant 0 : index
    %c1_20 = arith.constant 1 : index
    %c1_21 = arith.constant 1 : index
    %c0_22 = arith.constant 0 : index
    %c0_23 = arith.constant 0 : index
    %15 = vector.load %arg2[%c0_19, %c1_20, %c1_21, %c0_22, %c0_23] : memref<1x2x16x18x8xbf16, #tpu.memory_space<vmem>>, vector<1x1x1x18x8xbf16>
    %16 = vector.shape_cast %15 : vector<1x1x1x18x8xbf16> to vector<18x8xbf16>
    %17 = arith.extf %16 : vector<18x8xbf16> to vector<18x8xf32>
    %18 = arith.maximumf %14, %17 : vector<18x8xf32>
    %cst = arith.constant dense<0.000000e+00> : vector<8x8xf32>
    %19 = tpu.matmul %1, %18, %cst {dimension_numbers = #tpu.dot_dimension_numbers<[1], [0], [0], [1], [0, 0, 1, 1], [], []>} : vector<8x18xf32>, vector<18x8xf32>, vector<8x8xf32> -> vector<8x8xf32>
    %cst_24 = arith.constant dense<0.000000e+00> : vector<8x8xf32>
    %20 = tpu.matmul %3, %18, %cst_24 {dimension_numbers = #tpu.dot_dimension_numbers<[1], [0], [0], [1], [0, 0, 1, 1], [], []>} : vector<8x18xf32>, vector<18x8xf32>, vector<8x8xf32> -> vector<8x8xf32>
    %21 = arith.maximumf %19, %20 : vector<8x8xf32>
    %c0_25 = arith.constant 0 : index
    %c0_26 = arith.constant 0 : index
    %c0_27 = arith.constant 0 : index
    %c0_28 = arith.constant 0 : index
    %c0_29 = arith.constant 0 : index
    %22 = vector.load %arg4[%c0_25, %c0_26, %c0_27, %c0_28, %c0_29] : memref<1x1x8x8x8xf32, #tpu.memory_space<vmem>>, vector<1x1x1x8x8xf32>
    %23 = vector.shape_cast %22 : vector<1x1x1x8x8xf32> to vector<8x8xf32>
    %24 = vector.shape_cast %21 : vector<8x8xf32> to vector<1x1x1x8x8xf32>
    tpu.vector_store %arg4[%c0_25, %c0_26, %c0_27, %c0_28, %c0_29], %24 {strides = array<i32>} : memref<1x1x8x8x8xf32, #tpu.memory_space<vmem>>, vector<1x1x1x8x8xf32>,
    %c0_30 = arith.constant 0 : index
    %c0_31 = arith.constant 0 : index
    %c2 = arith.constant 2 : index
    %c0_32 = arith.constant 0 : index
    %c0_33 = arith.constant 0 : index
    %25 = vector.load %arg2[%c0_30, %c0_31, %c2, %c0_32, %c0_33] : memref<1x2x16x18x8xbf16, #tpu.memory_space<vmem>>, vector<1x1x1x18x8xbf16>
    %26 = vector.shape_cast %25 : vector<1x1x1x18x8xbf16> to vector<18x8xbf16>
    %27 = arith.extf %26 : vector<18x8xbf16> to vector<18x8xf32>
    %c0_34 = arith.constant 0 : index
    %c0_35 = arith.constant 0 : index
    %c3 = arith.constant 3 : index
    %c0_36 = arith.constant 0 : index
    %c0_37 = arith.constant 0 : index
    %28 = vector.load %arg2[%c0_34, %c0_35, %c3, %c0_36, %c0_37] : memref<1x2x16x18x8xbf16, #tpu.memory_space<vmem>>, vector<1x1x1x18x8xbf16>
    %29 = vector.shape_cast %28 : vector<1x1x1x18x8xbf16> to vector<18x8xbf16>
    %30 = arith.extf %29 : vector<18x8xbf16> to vector<18x8xf32>
    %31 = arith.maximumf %27, %30 : vector<18x8xf32>
    %c0_38 = arith.constant 0 : index
    %c1_39 = arith.constant 1 : index
    %c2_40 = arith.constant 2 : index
    %c0_41 = arith.constant 0 : index
    %c0_42 = arith.constant 0 : index
    %32 = vector.load %arg2[%c0_38, %c1_39, %c2_40, %c0_41, %c0_42] : memref<1x2x16x18x8xbf16, #tpu.memory_space<vmem>>, vector<1x1x1x18x8xbf16>
    %33 = vector.shape_cast %32 : vector<1x1x1x18x8xbf16> to vector<18x8xbf16>
    %34 = arith.extf %33 : vector<18x8xbf16> to vector<18x8xf32>
    %35 = arith.maximumf %31, %34 : vector<18x8xf32>
    %c0_43 = arith.constant 0 : index
    %c1_44 = arith.constant 1 : index
    %c3_45 = arith.constant 3 : index
    %c0_46 = arith.constant 0 : index
    %c0_47 = arith.constant 0 : index
    %36 = vector.load %arg2[%c0_43, %c1_44, %c3_45, %c0_46, %c0_47] : memref<1x2x16x18x8xbf16, #tpu.memory_space<vmem>>, vector<1x1x1x18x8xbf16>
    %37 = vector.shape_cast %36 : vector<1x1x1x18x8xbf16> to vector<18x8xbf16>
    %38 = arith.extf %37 : vector<18x8xbf16> to vector<18x8xf32>
    %39 = arith.maximumf %35, %38 : vector<18x8xf32>
    %cst_48 = arith.constant dense<0.000000e+00> : vector<8x8xf32>
    %40 = tpu.matmul %1, %39, %cst_48 {dimension_numbers = #tpu.dot_dimension_numbers<[1], [0], [0], [1], [0, 0, 1, 1], [], []>} : vector<8x18xf32>, vector<18x8xf32>, vector<8x8xf32> -> vector<8x8xf32>
    %cst_49 = arith.constant dense<0.000000e+00> : vector<8x8xf32>
    %41 = tpu.matmul %3, %39, %cst_49 {dimension_numbers = #tpu.dot_dimension_numbers<[1], [0], [0], [1], [0, 0, 1, 1], [], []>} : vector<8x18xf32>, vector<18x8xf32>, vector<8x8xf32> -> vector<8x8xf32>
    %42 = arith.maximumf %40, %41 : vector<8x8xf32>
    %c0_50 = arith.constant 0 : index
    %c0_51 = arith.constant 0 : index
    %c1_52 = arith.constant 1 : index
    %c0_53 = arith.constant 0 : index
    %c0_54 = arith.constant 0 : index
    %43 = vector.load %arg4[%c0_50, %c0_51, %c1_52, %c0_53, %c0_54] : memref<1x1x8x8x8xf32, #tpu.memory_space<vmem>>, vector<1x1x1x8x8xf32>
    %44 = vector.shape_cast %43 : vector<1x1x1x8x8xf32> to vector<8x8xf32>
    %45 = vector.shape_cast %42 : vector<8x8xf32> to vector<1x1x1x8x8xf32>
    tpu.vector_store %arg4[%c0_50, %c0_51, %c1_52, %c0_53, %c0_54], %45 {strides = array<i32>} : memref<1x1x8x8x8xf32, #tpu.memory_space<vmem>>, vector<1x1x1x8x8xf32>,
    %c0_55 = arith.constant 0 : index
    %c0_56 = arith.constant 0 : index
    %c4 = arith.constant 4 : index
    %c0_57 = arith.constant 0 : index
    %c0_58 = arith.constant 0 : index
    %46 = vector.load %arg2[%c0_55, %c0_56, %c4, %c0_57, %c0_58] : memref<1x2x16x18x8xbf16, #tpu.memory_space<vmem>>, vector<1x1x1x18x8xbf16>
    %47 = vector.shape_cast %46 : vector<1x1x1x18x8xbf16> to vector<18x8xbf16>
    %48 = arith.extf %47 : vector<18x8xbf16> to vector<18x8xf32>
    %c0_59 = arith.constant 0 : index
    %c0_60 = arith.constant 0 : index
    %c5 = arith.constant 5 : index
    %c0_61 = arith.constant 0 : index
    %c0_62 = arith.constant 0 : index
    %49 = vector.load %arg2[%c0_59, %c0_60, %c5, %c0_61, %c0_62] : memref<1x2x16x18x8xbf16, #tpu.memory_space<vmem>>, vector<1x1x1x18x8xbf16>
    %50 = vector.shape_cast %49 : vector<1x1x1x18x8xbf16> to vector<18x8xbf16>
    %51 = arith.extf %50 : vector<18x8xbf16> to vector<18x8xf32>
    %52 = arith.maximumf %48, %51 : vector<18x8xf32>
    %c0_63 = arith.constant 0 : index
    %c1_64 = arith.constant 1 : index
    %c4_65 = arith.constant 4 : index
    %c0_66 = arith.constant 0 : index
    %c0_67 = arith.constant 0 : index
    %53 = vector.load %arg2[%c0_63, %c1_64, %c4_65, %c0_66, %c0_67] : memref<1x2x16x18x8xbf16, #tpu.memory_space<vmem>>, vector<1x1x1x18x8xbf16>
    %54 = vector.shape_cast %53 : vector<1x1x1x18x8xbf16> to vector<18x8xbf16>
    %55 = arith.extf %54 : vector<18x8xbf16> to vector<18x8xf32>
    %56 = arith.maximumf %52, %55 : vector<18x8xf32>
    %c0_68 = arith.constant 0 : index
    %c1_69 = arith.constant 1 : index
    %c5_70 = arith.constant 5 : index
    %c0_71 = arith.constant 0 : index
    %c0_72 = arith.constant 0 : index
    %57 = vector.load %arg2[%c0_68, %c1_69, %c5_70, %c0_71, %c0_72] : memref<1x2x16x18x8xbf16, #tpu.memory_space<vmem>>, vector<1x1x1x18x8xbf16>
    %58 = vector.shape_cast %57 : vector<1x1x1x18x8xbf16> to vector<18x8xbf16>
    %59 = arith.extf %58 : vector<18x8xbf16> to vector<18x8xf32>
    %60 = arith.maximumf %56, %59 : vector<18x8xf32>
    %cst_73 = arith.constant dense<0.000000e+00> : vector<8x8xf32>
    %61 = tpu.matmul %1, %60, %cst_73 {dimension_numbers = #tpu.dot_dimension_numbers<[1], [0], [0], [1], [0, 0, 1, 1], [], []>} : vector<8x18xf32>, vector<18x8xf32>, vector<8x8xf32> -> vector<8x8xf32>
    %cst_74 = arith.constant dense<0.000000e+00> : vector<8x8xf32>
    %62 = tpu.matmul %3, %60, %cst_74 {dimension_numbers = #tpu.dot_dimension_numbers<[1], [0], [0], [1], [0, 0, 1, 1], [], []>} : vector<8x18xf32>, vector<18x8xf32>, vector<8x8xf32> -> vector<8x8xf32>
    %63 = arith.maximumf %61, %62 : vector<8x8xf32>
    %c0_75 = arith.constant 0 : index
    %c0_76 = arith.constant 0 : index
    %c2_77 = arith.constant 2 : index
    %c0_78 = arith.constant 0 : index
    %c0_79 = arith.constant 0 : index
    %64 = vector.load %arg4[%c0_75, %c0_76, %c2_77, %c0_78, %c0_79] : memref<1x1x8x8x8xf32, #tpu.memory_space<vmem>>, vector<1x1x1x8x8xf32>
    %65 = vector.shape_cast %64 : vector<1x1x1x8x8xf32> to vector<8x8xf32>
    %66 = vector.shape_cast %63 : vector<8x8xf32> to vector<1x1x1x8x8xf32>
    tpu.vector_store %arg4[%c0_75, %c0_76, %c2_77, %c0_78, %c0_79], %66 {strides = array<i32>} : memref<1x1x8x8x8xf32, #tpu.memory_space<vmem>>, vector<1x1x1x8x8xf32>,
    %c0_80 = arith.constant 0 : index
    %c0_81 = arith.constant 0 : index
    %c6 = arith.constant 6 : index
    %c0_82 = arith.constant 0 : index
    %c0_83 = arith.constant 0 : index
    %67 = vector.load %arg2[%c0_80, %c0_81, %c6, %c0_82, %c0_83] : memref<1x2x16x18x8xbf16, #tpu.memory_space<vmem>>, vector<1x1x1x18x8xbf16>
    %68 = vector.shape_cast %67 : vector<1x1x1x18x8xbf16> to vector<18x8xbf16>
    %69 = arith.extf %68 : vector<18x8xbf16> to vector<18x8xf32>
    %c0_84 = arith.constant 0 : index
    %c0_85 = arith.constant 0 : index
    %c7 = arith.constant 7 : index
    %c0_86 = arith.constant 0 : index
    %c0_87 = arith.constant 0 : index
    %70 = vector.load %arg2[%c0_84, %c0_85, %c7, %c0_86, %c0_87] : memref<1x2x16x18x8xbf16, #tpu.memory_space<vmem>>, vector<1x1x1x18x8xbf16>
    %71 = vector.shape_cast %70 : vector<1x1x1x18x8xbf16> to vector<18x8xbf16>
    %72 = arith.extf %71 : vector<18x8xbf16> to vector<18x8xf32>
    %73 = arith.maximumf %69, %72 : vector<18x8xf32>
    %c0_88 = arith.constant 0 : index
    %c1_89 = arith.constant 1 : index
    %c6_90 = arith.constant 6 : index
    %c0_91 = arith.constant 0 : index
    %c0_92 = arith.constant 0 : index
    %74 = vector.load %arg2[%c0_88, %c1_89, %c6_90, %c0_91, %c0_92] : memref<1x2x16x18x8xbf16, #tpu.memory_space<vmem>>, vector<1x1x1x18x8xbf16>
    %75 = vector.shape_cast %74 : vector<1x1x1x18x8xbf16> to vector<18x8xbf16>
    %76 = arith.extf %75 : vector<18x8xbf16> to vector<18x8xf32>
    %77 = arith.maximumf %73, %76 : vector<18x8xf32>
    %c0_93 = arith.constant 0 : index
    %c1_94 = arith.constant 1 : index
    %c7_95 = arith.constant 7 : index
    %c0_96 = arith.constant 0 : index
    %c0_97 = arith.constant 0 : index
    %78 = vector.load %arg2[%c0_93, %c1_94, %c7_95, %c0_96, %c0_97] : memref<1x2x16x18x8xbf16, #tpu.memory_space<vmem>>, vector<1x1x1x18x8xbf16>
    %79 = vector.shape_cast %78 : vector<1x1x1x18x8xbf16> to vector<18x8xbf16>
    %80 = arith.extf %79 : vector<18x8xbf16> to vector<18x8xf32>
    %81 = arith.maximumf %77, %80 : vector<18x8xf32>
    %cst_98 = arith.constant dense<0.000000e+00> : vector<8x8xf32>
    %82 = tpu.matmul %1, %81, %cst_98 {dimension_numbers = #tpu.dot_dimension_numbers<[1], [0], [0], [1], [0, 0, 1, 1], [], []>} : vector<8x18xf32>, vector<18x8xf32>, vector<8x8xf32> -> vector<8x8xf32>
    %cst_99 = arith.constant dense<0.000000e+00> : vector<8x8xf32>
    %83 = tpu.matmul %3, %81, %cst_99 {dimension_numbers = #tpu.dot_dimension_numbers<[1], [0], [0], [1], [0, 0, 1, 1], [], []>} : vector<8x18xf32>, vector<18x8xf32>, vector<8x8xf32> -> vector<8x8xf32>
    %84 = arith.maximumf %82, %83 : vector<8x8xf32>
    %c0_100 = arith.constant 0 : index
    %c0_101 = arith.constant 0 : index
    %c3_102 = arith.constant 3 : index
    %c0_103 = arith.constant 0 : index
    %c0_104 = arith.constant 0 : index
    %85 = vector.load %arg4[%c0_100, %c0_101, %c3_102, %c0_103, %c0_104] : memref<1x1x8x8x8xf32, #tpu.memory_space<vmem>>, vector<1x1x1x8x8xf32>
    %86 = vector.shape_cast %85 : vector<1x1x1x8x8xf32> to vector<8x8xf32>
    %87 = vector.shape_cast %84 : vector<8x8xf32> to vector<1x1x1x8x8xf32>
    tpu.vector_store %arg4[%c0_100, %c0_101, %c3_102, %c0_103, %c0_104], %87 {strides = array<i32>} : memref<1x1x8x8x8xf32, #tpu.memory_space<vmem>>, vector<1x1x1x8x8xf32>,
    %c0_105 = arith.constant 0 : index
    %c0_106 = arith.constant 0 : index
    %c8 = arith.constant 8 : index
    %c0_107 = arith.constant 0 : index
    %c0_108 = arith.constant 0 : index
    %88 = vector.load %arg2[%c0_105, %c0_106, %c8, %c0_107, %c0_108] : memref<1x2x16x18x8xbf16, #tpu.memory_space<vmem>>, vector<1x1x1x18x8xbf16>
    %89 = vector.shape_cast %88 : vector<1x1x1x18x8xbf16> to vector<18x8xbf16>
    %90 = arith.extf %89 : vector<18x8xbf16> to vector<18x8xf32>
    %c0_109 = arith.constant 0 : index
    %c0_110 = arith.constant 0 : index
    %c9 = arith.constant 9 : index
    %c0_111 = arith.constant 0 : index
    %c0_112 = arith.constant 0 : index
    %91 = vector.load %arg2[%c0_109, %c0_110, %c9, %c0_111, %c0_112] : memref<1x2x16x18x8xbf16, #tpu.memory_space<vmem>>, vector<1x1x1x18x8xbf16>
    %92 = vector.shape_cast %91 : vector<1x1x1x18x8xbf16> to vector<18x8xbf16>
    %93 = arith.extf %92 : vector<18x8xbf16> to vector<18x8xf32>
    %94 = arith.maximumf %90, %93 : vector<18x8xf32>
    %c0_113 = arith.constant 0 : index
    %c1_114 = arith.constant 1 : index
    %c8_115 = arith.constant 8 : index
    %c0_116 = arith.constant 0 : index
    %c0_117 = arith.constant 0 : index
    %95 = vector.load %arg2[%c0_113, %c1_114, %c8_115, %c0_116, %c0_117] : memref<1x2x16x18x8xbf16, #tpu.memory_space<vmem>>, vector<1x1x1x18x8xbf16>
    %96 = vector.shape_cast %95 : vector<1x1x1x18x8xbf16> to vector<18x8xbf16>
    %97 = arith.extf %96 : vector<18x8xbf16> to vector<18x8xf32>
    %98 = arith.maximumf %94, %97 : vector<18x8xf32>
    %c0_118 = arith.constant 0 : index
    %c1_119 = arith.constant 1 : index
    %c9_120 = arith.constant 9 : index
    %c0_121 = arith.constant 0 : index
    %c0_122 = arith.constant 0 : index
    %99 = vector.load %arg2[%c0_118, %c1_119, %c9_120, %c0_121, %c0_122] : memref<1x2x16x18x8xbf16, #tpu.memory_space<vmem>>, vector<1x1x1x18x8xbf16>
    %100 = vector.shape_cast %99 : vector<1x1x1x18x8xbf16> to vector<18x8xbf16>
    %101 = arith.extf %100 : vector<18x8xbf16> to vector<18x8xf32>
    %102 = arith.maximumf %98, %101 : vector<18x8xf32>
    %cst_123 = arith.constant dense<0.000000e+00> : vector<8x8xf32>
    %103 = tpu.matmul %1, %102, %cst_123 {dimension_numbers = #tpu.dot_dimension_numbers<[1], [0], [0], [1], [0, 0, 1, 1], [], []>} : vector<8x18xf32>, vector<18x8xf32>, vector<8x8xf32> -> vector<8x8xf32>
    %cst_124 = arith.constant dense<0.000000e+00> : vector<8x8xf32>
    %104 = tpu.matmul %3, %102, %cst_124 {dimension_numbers = #tpu.dot_dimension_numbers<[1], [0], [0], [1], [0, 0, 1, 1], [], []>} : vector<8x18xf32>, vector<18x8xf32>, vector<8x8xf32> -> vector<8x8xf32>
    %105 = arith.maximumf %103, %104 : vector<8x8xf32>
    %c0_125 = arith.constant 0 : index
    %c0_126 = arith.constant 0 : index
    %c4_127 = arith.constant 4 : index
    %c0_128 = arith.constant 0 : index
    %c0_129 = arith.constant 0 : index
    %106 = vector.load %arg4[%c0_125, %c0_126, %c4_127, %c0_128, %c0_129] : memref<1x1x8x8x8xf32, #tpu.memory_space<vmem>>, vector<1x1x1x8x8xf32>
    %107 = vector.shape_cast %106 : vector<1x1x1x8x8xf32> to vector<8x8xf32>
    %108 = vector.shape_cast %105 : vector<8x8xf32> to vector<1x1x1x8x8xf32>
    tpu.vector_store %arg4[%c0_125, %c0_126, %c4_127, %c0_128, %c0_129], %108 {strides = array<i32>} : memref<1x1x8x8x8xf32, #tpu.memory_space<vmem>>, vector<1x1x1x8x8xf32>,
    %c0_130 = arith.constant 0 : index
    %c0_131 = arith.constant 0 : index
    %c10 = arith.constant 10 : index
    %c0_132 = arith.constant 0 : index
    %c0_133 = arith.constant 0 : index
    %109 = vector.load %arg2[%c0_130, %c0_131, %c10, %c0_132, %c0_133] : memref<1x2x16x18x8xbf16, #tpu.memory_space<vmem>>, vector<1x1x1x18x8xbf16>
    %110 = vector.shape_cast %109 : vector<1x1x1x18x8xbf16> to vector<18x8xbf16>
    %111 = arith.extf %110 : vector<18x8xbf16> to vector<18x8xf32>
    %c0_134 = arith.constant 0 : index
    %c0_135 = arith.constant 0 : index
    %c11 = arith.constant 11 : index
    %c0_136 = arith.constant 0 : index
    %c0_137 = arith.constant 0 : index
    %112 = vector.load %arg2[%c0_134, %c0_135, %c11, %c0_136, %c0_137] : memref<1x2x16x18x8xbf16, #tpu.memory_space<vmem>>, vector<1x1x1x18x8xbf16>
    %113 = vector.shape_cast %112 : vector<1x1x1x18x8xbf16> to vector<18x8xbf16>
    %114 = arith.extf %113 : vector<18x8xbf16> to vector<18x8xf32>
    %115 = arith.maximumf %111, %114 : vector<18x8xf32>
    %c0_138 = arith.constant 0 : index
    %c1_139 = arith.constant 1 : index
    %c10_140 = arith.constant 10 : index
    %c0_141 = arith.constant 0 : index
    %c0_142 = arith.constant 0 : index
    %116 = vector.load %arg2[%c0_138, %c1_139, %c10_140, %c0_141, %c0_142] : memref<1x2x16x18x8xbf16, #tpu.memory_space<vmem>>, vector<1x1x1x18x8xbf16>
    %117 = vector.shape_cast %116 : vector<1x1x1x18x8xbf16> to vector<18x8xbf16>
    %118 = arith.extf %117 : vector<18x8xbf16> to vector<18x8xf32>
    %119 = arith.maximumf %115, %118 : vector<18x8xf32>
    %c0_143 = arith.constant 0 : index
    %c1_144 = arith.constant 1 : index
    %c11_145 = arith.constant 11 : index
    %c0_146 = arith.constant 0 : index
    %c0_147 = arith.constant 0 : index
    %120 = vector.load %arg2[%c0_143, %c1_144, %c11_145, %c0_146, %c0_147] : memref<1x2x16x18x8xbf16, #tpu.memory_space<vmem>>, vector<1x1x1x18x8xbf16>
    %121 = vector.shape_cast %120 : vector<1x1x1x18x8xbf16> to vector<18x8xbf16>
    %122 = arith.extf %121 : vector<18x8xbf16> to vector<18x8xf32>
    %123 = arith.maximumf %119, %122 : vector<18x8xf32>
    %cst_148 = arith.constant dense<0.000000e+00> : vector<8x8xf32>
    %124 = tpu.matmul %1, %123, %cst_148 {dimension_numbers = #tpu.dot_dimension_numbers<[1], [0], [0], [1], [0, 0, 1, 1], [], []>} : vector<8x18xf32>, vector<18x8xf32>, vector<8x8xf32> -> vector<8x8xf32>
    %cst_149 = arith.constant dense<0.000000e+00> : vector<8x8xf32>
    %125 = tpu.matmul %3, %123, %cst_149 {dimension_numbers = #tpu.dot_dimension_numbers<[1], [0], [0], [1], [0, 0, 1, 1], [], []>} : vector<8x18xf32>, vector<18x8xf32>, vector<8x8xf32> -> vector<8x8xf32>
    %126 = arith.maximumf %124, %125 : vector<8x8xf32>
    %c0_150 = arith.constant 0 : index
    %c0_151 = arith.constant 0 : index
    %c5_152 = arith.constant 5 : index
    %c0_153 = arith.constant 0 : index
    %c0_154 = arith.constant 0 : index
    %127 = vector.load %arg4[%c0_150, %c0_151, %c5_152, %c0_153, %c0_154] : memref<1x1x8x8x8xf32, #tpu.memory_space<vmem>>, vector<1x1x1x8x8xf32>
    %128 = vector.shape_cast %127 : vector<1x1x1x8x8xf32> to vector<8x8xf32>
    %129 = vector.shape_cast %126 : vector<8x8xf32> to vector<1x1x1x8x8xf32>
    tpu.vector_store %arg4[%c0_150, %c0_151, %c5_152, %c0_153, %c0_154], %129 {strides = array<i32>} : memref<1x1x8x8x8xf32, #tpu.memory_space<vmem>>, vector<1x1x1x8x8xf32>,
    %c0_155 = arith.constant 0 : index
    %c0_156 = arith.constant 0 : index
    %c12 = arith.constant 12 : index
    %c0_157 = arith.constant 0 : index
    %c0_158 = arith.constant 0 : index
    %130 = vector.load %arg2[%c0_155, %c0_156, %c12, %c0_157, %c0_158] : memref<1x2x16x18x8xbf16, #tpu.memory_space<vmem>>, vector<1x1x1x18x8xbf16>
    %131 = vector.shape_cast %130 : vector<1x1x1x18x8xbf16> to vector<18x8xbf16>
    %132 = arith.extf %131 : vector<18x8xbf16> to vector<18x8xf32>
    %c0_159 = arith.constant 0 : index
    %c0_160 = arith.constant 0 : index
    %c13 = arith.constant 13 : index
    %c0_161 = arith.constant 0 : index
    %c0_162 = arith.constant 0 : index
    %133 = vector.load %arg2[%c0_159, %c0_160, %c13, %c0_161, %c0_162] : memref<1x2x16x18x8xbf16, #tpu.memory_space<vmem>>, vector<1x1x1x18x8xbf16>
    %134 = vector.shape_cast %133 : vector<1x1x1x18x8xbf16> to vector<18x8xbf16>
    %135 = arith.extf %134 : vector<18x8xbf16> to vector<18x8xf32>
    %136 = arith.maximumf %132, %135 : vector<18x8xf32>
    %c0_163 = arith.constant 0 : index
    %c1_164 = arith.constant 1 : index
    %c12_165 = arith.constant 12 : index
    %c0_166 = arith.constant 0 : index
    %c0_167 = arith.constant 0 : index
    %137 = vector.load %arg2[%c0_163, %c1_164, %c12_165, %c0_166, %c0_167] : memref<1x2x16x18x8xbf16, #tpu.memory_space<vmem>>, vector<1x1x1x18x8xbf16>
    %138 = vector.shape_cast %137 : vector<1x1x1x18x8xbf16> to vector<18x8xbf16>
    %139 = arith.extf %138 : vector<18x8xbf16> to vector<18x8xf32>
    %140 = arith.maximumf %136, %139 : vector<18x8xf32>
    %c0_168 = arith.constant 0 : index
    %c1_169 = arith.constant 1 : index
    %c13_170 = arith.constant 13 : index
    %c0_171 = arith.constant 0 : index
    %c0_172 = arith.constant 0 : index
    %141 = vector.load %arg2[%c0_168, %c1_169, %c13_170, %c0_171, %c0_172] : memref<1x2x16x18x8xbf16, #tpu.memory_space<vmem>>, vector<1x1x1x18x8xbf16>
    %142 = vector.shape_cast %141 : vector<1x1x1x18x8xbf16> to vector<18x8xbf16>
    %143 = arith.extf %142 : vector<18x8xbf16> to vector<18x8xf32>
    %144 = arith.maximumf %140, %143 : vector<18x8xf32>
    %cst_173 = arith.constant dense<0.000000e+00> : vector<8x8xf32>
    %145 = tpu.matmul %1, %144, %cst_173 {dimension_numbers = #tpu.dot_dimension_numbers<[1], [0], [0], [1], [0, 0, 1, 1], [], []>} : vector<8x18xf32>, vector<18x8xf32>, vector<8x8xf32> -> vector<8x8xf32>
    %cst_174 = arith.constant dense<0.000000e+00> : vector<8x8xf32>
    %146 = tpu.matmul %3, %144, %cst_174 {dimension_numbers = #tpu.dot_dimension_numbers<[1], [0], [0], [1], [0, 0, 1, 1], [], []>} : vector<8x18xf32>, vector<18x8xf32>, vector<8x8xf32> -> vector<8x8xf32>
    %147 = arith.maximumf %145, %146 : vector<8x8xf32>
    %c0_175 = arith.constant 0 : index
    %c0_176 = arith.constant 0 : index
    %c6_177 = arith.constant 6 : index
    %c0_178 = arith.constant 0 : index
    %c0_179 = arith.constant 0 : index
    %148 = vector.load %arg4[%c0_175, %c0_176, %c6_177, %c0_178, %c0_179] : memref<1x1x8x8x8xf32, #tpu.memory_space<vmem>>, vector<1x1x1x8x8xf32>
    %149 = vector.shape_cast %148 : vector<1x1x1x8x8xf32> to vector<8x8xf32>
    %150 = vector.shape_cast %147 : vector<8x8xf32> to vector<1x1x1x8x8xf32>
    tpu.vector_store %arg4[%c0_175, %c0_176, %c6_177, %c0_178, %c0_179], %150 {strides = array<i32>} : memref<1x1x8x8x8xf32, #tpu.memory_space<vmem>>, vector<1x1x1x8x8xf32>,
    %c0_180 = arith.constant 0 : index
    %c0_181 = arith.constant 0 : index
    %c14 = arith.constant 14 : index
    %c0_182 = arith.constant 0 : index
    %c0_183 = arith.constant 0 : index
    %151 = vector.load %arg2[%c0_180, %c0_181, %c14, %c0_182, %c0_183] : memref<1x2x16x18x8xbf16, #tpu.memory_space<vmem>>, vector<1x1x1x18x8xbf16>
    %152 = vector.shape_cast %151 : vector<1x1x1x18x8xbf16> to vector<18x8xbf16>
    %153 = arith.extf %152 : vector<18x8xbf16> to vector<18x8xf32>
    %c0_184 = arith.constant 0 : index
    %c0_185 = arith.constant 0 : index
    %c15 = arith.constant 15 : index
    %c0_186 = arith.constant 0 : index
    %c0_187 = arith.constant 0 : index
    %154 = vector.load %arg2[%c0_184, %c0_185, %c15, %c0_186, %c0_187] : memref<1x2x16x18x8xbf16, #tpu.memory_space<vmem>>, vector<1x1x1x18x8xbf16>
    %155 = vector.shape_cast %154 : vector<1x1x1x18x8xbf16> to vector<18x8xbf16>
    %156 = arith.extf %155 : vector<18x8xbf16> to vector<18x8xf32>
    %157 = arith.maximumf %153, %156 : vector<18x8xf32>
    %c0_188 = arith.constant 0 : index
    %c1_189 = arith.constant 1 : index
    %c14_190 = arith.constant 14 : index
    %c0_191 = arith.constant 0 : index
    %c0_192 = arith.constant 0 : index
    %158 = vector.load %arg2[%c0_188, %c1_189, %c14_190, %c0_191, %c0_192] : memref<1x2x16x18x8xbf16, #tpu.memory_space<vmem>>, vector<1x1x1x18x8xbf16>
    %159 = vector.shape_cast %158 : vector<1x1x1x18x8xbf16> to vector<18x8xbf16>
    %160 = arith.extf %159 : vector<18x8xbf16> to vector<18x8xf32>
    %161 = arith.maximumf %157, %160 : vector<18x8xf32>
    %c0_193 = arith.constant 0 : index
    %c1_194 = arith.constant 1 : index
    %c15_195 = arith.constant 15 : index
    %c0_196 = arith.constant 0 : index
    %c0_197 = arith.constant 0 : index
    %162 = vector.load %arg2[%c0_193, %c1_194, %c15_195, %c0_196, %c0_197] : memref<1x2x16x18x8xbf16, #tpu.memory_space<vmem>>, vector<1x1x1x18x8xbf16>
    %163 = vector.shape_cast %162 : vector<1x1x1x18x8xbf16> to vector<18x8xbf16>
    %164 = arith.extf %163 : vector<18x8xbf16> to vector<18x8xf32>
    %165 = arith.maximumf %161, %164 : vector<18x8xf32>
    %cst_198 = arith.constant dense<0.000000e+00> : vector<8x8xf32>
    %166 = tpu.matmul %1, %165, %cst_198 {dimension_numbers = #tpu.dot_dimension_numbers<[1], [0], [0], [1], [0, 0, 1, 1], [], []>} : vector<8x18xf32>, vector<18x8xf32>, vector<8x8xf32> -> vector<8x8xf32>
    %cst_199 = arith.constant dense<0.000000e+00> : vector<8x8xf32>
    %167 = tpu.matmul %3, %165, %cst_199 {dimension_numbers = #tpu.dot_dimension_numbers<[1], [0], [0], [1], [0, 0, 1, 1], [], []>} : vector<8x18xf32>, vector<18x8xf32>, vector<8x8xf32> -> vector<8x8xf32>
    %168 = arith.maximumf %166, %167 : vector<8x8xf32>
    %c0_200 = arith.constant 0 : index
    %c0_201 = arith.constant 0 : index
    %c7_202 = arith.constant 7 : index
    %c0_203 = arith.constant 0 : index
    %c0_204 = arith.constant 0 : index
    %169 = vector.load %arg4[%c0_200, %c0_201, %c7_202, %c0_203, %c0_204] : memref<1x1x8x8x8xf32, #tpu.memory_space<vmem>>, vector<1x1x1x8x8xf32>
    %170 = vector.shape_cast %169 : vector<1x1x1x8x8xf32> to vector<8x8xf32>
    %171 = vector.shape_cast %168 : vector<8x8xf32> to vector<1x1x1x8x8xf32>
    tpu.vector_store %arg4[%c0_200, %c0_201, %c7_202, %c0_203, %c0_204], %171 {strides = array<i32>} : memref<1x1x8x8x8xf32, #tpu.memory_space<vmem>>, vector<1x1x1x8x8xf32>,
    return
  }
  func.func @transform_0(%arg0: i32, %arg1: i32) -> (i32, i32, i32, i32, i32) {
    %c0_i32 = arith.constant 0 : i32
    %c0_i32_0 = arith.constant 0 : i32
    %c0_i32_1 = arith.constant 0 : i32
    %c0_i32_2 = arith.constant 0 : i32
    return %arg0, %arg1, %c0_i32, %c0_i32_0, %c0_i32_1 : i32, i32, i32, i32, i32
  }
  func.func @transform_1(%arg0: i32, %arg1: i32) -> (i32, i32, i32) {
    %c0_i32 = arith.constant 0 : i32
    %c0_i32_0 = arith.constant 0 : i32
    %c0_i32_1 = arith.constant 0 : i32
    %c0_i32_2 = arith.constant 0 : i32
    return %c0_i32, %c0_i32_0, %c0_i32_1 : i32, i32, i32
  }
  func.func @transform_2(%arg0: i32, %arg1: i32) -> (i32, i32, i32, i32, i32) {
    %c0_i32 = arith.constant 0 : i32
    %c0_i32_0 = arith.constant 0 : i32
    %c0_i32_1 = arith.constant 0 : i32
    %c0_i32_2 = arith.constant 0 : i32
    return %arg0, %arg1, %c0_i32, %c0_i32_0, %c0_i32_1 : i32, i32, i32, i32, i32
  }
}

</mosaic_0001>

<bundles_post_ra>
// kernel: vgg3d_block_2.3
= control target key start
LH: loop header
LB: loop body
LE: loop exit
PB: predicated region body
PF: predicated region fallthrough
CT: control target
= control target key end

     0   :  { %s12690_s18 = smov 0   ;;  %s12692_s19 = smov 0   ;;  %s14818_s0 = inlined_call_operand.vmem [shape: f32[2,18,328,4], index: 0, kind: input, shape index: {}, may-alias: {0,1,2}]   ;;  %s14819_s1 = inlined_call_operand.vmem [shape: f32[2,18,328,4], index: 1, kind: input, shape index: {}, may-alias: {0,1,2}]   ;;  %s14820_s2 = inlined_call_operand.vmem [shape: f32[2,18,328,4], index: 2, kind: input, shape index: {}, may-alias: {0,1,2}]   ;;  %s14821_s3 = inlined_call_operand.vmem [shape: bf16[3,9,4,8], index: 3, kind: input, shape index: {}]   ;;  %s14822_s4 = inlined_call_operand.vmem [shape: f32[1,8], index: 4, kind: input, shape index: {}]   ;;  %s14823_s5 = inlined_call_operand.vmem [shape: bf16[2,16,288,8], index: 5, kind: output, shape index: {}]  }
   0x1   :  { %s12694_s20 = smov 0   ;;  %s12696_s21 = smov 0  }
   0x2   :  { %s12698_s22 = smov 0  }
   0x3 LB: > { %s24_s23 = sadd.s32 1, %s12650_s20  ;;  %s27_s24 = sadd.s32 1, %s12654_s21  ;;  %s12658_s22 = sphi %s12698_s22, %s15_s22   ;;  %s12654_s21 = sphi %s12696_s21, %s14827_s21   ;;  %s12650_s20 = sphi %s12694_s20, %s14826_s20   ;;  %s12646_s19 = sphi %s12692_s19, %s14825_s19   ;;  %s12642_s18 = sphi %s12690_s18, %s14824_s18  }
   0x4   : > { %p25_p0 = scmp.ge.s32.totalorder %s24_s23, 16  ;;  %p9476_p1 = scmp.ge.s32.totalorder %s12658_s22, 1 }
   0x5   : > { %p247_p2 = scmp.lt.s32.totalorder %s12658_s22, 33 }
   0x6   : > { %s14829_s23 = smov (%p25_p0, %s24_s23), 0  ;;  %s14831_s24 = smov (!%p25_p0, %s27_s24), %s12654_s21 }
   0x7   : > { %p248_p3 = pnand %p9476_p1, %p247_p2  ;;  %p29_p4 = scmp.ge.s32.totalorder %s14831_s24, 2 }
   0x8   : > { %v9481_v0 = vld [vmem:[%s14821_s3 + $0x2] sm:$0x3] (!%p248_p3)  ;;  %vm510_vm0 = vcmask (!%p248_p3), 1041408   ;;  %v9727_v1 = vld [vmem:[%s14821_s3 + $0x1a] sm:$0x3] (!%p248_p3)  ;;  %p303_p5 = scmp.lt.s32.totalorder (!%p248_p3), %s12646_s19, 1 }
   0x9   : > { %s14833_s24 = smov (%p29_p4, %s14831_s24), 0  ;;  %251 = sbr.rel (%p248_p3) target bundleno = 1223 (0x4c7), region = 40 }
   0xa   : > { %12545 = vmatprep.subr.msk.bf16.mxu1 (!%p248_p3), %vm510_vm0, %v9481_v0  ;;  %12558 = vmatprep.subr.msk.bf16.mxu0 (!%p248_p3), %vm510_vm0, %v9727_v1  ;;  %v512_v2 = vsel (!%p248_p3), %vm510_vm0, %v9481_v0, 0  ;;  %v12732_v3 = vsel (!%p248_p3), %vm510_vm0, %v9727_v1, 0  ;;  %p305_p6 = scmp.lt.s32.totalorder (!%p248_p3), %s12642_s18, 17  ;;  %s312_s29 = sadd.s32 (!%p248_p3), 1, %s12642_s18  ;;  %v9746_v4 = vld [vmem:[%s14821_s3 + $0x1c] sm:$0x3] (!%p248_p3) }
   0xb   : > { %10582 = vmatpush3.bf16.msra.mxu1 (!%p248_p3), %v512_v2  ;;  %11076 = vmatpush3.bf16.msra.mxu0 (!%p248_p3), %v12732_v3  ;;  %v398_v5 = vld [vmem:[%s14821_s3] sm:$0x3] (!%p248_p3)  ;;  %p315_p7 = scmp.lt.s32.totalorder (!%p248_p3), %s312_s29, 17  ;;  %vm455_vm1 = vcmask (!%p248_p3), 31744   ;;  %v12773_v16 = vld [vmem:[%s14821_s3 + $0x4] sm:$0x3] (!%p248_p3) }
   0xc   : > { %12560 = vmatprep.subr.msk.bf16.mxu0 (!%p248_p3), %vm510_vm0, %v9746_v4  ;;  %12546 = vmatprep.subr.msk.bf16.mxu1 (!%p248_p3), %vm510_vm0, %v398_v5  ;;  %v746_v15 = vsel (!%p248_p3), %vm510_vm0, %v398_v5, 0  ;;  %v4948_v25 = vsel (!%p248_p3), %vm510_vm0, %v9746_v4, 0  ;;  %v12793_v31 = vld [vmem:[%s14821_s3 + $0x1e] sm:$0x3] (!%p248_p3)  ;;  %p336_p9 = scmp.lt.s32.totalorder (!%p248_p3), %s12642_s18, 15  ;;  %vm9298_vm2 = vcmask (!%p248_p3), 60416  }
  0x10   : > { %s14835_s19 = smov (!%p303_p5, %s12646_s19), 1  ;;  %s14837_s29 = smov (!%p315_p7, %s312_s29), 17 }
  0x11   : > { %s306_s9 = scalar_select %p305_p6, %s12642_s18, 17 }
  0x12   : > { %s12749_s10 = smul.u32 738, %s14835_s19 }
  0x13   : > { %s12573_s11 = smul.u32 41, %s306_s9 }
  0x14   : > { %s12575_s14 = smul.u32 41, %s14837_s29 }
  0x15   : > { %s309_s12 = sadd.s32 %s12749_s10, %s12573_s11  ;;  %s323_s11 = sadd.s32 2, %s12642_s18 }
  0x16   : > { %s9477_s13 = sshll.u32 %s309_s12, 3  ;;  %s319_s25 = sadd.s32 %s12575_s14, %s12749_s10 }
  0x17   : > { %s12755_s17 = scalar_lea.vmem %s14818_s0, %s9477_s13  ;;  %s9478_s26 = sshll.u32 %s319_s25, 3 }
  0x18   : > { %v399_v6 = vld [vmem:[%s12755_s17 + $0x1] sm:$0xff]  ;;  %v400_v7 = vld [vmem:[%s12755_s17 + $0x9] sm:$0xff]  ;;  %v401_v8 = vld [vmem:[%s12755_s17 + $0x11] sm:$0xff]  ;;  %s12767_s29 = scalar_lea.vmem %s14819_s1, %s9478_s26  ;;  %p326_p8 = scmp.lt.s32.totalorder %s323_s11, 17 }
  0x19   : > { %v435_v9 = vpack.c.bf16 %v400_v7, %v399_v6  ;;  %v402_v10 = vld [vmem:[%s12755_s17 + $0x19] sm:$0xff]  ;;  %v403_v11 = vld [vmem:[%s12755_s17 + $0x21] sm:$0xff]  ;;  %v404_v12 = vld [vmem:[%s12755_s17 + $0x29] sm:$0xff]  ;;  %s14841_s18 = smov (!%p336_p9, %s12642_s18), 15 }
  0x1a   : > { %v436_v13 = vpack.c.bf16 %v402_v10, %v401_v8  ;;  %v437_v14 = vpack.c.bf16 %v404_v12, %v403_v11  ;;  %v4511_v17 = vld [vmem:[%s12767_s29 + $0x13] sm:$0xff]  ;;  %v4512_v18 = vld [vmem:[%s12767_s29 + $0x1b] sm:$0xff]  ;;  %v4513_v19 = vld [vmem:[%s12767_s29 + $0x23] sm:$0xff]  ;;  %s14839_s11 = smov (!%p326_p8, %s323_s11), 17 }
  0x1b   : > { %10583 = vmatprep.mubr.msk.bf16.mxu1 %vm455_vm1, %v435_v9  ;;  %v4547_v20 = vpack.c.bf16 %v4512_v18, %v4511_v17  ;;  %v4514_v21 = vld [vmem:[%s12767_s29 + $0x2b] sm:$0xff]  ;;  %v4515_v22 = vld [vmem:[%s12767_s29 + $0x33] sm:$0xff]  ;;  %v4516_v23 = vld [vmem:[%s12767_s29 + $0x3b] sm:$0xff]  ;;  %s12576_s12 = smul.u32 41, %s14839_s11 }
  0x1c   : > { %10584 = vmatmul.mubr.msk.bf16.vlgmr.msra.gmra.mrb[0].mxu1 %vm455_vm1, %v436_v13  ;;  %v4548_v24 = vpack.c.bf16 %v4514_v21, %v4513_v19  ;;  %v405_v26 = vld [vmem:[%s12755_s17 + $0x31] sm:$0xff]  ;;  %v406_v27 = vld [vmem:[%s12755_s17 + $0x39] sm:$0xff]  ;;  %v4549_v28 = vpack.c.bf16 %v4516_v23, %v4515_v22  ;;  %v407_v29 = vld [vmem:[%s12755_s17 + $0x41] sm:$0xff] }
  0x1d   : > { %10587 = vmatprep.mubr.msk.bf16.mxu1 %vm455_vm1, %v437_v14  ;;  %10620 = vmatpush3.bf16.msra.mxu1 %v746_v15  ;;  %v408_v30 = vld [vmem:[%s12755_s17 + $0x49] sm:$0xff]  ;;  %v438_v32 = vpack.c.bf16 %v406_v27, %v405_v26  ;;  %v4519_v36 = vld [vmem:[%s12767_s29 + $0x53] sm:$0xff]  ;;  %v4520_v37 = vld [vmem:[%s12767_s29 + $0x5b] sm:$0xff]  ;;  %v5274_v26 = vsel %vm510_vm0, %v12793_v31, 0  ;;  %s330_s13 = sadd.s32 %s12576_s12, %s12749_s10 }
  0x1e   : > { %11077 = vmatprep.mubr.msk.bf16.mxu0 %vm455_vm1, %v4547_v20  ;;  %12547 = vmatprep.subr.msk.bf16.mxu1 %vm510_vm0, %v12773_v16  ;;  %v4517_v33 = vld [vmem:[%s12767_s29 + $0x43] sm:$0xff]  ;;  %v4518_v34 = vld [vmem:[%s12767_s29 + $0x4b] sm:$0xff]  ;;  %v439_v35 = vpack.c.bf16 %v408_v30, %v407_v29  ;;  %v4551_v39 = vpack.c.bf16 %v4520_v37, %v4519_v36  ;;  %v410_v41 = vld [vmem:[%s12755_s17 + $0x59] sm:$0xff]  ;;  %s9479_s14 = sshll.u32 %s330_s13, 3 }
  0x1f   : > { %11078 = vmatmul.mubr.msk.bf16.vlgmr.msra.gmra.mrb[0].mxu0 %vm455_vm1, %v4548_v24  ;;  %v4550_v38 = vpack.c.bf16 %v4518_v34, %v4517_v33  ;;  %v409_v40 = vld [vmem:[%s12755_s17 + $0x51] sm:$0xff]  ;;  %v411_v42 = vld [vmem:[%s12755_s17 + $0x61] sm:$0xff]  ;;  %v412_v43 = vld [vmem:[%s12755_s17 + $0x69] sm:$0xff]  ;;  %s13412_s16 = scalar_lea.vmem %s14820_s2, %s9479_s14 }
  0x20   : > { %11114 = vmatpush3.bf16.msra.mxu0 %v4948_v25  ;;  %11081 = vmatprep.mubr.msk.bf16.mxu0 %vm455_vm1, %v4549_v28  ;;  %v440_v44 = vpack.c.bf16 %v410_v41, %v409_v40  ;;  %v4521_v45 = vld [vmem:[%s12767_s29 + $0x63] sm:$0xff]  ;;  %v4522_v46 = vld [vmem:[%s12767_s29 + $0x6b] sm:$0xff]  ;;  %v441_v47 = vpack.c.bf16 %v412_v43, %v411_v42  ;;  %v4523_v48 = vld [vmem:[%s12767_s29 + $0x73] sm:$0xff] }
  0x21   : > { %12561 = vmatprep.subr.msk.bf16.mxu0 %vm510_vm0, %v12793_v31  ;;  %v4524_v49 = vld [vmem:[%s12767_s29 + $0x7b] sm:$0xff]  ;;  %v4552_v50 = vpack.c.bf16 %v4522_v46, %v4521_v45  ;;  %v413_v52 = vld [vmem:[%s12755_s17 + $0x71] sm:$0xff]  ;;  %v416_v55 = vld [vmem:[%s12755_s17 + $0x89] sm:$0xff] }
  0x22   : > { %v4553_v51 = vpack.c.bf16 %v4524_v49, %v4523_v48  ;;  %v414_v53 = vld [vmem:[%s12755_s17 + $0x79] sm:$0xff]  ;;  %v415_v54 = vld [vmem:[%s12755_s17 + $0x81] sm:$0xff]  ;;  %v4526_v58 = vld [vmem:[%s12767_s29 + $0x8b] sm:$0xff] }
  0x23   : > { %v442_v56 = vpack.c.bf16 %v414_v53, %v413_v52  ;;  %v4525_v57 = vld [vmem:[%s12767_s29 + $0x83] sm:$0xff]  ;;  %v443_v59 = vpack.c.bf16 %v416_v55, %v415_v54  ;;  %v4527_v60 = vld [vmem:[%s12767_s29 + $0x93] sm:$0xff]  ;;  %v4528_v61 = vld [vmem:[%s12767_s29 + $0x9b] sm:$0xff] }
  0x24   : > { %10588 = vmatmul.mubr.msk.bf16.gmra.mrb[4].mxu1 %vm455_vm1, %v438_v32  ;;  %v4554_v62 = vpack.c.bf16 %v4526_v58, %v4525_v57  ;;  %v4555_v63 = vpack.c.bf16 %v4528_v61, %v4527_v60  ;;  %v417_v0 = vld [vmem:[%s12755_s17 + $0x91] sm:$0xff]  ;;  %v418_v1 = vld [vmem:[%s12755_s17 + $0x99] sm:$0xff]  ;;  %v419_v2 = vld [vmem:[%s12755_s17 + $0xa1] sm:$0xff] }
  0x25   : > { %10591 = vmatprep.mubr.msk.bf16.mxu1 %vm455_vm1, %v439_v35  ;;  %v420_v4 = vld [vmem:[%s12755_s17 + $0xa9] sm:$0xff]  ;;  %v444_v5 = vpack.c.bf16 %v418_v1, %v417_v0  ;;  %v4837_v9 = vld [vmem:[%s12767_s29 + $0x14] sm:$0xff]  ;;  %v4838_v10 = vld [vmem:[%s12767_s29 + $0x1c] sm:$0xff] }
  0x26   : > { %v4529_v6 = vld [vmem:[%s12767_s29 + $0xa3] sm:$0xff]  ;;  %v4530_v7 = vld [vmem:[%s12767_s29 + $0xab] sm:$0xff]  ;;  %v445_v8 = vpack.c.bf16 %v420_v4, %v419_v2  ;;  %v4873_v12 = vpack.c.bf16 %v4838_v10, %v4837_v9  ;;  %v422_v14 = vld [vmem:[%s12755_s17 + $0xb9] sm:$0xff] }
  0x27   : > { %11082 = vmatmul.mubr.msk.bf16.gmra.mrb[4].mxu0 %vm455_vm1, %v4550_v38  ;;  %v4556_v11 = vpack.c.bf16 %v4530_v7, %v4529_v6  ;;  %v421_v13 = vld [vmem:[%s12755_s17 + $0xb1] sm:$0xff]  ;;  %v423_v15 = vld [vmem:[%s12755_s17 + $0xc1] sm:$0xff]  ;;  %v424_v17 = vld [vmem:[%s12755_s17 + $0xc9] sm:$0xff] }
  0x28   : > { %11085 = vmatprep.mubr.msk.bf16.mxu0 %vm455_vm1, %v4551_v39  ;;  %v446_v18 = vpack.c.bf16 %v422_v14, %v421_v13  ;;  %v4839_v19 = vld [vmem:[%s12767_s29 + $0x24] sm:$0xff]  ;;  %v4840_v20 = vld [vmem:[%s12767_s29 + $0x2c] sm:$0xff]  ;;  %v447_v21 = vpack.c.bf16 %v424_v17, %v423_v15  ;;  %v4841_v22 = vld [vmem:[%s12767_s29 + $0x34] sm:$0xff] }
  0x29   : > { %v4842_v23 = vld [vmem:[%s12767_s29 + $0x3c] sm:$0xff]  ;;  %v12853_v24 = vpack.c.bf16 %v4840_v20, %v4839_v19  ;;  %v425_v27 = vld [vmem:[%s12755_s17 + $0xd1] sm:$0xff]  ;;  %v428_v30 = vld [vmem:[%s12755_s17 + $0xe9] sm:$0xff] }
  0x2a   : > { %v12856_v25 = vpack.c.bf16 %v4842_v23, %v4841_v22  ;;  %v426_v28 = vld [vmem:[%s12755_s17 + $0xd9] sm:$0xff]  ;;  %v427_v29 = vld [vmem:[%s12755_s17 + $0xe1] sm:$0xff]  ;;  %v4844_v34 = vld [vmem:[%s12767_s29 + $0x4c] sm:$0xff] }
  0x2b   : > { %v12868_v32 = vld [vmem:[%s14821_s3 + $0x20] sm:$0x3]  ;;  %v448_v31 = vpack.c.bf16 %v426_v28, %v425_v27  ;;  %v4843_v33 = vld [vmem:[%s12767_s29 + $0x44] sm:$0xff]  ;;  %v449_v35 = vpack.c.bf16 %v428_v30, %v427_v29  ;;  %v4845_v36 = vld [vmem:[%s12767_s29 + $0x54] sm:$0xff] }
  0x2c   : > { %10592 = vmatmul.mubr.msk.bf16.gmra.mrb[8].mxu1 %vm455_vm1, %v440_v44  ;;  %v4846_v37 = vld [vmem:[%s12767_s29 + $0x5c] sm:$0xff]  ;;  %v12880_v38 = vpack.c.bf16 %v4844_v34, %v4843_v33  ;;  %v429_v40 = vld [vmem:[%s12755_s17 + $0xf1] sm:$0xff]  ;;  %v432_v43 = vld [vmem:[%s12755_s17 + $0x109] sm:$0xff] }
  0x2d   : > { %10595 = vmatprep.mubr.msk.bf16.mxu1 %vm455_vm1, %v441_v47  ;;  %v12883_v39 = vpack.c.bf16 %v4846_v37, %v4845_v36  ;;  %v430_v41 = vld [vmem:[%s12755_s17 + $0xf9] sm:$0xff]  ;;  %v431_v42 = vld [vmem:[%s12755_s17 + $0x101] sm:$0xff]  ;;  %v4848_v46 = vld [vmem:[%s12767_s29 + $0x6c] sm:$0xff] }
  0x2e   : > { %v450_v44 = vpack.c.bf16 %v430_v41, %v429_v40  ;;  %v4847_v45 = vld [vmem:[%s12767_s29 + $0x64] sm:$0xff]  ;;  %v451_v47 = vpack.c.bf16 %v432_v43, %v431_v42  ;;  %v4849_v48 = vld [vmem:[%s12767_s29 + $0x74] sm:$0xff]  ;;  %v4850_v49 = vld [vmem:[%s12767_s29 + $0x7c] sm:$0xff] }
  0x2f   : > { %11086 = vmatmul.mubr.msk.bf16.gmra.mrb[8].mxu0 %vm455_vm1, %v4552_v50  ;;  %v12898_v50 = vpack.c.bf16 %v4848_v46, %v4847_v45  ;;  %v433_v52 = vld [vmem:[%s12755_s17 + $0x111] sm:$0xff]  ;;  %v434_v53 = vld [vmem:[%s12755_s17 + $0x119] sm:$0xff]  ;;  %v345_v55 = vld [vmem:[%s12755_s17 + $0x8] sm:$0xff] }
  0x30   : > { %11089 = vmatprep.mubr.msk.bf16.mxu0 %vm455_vm1, %v4553_v51  ;;  %v12901_v51 = vpack.c.bf16 %v4850_v49, %v4849_v48  ;;  %v344_v54 = vld [vmem:[%s12755_s17] sm:$0xff]  ;;  %v4852_v58 = vld [vmem:[%s12767_s29 + $0x8c] sm:$0xff]  ;;  %v4853_v60 = vld [vmem:[%s12767_s29 + $0x94] sm:$0xff] }
  0x31   : > { %v4851_v57 = vld [vmem:[%s12767_s29 + $0x84] sm:$0xff]  ;;  %v4854_v61 = vld [vmem:[%s12767_s29 + $0x9c] sm:$0xff]  ;;  %v346_v0 = vld [vmem:[%s12755_s17 + $0x10] sm:$0xff] }
  0x32   : > { %v347_v1 = vld [vmem:[%s12755_s17 + $0x18] sm:$0xff]  ;;  %v348_v2 = vld [vmem:[%s12755_s17 + $0x20] sm:$0xff]  ;;  %v349_v4 = vld [vmem:[%s12755_s17 + $0x28] sm:$0xff] }
  0x33   : > { %v4855_v6 = vld [vmem:[%s12767_s29 + $0xa4] sm:$0xff]  ;;  %v4856_v7 = vld [vmem:[%s12767_s29 + $0xac] sm:$0xff]  ;;  %v4857_v9 = vld [vmem:[%s12767_s29 + $0xb4] sm:$0xff] }
  0x34   : > { %10596 = vmatmul.mubr.msk.bf16.gmra.mrb[12].mxu1 %vm455_vm1, %v442_v56  ;;  %v452_v56 = vpack.c.bf16 %v434_v53, %v433_v52  ;;  %v4858_v10 = vld [vmem:[%s12767_s29 + $0xbc] sm:$0xff]  ;;  %v12941_v13 = vld [vmem:[%s14821_s3 + $0x6] sm:$0x3]  ;;  %v350_v15 = vld [vmem:[%s12755_s17 + $0x30] sm:$0xff] }
  0x35   : > { %10599 = vmatprep.mubr.msk.bf16.mxu1 %vm455_vm1, %v443_v59  ;;  %v380_v59 = vpack.c.bf16 %v345_v55, %v344_v54  ;;  %v12944_v14 = vpack.c.bf16 %v4858_v10, %v4857_v9  ;;  %v351_v17 = vld [vmem:[%s12755_s17 + $0x38] sm:$0xff]  ;;  %v4859_v20 = vld [vmem:[%s12767_s29 + $0xc4] sm:$0xff]  ;;  %v354_v29 = vld [vmem:[%s12755_s17 + $0x50] sm:$0xff] }
  0x36   : > { %v383_v19 = vpack.c.bf16 %v351_v17, %v350_v15  ;;  %v4861_v23 = vld [vmem:[%s12767_s29 + $0xd4] sm:$0xff]  ;;  %v357_v33 = vld [vmem:[%s12755_s17 + $0x68] sm:$0xff]  ;;  %v4866_v41 = vld [vmem:[%s12767_s29 + $0xfc] sm:$0xff]  ;;  %v5600_v15 = vsel %vm510_vm0, %v12868_v32, 0 }
  0x37   : > { %11090 = vmatmul.mubr.msk.bf16.gmra.mrb[12].mxu0 %vm455_vm1, %v4554_v62  ;;  %v12916_v62 = vpack.c.bf16 %v4852_v58, %v4851_v57  ;;  %v355_v30 = vld [vmem:[%s12755_s17 + $0x58] sm:$0xff]  ;;  %v4864_v36 = vld [vmem:[%s12767_s29 + $0xec] sm:$0xff]  ;;  %v360_v46 = vld [vmem:[%s12755_s17 + $0x80] sm:$0xff] }
  0x38   : > { %11093 = vmatprep.mubr.msk.bf16.mxu0 %vm455_vm1, %v4555_v63  ;;  %v12919_v63 = vpack.c.bf16 %v4854_v61, %v4853_v60  ;;  %v385_v34 = vpack.c.bf16 %v355_v30, %v354_v29  ;;  %v4865_v40 = vld [vmem:[%s12767_s29 + $0xf4] sm:$0xff]  ;;  %v4867_v49 = vld [vmem:[%s12767_s29 + $0x104] sm:$0xff]  ;;  %v4868_v52 = vld [vmem:[%s12767_s29 + $0x10c] sm:$0xff] }
  0x39   : > { %v12982_v43 = vpack.c.bf16 %v4866_v41, %v4865_v40  ;;  %v359_v45 = vld [vmem:[%s12755_s17 + $0x78] sm:$0xff]  ;;  %v362_v58 = vld [vmem:[%s12755_s17 + $0x90] sm:$0xff]  ;;  %v364_v60 = vld [vmem:[%s12755_s17 + $0xa0] sm:$0xff]  ;;  %v1362_v40 = vsel %vm510_vm0, %v12941_v13, 0 }
  0x3a   : > { %v4869_v54 = vld [vmem:[%s12767_s29 + $0x114] sm:$0xff]  ;;  %v4870_v55 = vld [vmem:[%s12767_s29 + $0x11c] sm:$0xff]  ;;  %v365_v61 = vld [vmem:[%s12755_s17 + $0xa8] sm:$0xff] }
  0x3b   : > { %v13000_v57 = vpack.c.bf16 %v4870_v55, %v4869_v54  ;;  %v369_v9 = vld [vmem:[%s12755_s17 + $0xc8] sm:$0xff]  ;;  %v370_v17 = vld [vmem:[%s12755_s17 + $0xd0] sm:$0xff]  ;;  %v379_v30 = vld [vmem:[%s12755_s17 + $0x118] sm:$0xff] }
  0x3c   : > { %10600 = vmatmul.mubr.msk.bf16.gmra.mrb[16].mxu1 %vm455_vm1, %v444_v5  ;;  %v381_v5 = vpack.c.bf16 %v347_v1, %v346_v0  ;;  %v4871_v1 = vld [vmem:[%s12767_s29 + $0x124] sm:$0xff]  ;;  %v378_v29 = vld [vmem:[%s12755_s17 + $0x110] sm:$0xff]  ;;  %v940_v54 = vld [vmem:[%s12755_s17 + $0x7a] sm:$0xff] }
  0x3d   : > { %10603 = vmatprep.mubr.msk.bf16.mxu1 %vm455_vm1, %v445_v8  ;;  %v382_v8 = vpack.c.bf16 %v349_v4, %v348_v2  ;;  %v4872_v2 = vld [vmem:[%s12767_s29 + $0x12c] sm:$0xff]  ;;  %v390_v4 = vpack.c.bf16 %v365_v61, %v364_v60  ;;  %v13083_v41 = vld [vmem:[%s14821_s3 + $0x8] sm:$0x3]  ;;  %v944_v60 = vld [vmem:[%s12755_s17 + $0x9a] sm:$0xff] }
  0x3e   : > { %v942_v55 = vld [vmem:[%s12755_s17 + $0x8a] sm:$0xff] }
  0x3f   : > { %11094 = vmatmul.mubr.msk.bf16.gmra.mrb[16].mxu0 %vm455_vm1, %v4556_v11  ;;  %v1036_v11 = vsel %vm510_vm0, %v12773_v16, 0  ;;  %v352_v16 = vld [vmem:[%s12755_s17 + $0x40] sm:$0xff]  ;;  %v946_v61 = vld [vmem:[%s12755_s17 + $0xaa] sm:$0xff] }
  0x40   : > { %11115 = vmatprep.mubr.msk.bf16.mxu0 %vm455_vm1, %v4873_v12  ;;  %v12936_v12 = vpack.c.bf16 %v4856_v7, %v4855_v6  ;;  %v366_v6 = vld [vmem:[%s12755_s17 + $0xb0] sm:$0xff]  ;;  %v367_v7 = vld [vmem:[%s12755_s17 + $0xb8] sm:$0xff] }
  0x41   : > { %v391_v10 = vpack.c.bf16 %v367_v7, %v366_v6  ;;  %v5490_v6 = vld [vmem:[%s12767_s29 + $0x2d] sm:$0xff] }
  0x44   : > { %10604 = vmatmul.mubr.msk.bf16.gmra.mrb[20].mxu1 %vm455_vm1, %v446_v18  ;;  %v353_v18 = vld [vmem:[%s12755_s17 + $0x48] sm:$0xff] }
  0x45   : > { %10607 = vmatprep.mubr.msk.bf16.mxu1 %vm455_vm1, %v447_v21  ;;  %v4860_v21 = vld [vmem:[%s12767_s29 + $0xcc] sm:$0xff]  ;;  %v384_v22 = vpack.c.bf16 %v353_v18, %v352_v16  ;;  %v371_v16 = vld [vmem:[%s12755_s17 + $0xd8] sm:$0xff]  ;;  %v372_v18 = vld [vmem:[%s12755_s17 + $0xe0] sm:$0xff] }
  0x46   : > { %v12961_v27 = vpack.c.bf16 %v4860_v21, %v4859_v20  ;;  %v393_v20 = vpack.c.bf16 %v371_v16, %v370_v17  ;;  %v374_v21 = vld [vmem:[%s12755_s17 + $0xf0] sm:$0xff]  ;;  %v5492_v17 = vld [vmem:[%s12767_s29 + $0x3d] sm:$0xff] }
  0x47   : > { %11116 = vmatmul.mubr.msk.bf16.vlgmr.msra.gmra.mrb[0].mxu0 %vm455_vm1, %v12853_v24 }
  0x48   : > { %11152 = vmatpush3.bf16.msra.mxu0 %v5274_v26  ;;  %11119 = vmatprep.mubr.msk.bf16.mxu0 %vm455_vm1, %v12856_v25  ;;  %v4862_v26 = vld [vmem:[%s12767_s29 + $0xdc] sm:$0xff] }
  0x49   : > { %12562 = vmatprep.subr.msk.bf16.mxu0 %vm510_vm0, %v12868_v32  ;;  %v12964_v28 = vpack.c.bf16 %v4862_v26, %v4861_v23  ;;  %v377_v23 = vld [vmem:[%s12755_s17 + $0x108] sm:$0xff] }
  0x4c   : > { %10608 = vmatmul.mubr.msk.bf16.gmra.mrb[24].mxu1 %vm455_vm1, %v448_v31  ;;  %v356_v31 = vld [vmem:[%s12755_s17 + $0x60] sm:$0xff] }
  0x4d   : > { %10611 = vmatprep.mubr.msk.bf16.mxu1 %vm455_vm1, %v449_v35  ;;  %v4863_v35 = vld [vmem:[%s12767_s29 + $0xe4] sm:$0xff]  ;;  %v386_v37 = vpack.c.bf16 %v357_v33, %v356_v31 }
  0x4e   : > { %v12979_v42 = vpack.c.bf16 %v4864_v36, %v4863_v35  ;;  %v925_v31 = vld [vmem:[%s12755_s17 + $0x2] sm:$0xff]  ;;  %v926_v33 = vld [vmem:[%s12755_s17 + $0xa] sm:$0xff]  ;;  %v928_v35 = vld [vmem:[%s12755_s17 + $0x1a] sm:$0xff] }
  0x4f   : > { %11120 = vmatmul.mubr.msk.bf16.gmra.mrb[4].mxu0 %vm455_vm1, %v12880_v38  ;;  %v929_v36 = vld [vmem:[%s12755_s17 + $0x22] sm:$0xff] }
  0x50   : > { %11123 = vmatprep.mubr.msk.bf16.mxu0 %vm455_vm1, %v12883_v39 }
  0x54   : > { %10612 = vmatmul.mubr.msk.bf16.gmra.mrb[28].mxu1 %vm455_vm1, %v450_v44  ;;  %v358_v44 = vld [vmem:[%s12755_s17 + $0x70] sm:$0xff] }
  0x55   : > { %10615 = vmatprep.mubr.msk.bf16.mxu1 %vm455_vm1, %v451_v47  ;;  %v361_v47 = vld [vmem:[%s12755_s17 + $0x88] sm:$0xff]  ;;  %v387_v48 = vpack.c.bf16 %v359_v45, %v358_v44 }
  0x56   : > { %v388_v53 = vpack.c.bf16 %v361_v47, %v360_v46  ;;  %v933_v44 = vld [vmem:[%s12755_s17 + $0x42] sm:$0xff]  ;;  %v935_v47 = vld [vmem:[%s12755_s17 + $0x52] sm:$0xff] }
  0x57   : > { %11124 = vmatmul.mubr.msk.bf16.gmra.mrb[8].mxu0 %vm455_vm1, %v12898_v50 }
  0x58   : > { %11127 = vmatprep.mubr.msk.bf16.mxu0 %vm455_vm1, %v12901_v51 }
  0x5c   : > { %10616 = vmatmul.mubr.msk.bf16.gmra.mrb[32].mxu1 %vm455_vm1, %v452_v56  ;;  %v12997_v56 = vpack.c.bf16 %v4868_v52, %v4867_v49  ;;  %v938_v49 = vld [vmem:[%s12755_s17 + $0x6a] sm:$0xff] }
  0x5d   : > { %10621 = vmatprep.mubr.msk.bf16.mxu1 %vm455_vm1, %v380_v59  ;;  %v363_v59 = vld [vmem:[%s12755_s17 + $0x98] sm:$0xff] }
  0x5e   : > { %v389_v0 = vpack.c.bf16 %v363_v59, %v362_v58  ;;  %v943_v59 = vld [vmem:[%s12755_s17 + $0x92] sm:$0xff] }
  0x5f   : > { %11128 = vmatmul.mubr.msk.bf16.gmra.mrb[12].mxu0 %vm455_vm1, %v12916_v62 }
  0x60   : > { %11131 = vmatprep.mubr.msk.bf16.mxu0 %vm455_vm1, %v12919_v63 }
  0x64   : > { %10622 = vmatmul.mubr.msk.bf16.vlgmr.msra.gmra.mrb[0].mxu1 %vm455_vm1, %v381_v5  ;;  %v13013_v5 = vpack.c.bf16 %v4872_v2, %v4871_v1  ;;  %v5198_v1 = vld [vmem:[%s12767_s29 + $0x13c] sm:$0xff] }
  0x65   : > { %10625 = vmatprep.mubr.msk.bf16.mxu1 %vm455_vm1, %v382_v8  ;;  %10658 = vmatpush3.bf16.msra.mxu1 %v1036_v11  ;;  %v368_v8 = vld [vmem:[%s12755_s17 + $0xc0] sm:$0xff] }
  0x66   : > { %12548 = vmatprep.subr.msk.bf16.mxu1 %vm510_vm0, %v12941_v13  ;;  %v392_v11 = vpack.c.bf16 %v369_v9, %v368_v8  ;;  %v934_v13 = vld [vmem:[%s12755_s17 + $0x4a] sm:$0xff]  ;;  %v947_v8 = vld [vmem:[%s12755_s17 + $0xb2] sm:$0xff]  ;;  %v949_v9 = vld [vmem:[%s12755_s17 + $0xc2] sm:$0xff] }
  0x67   : > { %11132 = vmatmul.mubr.msk.bf16.gmra.mrb[16].mxu0 %vm455_vm1, %v12936_v12  ;;  %v13101_v46 = vpack.c.bf16 %v934_v13, %v933_v44  ;;  %v5500_v44 = vld [vmem:[%s12767_s29 + $0x7d] sm:$0xff] }
  0x68   : > { %11135 = vmatprep.mubr.msk.bf16.mxu0 %vm455_vm1, %v12944_v14 }
  0x6c   : > { %10626 = vmatmul.mubr.msk.bf16.gmra.mrb[4].mxu1 %vm455_vm1, %v383_v19  ;;  %v373_v19 = vld [vmem:[%s12755_s17 + $0xe8] sm:$0xff] }
  0x6d   : > { %10629 = vmatprep.mubr.msk.bf16.mxu1 %vm455_vm1, %v384_v22  ;;  %v394_v32 = vpack.c.bf16 %v373_v19, %v372_v18  ;;  %v375_v22 = vld [vmem:[%s12755_s17 + $0xf8] sm:$0xff]  ;;  %v5493_v18 = vld [vmem:[%s12767_s29 + $0x45] sm:$0xff]  ;;  %v5494_v19 = vld [vmem:[%s12767_s29 + $0x4d] sm:$0xff] }
  0x6f   : > { %11136 = vmatmul.mubr.msk.bf16.gmra.mrb[20].mxu0 %vm455_vm1, %v12961_v27 }
  0x70   : > { %11139 = vmatprep.mubr.msk.bf16.mxu0 %vm455_vm1, %v12964_v28 }
  0x74   : > { %10630 = vmatmul.mubr.msk.bf16.gmra.mrb[8].mxu1 %vm455_vm1, %v385_v34  ;;  %v927_v34 = vld [vmem:[%s12755_s17 + $0x12] sm:$0xff] }
  0x75   : > { %10633 = vmatprep.mubr.msk.bf16.mxu1 %vm455_vm1, %v386_v37  ;;  %v930_v37 = vld [vmem:[%s12755_s17 + $0x2a] sm:$0xff] }
  0x77   : > { %11140 = vmatmul.mubr.msk.bf16.gmra.mrb[24].mxu0 %vm455_vm1, %v12979_v42 }
  0x78   : > { %11143 = vmatprep.mubr.msk.bf16.mxu0 %vm455_vm1, %v12982_v43 }
  0x7c   : > { %10634 = vmatmul.mubr.msk.bf16.gmra.mrb[12].mxu1 %vm455_vm1, %v387_v48  ;;  %v936_v48 = vld [vmem:[%s12755_s17 + $0x5a] sm:$0xff] }
  0x7d   : > { %10637 = vmatprep.mubr.msk.bf16.mxu1 %vm455_vm1, %v388_v53  ;;  %v13113_v52 = vpack.c.bf16 %v936_v48, %v935_v47  ;;  %v939_v53 = vld [vmem:[%s12755_s17 + $0x72] sm:$0xff]  ;;  %v5501_v47 = vld [vmem:[%s12767_s29 + $0x85] sm:$0xff] }
  0x7e   : > { %v5502_v48 = vld [vmem:[%s12767_s29 + $0x8d] sm:$0xff] }
  0x7f   : > { %11144 = vmatmul.mubr.msk.bf16.gmra.mrb[28].mxu0 %vm455_vm1, %v12997_v56 }
  0x80   : > { %11147 = vmatprep.mubr.msk.bf16.mxu0 %vm455_vm1, %v13000_v57 }
  0x84   : > { %10638 = vmatmul.mubr.msk.bf16.gmra.mrb[16].mxu1 %vm455_vm1, %v389_v0  ;;  %v5197_v0 = vld [vmem:[%s12767_s29 + $0x134] sm:$0xff] }
  0x85   : > { %10641 = vmatprep.mubr.msk.bf16.mxu1 %vm455_vm1, %v390_v4  ;;  %v5489_v4 = vld [vmem:[%s12767_s29 + $0x25] sm:$0xff]  ;;  %v5216_v7 = vpack.c.bf16 %v5198_v1, %v5197_v0  ;;  %v5507_v1 = vld [vmem:[%s12767_s29 + $0xb5] sm:$0xff] }
  0x87   : > { %11148 = vmatmul.mubr.msk.bf16.gmra.mrb[32].mxu0 %vm455_vm1, %v13013_v5 }
  0x88   : > { %11153 = vmatprep.mubr.msk.bf16.mxu0 %vm455_vm1, %v12853_v24  ;;  %v13036_v24 = vld [vmem:[%s14821_s3 + $0x22] sm:$0x3] }
  0x8c   : > { %10642 = vmatmul.mubr.msk.bf16.gmra.mrb[20].mxu1 %vm455_vm1, %v391_v10  ;;  %v950_v10 = vld [vmem:[%s12755_s17 + $0xca] sm:$0xff] }
  0x8d   : > { %10645 = vmatprep.mubr.msk.bf16.mxu1 %vm455_vm1, %v392_v11  ;;  %v13169_v16 = vpack.c.bf16 %v950_v10, %v949_v9  ;;  %v5512_v9 = vld [vmem:[%s12767_s29 + $0xdd] sm:$0xff]  ;;  %v5513_v10 = vld [vmem:[%s12767_s29 + $0xe5] sm:$0xff] }
  0x8f   : > { %11154 = vmatmul.mubr.msk.bf16.vlgmr.msra.gmra.mrb[0].mxu0 %vm455_vm1, %v12856_v25  ;;  %v376_v25 = vld [vmem:[%s12755_s17 + $0x100] sm:$0xff] }
  0x90   : > { %11190 = vmatpush3.bf16.msra.mxu0 %v5600_v15  ;;  %11157 = vmatprep.mubr.msk.bf16.mxu0 %vm455_vm1, %v12880_v38  ;;  %v395_v38 = vpack.c.bf16 %v375_v22, %v374_v21  ;;  %v396_v26 = vpack.c.bf16 %v377_v23, %v376_v25  ;;  %v5491_v15 = vld [vmem:[%s12767_s29 + $0x35] sm:$0xff]  ;;  %v5926_v21 = vsel %vm510_vm0, %v13036_v24, 0  ;;  %v953_v23 = vld [vmem:[%s12755_s17 + $0xe2] sm:$0xff] }
  0x91   : > { %12563 = vmatprep.subr.msk.bf16.mxu0 %vm510_vm0, %v13036_v24  ;;  %v951_v22 = vld [vmem:[%s12755_s17 + $0xd2] sm:$0xff]  ;;  %v952_v25 = vld [vmem:[%s12755_s17 + $0xda] sm:$0xff] }
  0x92   : > { %v13189_v24 = vpack.c.bf16 %v952_v25, %v951_v22  ;;  %v5521_v22 = vld [vmem:[%s12767_s29 + $0x125] sm:$0xff]  ;;  %v5522_v25 = vld [vmem:[%s12767_s29 + $0x12d] sm:$0xff] }
  0x94   : > { %10646 = vmatmul.mubr.msk.bf16.gmra.mrb[24].mxu1 %vm455_vm1, %v393_v20  ;;  %v5526_v20 = vpack.c.bf16 %v5492_v17, %v5491_v15  ;;  %v5515_v17 = vld [vmem:[%s12767_s29 + $0xf5] sm:$0xff] }
  0x95   : > { %10649 = vmatprep.mubr.msk.bf16.mxu1 %vm455_vm1, %v394_v32  ;;  %v5527_v32 = vpack.c.bf16 %v5494_v19, %v5493_v18  ;;  %v5516_v18 = vld [vmem:[%s12767_s29 + $0xfd] sm:$0xff]  ;;  %v5517_v19 = vld [vmem:[%s12767_s29 + $0x105] sm:$0xff] }
  0x97   : > { %11158 = vmatmul.mubr.msk.bf16.gmra.mrb[4].mxu0 %vm455_vm1, %v12883_v39  ;;  %v397_v39 = vpack.c.bf16 %v379_v30, %v378_v29  ;;  %v5495_v29 = vld [vmem:[%s12767_s29 + $0x55] sm:$0xff]  ;;  %v5496_v30 = vld [vmem:[%s12767_s29 + $0x5d] sm:$0xff] }
  0x98   : > { %11161 = vmatprep.mubr.msk.bf16.mxu0 %vm455_vm1, %v12898_v50  ;;  %v961_v50 = vpack.c.bf16 %v926_v33, %v925_v31  ;;  %v5497_v33 = vld [vmem:[%s12767_s29 + $0x65] sm:$0xff] }
  0x9c   : > { %10650 = vmatmul.mubr.msk.bf16.gmra.mrb[28].mxu1 %vm455_vm1, %v395_v38  ;;  %v954_v38 = vld [vmem:[%s12755_s17 + $0xea] sm:$0xff] }
  0x9d   : > { %10653 = vmatprep.mubr.msk.bf16.mxu1 %vm455_vm1, %v396_v26  ;;  %v13186_v26 = vld [vmem:[%s14821_s3 + $0x24] sm:$0x3]  ;;  %v13194_v31 = vpack.c.bf16 %v954_v38, %v953_v23 }
  0x9e   : > { %v5524_v38 = vld [vmem:[%s12767_s29 + $0x13d] sm:$0xff] }
  0x9f   : > { %11162 = vmatmul.mubr.msk.bf16.gmra.mrb[8].mxu0 %vm455_vm1, %v12901_v51  ;;  %v13072_v51 = vpack.c.bf16 %v928_v35, %v927_v34  ;;  %v955_v35 = vld [vmem:[%s12755_s17 + $0xf2] sm:$0xff] }
  0xa0   : > { %11165 = vmatprep.mubr.msk.bf16.mxu0 %vm455_vm1, %v12916_v62  ;;  %v13076_v62 = vpack.c.bf16 %v930_v37, %v929_v36  ;;  %v956_v36 = vld [vmem:[%s12755_s17 + $0xfa] sm:$0xff]  ;;  %v957_v37 = vld [vmem:[%s12755_s17 + $0x102] sm:$0xff] }
  0xa4   : > { %10654 = vmatmul.mubr.msk.bf16.gmra.mrb[32].mxu1 %vm455_vm1, %v397_v39  ;;  %v5498_v39 = vld [vmem:[%s12767_s29 + $0x6d] sm:$0xff] }
  0xa5   : > { %10659 = vmatprep.mubr.msk.bf16.mxu1 %vm455_vm1, %v961_v50  ;;  %v5528_v50 = vpack.c.bf16 %v5496_v30, %v5495_v29  ;;  %v5529_v34 = vpack.c.bf16 %v5498_v39, %v5497_v33  ;;  %v5815_v29 = vld [vmem:[%s12767_s29 + $0x26] sm:$0xff]  ;;  %v5816_v30 = vld [vmem:[%s12767_s29 + $0x2e] sm:$0xff]  ;;  %v5818_v39 = vld [vmem:[%s12767_s29 + $0x3e] sm:$0xff] }
  0xa7   : > { %11166 = vmatmul.mubr.msk.bf16.gmra.mrb[12].mxu0 %vm455_vm1, %v12919_v63  ;;  %v931_v63 = vld [vmem:[%s12755_s17 + $0x32] sm:$0xff] }
  0xa8   : > { %11169 = vmatprep.mubr.msk.bf16.mxu0 %vm455_vm1, %v12936_v12  ;;  %v932_v12 = vld [vmem:[%s12755_s17 + $0x3a] sm:$0xff] }
  0xa9   : > { %v13097_v45 = vpack.c.bf16 %v932_v12, %v931_v63  ;;  %v13209_v63 = vpack.c.bf16 %v956_v36, %v955_v35  ;;  %v5499_v12 = vld [vmem:[%s12767_s29 + $0x75] sm:$0xff]  ;;  %v13310_v36 = vld [vmem:[%s14821_s3 + $0x26] sm:$0x3] }
  0xac   : > { %10660 = vmatmul.mubr.msk.bf16.vlgmr.msra.gmra.mrb[0].mxu1 %vm455_vm1, %v13072_v51 }
  0xad   : > { %10663 = vmatprep.mubr.msk.bf16.mxu1 %vm455_vm1, %v13076_v62  ;;  %10696 = vmatpush3.bf16.msra.mxu1 %v1362_v40  ;;  %v958_v40 = vld [vmem:[%s12755_s17 + $0x10a] sm:$0xff] }
  0xae   : > { %12549 = vmatprep.subr.msk.bf16.mxu1 %vm510_vm0, %v13083_v41  ;;  %v13214_v13 = vpack.c.bf16 %v958_v40, %v957_v37  ;;  %v5822_v37 = vld [vmem:[%s12767_s29 + $0x5e] sm:$0xff]  ;;  %v5824_v40 = vld [vmem:[%s12767_s29 + $0x6e] sm:$0xff] }
  0xaf   : > { %11170 = vmatmul.mubr.msk.bf16.gmra.mrb[16].mxu0 %vm455_vm1, %v12944_v14  ;;  %v937_v14 = vld [vmem:[%s12755_s17 + $0x62] sm:$0xff] }
  0xb0   : > { %11173 = vmatprep.mubr.msk.bf16.mxu0 %vm455_vm1, %v12961_v27  ;;  %v13117_v27 = vpack.c.bf16 %v938_v49, %v937_v14  ;;  %v5530_v14 = vpack.c.bf16 %v5500_v44, %v5499_v12  ;;  %v5531_v49 = vpack.c.bf16 %v5502_v48, %v5501_v47  ;;  %v5825_v44 = vld [vmem:[%s12767_s29 + $0x76] sm:$0xff]  ;;  %v5826_v47 = vld [vmem:[%s12767_s29 + $0x7e] sm:$0xff]  ;;  %v5827_v48 = vld [vmem:[%s12767_s29 + $0x86] sm:$0xff] }
  0xb4   : > { %10664 = vmatmul.mubr.msk.bf16.gmra.mrb[4].mxu1 %vm455_vm1, %v13097_v45 }
  0xb5   : > { %10667 = vmatprep.mubr.msk.bf16.mxu1 %vm455_vm1, %v13101_v46 }
  0xb7   : > { %11174 = vmatmul.mubr.msk.bf16.gmra.mrb[20].mxu0 %vm455_vm1, %v12964_v28  ;;  %v941_v28 = vld [vmem:[%s12755_s17 + $0x82] sm:$0xff] }
  0xb8   : > { %11177 = vmatprep.mubr.msk.bf16.mxu0 %vm455_vm1, %v12979_v42  ;;  %v13129_v42 = vpack.c.bf16 %v940_v54, %v939_v53  ;;  %v13133_v58 = vpack.c.bf16 %v942_v55, %v941_v28  ;;  %v959_v53 = vld [vmem:[%s12755_s17 + $0x112] sm:$0xff]  ;;  %v960_v54 = vld [vmem:[%s12755_s17 + $0x11a] sm:$0xff] }
  0xb9   : > { %v13225_v28 = vpack.c.bf16 %v960_v54, %v959_v53  ;;  %v5503_v55 = vld [vmem:[%s12767_s29 + $0x95] sm:$0xff]  ;;  %v1286_v53 = vld [vmem:[%s12755_s17 + $0x12a] sm:$0xff] }
  0xba   : > { %v1577_v54 = vld [vmem:[%s12755_s17 + $0x13] sm:$0xff] }
  0xbc   : > { %10668 = vmatmul.mubr.msk.bf16.gmra.mrb[8].mxu1 %vm455_vm1, %v13113_v52 }
  0xbd   : > { %10671 = vmatprep.mubr.msk.bf16.mxu1 %vm455_vm1, %v13117_v27 }
  0xbf   : > { %11178 = vmatmul.mubr.msk.bf16.gmra.mrb[24].mxu0 %vm455_vm1, %v12982_v43  ;;  %v945_v43 = vld [vmem:[%s12755_s17 + $0xa2] sm:$0xff] }
  0xc0   : > { %11181 = vmatprep.mubr.msk.bf16.mxu0 %vm455_vm1, %v12997_v56  ;;  %v13145_v56 = vpack.c.bf16 %v944_v60, %v943_v59  ;;  %v13151_v2 = vpack.c.bf16 %v946_v61, %v945_v43  ;;  %v5504_v59 = vld [vmem:[%s12767_s29 + $0x9d] sm:$0xff]  ;;  %v5505_v60 = vld [vmem:[%s12767_s29 + $0xa5] sm:$0xff]  ;;  %v5506_v43 = vld [vmem:[%s12767_s29 + $0xad] sm:$0xff] }
  0xc1   : > { %v5532_v61 = vpack.c.bf16 %v5504_v59, %v5503_v55  ;;  %v5533_v0 = vpack.c.bf16 %v5506_v43, %v5505_v60  ;;  %v1578_v55 = vld [vmem:[%s12755_s17 + $0x1b] sm:$0xff] }
  0xc2   : > { %v5829_v60 = vld [vmem:[%s12767_s29 + $0x96] sm:$0xff]  ;;  %v1613_v43 = vpack.c.bf16 %v1578_v55, %v1577_v54 }
  0xc3   : > { %v1597_v54 = vld [vmem:[%s12755_s17 + $0xb3] sm:$0xff]  ;;  %v1598_v55 = vld [vmem:[%s12755_s17 + $0xbb] sm:$0xff] }
  0xc4   : > { %10672 = vmatmul.mubr.msk.bf16.gmra.mrb[12].mxu1 %vm455_vm1, %v13129_v42 }
  0xc5   : > { %10675 = vmatprep.mubr.msk.bf16.mxu1 %vm455_vm1, %v13133_v58 }
  0xc7   : > { %11182 = vmatmul.mubr.msk.bf16.gmra.mrb[28].mxu0 %vm455_vm1, %v13000_v57  ;;  %v5525_v57 = vpack.c.bf16 %v5490_v6, %v5489_v4  ;;  %v5508_v4 = vld [vmem:[%s12767_s29 + $0xbd] sm:$0xff]  ;;  %v5509_v6 = vld [vmem:[%s12767_s29 + $0xc5] sm:$0xff] }
  0xc8   : > { %11185 = vmatprep.mubr.msk.bf16.mxu0 %vm455_vm1, %v13013_v5  ;;  %v948_v5 = vld [vmem:[%s12755_s17 + $0xba] sm:$0xff] }
  0xc9   : > { %v13164_v11 = vpack.c.bf16 %v948_v5, %v947_v8  ;;  %v5534_v8 = vpack.c.bf16 %v5508_v4, %v5507_v1  ;;  %v1579_v4 = vld [vmem:[%s12755_s17 + $0x23] sm:$0xff] }
  0xcc   : > { %10676 = vmatmul.mubr.msk.bf16.gmra.mrb[16].mxu1 %vm455_vm1, %v13145_v56 }
  0xcd   : > { %10679 = vmatprep.mubr.msk.bf16.mxu1 %vm455_vm1, %v13151_v2 }
  0xcf   : > { %11186 = vmatmul.mubr.msk.bf16.gmra.mrb[32].mxu0 %vm455_vm1, %v5216_v7  ;;  %v5510_v7 = vld [vmem:[%s12767_s29 + $0xcd] sm:$0xff] }
  0xd0   : > { %11191 = vmatprep.mubr.msk.bf16.mxu0 %vm455_vm1, %v5525_v57  ;;  %v1688_v57 = vsel %vm510_vm0, %v13083_v41, 0  ;;  %v5535_v5 = vpack.c.bf16 %v5510_v7, %v5509_v6  ;;  %v5511_v41 = vld [vmem:[%s12767_s29 + $0xd5] sm:$0xff]  ;;  %v1580_v6 = vld [vmem:[%s12755_s17 + $0x2b] sm:$0xff] }
  0xd1   : > { %v5536_v15 = vpack.c.bf16 %v5512_v9, %v5511_v41  ;;  %v1581_v7 = vld [vmem:[%s12755_s17 + $0x33] sm:$0xff]  ;;  %v5834_v41 = vld [vmem:[%s12767_s29 + $0xbe] sm:$0xff] }
  0xd4   : > { %10680 = vmatmul.mubr.msk.bf16.gmra.mrb[20].mxu1 %vm455_vm1, %v13164_v11 }
  0xd5   : > { %10683 = vmatprep.mubr.msk.bf16.mxu1 %vm455_vm1, %v13169_v16 }
  0xd7   : > { %11192 = vmatmul.mubr.msk.bf16.vlgmr.msra.gmra.mrb[0].mxu0 %vm455_vm1, %v5526_v20  ;;  %v5518_v20 = vld [vmem:[%s12767_s29 + $0x10d] sm:$0xff] }
  0xd8   : > { %11228 = vmatpush3.bf16.msra.mxu0 %v5926_v21  ;;  %11195 = vmatprep.mubr.msk.bf16.mxu0 %vm455_vm1, %v5527_v32  ;;  %v5538_v32 = vpack.c.bf16 %v5516_v18, %v5515_v17  ;;  %v5520_v21 = vld [vmem:[%s12767_s29 + $0x11d] sm:$0xff]  ;;  %v13361_v17 = vld [vmem:[%s14821_s3 + $0xc] sm:$0x3] }
  0xd9   : > { %12564 = vmatprep.subr.msk.bf16.mxu0 %vm510_vm0, %v13186_v26 }
  0xdc   : > { %10684 = vmatmul.mubr.msk.bf16.gmra.mrb[24].mxu1 %vm455_vm1, %v13189_v24 }
  0xdd   : > { %10687 = vmatprep.mubr.msk.bf16.mxu1 %vm455_vm1, %v13194_v31 }
  0xdf   : > { %11196 = vmatmul.mubr.msk.bf16.gmra.mrb[4].mxu0 %vm455_vm1, %v5528_v50  ;;  %v5819_v50 = vld [vmem:[%s12767_s29 + $0x46] sm:$0xff] }
  0xe0   : > { %11199 = vmatprep.mubr.msk.bf16.mxu0 %vm455_vm1, %v5529_v34  ;;  %v5820_v34 = vld [vmem:[%s12767_s29 + $0x4e] sm:$0xff] }
  0xe4   : > { %10688 = vmatmul.mubr.msk.bf16.gmra.mrb[28].mxu1 %vm455_vm1, %v13209_v63 }
  0xe5   : > { %10691 = vmatprep.mubr.msk.bf16.mxu1 %vm455_vm1, %v13214_v13 }
  0xe7   : > { %11200 = vmatmul.mubr.msk.bf16.gmra.mrb[8].mxu0 %vm455_vm1, %v5530_v14  ;;  %v5828_v14 = vld [vmem:[%s12767_s29 + $0x8e] sm:$0xff] }
  0xe8   : > { %11203 = vmatprep.mubr.msk.bf16.mxu0 %vm455_vm1, %v5531_v49  ;;  %v5856_v49 = vpack.c.bf16 %v5826_v47, %v5825_v44  ;;  %v5846_v44 = vld [vmem:[%s12767_s29 + $0x11e] sm:$0xff] }
  0xec   : > { %10692 = vmatmul.mubr.msk.bf16.gmra.mrb[32].mxu1 %vm455_vm1, %v13225_v28 }
  0xed   : > { %10697 = vmatprep.mubr.msk.bf16.mxu1 %vm455_vm1, %v13072_v51  ;;  %v13247_v51 = vld [vmem:[%s14821_s3 + $0xa] sm:$0x3] }
  0xef   : > { %11204 = vmatmul.mubr.msk.bf16.gmra.mrb[12].mxu0 %vm455_vm1, %v5532_v61  ;;  %v5831_v61 = vld [vmem:[%s12767_s29 + $0xa6] sm:$0xff] }
  0xf0   : > { %11207 = vmatprep.mubr.msk.bf16.mxu0 %vm455_vm1, %v5533_v0 }
  0xf4   : > { %10698 = vmatmul.mubr.msk.bf16.vlgmr.msra.gmra.mrb[0].mxu1 %vm455_vm1, %v13076_v62  ;;  %v5514_v62 = vld [vmem:[%s12767_s29 + $0xed] sm:$0xff] }
  0xf5   : > { %10701 = vmatprep.mubr.msk.bf16.mxu1 %vm455_vm1, %v13097_v45  ;;  %10734 = vmatpush3.bf16.msra.mxu1 %v1688_v57  ;;  %v5537_v45 = vpack.c.bf16 %v5514_v62, %v5513_v10  ;;  %v1582_v57 = vld [vmem:[%s12755_s17 + $0x3b] sm:$0xff]  ;;  %v5835_v10 = vld [vmem:[%s12767_s29 + $0xc6] sm:$0xff]  ;;  %v5836_v62 = vld [vmem:[%s12767_s29 + $0xce] sm:$0xff] }
  0xf6   : > { %12550 = vmatprep.subr.msk.bf16.mxu1 %vm510_vm0, %v13247_v51  ;;  %v1615_v9 = vpack.c.bf16 %v1582_v57, %v1581_v7  ;;  %v5861_v18 = vpack.c.bf16 %v5836_v62, %v5835_v10  ;;  %v1601_v7 = vld [vmem:[%s12755_s17 + $0xd3] sm:$0xff]  ;;  %v1602_v57 = vld [vmem:[%s12755_s17 + $0xdb] sm:$0xff]  ;;  %v6146_v62 = vld [vmem:[%s13412_s16 + $0x28] sm:$0xff] }
  0xf7   : > { %11208 = vmatmul.mubr.msk.bf16.gmra.mrb[16].mxu0 %vm455_vm1, %v5534_v8  ;;  %v1614_v8 = vpack.c.bf16 %v1580_v6, %v1579_v4  ;;  %v1599_v4 = vld [vmem:[%s12755_s17 + $0xc3] sm:$0xff]  ;;  %v1600_v6 = vld [vmem:[%s12755_s17 + $0xcb] sm:$0xff] }
  0xf8   : > { %11211 = vmatprep.mubr.msk.bf16.mxu0 %vm455_vm1, %v5535_v5  ;;  %v5833_v5 = vld [vmem:[%s12767_s29 + $0xb6] sm:$0xff]  ;;  %v6145_v10 = vld [vmem:[%s13412_s16 + $0x20] sm:$0xff] }
  0xfc   : > { %10702 = vmatmul.mubr.msk.bf16.gmra.mrb[4].mxu1 %vm455_vm1, %v13101_v46  ;;  %v5539_v46 = vpack.c.bf16 %v5518_v20, %v5517_v19  ;;  %v1583_v19 = vld [vmem:[%s12755_s17 + $0x43] sm:$0xff]  ;;  %v1584_v20 = vld [vmem:[%s12755_s17 + $0x4b] sm:$0xff] }
  0xfd   : > { %10705 = vmatprep.mubr.msk.bf16.mxu1 %vm455_vm1, %v13113_v52  ;;  %v5519_v52 = vld [vmem:[%s12767_s29 + $0x115] sm:$0xff] }
  0xfe   : > { %v5540_v23 = vpack.c.bf16 %v5520_v21, %v5519_v52  ;;  %v5837_v52 = vld [vmem:[%s12767_s29 + $0xd6] sm:$0xff]  ;;  %v5838_v21 = vld [vmem:[%s12767_s29 + $0xde] sm:$0xff] }
  0xff   : > { %11212 = vmatmul.mubr.msk.bf16.gmra.mrb[20].mxu0 %vm455_vm1, %v5536_v15  ;;  %v2014_v15 = vsel %vm510_vm0, %v13247_v51, 0  ;;  %v1586_v51 = vld [vmem:[%s12755_s17 + $0x5b] sm:$0xff] }
 0x100   : > { %11215 = vmatprep.mubr.msk.bf16.mxu0 %vm455_vm1, %v5537_v45  ;;  %v5860_v45 = vpack.c.bf16 %v5834_v41, %v5833_v5  ;;  %v6143_v5 = vld [vmem:[%s13412_s16 + $0x10] sm:$0xff]  ;;  %v6144_v41 = vld [vmem:[%s13412_s16 + $0x18] sm:$0xff] }
 0x104   : > { %10706 = vmatmul.mubr.msk.bf16.gmra.mrb[8].mxu1 %vm455_vm1, %v13117_v27  ;;  %v5541_v27 = vpack.c.bf16 %v5522_v25, %v5521_v22  ;;  %v5839_v25 = vld [vmem:[%s12767_s29 + $0xe6] sm:$0xff] }
 0x105   : > { %10709 = vmatprep.mubr.msk.bf16.mxu1 %vm455_vm1, %v13129_v42  ;;  %v5523_v42 = vld [vmem:[%s12767_s29 + $0x135] sm:$0xff] }
 0x106   : > { %v5542_v33 = vpack.c.bf16 %v5524_v38, %v5523_v42  ;;  %v1587_v38 = vld [vmem:[%s12755_s17 + $0x63] sm:$0xff] }
 0x107   : > { %11216 = vmatmul.mubr.msk.bf16.gmra.mrb[24].mxu0 %vm455_vm1, %v5538_v32  ;;  %v1585_v32 = vld [vmem:[%s12755_s17 + $0x53] sm:$0xff] }
 0x108   : > { %11219 = vmatprep.mubr.msk.bf16.mxu0 %vm455_vm1, %v5539_v46  ;;  %v1616_v46 = vpack.c.bf16 %v1584_v20, %v1583_v19  ;;  %v1617_v22 = vpack.c.bf16 %v1586_v51, %v1585_v32  ;;  %v1603_v19 = vld [vmem:[%s12755_s17 + $0xe3] sm:$0xff]  ;;  %v1604_v20 = vld [vmem:[%s12755_s17 + $0xeb] sm:$0xff]  ;;  %v1605_v32 = vld [vmem:[%s12755_s17 + $0xf3] sm:$0xff] }
 0x109   : > { %v1606_v51 = vld [vmem:[%s12755_s17 + $0xfb] sm:$0xff] }
 0x10c   : > { %10710 = vmatmul.mubr.msk.bf16.gmra.mrb[12].mxu1 %vm455_vm1, %v13133_v58  ;;  %v5851_v58 = vpack.c.bf16 %v5816_v30, %v5815_v29  ;;  %v1588_v29 = vld [vmem:[%s12755_s17 + $0x6b] sm:$0xff]  ;;  %v1589_v30 = vld [vmem:[%s12755_s17 + $0x73] sm:$0xff] }
 0x10d   : > { %10713 = vmatprep.mubr.msk.bf16.mxu1 %vm455_vm1, %v13145_v56  ;;  %v5817_v56 = vld [vmem:[%s12767_s29 + $0x36] sm:$0xff] }
 0x10e   : > { %v5852_v35 = vpack.c.bf16 %v5818_v39, %v5817_v56  ;;  %v5841_v56 = vld [vmem:[%s12767_s29 + $0xf6] sm:$0xff]  ;;  %v5842_v39 = vld [vmem:[%s12767_s29 + $0xfe] sm:$0xff] }
 0x10f   : > { %11220 = vmatmul.mubr.msk.bf16.gmra.mrb[28].mxu0 %vm455_vm1, %v5540_v23  ;;  %v5840_v23 = vld [vmem:[%s12767_s29 + $0xee] sm:$0xff] }
 0x110   : > { %11223 = vmatprep.mubr.msk.bf16.mxu0 %vm455_vm1, %v5541_v27  ;;  %v5862_v27 = vpack.c.bf16 %v5838_v21, %v5837_v52  ;;  %v5863_v42 = vpack.c.bf16 %v5840_v23, %v5839_v25  ;;  %v1626_v52 = vpack.c.bf16 %v1604_v20, %v1603_v19  ;;  %v6148_v21 = vld [vmem:[%s13412_s16 + $0x38] sm:$0xff]  ;;  %v6149_v25 = vld [vmem:[%s13412_s16 + $0x40] sm:$0xff]  ;;  %v6150_v23 = vld [vmem:[%s13412_s16 + $0x48] sm:$0xff] }
 0x111   : > { %v1913_v19 = vld [vmem:[%s12755_s17 + $0x64] sm:$0xff]  ;;  %v1914_v20 = vld [vmem:[%s12755_s17 + $0x6c] sm:$0xff] }
 0x114   : > { %10714 = vmatmul.mubr.msk.bf16.gmra.mrb[16].mxu1 %vm455_vm1, %v13151_v2  ;;  %v5853_v2 = vpack.c.bf16 %v5820_v34, %v5819_v50  ;;  %v5843_v34 = vld [vmem:[%s12767_s29 + $0x106] sm:$0xff] }
 0x115   : > { %10717 = vmatprep.mubr.msk.bf16.mxu1 %vm455_vm1, %v13164_v11  ;;  %v6252_v11 = vsel %vm510_vm0, %v13186_v26, 0  ;;  %v5823_v26 = vld [vmem:[%s12767_s29 + $0x66] sm:$0xff] }
 0x116   : > { %v5855_v12 = vpack.c.bf16 %v5824_v40, %v5823_v26  ;;  %v1593_v26 = vld [vmem:[%s12755_s17 + $0x93] sm:$0xff]  ;;  %v1594_v40 = vld [vmem:[%s12755_s17 + $0x9b] sm:$0xff] }
 0x117   : > { %11224 = vmatmul.mubr.msk.bf16.gmra.mrb[32].mxu0 %vm455_vm1, %v5542_v33  ;;  %v1590_v33 = vld [vmem:[%s12755_s17 + $0x7b] sm:$0xff]  ;;  %v1621_v47 = vpack.c.bf16 %v1594_v40, %v1593_v26 }
 0x118   : > { %11229 = vmatprep.mubr.msk.bf16.mxu0 %vm455_vm1, %v5851_v58  ;;  %v1618_v58 = vpack.c.bf16 %v1588_v29, %v1587_v38  ;;  %v1619_v50 = vpack.c.bf16 %v1590_v33, %v1589_v30  ;;  %v1607_v38 = vld [vmem:[%s12755_s17 + $0x103] sm:$0xff]  ;;  %v1608_v29 = vld [vmem:[%s12755_s17 + $0x10b] sm:$0xff]  ;;  %v1609_v30 = vld [vmem:[%s12755_s17 + $0x113] sm:$0xff] }
 0x119   : > { %v1610_v33 = vld [vmem:[%s12755_s17 + $0x11b] sm:$0xff] }
 0x11a   : > { %v1903_v26 = vld [vmem:[%s12755_s17 + $0x14] sm:$0xff]  ;;  %v1904_v40 = vld [vmem:[%s12755_s17 + $0x1c] sm:$0xff] }
 0x11c   : > { %10718 = vmatmul.mubr.msk.bf16.gmra.mrb[20].mxu1 %vm455_vm1, %v13169_v16  ;;  %v5821_v16 = vld [vmem:[%s12767_s29 + $0x56] sm:$0xff] }
 0x11d   : > { %10721 = vmatprep.mubr.msk.bf16.mxu1 %vm455_vm1, %v13189_v24  ;;  %v5854_v24 = vpack.c.bf16 %v5822_v37, %v5821_v16  ;;  %v1591_v16 = vld [vmem:[%s12755_s17 + $0x83] sm:$0xff]  ;;  %v1592_v37 = vld [vmem:[%s12755_s17 + $0x8b] sm:$0xff] }
 0x11f   : > { %11230 = vmatmul.mubr.msk.bf16.vlgmr.msra.gmra.mrb[0].mxu0 %vm455_vm1, %v5852_v35  ;;  %v5844_v35 = vld [vmem:[%s12767_s29 + $0x10e] sm:$0xff] }
 0x120   : > { %11266 = vmatpush3.bf16.msra.mxu0 %v6252_v11  ;;  %11233 = vmatprep.mubr.msk.bf16.mxu0 %vm455_vm1, %v5853_v2  ;;  %v5864_v2 = vpack.c.bf16 %v5842_v39, %v5841_v56  ;;  %v5865_v11 = vpack.c.bf16 %v5844_v35, %v5843_v34  ;;  %v6151_v56 = vld [vmem:[%s13412_s16 + $0x50] sm:$0xff]  ;;  %v6152_v39 = vld [vmem:[%s13412_s16 + $0x58] sm:$0xff]  ;;  %v6153_v34 = vld [vmem:[%s13412_s16 + $0x60] sm:$0xff] }
 0x121   : > { %12565 = vmatprep.subr.msk.bf16.mxu0 %vm510_vm0, %v13310_v36  ;;  %v6154_v35 = vld [vmem:[%s13412_s16 + $0x68] sm:$0xff] }
 0x124   : > { %10722 = vmatmul.mubr.msk.bf16.gmra.mrb[24].mxu1 %vm455_vm1, %v13194_v31  ;;  %v5857_v31 = vpack.c.bf16 %v5828_v14, %v5827_v48  ;;  %v5847_v48 = vld [vmem:[%s12767_s29 + $0x126] sm:$0xff]  ;;  %v5848_v14 = vld [vmem:[%s12767_s29 + $0x12e] sm:$0xff] }
 0x125   : > { %10725 = vmatprep.mubr.msk.bf16.mxu1 %vm455_vm1, %v13209_v63  ;;  %v1285_v63 = vld [vmem:[%s12755_s17 + $0x122] sm:$0xff] }
 0x126   : > { %v1304_v59 = vpack.c.bf16 %v1286_v53, %v1285_v63  ;;  %v1595_v63 = vld [vmem:[%s12755_s17 + $0xa3] sm:$0xff]  ;;  %v1596_v53 = vld [vmem:[%s12755_s17 + $0xab] sm:$0xff] }
 0x127   : > { %11234 = vmatmul.mubr.msk.bf16.gmra.mrb[4].mxu0 %vm455_vm1, %v5854_v24  ;;  %v1620_v24 = vpack.c.bf16 %v1592_v37, %v1591_v16  ;;  %v1611_v16 = vld [vmem:[%s12755_s17 + $0x123] sm:$0xff]  ;;  %v1612_v37 = vld [vmem:[%s12755_s17 + $0x12b] sm:$0xff] }
 0x128   : > { %11237 = vmatprep.mubr.msk.bf16.mxu0 %vm455_vm1, %v5855_v12  ;;  %v5845_v12 = vld [vmem:[%s12767_s29 + $0x116] sm:$0xff] }
 0x12c   : > { %10726 = vmatmul.mubr.msk.bf16.gmra.mrb[28].mxu1 %vm455_vm1, %v13214_v13  ;;  %v5830_v13 = vld [vmem:[%s12767_s29 + $0x9e] sm:$0xff] }
 0x12d   : > { %10729 = vmatprep.mubr.msk.bf16.mxu1 %vm455_vm1, %v13225_v28  ;;  %v5832_v28 = vld [vmem:[%s12767_s29 + $0xae] sm:$0xff]  ;;  %v5858_v0 = vpack.c.bf16 %v5830_v13, %v5829_v60  ;;  %v5849_v60 = vld [vmem:[%s12767_s29 + $0x136] sm:$0xff]  ;;  %v5850_v13 = vld [vmem:[%s12767_s29 + $0x13e] sm:$0xff] }
 0x12e   : > { %v5859_v1 = vpack.c.bf16 %v5832_v28, %v5831_v61  ;;  %v6141_v61 = vld [vmem:[%s13412_s16] sm:$0xff]  ;;  %v6142_v28 = vld [vmem:[%s13412_s16 + $0x8] sm:$0xff] }
 0x12f   : > { %11238 = vmatmul.mubr.msk.bf16.gmra.mrb[8].mxu0 %vm455_vm1, %v5856_v49  ;;  %v5866_v49 = vpack.c.bf16 %v5846_v44, %v5845_v12  ;;  %v6155_v12 = vld [vmem:[%s13412_s16 + $0x70] sm:$0xff]  ;;  %v6156_v44 = vld [vmem:[%s13412_s16 + $0x78] sm:$0xff] }
 0x130   : > { %11241 = vmatprep.mubr.msk.bf16.mxu0 %vm455_vm1, %v5857_v31  ;;  %v5867_v31 = vpack.c.bf16 %v5848_v14, %v5847_v48  ;;  %v6157_v48 = vld [vmem:[%s13412_s16 + $0x80] sm:$0xff]  ;;  %v6158_v14 = vld [vmem:[%s13412_s16 + $0x88] sm:$0xff] }
 0x134   : > { %10730 = vmatmul.mubr.msk.bf16.gmra.mrb[32].mxu1 %vm455_vm1, %v1304_v59  ;;  %v1622_v59 = vpack.c.bf16 %v1596_v53, %v1595_v63  ;;  %v1905_v63 = vld [vmem:[%s12755_s17 + $0x24] sm:$0xff]  ;;  %v1906_v53 = vld [vmem:[%s12755_s17 + $0x2c] sm:$0xff] }
 0x135   : > { %10735 = vmatprep.mubr.msk.bf16.mxu1 %vm455_vm1, %v1613_v43  ;;  %v1623_v43 = vpack.c.bf16 %v1598_v55, %v1597_v54  ;;  %v1907_v54 = vld [vmem:[%s12755_s17 + $0x34] sm:$0xff]  ;;  %v1908_v55 = vld [vmem:[%s12755_s17 + $0x3c] sm:$0xff] }
 0x137   : > { %11242 = vmatmul.mubr.msk.bf16.gmra.mrb[12].mxu0 %vm455_vm1, %v5858_v0  ;;  %v5868_v0 = vpack.c.bf16 %v5850_v13, %v5849_v60  ;;  %v6159_v60 = vld [vmem:[%s13412_s16 + $0x90] sm:$0xff]  ;;  %v6160_v13 = vld [vmem:[%s13412_s16 + $0x98] sm:$0xff] }
 0x138   : > { %11245 = vmatprep.mubr.msk.bf16.mxu0 %vm455_vm1, %v5859_v1  ;;  %v6177_v1 = vpack.c.bf16 %v6142_v28, %v6141_v61  ;;  %v6161_v61 = vld [vmem:[%s13412_s16 + $0xa0] sm:$0xff]  ;;  %v6162_v28 = vld [vmem:[%s13412_s16 + $0xa8] sm:$0xff] }
 0x13c   : > { %10736 = vmatmul.mubr.msk.bf16.vlgmr.msra.gmra.mrb[0].mxu1 %vm455_vm1, %v1614_v8  ;;  %v1624_v8 = vpack.c.bf16 %v1600_v6, %v1599_v4  ;;  %v13498_v4 = vld [vmem:[%s14821_s3 + $0xe] sm:$0x3]  ;;  %v6187_v6 = vpack.c.bf16 %v6162_v28, %v6161_v61  ;;  %v6470_v61 = vld [vmem:[%s13412_s16 + $0x19] sm:$0xff] }
 0x13d   : > { %10739 = vmatprep.mubr.msk.bf16.mxu1 %vm455_vm1, %v1615_v9  ;;  %10772 = vmatpush3.bf16.msra.mxu1 %v2014_v15  ;;  %v1625_v9 = vpack.c.bf16 %v1602_v57, %v1601_v7  ;;  %v6178_v15 = vpack.c.bf16 %v6144_v41, %v6143_v5  ;;  %v1909_v7 = vld [vmem:[%s12755_s17 + $0x44] sm:$0xff]  ;;  %v1910_v57 = vld [vmem:[%s12755_s17 + $0x4c] sm:$0xff] }
 0x13e   : > { %12551 = vmatprep.subr.msk.bf16.mxu1 %vm510_vm0, %v13361_v17  ;;  %v13511_v5 = vpack.c.bf16 %v1910_v57, %v1909_v7  ;;  %v6163_v41 = vld [vmem:[%s13412_s16 + $0xb0] sm:$0xff] }
 0x13f   : > { %11246 = vmatmul.mubr.msk.bf16.gmra.mrb[16].mxu0 %vm455_vm1, %v5860_v45  ;;  %v6179_v45 = vpack.c.bf16 %v6146_v62, %v6145_v10  ;;  %v6165_v62 = vld [vmem:[%s13412_s16 + $0xc0] sm:$0xff] }
 0x140   : > { %11249 = vmatprep.mubr.msk.bf16.mxu0 %vm455_vm1, %v5861_v18  ;;  %v6578_v18 = vsel %vm510_vm0, %v13310_v36, 0  ;;  %v6147_v36 = vld [vmem:[%s13412_s16 + $0x30] sm:$0xff] }
 0x144   : > { %10740 = vmatmul.mubr.msk.bf16.gmra.mrb[4].mxu1 %vm455_vm1, %v1616_v46  ;;  %v13443_v46 = vld [vmem:[%s14821_s3 + $0x28] sm:$0x3] }
 0x145   : > { %10743 = vmatprep.mubr.msk.bf16.mxu1 %vm455_vm1, %v1617_v22  ;;  %v1627_v22 = vpack.c.bf16 %v1606_v51, %v1605_v32  ;;  %v1915_v32 = vld [vmem:[%s12755_s17 + $0x74] sm:$0xff]  ;;  %v1916_v51 = vld [vmem:[%s12755_s17 + $0x7c] sm:$0xff]  ;;  %v6904_v57 = vsel %vm510_vm0, %v13443_v46, 0 }
 0x147   : > { %11250 = vmatmul.mubr.msk.bf16.gmra.mrb[20].mxu0 %vm455_vm1, %v5862_v27  ;;  %v6180_v27 = vpack.c.bf16 %v6148_v21, %v6147_v36  ;;  %v6167_v36 = vld [vmem:[%s13412_s16 + $0xd0] sm:$0xff]  ;;  %v6168_v21 = vld [vmem:[%s13412_s16 + $0xd8] sm:$0xff] }
 0x148   : > { %11253 = vmatprep.mubr.msk.bf16.mxu0 %vm455_vm1, %v5863_v42  ;;  %v6181_v42 = vpack.c.bf16 %v6150_v23, %v6149_v25  ;;  %v6169_v25 = vld [vmem:[%s13412_s16 + $0xe0] sm:$0xff]  ;;  %v6170_v23 = vld [vmem:[%s13412_s16 + $0xe8] sm:$0xff] }
 0x14c   : > { %10744 = vmatmul.mubr.msk.bf16.gmra.mrb[8].mxu1 %vm455_vm1, %v1618_v58  ;;  %v1628_v58 = vpack.c.bf16 %v1608_v29, %v1607_v38  ;;  %v1917_v38 = vld [vmem:[%s12755_s17 + $0x84] sm:$0xff]  ;;  %v1918_v29 = vld [vmem:[%s12755_s17 + $0x8c] sm:$0xff] }
 0x14d   : > { %10747 = vmatprep.mubr.msk.bf16.mxu1 %vm455_vm1, %v1619_v50  ;;  %v1629_v50 = vpack.c.bf16 %v1610_v33, %v1609_v30  ;;  %v1919_v30 = vld [vmem:[%s12755_s17 + $0x94] sm:$0xff]  ;;  %v1920_v33 = vld [vmem:[%s12755_s17 + $0x9c] sm:$0xff] }
 0x14f   : > { %11254 = vmatmul.mubr.msk.bf16.gmra.mrb[24].mxu0 %vm455_vm1, %v5864_v2  ;;  %v6182_v2 = vpack.c.bf16 %v6152_v39, %v6151_v56  ;;  %v6171_v56 = vld [vmem:[%s13412_s16 + $0xf0] sm:$0xff]  ;;  %v6172_v39 = vld [vmem:[%s13412_s16 + $0xf8] sm:$0xff] }
 0x150   : > { %11257 = vmatprep.mubr.msk.bf16.mxu0 %vm455_vm1, %v5865_v11  ;;  %v6183_v11 = vpack.c.bf16 %v6154_v35, %v6153_v34  ;;  %v6173_v34 = vld [vmem:[%s13412_s16 + $0x100] sm:$0xff]  ;;  %v6174_v35 = vld [vmem:[%s13412_s16 + $0x108] sm:$0xff] }
 0x154   : > { %10748 = vmatmul.mubr.msk.bf16.gmra.mrb[12].mxu1 %vm455_vm1, %v1620_v24  ;;  %v1630_v24 = vpack.c.bf16 %v1612_v37, %v1611_v16  ;;  %v1921_v16 = vld [vmem:[%s12755_s17 + $0xa4] sm:$0xff]  ;;  %v1922_v37 = vld [vmem:[%s12755_s17 + $0xac] sm:$0xff] }
 0x155   : > { %10751 = vmatprep.mubr.msk.bf16.mxu1 %vm455_vm1, %v1621_v47  ;;  %v1939_v47 = vpack.c.bf16 %v1904_v40, %v1903_v26  ;;  %v1923_v26 = vld [vmem:[%s12755_s17 + $0xb4] sm:$0xff]  ;;  %v1924_v40 = vld [vmem:[%s12755_s17 + $0xbc] sm:$0xff] }
 0x157   : > { %11258 = vmatmul.mubr.msk.bf16.gmra.mrb[28].mxu0 %vm455_vm1, %v5866_v49  ;;  %v6184_v49 = vpack.c.bf16 %v6156_v44, %v6155_v12  ;;  %v6175_v12 = vld [vmem:[%s13412_s16 + $0x110] sm:$0xff]  ;;  %v6176_v44 = vld [vmem:[%s13412_s16 + $0x118] sm:$0xff] }
 0x158   : > { %11261 = vmatprep.mubr.msk.bf16.mxu0 %vm455_vm1, %v5867_v31  ;;  %v6185_v31 = vpack.c.bf16 %v6158_v14, %v6157_v48  ;;  %v6467_v48 = vld [vmem:[%s13412_s16 + $0x1] sm:$0xff]  ;;  %v6468_v14 = vld [vmem:[%s13412_s16 + $0x9] sm:$0xff] }
 0x15c   : > { %10752 = vmatmul.mubr.msk.bf16.gmra.mrb[16].mxu1 %vm455_vm1, %v1622_v59  ;;  %v13484_v59 = vpack.c.bf16 %v1906_v53, %v1905_v63  ;;  %v1925_v63 = vld [vmem:[%s12755_s17 + $0xc4] sm:$0xff]  ;;  %v1926_v53 = vld [vmem:[%s12755_s17 + $0xcc] sm:$0xff] }
 0x15d   : > { %10755 = vmatprep.mubr.msk.bf16.mxu1 %vm455_vm1, %v1623_v43  ;;  %v13489_v43 = vpack.c.bf16 %v1908_v55, %v1907_v54  ;;  %v1927_v54 = vld [vmem:[%s12755_s17 + $0xd4] sm:$0xff]  ;;  %v1928_v55 = vld [vmem:[%s12755_s17 + $0xdc] sm:$0xff] }
 0x15e   : > { %v13588_v28 = vpack.c.bf16 %v1928_v55, %v1927_v54  ;;  %v6490_v54 = vld [vmem:[%s13412_s16 + $0xb9] sm:$0xff]  ;;  %v6491_v55 = vld [vmem:[%s13412_s16 + $0xc1] sm:$0xff] }
 0x15f   : > { %11262 = vmatmul.mubr.msk.bf16.gmra.mrb[32].mxu0 %vm455_vm1, %v5868_v0  ;;  %v2340_v0 = vsel %vm510_vm0, %v13361_v17, 0  ;;  %v1911_v17 = vld [vmem:[%s12755_s17 + $0x54] sm:$0xff] }
 0x160   : > { %11267 = vmatprep.mubr.msk.bf16.mxu0 %vm455_vm1, %v6177_v1  ;;  %v6186_v1 = vpack.c.bf16 %v6160_v13, %v6159_v60  ;;  %v13583_v60 = vpack.c.bf16 %v1926_v53, %v1925_v63  ;;  %v6469_v13 = vld [vmem:[%s13412_s16 + $0x11] sm:$0xff] }
 0x164   : > { %10756 = vmatmul.mubr.msk.bf16.gmra.mrb[20].mxu1 %vm455_vm1, %v1624_v8  ;;  %v1912_v8 = vld [vmem:[%s12755_s17 + $0x5c] sm:$0xff] }
 0x165   : > { %10759 = vmatprep.mubr.msk.bf16.mxu1 %vm455_vm1, %v1625_v9  ;;  %v6164_v9 = vld [vmem:[%s13412_s16 + $0xb8] sm:$0xff]  ;;  %v13516_v10 = vpack.c.bf16 %v1912_v8, %v1911_v17  ;;  %v1929_v17 = vld [vmem:[%s12755_s17 + $0xe4] sm:$0xff]  ;;  %v1930_v8 = vld [vmem:[%s12755_s17 + $0xec] sm:$0xff] }
 0x167   : > { %11268 = vmatmul.mubr.msk.bf16.vlgmr.msra.gmra.mrb[0].mxu0 %vm455_vm1, %v6178_v15  ;;  %v6166_v15 = vld [vmem:[%s13412_s16 + $0xc8] sm:$0xff] }
 0x168   : > { %11304 = vmatpush3.bf16.msra.mxu0 %v6578_v18  ;;  %11271 = vmatprep.mubr.msk.bf16.mxu0 %vm455_vm1, %v6179_v45  ;;  %v6188_v45 = vpack.c.bf16 %v6164_v9, %v6163_v41  ;;  %v6189_v18 = vpack.c.bf16 %v6166_v15, %v6165_v62  ;;  %v1931_v41 = vld [vmem:[%s12755_s17 + $0xf4] sm:$0xff]  ;;  %v1932_v9 = vld [vmem:[%s12755_s17 + $0xfc] sm:$0xff]  ;;  %v13605_v62 = vld [vmem:[%s14821_s3 + $0x2a] sm:$0x3] }
 0x169   : > { %12566 = vmatprep.subr.msk.bf16.mxu0 %vm510_vm0, %v13443_v46  ;;  %v13608_v46 = vpack.c.bf16 %v1930_v8, %v1929_v17  ;;  %v6473_v15 = vld [vmem:[%s13412_s16 + $0x31] sm:$0xff]  ;;  %v6499_v17 = vld [vmem:[%s13412_s16 + $0x101] sm:$0xff]  ;;  %v6500_v8 = vld [vmem:[%s13412_s16 + $0x109] sm:$0xff] }
 0x16c   : > { %10760 = vmatmul.mubr.msk.bf16.gmra.mrb[24].mxu1 %vm455_vm1, %v1626_v52  ;;  %v13529_v52 = vpack.c.bf16 %v1914_v20, %v1913_v19  ;;  %v6475_v19 = vld [vmem:[%s13412_s16 + $0x41] sm:$0xff]  ;;  %v6476_v20 = vld [vmem:[%s13412_s16 + $0x49] sm:$0xff] }
 0x16d   : > { %10763 = vmatprep.mubr.msk.bf16.mxu1 %vm455_vm1, %v1627_v22  ;;  %v13534_v22 = vpack.c.bf16 %v1916_v51, %v1915_v32  ;;  %v6507_v51 = vpack.c.bf16 %v6476_v20, %v6475_v19  ;;  %v6796_v20 = vld [vmem:[%s13412_s16 + $0x1a] sm:$0xff] }
 0x16f   : > { %11272 = vmatmul.mubr.msk.bf16.gmra.mrb[4].mxu0 %vm455_vm1, %v6180_v27  ;;  %v6190_v27 = vpack.c.bf16 %v6168_v21, %v6167_v36  ;;  %v1933_v36 = vld [vmem:[%s12755_s17 + $0x104] sm:$0xff]  ;;  %v1934_v21 = vld [vmem:[%s12755_s17 + $0x10c] sm:$0xff] }
 0x170   : > { %11275 = vmatprep.mubr.msk.bf16.mxu0 %vm455_vm1, %v6181_v42  ;;  %v6191_v42 = vpack.c.bf16 %v6170_v23, %v6169_v25  ;;  %v1935_v25 = vld [vmem:[%s12755_s17 + $0x114] sm:$0xff]  ;;  %v1936_v23 = vld [vmem:[%s12755_s17 + $0x11c] sm:$0xff] }
 0x174   : > { %10764 = vmatmul.mubr.msk.bf16.gmra.mrb[28].mxu1 %vm455_vm1, %v1628_v58  ;;  %v13547_v58 = vpack.c.bf16 %v1918_v29, %v1917_v38  ;;  %v6478_v38 = vld [vmem:[%s13412_s16 + $0x59] sm:$0xff]  ;;  %v13633_v29 = vpack.c.bf16 %v1936_v23, %v1935_v25  ;;  %v6801_v25 = vld [vmem:[%s13412_s16 + $0x42] sm:$0xff] }
 0x175   : > { %10767 = vmatprep.mubr.msk.bf16.mxu1 %vm455_vm1, %v1629_v50  ;;  %v13552_v50 = vpack.c.bf16 %v1920_v33, %v1919_v30  ;;  %v6479_v30 = vld [vmem:[%s13412_s16 + $0x61] sm:$0xff]  ;;  %v6480_v33 = vld [vmem:[%s13412_s16 + $0x69] sm:$0xff] }
 0x177   : > { %11276 = vmatmul.mubr.msk.bf16.gmra.mrb[8].mxu0 %vm455_vm1, %v6182_v2  ;;  %v6192_v2 = vpack.c.bf16 %v6172_v39, %v6171_v56  ;;  %v6509_v39 = vpack.c.bf16 %v6480_v33, %v6479_v30  ;;  %v6804_v30 = vld [vmem:[%s13412_s16 + $0x5a] sm:$0xff]  ;;  %v6805_v33 = vld [vmem:[%s13412_s16 + $0x62] sm:$0xff] }
 0x178   : > { %11279 = vmatprep.mubr.msk.bf16.mxu0 %vm455_vm1, %v6183_v11  ;;  %v6193_v11 = vpack.c.bf16 %v6174_v35, %v6173_v34  ;;  %v1937_v34 = vld [vmem:[%s12755_s17 + $0x124] sm:$0xff]  ;;  %v1938_v35 = vld [vmem:[%s12755_s17 + $0x12c] sm:$0xff] }
 0x17c   : > { %10768 = vmatmul.mubr.msk.bf16.gmra.mrb[32].mxu1 %vm455_vm1, %v1630_v24  ;;  %v13565_v24 = vpack.c.bf16 %v1922_v37, %v1921_v16  ;;  %v6482_v16 = vld [vmem:[%s13412_s16 + $0x79] sm:$0xff]  ;;  %v6483_v37 = vld [vmem:[%s13412_s16 + $0x81] sm:$0xff] }
 0x17d   : > { %10773 = vmatprep.mubr.msk.bf16.mxu1 %vm455_vm1, %v1939_v47  ;;  %v13570_v47 = vpack.c.bf16 %v1924_v40, %v1923_v26  ;;  %v6484_v26 = vld [vmem:[%s13412_s16 + $0x89] sm:$0xff] }
 0x17f   : > { %11280 = vmatmul.mubr.msk.bf16.gmra.mrb[12].mxu0 %vm455_vm1, %v6184_v49  ;;  %v6194_v49 = vpack.c.bf16 %v6176_v44, %v6175_v12  ;;  %v6511_v12 = vpack.c.bf16 %v6484_v26, %v6483_v37  ;;  %v6485_v44 = vld [vmem:[%s13412_s16 + $0x91] sm:$0xff]  ;;  %v6808_v37 = vld [vmem:[%s13412_s16 + $0x7a] sm:$0xff]  ;;  %v6809_v26 = vld [vmem:[%s13412_s16 + $0x82] sm:$0xff] }
 0x180   : > { %11283 = vmatprep.mubr.msk.bf16.mxu0 %vm455_vm1, %v6185_v31  ;;  %v6503_v31 = vpack.c.bf16 %v6468_v14, %v6467_v48  ;;  %v6486_v48 = vld [vmem:[%s13412_s16 + $0x99] sm:$0xff]  ;;  %v6487_v14 = vld [vmem:[%s13412_s16 + $0xa1] sm:$0xff] }
 0x181   : > { %v6512_v63 = vpack.c.bf16 %v6486_v48, %v6485_v44  ;;  %v2557_v48 = vld [vmem:[%s12755_s17 + $0x35] sm:$0xff] }
 0x184   : > { %10774 = vmatmul.mubr.msk.bf16.vlgmr.msra.gmra.mrb[0].mxu1 %vm455_vm1, %v13484_v59 }
 0x185   : > { %10777 = vmatprep.mubr.msk.bf16.mxu1 %vm455_vm1, %v13489_v43  ;;  %10810 = vmatpush3.bf16.msra.mxu1 %v2340_v0  ;;  %v6471_v0 = vld [vmem:[%s13412_s16 + $0x21] sm:$0xff] }
 0x186   : > { %12552 = vmatprep.subr.msk.bf16.mxu1 %vm510_vm0, %v13498_v4 }
 0x187   : > { %11284 = vmatmul.mubr.msk.bf16.gmra.mrb[16].mxu0 %vm455_vm1, %v6186_v1  ;;  %v6472_v1 = vld [vmem:[%s13412_s16 + $0x29] sm:$0xff] }
 0x188   : > { %11287 = vmatprep.mubr.msk.bf16.mxu0 %vm455_vm1, %v6187_v6  ;;  %v6504_v6 = vpack.c.bf16 %v6470_v61, %v6469_v13  ;;  %v6505_v7 = vpack.c.bf16 %v6472_v1, %v6471_v0  ;;  %v6493_v61 = vld [vmem:[%s13412_s16 + $0xd1] sm:$0xff]  ;;  %v6494_v0 = vld [vmem:[%s13412_s16 + $0xd9] sm:$0xff]  ;;  %v6495_v1 = vld [vmem:[%s13412_s16 + $0xe1] sm:$0xff] }
 0x18c   : > { %10778 = vmatmul.mubr.msk.bf16.gmra.mrb[4].mxu1 %vm455_vm1, %v13511_v5 }
 0x18d   : > { %10781 = vmatprep.mubr.msk.bf16.mxu1 %vm455_vm1, %v13516_v10 }
 0x18f   : > { %11288 = vmatmul.mubr.msk.bf16.gmra.mrb[20].mxu0 %vm455_vm1, %v6188_v45  ;;  %v6474_v45 = vld [vmem:[%s13412_s16 + $0x39] sm:$0xff] }
 0x190   : > { %11291 = vmatprep.mubr.msk.bf16.mxu0 %vm455_vm1, %v6189_v18  ;;  %v13613_v18 = vpack.c.bf16 %v1932_v9, %v1931_v41  ;;  %v6506_v32 = vpack.c.bf16 %v6474_v45, %v6473_v15  ;;  %v6502_v9 = vld [vmem:[%s13412_s16 + $0x119] sm:$0xff]  ;;  %v6793_v15 = vld [vmem:[%s13412_s16 + $0x2] sm:$0xff]  ;;  %v6794_v45 = vld [vmem:[%s13412_s16 + $0xa] sm:$0xff] }
 0x194   : > { %10782 = vmatmul.mubr.msk.bf16.gmra.mrb[8].mxu1 %vm455_vm1, %v13529_v52 }
 0x195   : > { %10785 = vmatprep.mubr.msk.bf16.mxu1 %vm455_vm1, %v13534_v22 }
 0x197   : > { %11292 = vmatmul.mubr.msk.bf16.gmra.mrb[24].mxu0 %vm455_vm1, %v6190_v27  ;;  %v13628_v27 = vpack.c.bf16 %v1934_v21, %v1933_v36  ;;  %v13733_v21 = vld [vmem:[%s14821_s3 + $0x2c] sm:$0x3] }
 0x198   : > { %11295 = vmatprep.mubr.msk.bf16.mxu0 %vm455_vm1, %v6191_v42  ;;  %v6477_v42 = vld [vmem:[%s13412_s16 + $0x51] sm:$0xff] }
 0x199   : > { %v6508_v56 = vpack.c.bf16 %v6478_v38, %v6477_v42  ;;  %v6803_v38 = vld [vmem:[%s13412_s16 + $0x52] sm:$0xff] }
 0x19c   : > { %10786 = vmatmul.mubr.msk.bf16.gmra.mrb[12].mxu1 %vm455_vm1, %v13547_v58 }
 0x19d   : > { %10789 = vmatprep.mubr.msk.bf16.mxu1 %vm455_vm1, %v13552_v50 }
 0x19f   : > { %11296 = vmatmul.mubr.msk.bf16.gmra.mrb[28].mxu0 %vm455_vm1, %v6192_v2  ;;  %v13644_v2 = vpack.c.bf16 %v1938_v35, %v1937_v34  ;;  %v2264_v34 = vld [vmem:[%s12755_s17 + $0x13c] sm:$0xff]  ;;  %v2555_v35 = vld [vmem:[%s12755_s17 + $0x25] sm:$0xff] }
 0x1a0   : > { %11299 = vmatprep.mubr.msk.bf16.mxu0 %vm455_vm1, %v6193_v11  ;;  %v6481_v11 = vld [vmem:[%s13412_s16 + $0x71] sm:$0xff] }
 0x1a1   : > { %v6510_v40 = vpack.c.bf16 %v6482_v16, %v6481_v11  ;;  %v2556_v11 = vld [vmem:[%s12755_s17 + $0x2d] sm:$0xff] }
 0x1a4   : > { %10790 = vmatmul.mubr.msk.bf16.gmra.mrb[16].mxu1 %vm455_vm1, %v13565_v24 }
 0x1a5   : > { %10793 = vmatprep.mubr.msk.bf16.mxu1 %vm455_vm1, %v13570_v47 }
 0x1a7   : > { %11300 = vmatmul.mubr.msk.bf16.gmra.mrb[32].mxu0 %vm455_vm1, %v6194_v49  ;;  %v6488_v49 = vld [vmem:[%s13412_s16 + $0xa9] sm:$0xff] }
 0x1a8   : > { %11305 = vmatprep.mubr.msk.bf16.mxu0 %vm455_vm1, %v6503_v31  ;;  %v2666_v31 = vsel %vm510_vm0, %v13498_v4, 0  ;;  %v6513_v53 = vpack.c.bf16 %v6488_v49, %v6487_v14  ;;  %v6489_v4 = vld [vmem:[%s13412_s16 + $0xb1] sm:$0xff]  ;;  %v2558_v14 = vld [vmem:[%s12755_s17 + $0x3d] sm:$0xff]  ;;  %v2559_v49 = vld [vmem:[%s12755_s17 + $0x45] sm:$0xff] }
 0x1a9   : > { %v6514_v13 = vpack.c.bf16 %v6490_v54, %v6489_v4  ;;  %v6812_v4 = vld [vmem:[%s13412_s16 + $0x9a] sm:$0xff] }
 0x1ac   : > { %10794 = vmatmul.mubr.msk.bf16.gmra.mrb[20].mxu1 %vm455_vm1, %v13583_v60 }
 0x1ad   : > { %10797 = vmatprep.mubr.msk.bf16.mxu1 %vm455_vm1, %v13588_v28 }
 0x1af   : > { %11306 = vmatmul.mubr.msk.bf16.vlgmr.msra.gmra.mrb[0].mxu0 %vm455_vm1, %v6504_v6  ;;  %v6496_v6 = vld [vmem:[%s13412_s16 + $0xe9] sm:$0xff] }
 0x1b0   : > { %11342 = vmatpush3.bf16.msra.mxu0 %v6904_v57  ;;  %11309 = vmatprep.mubr.msk.bf16.mxu0 %vm455_vm1, %v6505_v7  ;;  %v6516_v7 = vpack.c.bf16 %v6494_v0, %v6493_v61  ;;  %v6498_v57 = vld [vmem:[%s13412_s16 + $0xf9] sm:$0xff]  ;;  %v13806_v61 = vld [vmem:[%s14821_s3 + $0x12] sm:$0x3] }
 0x1b1   : > { %12567 = vmatprep.subr.msk.bf16.mxu0 %vm510_vm0, %v13605_v62 }
 0x1b4   : > { %10798 = vmatmul.mubr.msk.bf16.gmra.mrb[24].mxu1 %vm455_vm1, %v13608_v46 }
 0x1b5   : > { %10801 = vmatprep.mubr.msk.bf16.mxu1 %vm455_vm1, %v13613_v18 }
 0x1b7   : > { %11310 = vmatmul.mubr.msk.bf16.gmra.mrb[4].mxu0 %vm455_vm1, %v6506_v32  ;;  %v6797_v32 = vld [vmem:[%s13412_s16 + $0x22] sm:$0xff] }
 0x1b8   : > { %11313 = vmatprep.mubr.msk.bf16.mxu0 %vm455_vm1, %v6507_v51  ;;  %v6798_v51 = vld [vmem:[%s13412_s16 + $0x2a] sm:$0xff] }
 0x1bc   : > { %10802 = vmatmul.mubr.msk.bf16.gmra.mrb[28].mxu1 %vm455_vm1, %v13628_v27 }
 0x1bd   : > { %10805 = vmatprep.mubr.msk.bf16.mxu1 %vm455_vm1, %v13633_v29 }
 0x1bf   : > { %11314 = vmatmul.mubr.msk.bf16.gmra.mrb[8].mxu0 %vm455_vm1, %v6508_v56  ;;  %v6806_v56 = vld [vmem:[%s13412_s16 + $0x6a] sm:$0xff] }
 0x1c0   : > { %11317 = vmatprep.mubr.msk.bf16.mxu0 %vm455_vm1, %v6509_v39  ;;  %v2263_v39 = vld [vmem:[%s12755_s17 + $0x134] sm:$0xff] }
 0x1c1   : > { %v2282_v16 = vpack.c.bf16 %v2264_v34, %v2263_v39  ;;  %v6824_v39 = vld [vmem:[%s13412_s16 + $0xfa] sm:$0xff] }
 0x1c4   : > { %10806 = vmatmul.mubr.msk.bf16.gmra.mrb[32].mxu1 %vm455_vm1, %v13644_v2 }
 0x1c5   : > { %10811 = vmatprep.mubr.msk.bf16.mxu1 %vm455_vm1, %v13484_v59  ;;  %v13666_v59 = vld [vmem:[%s14821_s3 + $0x10] sm:$0x3] }
 0x1c7   : > { %11318 = vmatmul.mubr.msk.bf16.gmra.mrb[12].mxu0 %vm455_vm1, %v6510_v40  ;;  %v6810_v40 = vld [vmem:[%s13412_s16 + $0x8a] sm:$0xff] }
 0x1c8   : > { %11321 = vmatprep.mubr.msk.bf16.mxu0 %vm455_vm1, %v6511_v12  ;;  %v13784_v44 = vpack.c.bf16 %v6810_v40, %v6809_v26  ;;  %v2575_v26 = vld [vmem:[%s12755_s17 + $0xc5] sm:$0xff]  ;;  %v2576_v40 = vld [vmem:[%s12755_s17 + $0xcd] sm:$0xff] }
 0x1cc   : > { %10812 = vmatmul.mubr.msk.bf16.vlgmr.msra.gmra.mrb[0].mxu1 %vm455_vm1, %v13489_v43  ;;  %v6492_v43 = vld [vmem:[%s13412_s16 + $0xc9] sm:$0xff] }
 0x1cd   : > { %10815 = vmatprep.mubr.msk.bf16.mxu1 %vm455_vm1, %v13511_v5  ;;  %10848 = vmatpush3.bf16.msra.mxu1 %v2666_v31  ;;  %v6515_v5 = vpack.c.bf16 %v6492_v43, %v6491_v55  ;;  %v2560_v31 = vld [vmem:[%s12755_s17 + $0x4d] sm:$0xff]  ;;  %v6813_v55 = vld [vmem:[%s13412_s16 + $0xa2] sm:$0xff] }
 0x1ce   : > { %12553 = vmatprep.subr.msk.bf16.mxu1 %vm510_vm0, %v13666_v59  ;;  %v2593_v54 = vpack.c.bf16 %v2560_v31, %v2559_v49  ;;  %v6814_v43 = vld [vmem:[%s13412_s16 + $0xaa] sm:$0xff]  ;;  %v6828_v49 = vld [vmem:[%s13412_s16 + $0x11a] sm:$0xff]  ;;  %v2601_v31 = vpack.c.bf16 %v2576_v40, %v2575_v26 }
 0x1cf   : > { %11322 = vmatmul.mubr.msk.bf16.gmra.mrb[16].mxu0 %vm455_vm1, %v6512_v63  ;;  %v2592_v63 = vpack.c.bf16 %v2558_v14, %v2557_v48  ;;  %v13809_v0 = vpack.c.bf16 %v6814_v43, %v6813_v55  ;;  %v6827_v14 = vld [vmem:[%s13412_s16 + $0x112] sm:$0xff]  ;;  %v2900_v26 = vld [vmem:[%s12755_s17 + $0xbe] sm:$0xff]  ;;  %v2901_v40 = vld [vmem:[%s12755_s17 + $0xc6] sm:$0xff] }
 0x1d0   : > { %11325 = vmatprep.mubr.msk.bf16.mxu0 %vm455_vm1, %v6513_v53  ;;  %v6811_v53 = vld [vmem:[%s13412_s16 + $0x92] sm:$0xff] }
 0x1d1   : > { %v2580_v55 = vld [vmem:[%s12755_s17 + $0xed] sm:$0xff] }
 0x1d4   : > { %10816 = vmatmul.mubr.msk.bf16.gmra.mrb[4].mxu1 %vm455_vm1, %v13516_v10  ;;  %v6517_v10 = vpack.c.bf16 %v6496_v6, %v6495_v1  ;;  %v2561_v1 = vld [vmem:[%s12755_s17 + $0x55] sm:$0xff]  ;;  %v2562_v6 = vld [vmem:[%s12755_s17 + $0x5d] sm:$0xff] }
 0x1d5   : > { %10819 = vmatprep.mubr.msk.bf16.mxu1 %vm455_vm1, %v13529_v52  ;;  %v6497_v52 = vld [vmem:[%s13412_s16 + $0xf1] sm:$0xff] }
 0x1d6   : > { %v6518_v41 = vpack.c.bf16 %v6498_v57, %v6497_v52  ;;  %v6815_v52 = vld [vmem:[%s13412_s16 + $0xb2] sm:$0xff]  ;;  %v6816_v57 = vld [vmem:[%s13412_s16 + $0xba] sm:$0xff] }
 0x1d7   : > { %11326 = vmatmul.mubr.msk.bf16.gmra.mrb[20].mxu0 %vm455_vm1, %v6514_v13  ;;  %v2992_v13 = vsel %vm510_vm0, %v13666_v59, 0  ;;  %v2563_v59 = vld [vmem:[%s12755_s17 + $0x65] sm:$0xff] }
 0x1d8   : > { %11329 = vmatprep.mubr.msk.bf16.mxu0 %vm455_vm1, %v6515_v5  ;;  %v13801_v5 = vpack.c.bf16 %v6812_v4, %v6811_v53  ;;  %v2577_v53 = vld [vmem:[%s12755_s17 + $0xd5] sm:$0xff]  ;;  %v2578_v4 = vld [vmem:[%s12755_s17 + $0xdd] sm:$0xff] }
 0x1d9   : > { %v2602_v43 = vpack.c.bf16 %v2578_v4, %v2577_v53  ;;  %v7446_v53 = vld [vmem:[%s13412_s16 + $0x1b] sm:$0xff] }
 0x1dc   : > { %10820 = vmatmul.mubr.msk.bf16.gmra.mrb[8].mxu1 %vm455_vm1, %v13534_v22  ;;  %v6519_v22 = vpack.c.bf16 %v6500_v8, %v6499_v17  ;;  %v6817_v8 = vld [vmem:[%s13412_s16 + $0xc2] sm:$0xff] }
 0x1dd   : > { %10823 = vmatprep.mubr.msk.bf16.mxu1 %vm455_vm1, %v13547_v58  ;;  %v6501_v58 = vld [vmem:[%s13412_s16 + $0x111] sm:$0xff] }
 0x1de   : > { %v6520_v19 = vpack.c.bf16 %v6502_v9, %v6501_v58  ;;  %v2565_v9 = vld [vmem:[%s12755_s17 + $0x75] sm:$0xff] }
 0x1df   : > { %11330 = vmatmul.mubr.msk.bf16.gmra.mrb[24].mxu0 %vm455_vm1, %v6516_v7  ;;  %v2564_v7 = vld [vmem:[%s12755_s17 + $0x6d] sm:$0xff] }
 0x1e0   : > { %11333 = vmatprep.mubr.msk.bf16.mxu0 %vm455_vm1, %v6517_v10  ;;  %v2594_v10 = vpack.c.bf16 %v2562_v6, %v2561_v1  ;;  %v2595_v17 = vpack.c.bf16 %v2564_v7, %v2563_v59  ;;  %v7556_v1 = vsel %vm510_vm0, %v13733_v21, 0  ;;  %v2581_v6 = vld [vmem:[%s12755_s17 + $0xf5] sm:$0xff]  ;;  %v2582_v59 = vld [vmem:[%s12755_s17 + $0xfd] sm:$0xff]  ;;  %v2583_v7 = vld [vmem:[%s12755_s17 + $0x105] sm:$0xff] }
 0x1e4   : > { %10824 = vmatmul.mubr.msk.bf16.gmra.mrb[12].mxu1 %vm455_vm1, %v13552_v50  ;;  %v6829_v50 = vpack.c.bf16 %v6794_v45, %v6793_v15  ;;  %v2566_v15 = vld [vmem:[%s12755_s17 + $0x7d] sm:$0xff]  ;;  %v2567_v45 = vld [vmem:[%s12755_s17 + $0x85] sm:$0xff] }
 0x1e5   : > { %10827 = vmatprep.mubr.msk.bf16.mxu1 %vm455_vm1, %v13565_v24  ;;  %v6795_v24 = vld [vmem:[%s13412_s16 + $0x12] sm:$0xff] }
 0x1e6   : > { %v13720_v36 = vpack.c.bf16 %v6796_v20, %v6795_v24  ;;  %v6819_v24 = vld [vmem:[%s13412_s16 + $0xd2] sm:$0xff]  ;;  %v6820_v20 = vld [vmem:[%s13412_s16 + $0xda] sm:$0xff] }
 0x1e7   : > { %11334 = vmatmul.mubr.msk.bf16.gmra.mrb[28].mxu0 %vm455_vm1, %v6518_v41  ;;  %v6818_v41 = vld [vmem:[%s13412_s16 + $0xca] sm:$0xff] }
 0x1e8   : > { %11337 = vmatprep.mubr.msk.bf16.mxu0 %vm455_vm1, %v6519_v22  ;;  %v13826_v22 = vpack.c.bf16 %v6816_v57, %v6815_v52  ;;  %v13829_v58 = vpack.c.bf16 %v6818_v41, %v6817_v8  ;;  %v2604_v52 = vpack.c.bf16 %v2582_v59, %v2581_v6  ;;  %v2585_v57 = vld [vmem:[%s12755_s17 + $0x115] sm:$0xff]  ;;  %v2588_v8 = vld [vmem:[%s12755_s17 + $0x12d] sm:$0xff] }
 0x1e9   : > { %v7448_v6 = vld [vmem:[%s13412_s16 + $0x2b] sm:$0xff] }
 0x1ec   : > { %10828 = vmatmul.mubr.msk.bf16.gmra.mrb[16].mxu1 %vm455_vm1, %v13570_v47  ;;  %v13724_v47 = vpack.c.bf16 %v6798_v51, %v6797_v32  ;;  %v6821_v51 = vld [vmem:[%s13412_s16 + $0xe2] sm:$0xff] }
 0x1ed   : > { %10831 = vmatprep.mubr.msk.bf16.mxu1 %vm455_vm1, %v13583_v60  ;;  %v7230_v60 = vsel %vm510_vm0, %v13605_v62, 0  ;;  %v6800_v62 = vld [vmem:[%s13412_s16 + $0x3a] sm:$0xff] }
 0x1ef   : > { %11338 = vmatmul.mubr.msk.bf16.gmra.mrb[32].mxu0 %vm455_vm1, %v6520_v19  ;;  %v2568_v19 = vld [vmem:[%s12755_s17 + $0x8d] sm:$0xff] }
 0x1f0   : > { %11343 = vmatprep.mubr.msk.bf16.mxu0 %vm455_vm1, %v6829_v50  ;;  %v2596_v50 = vpack.c.bf16 %v2566_v15, %v2565_v9  ;;  %v2597_v32 = vpack.c.bf16 %v2568_v19, %v2567_v45  ;;  %v2589_v9 = vld [vmem:[%s12755_s17 + $0x135] sm:$0xff]  ;;  %v2590_v15 = vld [vmem:[%s12755_s17 + $0x13d] sm:$0xff]  ;;  %v2881_v45 = vld [vmem:[%s12755_s17 + $0x26] sm:$0xff] }
 0x1f1   : > { %v2882_v19 = vld [vmem:[%s12755_s17 + $0x2e] sm:$0xff] }
 0x1f4   : > { %10832 = vmatmul.mubr.msk.bf16.gmra.mrb[20].mxu1 %vm455_vm1, %v13588_v28  ;;  %v6799_v28 = vld [vmem:[%s13412_s16 + $0x32] sm:$0xff] }
 0x1f5   : > { %10835 = vmatprep.mubr.msk.bf16.mxu1 %vm455_vm1, %v13608_v46  ;;  %v6802_v46 = vld [vmem:[%s13412_s16 + $0x4a] sm:$0xff]  ;;  %v13745_v23 = vpack.c.bf16 %v6800_v62, %v6799_v28  ;;  %v13844_v28 = vpack.c.bf16 %v6820_v20, %v6819_v24  ;;  %v2884_v24 = vld [vmem:[%s12755_s17 + $0x3e] sm:$0xff] }
 0x1f6   : > { %v13749_v42 = vpack.c.bf16 %v6802_v46, %v6801_v25  ;;  %v2569_v25 = vld [vmem:[%s12755_s17 + $0x95] sm:$0xff]  ;;  %v2570_v46 = vld [vmem:[%s12755_s17 + $0x9d] sm:$0xff]  ;;  %v2885_v20 = vld [vmem:[%s12755_s17 + $0x46] sm:$0xff] }
 0x1f7   : > { %11344 = vmatmul.mubr.msk.bf16.vlgmr.msra.gmra.mrb[0].mxu0 %vm455_vm1, %v13720_v36 }
 0x1f8   : > { %11380 = vmatpush3.bf16.msra.mxu0 %v7230_v60  ;;  %11347 = vmatprep.mubr.msk.bf16.mxu0 %vm455_vm1, %v13724_v47  ;;  %v6822_v60 = vld [vmem:[%s13412_s16 + $0xea] sm:$0xff] }
 0x1f9   : > { %12568 = vmatprep.subr.msk.bf16.mxu0 %vm510_vm0, %v13733_v21  ;;  %v13847_v62 = vpack.c.bf16 %v6822_v60, %v6821_v51  ;;  %v3318_v51 = vsel %vm510_vm0, %v13806_v61, 0  ;;  %v13944_v60 = vld [vmem:[%s14821_s3 + $0x14] sm:$0x3] }
 0x1fc   : > { %10836 = vmatmul.mubr.msk.bf16.gmra.mrb[24].mxu1 %vm455_vm1, %v13613_v18  ;;  %v13761_v18 = vpack.c.bf16 %v6804_v30, %v6803_v38  ;;  %v2571_v38 = vld [vmem:[%s12755_s17 + $0xa5] sm:$0xff]  ;;  %v2572_v30 = vld [vmem:[%s12755_s17 + $0xad] sm:$0xff] }
 0x1fd   : > { %10839 = vmatprep.mubr.msk.bf16.mxu1 %vm455_vm1, %v13628_v27  ;;  %v13765_v27 = vpack.c.bf16 %v6806_v56, %v6805_v33  ;;  %v2598_v33 = vpack.c.bf16 %v2570_v46, %v2569_v25  ;;  %v6823_v56 = vld [vmem:[%s13412_s16 + $0xf2] sm:$0xff]  ;;  %v2599_v34 = vpack.c.bf16 %v2572_v30, %v2571_v38  ;;  %v2888_v25 = vld [vmem:[%s12755_s17 + $0x5e] sm:$0xff] }
 0x1fe   : > { %v2890_v46 = vld [vmem:[%s12755_s17 + $0x6e] sm:$0xff]  ;;  %v2891_v30 = vld [vmem:[%s12755_s17 + $0x76] sm:$0xff] }
 0x1ff   : > { %11348 = vmatmul.mubr.msk.bf16.gmra.mrb[4].mxu0 %vm455_vm1, %v13745_v23 }
 0x200   : > { %11351 = vmatprep.mubr.msk.bf16.mxu0 %vm455_vm1, %v13749_v42 }
 0x204   : > { %10840 = vmatmul.mubr.msk.bf16.gmra.mrb[28].mxu1 %vm455_vm1, %v13633_v29  ;;  %v6807_v29 = vld [vmem:[%s13412_s16 + $0x72] sm:$0xff] }
 0x205   : > { %10843 = vmatprep.mubr.msk.bf16.mxu1 %vm455_vm1, %v13644_v2  ;;  %v2591_v2 = vpack.c.bf16 %v2556_v11, %v2555_v35  ;;  %v13781_v12 = vpack.c.bf16 %v6808_v37, %v6807_v29  ;;  %v6825_v35 = vld [vmem:[%s13412_s16 + $0x102] sm:$0xff]  ;;  %v6826_v11 = vld [vmem:[%s13412_s16 + $0x10a] sm:$0xff]  ;;  %v2573_v37 = vld [vmem:[%s12755_s17 + $0xb5] sm:$0xff] }
 0x206   : > { %v13865_v29 = vpack.c.bf16 %v6826_v11, %v6825_v35  ;;  %v2896_v35 = vld [vmem:[%s12755_s17 + $0x9e] sm:$0xff]  ;;  %v2897_v11 = vld [vmem:[%s12755_s17 + $0xa6] sm:$0xff] }
 0x207   : > { %11352 = vmatmul.mubr.msk.bf16.gmra.mrb[8].mxu0 %vm455_vm1, %v13761_v18 }
 0x208   : > { %11355 = vmatprep.mubr.msk.bf16.mxu0 %vm455_vm1, %v13765_v27 }
 0x20c   : > { %10844 = vmatmul.mubr.msk.bf16.gmra.mrb[32].mxu1 %vm455_vm1, %v2282_v16  ;;  %v13862_v16 = vpack.c.bf16 %v6824_v39, %v6823_v56  ;;  %v2893_v56 = vld [vmem:[%s12755_s17 + $0x86] sm:$0xff]  ;;  %v2894_v39 = vld [vmem:[%s12755_s17 + $0x8e] sm:$0xff] }
 0x20d   : > { %10849 = vmatprep.mubr.msk.bf16.mxu1 %vm455_vm1, %v2591_v2  ;;  %v2574_v2 = vld [vmem:[%s12755_s17 + $0xbd] sm:$0xff] }
 0x20e   : > { %v2600_v48 = vpack.c.bf16 %v2574_v2, %v2573_v37  ;;  %v2898_v37 = vld [vmem:[%s12755_s17 + $0xae] sm:$0xff]  ;;  %v2899_v2 = vld [vmem:[%s12755_s17 + $0xb6] sm:$0xff] }
 0x20f   : > { %11356 = vmatmul.mubr.msk.bf16.gmra.mrb[12].mxu0 %vm455_vm1, %v13781_v12 }
 0x210   : > { %11359 = vmatprep.mubr.msk.bf16.mxu0 %vm455_vm1, %v13784_v44 }
 0x214   : > { %10850 = vmatmul.mubr.msk.bf16.vlgmr.msra.gmra.mrb[0].mxu1 %vm455_vm1, %v2592_v63  ;;  %v13878_v63 = vpack.c.bf16 %v6828_v49, %v6827_v14  ;;  %v7154_v14 = vld [vmem:[%s13412_s16 + $0x12a] sm:$0xff] }
 0x215   : > { %10853 = vmatprep.mubr.msk.bf16.mxu1 %vm455_vm1, %v2593_v54  ;;  %10886 = vmatpush3.bf16.msra.mxu1 %v2992_v13  ;;  %v2579_v54 = vld [vmem:[%s12755_s17 + $0xe5] sm:$0xff] }
 0x216   : > { %12554 = vmatprep.subr.msk.bf16.mxu1 %vm510_vm0, %v13806_v61  ;;  %v2603_v13 = vpack.c.bf16 %v2580_v55, %v2579_v54  ;;  %v2904_v55 = vld [vmem:[%s12755_s17 + $0xde] sm:$0xff] }
 0x217   : > { %11360 = vmatmul.mubr.msk.bf16.gmra.mrb[16].mxu0 %vm455_vm1, %v13801_v5 }
 0x218   : > { %11363 = vmatprep.mubr.msk.bf16.mxu0 %vm455_vm1, %v13809_v0 }
 0x21c   : > { %10854 = vmatmul.mubr.msk.bf16.gmra.mrb[4].mxu1 %vm455_vm1, %v2594_v10  ;;  %v2584_v10 = vld [vmem:[%s12755_s17 + $0x10d] sm:$0xff] }
 0x21d   : > { %10857 = vmatprep.mubr.msk.bf16.mxu1 %vm455_vm1, %v2595_v17  ;;  %v2605_v21 = vpack.c.bf16 %v2584_v10, %v2583_v7  ;;  %v2586_v17 = vld [vmem:[%s12755_s17 + $0x11d] sm:$0xff]  ;;  %v7449_v7 = vld [vmem:[%s13412_s16 + $0x33] sm:$0xff] }
 0x21e   : > { %v7450_v10 = vld [vmem:[%s13412_s16 + $0x3b] sm:$0xff] }
 0x21f   : > { %11364 = vmatmul.mubr.msk.bf16.gmra.mrb[20].mxu0 %vm455_vm1, %v13826_v22 }
 0x220   : > { %11367 = vmatprep.mubr.msk.bf16.mxu0 %vm455_vm1, %v13829_v58 }
 0x224   : > { %10858 = vmatmul.mubr.msk.bf16.gmra.mrb[8].mxu1 %vm455_vm1, %v2596_v50  ;;  %v2883_v50 = vld [vmem:[%s12755_s17 + $0x36] sm:$0xff] }
 0x225   : > { %10861 = vmatprep.mubr.msk.bf16.mxu1 %vm455_vm1, %v2597_v32  ;;  %v2886_v32 = vld [vmem:[%s12755_s17 + $0x4e] sm:$0xff] }
 0x227   : > { %11368 = vmatmul.mubr.msk.bf16.gmra.mrb[24].mxu0 %vm455_vm1, %v13844_v28 }
 0x228   : > { %11371 = vmatprep.mubr.msk.bf16.mxu0 %vm455_vm1, %v13847_v62 }
 0x22c   : > { %10862 = vmatmul.mubr.msk.bf16.gmra.mrb[12].mxu1 %vm455_vm1, %v2598_v33  ;;  %v2892_v33 = vld [vmem:[%s12755_s17 + $0x7e] sm:$0xff] }
 0x22d   : > { %10865 = vmatprep.mubr.msk.bf16.mxu1 %vm455_vm1, %v2599_v34  ;;  %v2895_v34 = vld [vmem:[%s12755_s17 + $0x96] sm:$0xff] }
 0x22f   : > { %11372 = vmatmul.mubr.msk.bf16.gmra.mrb[28].mxu0 %vm455_vm1, %v13862_v16 }
 0x230   : > { %11375 = vmatprep.mubr.msk.bf16.mxu0 %vm455_vm1, %v13865_v29 }
 0x234   : > { %10866 = vmatmul.mubr.msk.bf16.gmra.mrb[16].mxu1 %vm455_vm1, %v2600_v48  ;;  %v2902_v48 = vld [vmem:[%s12755_s17 + $0xce] sm:$0xff] }
 0x235   : > { %10869 = vmatprep.mubr.msk.bf16.mxu1 %vm455_vm1, %v2601_v31  ;;  %v2927_v49 = vpack.c.bf16 %v2902_v48, %v2901_v40  ;;  %v7445_v31 = vld [vmem:[%s13412_s16 + $0x13] sm:$0xff]  ;;  %v3211_v40 = vld [vmem:[%s12767_s29 + $0x20] sm:$0xff]  ;;  %v3212_v48 = vld [vmem:[%s12767_s29 + $0x28] sm:$0xff] }
 0x236   : > { %v7481_v54 = vpack.c.bf16 %v7446_v53, %v7445_v31  ;;  %v7465_v31 = vld [vmem:[%s13412_s16 + $0xb3] sm:$0xff]  ;;  %v7466_v53 = vld [vmem:[%s13412_s16 + $0xbb] sm:$0xff] }
 0x237   : > { %11376 = vmatmul.mubr.msk.bf16.gmra.mrb[32].mxu0 %vm455_vm1, %v13878_v63 }
 0x238   : > { %11381 = vmatprep.mubr.msk.bf16.mxu0 %vm455_vm1, %v13720_v36  ;;  %v13901_v36 = vld [vmem:[%s14821_s3 + $0x2e] sm:$0x3] }
 0x23c   : > { %10870 = vmatmul.mubr.msk.bf16.gmra.mrb[20].mxu1 %vm455_vm1, %v2602_v43  ;;  %v2905_v43 = vld [vmem:[%s12755_s17 + $0xe6] sm:$0xff] }
 0x23d   : > { %10873 = vmatprep.mubr.msk.bf16.mxu1 %vm455_vm1, %v2603_v13 }
 0x23f   : > { %11382 = vmatmul.mubr.msk.bf16.vlgmr.msra.gmra.mrb[0].mxu0 %vm455_vm1, %v13724_v47  ;;  %v2587_v47 = vld [vmem:[%s12755_s17 + $0x125] sm:$0xff] }
 0x240   : > { %11418 = vmatpush3.bf16.msra.mxu0 %v7556_v1  ;;  %11385 = vmatprep.mubr.msk.bf16.mxu0 %vm455_vm1, %v13745_v23  ;;  %v2606_v23 = vpack.c.bf16 %v2586_v17, %v2585_v57  ;;  %v2607_v41 = vpack.c.bf16 %v2588_v8, %v2587_v47  ;;  %v7447_v1 = vld [vmem:[%s13412_s16 + $0x23] sm:$0xff]  ;;  %v7882_v57 = vsel %vm510_vm0, %v13901_v36, 0  ;;  %v2907_v17 = vld [vmem:[%s12755_s17 + $0xf6] sm:$0xff] }
 0x241   : > { %12569 = vmatprep.subr.msk.bf16.mxu0 %vm510_vm0, %v13901_v36  ;;  %v2908_v47 = vld [vmem:[%s12755_s17 + $0xfe] sm:$0xff]  ;;  %v2909_v8 = vld [vmem:[%s12755_s17 + $0x106] sm:$0xff] }
 0x242   : > { %v7451_v36 = vld [vmem:[%s13412_s16 + $0x43] sm:$0xff] }
 0x244   : > { %10874 = vmatmul.mubr.msk.bf16.gmra.mrb[24].mxu1 %vm455_vm1, %v2604_v52  ;;  %v7482_v52 = vpack.c.bf16 %v7448_v6, %v7447_v1  ;;  %v7467_v6 = vld [vmem:[%s13412_s16 + $0xc3] sm:$0xff] }
 0x245   : > { %10877 = vmatprep.mubr.msk.bf16.mxu1 %vm455_vm1, %v2605_v21  ;;  %v7483_v21 = vpack.c.bf16 %v7450_v10, %v7449_v7  ;;  %v7469_v10 = vld [vmem:[%s13412_s16 + $0xd3] sm:$0xff] }
 0x247   : > { %11386 = vmatmul.mubr.msk.bf16.gmra.mrb[4].mxu0 %vm455_vm1, %v13749_v42  ;;  %v2608_v42 = vpack.c.bf16 %v2590_v15, %v2589_v9  ;;  %v2930_v9 = vpack.c.bf16 %v2908_v47, %v2907_v17  ;;  %v7452_v15 = vld [vmem:[%s13412_s16 + $0x4b] sm:$0xff]  ;;  %v3218_v47 = vld [vmem:[%s12767_s29 + $0x58] sm:$0xff] }
 0x248   : > { %11389 = vmatprep.mubr.msk.bf16.mxu0 %vm455_vm1, %v13761_v18  ;;  %v2917_v18 = vpack.c.bf16 %v2882_v19, %v2881_v45  ;;  %v7453_v19 = vld [vmem:[%s13412_s16 + $0x53] sm:$0xff] }
 0x249   : > { %v3217_v17 = vld [vmem:[%s12767_s29 + $0x50] sm:$0xff] }
 0x24c   : > { %10878 = vmatmul.mubr.msk.bf16.gmra.mrb[28].mxu1 %vm455_vm1, %v2606_v23  ;;  %v2910_v23 = vld [vmem:[%s12755_s17 + $0x10e] sm:$0xff] }
 0x24d   : > { %10881 = vmatprep.mubr.msk.bf16.mxu1 %vm455_vm1, %v2607_v41  ;;  %v14015_v41 = vld [vmem:[%s14821_s3 + $0x30] sm:$0x3]  ;;  %v2931_v45 = vpack.c.bf16 %v2910_v23, %v2909_v8  ;;  %v3219_v8 = vld [vmem:[%s12767_s29 + $0x60] sm:$0xff]  ;;  %v3220_v23 = vld [vmem:[%s12767_s29 + $0x68] sm:$0xff] }
 0x24f   : > { %11390 = vmatmul.mubr.msk.bf16.gmra.mrb[8].mxu0 %vm455_vm1, %v13765_v27  ;;  %v2918_v27 = vpack.c.bf16 %v2884_v24, %v2883_v50  ;;  %v2911_v24 = vld [vmem:[%s12755_s17 + $0x116] sm:$0xff] }
 0x250   : > { %11393 = vmatprep.mubr.msk.bf16.mxu0 %vm455_vm1, %v13781_v12  ;;  %v2919_v12 = vpack.c.bf16 %v2886_v32, %v2885_v20  ;;  %v2912_v20 = vld [vmem:[%s12755_s17 + $0x11e] sm:$0xff]  ;;  %v2913_v32 = vld [vmem:[%s12755_s17 + $0x126] sm:$0xff] }
 0x254   : > { %10882 = vmatmul.mubr.msk.bf16.gmra.mrb[32].mxu1 %vm455_vm1, %v2608_v42  ;;  %v7454_v42 = vld [vmem:[%s13412_s16 + $0x5b] sm:$0xff] }
 0x255   : > { %10887 = vmatprep.mubr.msk.bf16.mxu1 %vm455_vm1, %v2917_v18  ;;  %v7484_v18 = vpack.c.bf16 %v7452_v15, %v7451_v36  ;;  %v7485_v50 = vpack.c.bf16 %v7454_v42, %v7453_v19  ;;  %v7471_v36 = vld [vmem:[%s13412_s16 + $0xe3] sm:$0xff]  ;;  %v7472_v15 = vld [vmem:[%s13412_s16 + $0xeb] sm:$0xff]  ;;  %v7473_v19 = vld [vmem:[%s13412_s16 + $0xf3] sm:$0xff] }
 0x256   : > { %v7474_v42 = vld [vmem:[%s13412_s16 + $0xfb] sm:$0xff] }
 0x257   : > { %11394 = vmatmul.mubr.msk.bf16.gmra.mrb[12].mxu0 %vm455_vm1, %v13784_v44  ;;  %v2887_v44 = vld [vmem:[%s12755_s17 + $0x56] sm:$0xff] }
 0x258   : > { %11397 = vmatprep.mubr.msk.bf16.mxu0 %vm455_vm1, %v13801_v5  ;;  %v2889_v5 = vld [vmem:[%s12755_s17 + $0x66] sm:$0xff]  ;;  %v2920_v61 = vpack.c.bf16 %v2888_v25, %v2887_v44 }
 0x259   : > { %v2921_v38 = vpack.c.bf16 %v2890_v46, %v2889_v5  ;;  %v7456_v44 = vld [vmem:[%s13412_s16 + $0x6b] sm:$0xff]  ;;  %v7457_v5 = vld [vmem:[%s13412_s16 + $0x73] sm:$0xff]  ;;  %v7458_v46 = vld [vmem:[%s13412_s16 + $0x7b] sm:$0xff] }
 0x25c   : > { %10888 = vmatmul.mubr.msk.bf16.vlgmr.msra.gmra.mrb[0].mxu1 %vm455_vm1, %v2918_v27  ;;  %v2914_v27 = vld [vmem:[%s12755_s17 + $0x12e] sm:$0xff] }
 0x25d   : > { %10891 = vmatprep.mubr.msk.bf16.mxu1 %vm455_vm1, %v2919_v12  ;;  %10924 = vmatpush3.bf16.msra.mxu1 %v3318_v51  ;;  %v2932_v12 = vpack.c.bf16 %v2912_v20, %v2911_v24  ;;  %v7455_v51 = vld [vmem:[%s13412_s16 + $0x63] sm:$0xff]  ;;  %v2933_v25 = vpack.c.bf16 %v2914_v27, %v2913_v32  ;;  %v3221_v24 = vld [vmem:[%s12767_s29 + $0x70] sm:$0xff]  ;;  %v3222_v20 = vld [vmem:[%s12767_s29 + $0x78] sm:$0xff] }
 0x25e   : > { %12555 = vmatprep.subr.msk.bf16.mxu1 %vm510_vm0, %v13944_v60  ;;  %v3223_v32 = vld [vmem:[%s12767_s29 + $0x80] sm:$0xff]  ;;  %v3224_v27 = vld [vmem:[%s12767_s29 + $0x88] sm:$0xff] }
 0x25f   : > { %11398 = vmatmul.mubr.msk.bf16.gmra.mrb[16].mxu0 %vm455_vm1, %v13809_v0  ;;  %v2922_v0 = vpack.c.bf16 %v2892_v33, %v2891_v30  ;;  %v2915_v30 = vld [vmem:[%s12755_s17 + $0x136] sm:$0xff]  ;;  %v2916_v33 = vld [vmem:[%s12755_s17 + $0x13e] sm:$0xff] }
 0x260   : > { %11401 = vmatprep.mubr.msk.bf16.mxu0 %vm455_vm1, %v13826_v22  ;;  %v2923_v22 = vpack.c.bf16 %v2894_v39, %v2893_v56  ;;  %v3207_v56 = vld [vmem:[%s12767_s29] sm:$0xff]  ;;  %v3208_v39 = vld [vmem:[%s12767_s29 + $0x8] sm:$0xff] }
 0x264   : > { %10892 = vmatmul.mubr.msk.bf16.gmra.mrb[4].mxu1 %vm455_vm1, %v2920_v61  ;;  %v7486_v61 = vpack.c.bf16 %v7456_v44, %v7455_v51  ;;  %v7475_v51 = vld [vmem:[%s13412_s16 + $0x103] sm:$0xff]  ;;  %v7476_v44 = vld [vmem:[%s13412_s16 + $0x10b] sm:$0xff] }
 0x265   : > { %10895 = vmatprep.mubr.msk.bf16.mxu1 %vm455_vm1, %v2921_v38  ;;  %v7487_v38 = vpack.c.bf16 %v7458_v46, %v7457_v5  ;;  %v7477_v5 = vld [vmem:[%s13412_s16 + $0x113] sm:$0xff]  ;;  %v7478_v46 = vld [vmem:[%s13412_s16 + $0x11b] sm:$0xff] }
 0x267   : > { %11402 = vmatmul.mubr.msk.bf16.gmra.mrb[20].mxu0 %vm455_vm1, %v13829_v58  ;;  %v2924_v58 = vpack.c.bf16 %v2896_v35, %v2895_v34  ;;  %v7460_v34 = vld [vmem:[%s13412_s16 + $0x8b] sm:$0xff]  ;;  %v3243_v35 = vpack.c.bf16 %v3208_v39, %v3207_v56  ;;  %v3227_v56 = vld [vmem:[%s12767_s29 + $0xa0] sm:$0xff] }
 0x268   : > { %11405 = vmatprep.mubr.msk.bf16.mxu0 %vm455_vm1, %v13844_v28  ;;  %v2925_v28 = vpack.c.bf16 %v2898_v37, %v2897_v11  ;;  %v7461_v11 = vld [vmem:[%s13412_s16 + $0x93] sm:$0xff]  ;;  %v7462_v37 = vld [vmem:[%s13412_s16 + $0x9b] sm:$0xff]  ;;  %v3228_v39 = vld [vmem:[%s12767_s29 + $0xa8] sm:$0xff] }
 0x26c   : > { %10896 = vmatmul.mubr.msk.bf16.gmra.mrb[8].mxu1 %vm455_vm1, %v2922_v0  ;;  %v2934_v0 = vpack.c.bf16 %v2916_v33, %v2915_v30  ;;  %v3225_v30 = vld [vmem:[%s12767_s29 + $0x90] sm:$0xff]  ;;  %v3226_v33 = vld [vmem:[%s12767_s29 + $0x98] sm:$0xff] }
 0x26d   : > { %10899 = vmatprep.mubr.msk.bf16.mxu1 %vm455_vm1, %v2923_v22  ;;  %v7459_v22 = vld [vmem:[%s13412_s16 + $0x83] sm:$0xff] }
 0x26f   : > { %11406 = vmatmul.mubr.msk.bf16.gmra.mrb[24].mxu0 %vm455_vm1, %v13847_v62  ;;  %v2926_v62 = vpack.c.bf16 %v2900_v26, %v2899_v2  ;;  %v3209_v2 = vld [vmem:[%s12767_s29 + $0x10] sm:$0xff]  ;;  %v3210_v26 = vld [vmem:[%s12767_s29 + $0x18] sm:$0xff] }
 0x270   : > { %11409 = vmatprep.mubr.msk.bf16.mxu0 %vm455_vm1, %v13862_v16  ;;  %v7153_v16 = vld [vmem:[%s13412_s16 + $0x122] sm:$0xff] }
 0x271   : > { %v7172_v4 = vpack.c.bf16 %v7154_v14, %v7153_v16  ;;  %v7463_v16 = vld [vmem:[%s13412_s16 + $0xa3] sm:$0xff]  ;;  %v7464_v14 = vld [vmem:[%s13412_s16 + $0xab] sm:$0xff] }
 0x274   : > { %10900 = vmatmul.mubr.msk.bf16.gmra.mrb[12].mxu1 %vm455_vm1, %v2924_v58  ;;  %v7488_v58 = vpack.c.bf16 %v7460_v34, %v7459_v22  ;;  %v7479_v22 = vld [vmem:[%s13412_s16 + $0x123] sm:$0xff]  ;;  %v7480_v34 = vld [vmem:[%s13412_s16 + $0x12b] sm:$0xff] }
 0x275   : > { %10903 = vmatprep.mubr.msk.bf16.mxu1 %vm455_vm1, %v2925_v28  ;;  %v7489_v28 = vpack.c.bf16 %v7462_v37, %v7461_v11  ;;  %v7771_v11 = vld [vmem:[%s13412_s16 + $0x14] sm:$0xff]  ;;  %v7772_v37 = vld [vmem:[%s13412_s16 + $0x1c] sm:$0xff] }
 0x277   : > { %11410 = vmatmul.mubr.msk.bf16.gmra.mrb[28].mxu0 %vm455_vm1, %v13865_v29  ;;  %v2903_v29 = vld [vmem:[%s12755_s17 + $0xd6] sm:$0xff] }
 0x278   : > { %11413 = vmatprep.mubr.msk.bf16.mxu0 %vm455_vm1, %v13878_v63  ;;  %v2906_v63 = vld [vmem:[%s12755_s17 + $0xee] sm:$0xff]  ;;  %v2928_v13 = vpack.c.bf16 %v2904_v55, %v2903_v29  ;;  %v14066_v29 = vld [vmem:[%s14821_s3 + $0x16] sm:$0x3]  ;;  %v7491_v55 = vpack.c.bf16 %v7466_v53, %v7465_v31  ;;  %v7776_v53 = vld [vmem:[%s13412_s16 + $0x3c] sm:$0xff] }
 0x279   : > { %v2929_v59 = vpack.c.bf16 %v2906_v63, %v2905_v43  ;;  %v3213_v43 = vld [vmem:[%s12767_s29 + $0x30] sm:$0xff]  ;;  %v3214_v63 = vld [vmem:[%s12767_s29 + $0x38] sm:$0xff] }
 0x27a   : > { %v3246_v1 = vpack.c.bf16 %v3214_v63, %v3213_v43  ;;  %v7775_v31 = vld [vmem:[%s13412_s16 + $0x34] sm:$0xff] }
 0x27b   : > { %v3233_v43 = vld [vmem:[%s12767_s29 + $0xd0] sm:$0xff]  ;;  %v3234_v63 = vld [vmem:[%s12767_s29 + $0xd8] sm:$0xff] }
 0x27c   : > { %10904 = vmatmul.mubr.msk.bf16.gmra.mrb[16].mxu1 %vm455_vm1, %v2926_v62  ;;  %v3244_v62 = vpack.c.bf16 %v3210_v26, %v3209_v2  ;;  %v3229_v2 = vld [vmem:[%s12767_s29 + $0xb0] sm:$0xff]  ;;  %v3230_v26 = vld [vmem:[%s12767_s29 + $0xb8] sm:$0xff] }
 0x27d   : > { %10907 = vmatprep.mubr.msk.bf16.mxu1 %vm455_vm1, %v2927_v49  ;;  %v3245_v49 = vpack.c.bf16 %v3212_v48, %v3211_v40  ;;  %v3231_v40 = vld [vmem:[%s12767_s29 + $0xc0] sm:$0xff]  ;;  %v3232_v48 = vld [vmem:[%s12767_s29 + $0xc8] sm:$0xff] }
 0x27f   : > { %11414 = vmatmul.mubr.msk.bf16.gmra.mrb[32].mxu0 %vm455_vm1, %v7172_v4  ;;  %v3644_v4 = vsel %vm510_vm0, %v13944_v60, 0  ;;  %v3216_v60 = vld [vmem:[%s12767_s29 + $0x48] sm:$0xff] }
 0x280   : > { %11419 = vmatprep.mubr.msk.bf16.mxu0 %vm455_vm1, %v7481_v54  ;;  %v7490_v54 = vpack.c.bf16 %v7464_v14, %v7463_v16  ;;  %v7773_v16 = vld [vmem:[%s13412_s16 + $0x24] sm:$0xff]  ;;  %v7774_v14 = vld [vmem:[%s13412_s16 + $0x2c] sm:$0xff] }
 0x284   : > { %10908 = vmatmul.mubr.msk.bf16.gmra.mrb[20].mxu1 %vm455_vm1, %v2928_v13  ;;  %v3215_v13 = vld [vmem:[%s12767_s29 + $0x40] sm:$0xff] }
 0x285   : > { %10911 = vmatprep.mubr.msk.bf16.mxu1 %vm455_vm1, %v2929_v59  ;;  %v7468_v59 = vld [vmem:[%s13412_s16 + $0xcb] sm:$0xff]  ;;  %v3247_v7 = vpack.c.bf16 %v3216_v60, %v3215_v13  ;;  %v3235_v13 = vld [vmem:[%s12767_s29 + $0xe0] sm:$0xff] }
 0x286   : > { %v3236_v60 = vld [vmem:[%s12767_s29 + $0xe8] sm:$0xff] }
 0x287   : > { %11420 = vmatmul.mubr.msk.bf16.vlgmr.msra.gmra.mrb[0].mxu0 %vm455_vm1, %v7482_v52  ;;  %v7470_v52 = vld [vmem:[%s13412_s16 + $0xdb] sm:$0xff] }
 0x288   : > { %11456 = vmatpush3.bf16.msra.mxu0 %v7882_v57  ;;  %11423 = vmatprep.mubr.msk.bf16.mxu0 %vm455_vm1, %v7483_v21  ;;  %v7492_v21 = vpack.c.bf16 %v7468_v59, %v7467_v6  ;;  %v7493_v57 = vpack.c.bf16 %v7470_v52, %v7469_v10  ;;  %v7777_v6 = vld [vmem:[%s13412_s16 + $0x44] sm:$0xff]  ;;  %v7778_v59 = vld [vmem:[%s13412_s16 + $0x4c] sm:$0xff]  ;;  %v7779_v10 = vld [vmem:[%s13412_s16 + $0x54] sm:$0xff] }
 0x289   : > { %12570 = vmatprep.subr.msk.bf16.mxu0 %vm510_vm0, %v14015_v41  ;;  %v7780_v52 = vld [vmem:[%s13412_s16 + $0x5c] sm:$0xff] }
 0x28c   : > { %10912 = vmatmul.mubr.msk.bf16.gmra.mrb[24].mxu1 %vm455_vm1, %v2930_v9  ;;  %v3248_v9 = vpack.c.bf16 %v3218_v47, %v3217_v17  ;;  %v3237_v17 = vld [vmem:[%s12767_s29 + $0xf0] sm:$0xff]  ;;  %v3238_v47 = vld [vmem:[%s12767_s29 + $0xf8] sm:$0xff] }
 0x28d   : > { %10915 = vmatprep.mubr.msk.bf16.mxu1 %vm455_vm1, %v2931_v45  ;;  %v3249_v45 = vpack.c.bf16 %v3220_v23, %v3219_v8  ;;  %v3239_v8 = vld [vmem:[%s12767_s29 + $0x100] sm:$0xff]  ;;  %v3240_v23 = vld [vmem:[%s12767_s29 + $0x108] sm:$0xff] }
 0x28f   : > { %11424 = vmatmul.mubr.msk.bf16.gmra.mrb[4].mxu0 %vm455_vm1, %v7484_v18  ;;  %v7494_v18 = vpack.c.bf16 %v7472_v15, %v7471_v36  ;;  %v7781_v36 = vld [vmem:[%s13412_s16 + $0x64] sm:$0xff]  ;;  %v7782_v15 = vld [vmem:[%s13412_s16 + $0x6c] sm:$0xff] }
 0x290   : > { %11427 = vmatprep.mubr.msk.bf16.mxu0 %vm455_vm1, %v7485_v50  ;;  %v7495_v50 = vpack.c.bf16 %v7474_v42, %v7473_v19  ;;  %v7783_v19 = vld [vmem:[%s13412_s16 + $0x74] sm:$0xff]  ;;  %v7784_v42 = vld [vmem:[%s13412_s16 + $0x7c] sm:$0xff] }
 0x294   : > { %10916 = vmatmul.mubr.msk.bf16.gmra.mrb[28].mxu1 %vm455_vm1, %v2932_v12  ;;  %v3250_v12 = vpack.c.bf16 %v3222_v20, %v3221_v24  ;;  %v3241_v24 = vld [vmem:[%s12767_s29 + $0x110] sm:$0xff]  ;;  %v3242_v20 = vld [vmem:[%s12767_s29 + $0x118] sm:$0xff] }
 0x295   : > { %10919 = vmatprep.mubr.msk.bf16.mxu1 %vm455_vm1, %v2933_v25  ;;  %v3251_v25 = vpack.c.bf16 %v3224_v27, %v3223_v32  ;;  %v3533_v32 = vld [vmem:[%s12767_s29 + $0x1] sm:$0xff]  ;;  %v3534_v27 = vld [vmem:[%s12767_s29 + $0x9] sm:$0xff] }
 0x297   : > { %11428 = vmatmul.mubr.msk.bf16.gmra.mrb[8].mxu0 %vm455_vm1, %v7486_v61  ;;  %v7496_v61 = vpack.c.bf16 %v7476_v44, %v7475_v51  ;;  %v7785_v51 = vld [vmem:[%s13412_s16 + $0x84] sm:$0xff]  ;;  %v7786_v44 = vld [vmem:[%s13412_s16 + $0x8c] sm:$0xff] }
 0x298   : > { %11431 = vmatprep.mubr.msk.bf16.mxu0 %vm455_vm1, %v7487_v38  ;;  %v7497_v38 = vpack.c.bf16 %v7478_v46, %v7477_v5  ;;  %v7787_v5 = vld [vmem:[%s13412_s16 + $0x94] sm:$0xff]  ;;  %v7788_v46 = vld [vmem:[%s13412_s16 + $0x9c] sm:$0xff] }
 0x29c   : > { %10920 = vmatmul.mubr.msk.bf16.gmra.mrb[32].mxu1 %vm455_vm1, %v2934_v0  ;;  %v3252_v0 = vpack.c.bf16 %v3226_v33, %v3225_v30  ;;  %v3535_v30 = vld [vmem:[%s12767_s29 + $0x11] sm:$0xff]  ;;  %v3536_v33 = vld [vmem:[%s12767_s29 + $0x19] sm:$0xff] }
 0x29d   : > { %10925 = vmatprep.mubr.msk.bf16.mxu1 %vm455_vm1, %v3243_v35  ;;  %v3253_v35 = vpack.c.bf16 %v3228_v39, %v3227_v56  ;;  %v3537_v56 = vld [vmem:[%s12767_s29 + $0x21] sm:$0xff]  ;;  %v3538_v39 = vld [vmem:[%s12767_s29 + $0x29] sm:$0xff] }
 0x29f   : > { %11432 = vmatmul.mubr.msk.bf16.gmra.mrb[12].mxu0 %vm455_vm1, %v7488_v58  ;;  %v7498_v58 = vpack.c.bf16 %v7480_v34, %v7479_v22  ;;  %v7789_v22 = vld [vmem:[%s13412_s16 + $0xa4] sm:$0xff]  ;;  %v7790_v34 = vld [vmem:[%s13412_s16 + $0xac] sm:$0xff] }
 0x2a0   : > { %11435 = vmatprep.mubr.msk.bf16.mxu0 %vm455_vm1, %v7489_v28  ;;  %v7807_v28 = vpack.c.bf16 %v7772_v37, %v7771_v11  ;;  %v7791_v11 = vld [vmem:[%s13412_s16 + $0xb4] sm:$0xff]  ;;  %v7792_v37 = vld [vmem:[%s13412_s16 + $0xbc] sm:$0xff] }
 0x2a4   : > { %10926 = vmatmul.mubr.msk.bf16.vlgmr.msra.gmra.mrb[0].mxu1 %vm455_vm1, %v3244_v62  ;;  %v3254_v62 = vpack.c.bf16 %v3230_v26, %v3229_v2  ;;  %v14218_v2 = vld [vmem:[%s14821_s3 + $0x18] sm:$0x3]  ;;  %v14221_v26 = vpack.c.bf16 %v7792_v37, %v7791_v11  ;;  %v3558_v11 = vld [vmem:[%s12767_s29 + $0xc9] sm:$0xff] }
 0x2a5   : > { %10929 = vmatprep.mubr.msk.bf16.mxu1 %vm455_vm1, %v3245_v49  ;;  %10962 = vmatpush3.bf16.msra.mxu1 %v3644_v4  ;;  %v3255_v49 = vpack.c.bf16 %v3232_v48, %v3231_v40  ;;  %v14130_v4 = vpack.c.bf16 %v7774_v14, %v7773_v16  ;;  %v3539_v40 = vld [vmem:[%s12767_s29 + $0x31] sm:$0xff]  ;;  %v3540_v48 = vld [vmem:[%s12767_s29 + $0x39] sm:$0xff]  ;;  %v7793_v14 = vld [vmem:[%s13412_s16 + $0xc4] sm:$0xff] }
 0x2a6   : > { %12556 = vmatprep.subr.msk.bf16.mxu1 %vm510_vm0, %v14066_v29  ;;  %v3572_v16 = vpack.c.bf16 %v3540_v48, %v3539_v40  ;;  %v3559_v48 = vld [vmem:[%s12767_s29 + $0xd1] sm:$0xff] }
 0x2a7   : > { %11436 = vmatmul.mubr.msk.bf16.gmra.mrb[16].mxu0 %vm455_vm1, %v7490_v54  ;;  %v14133_v54 = vpack.c.bf16 %v7776_v53, %v7775_v31  ;;  %v7795_v53 = vld [vmem:[%s13412_s16 + $0xd4] sm:$0xff] }
 0x2a8   : > { %11439 = vmatprep.mubr.msk.bf16.mxu0 %vm455_vm1, %v7491_v55  ;;  %v8208_v55 = vsel %vm510_vm0, %v14015_v41, 0  ;;  %v3256_v41 = vpack.c.bf16 %v3234_v63, %v3233_v43 }
 0x2ac   : > { %10930 = vmatmul.mubr.msk.bf16.gmra.mrb[4].mxu1 %vm455_vm1, %v3246_v1  ;;  %v14145_v1 = vld [vmem:[%s14821_s3 + $0x32] sm:$0x3] }
 0x2ad   : > { %10933 = vmatprep.mubr.msk.bf16.mxu1 %vm455_vm1, %v3247_v7  ;;  %v3257_v7 = vpack.c.bf16 %v3236_v60, %v3235_v13  ;;  %v3543_v13 = vld [vmem:[%s12767_s29 + $0x51] sm:$0xff]  ;;  %v3544_v60 = vld [vmem:[%s12767_s29 + $0x59] sm:$0xff]  ;;  %v8534_v40 = vsel %vm510_vm0, %v14145_v1, 0 }
 0x2af   : > { %11440 = vmatmul.mubr.msk.bf16.gmra.mrb[20].mxu0 %vm455_vm1, %v7492_v21  ;;  %v14157_v21 = vpack.c.bf16 %v7778_v59, %v7777_v6  ;;  %v3546_v6 = vld [vmem:[%s12767_s29 + $0x69] sm:$0xff]  ;;  %v3574_v59 = vpack.c.bf16 %v3544_v60, %v3543_v13  ;;  %v3567_v13 = vld [vmem:[%s12767_s29 + $0x111] sm:$0xff]  ;;  %v3568_v60 = vld [vmem:[%s12767_s29 + $0x119] sm:$0xff] }
 0x2b0   : > { %11443 = vmatprep.mubr.msk.bf16.mxu0 %vm455_vm1, %v7493_v57  ;;  %v14160_v57 = vpack.c.bf16 %v7780_v52, %v7779_v10  ;;  %v7798_v10 = vld [vmem:[%s13412_s16 + $0xec] sm:$0xff] }
 0x2b4   : > { %10934 = vmatmul.mubr.msk.bf16.gmra.mrb[8].mxu1 %vm455_vm1, %v3248_v9  ;;  %v3258_v9 = vpack.c.bf16 %v3238_v47, %v3237_v17  ;;  %v7799_v17 = vld [vmem:[%s13412_s16 + $0xf4] sm:$0xff]  ;;  %v7800_v47 = vld [vmem:[%s13412_s16 + $0xfc] sm:$0xff] }
 0x2b5   : > { %10937 = vmatprep.mubr.msk.bf16.mxu1 %vm455_vm1, %v3249_v45  ;;  %v3259_v45 = vpack.c.bf16 %v3240_v23, %v3239_v8  ;;  %v14259_v23 = vpack.c.bf16 %v7800_v47, %v7799_v17  ;;  %v4296_v17 = vsel %vm510_vm0, %v14218_v2, 0  ;;  %v3866_v47 = vld [vmem:[%s12767_s29 + $0x3a] sm:$0xff] }
 0x2b7   : > { %11444 = vmatmul.mubr.msk.bf16.gmra.mrb[24].mxu0 %vm455_vm1, %v7494_v18  ;;  %v14175_v18 = vpack.c.bf16 %v7782_v15, %v7781_v36  ;;  %v3548_v36 = vld [vmem:[%s12767_s29 + $0x79] sm:$0xff]  ;;  %v3549_v15 = vld [vmem:[%s12767_s29 + $0x81] sm:$0xff] }
 0x2b8   : > { %11447 = vmatprep.mubr.msk.bf16.mxu0 %vm455_vm1, %v7495_v50  ;;  %v14178_v50 = vpack.c.bf16 %v7784_v42, %v7783_v19  ;;  %v7801_v42 = vld [vmem:[%s13412_s16 + $0x104] sm:$0xff] }
 0x2bc   : > { %10938 = vmatmul.mubr.msk.bf16.gmra.mrb[12].mxu1 %vm455_vm1, %v3250_v12  ;;  %v3260_v12 = vpack.c.bf16 %v3242_v20, %v3241_v24  ;;  %v7802_v24 = vld [vmem:[%s13412_s16 + $0x10c] sm:$0xff] }
 0x2bd   : > { %10941 = vmatprep.mubr.msk.bf16.mxu1 %vm455_vm1, %v3251_v25  ;;  %v3569_v25 = vpack.c.bf16 %v3534_v27, %v3533_v32  ;;  %v7803_v32 = vld [vmem:[%s13412_s16 + $0x114] sm:$0xff]  ;;  %v7804_v27 = vld [vmem:[%s13412_s16 + $0x11c] sm:$0xff] }
 0x2bf   : > { %11448 = vmatmul.mubr.msk.bf16.gmra.mrb[28].mxu0 %vm455_vm1, %v7496_v61  ;;  %v14193_v61 = vpack.c.bf16 %v7786_v44, %v7785_v51  ;;  %v14277_v51 = vpack.c.bf16 %v7804_v27, %v7803_v32  ;;  %v3551_v44 = vld [vmem:[%s12767_s29 + $0x91] sm:$0xff]  ;;  %v3874_v32 = vld [vmem:[%s12767_s29 + $0x7a] sm:$0xff] }
 0x2c0   : > { %11451 = vmatprep.mubr.msk.bf16.mxu0 %vm455_vm1, %v7497_v38  ;;  %v14196_v38 = vpack.c.bf16 %v7788_v46, %v7787_v5  ;;  %v3553_v5 = vld [vmem:[%s12767_s29 + $0xa1] sm:$0xff]  ;;  %v3554_v46 = vld [vmem:[%s12767_s29 + $0xa9] sm:$0xff] }
 0x2c1   : > { %v3876_v27 = vld [vmem:[%s12767_s29 + $0x8a] sm:$0xff] }
 0x2c4   : > { %10942 = vmatmul.mubr.msk.bf16.gmra.mrb[16].mxu1 %vm455_vm1, %v3252_v0  ;;  %v3570_v0 = vpack.c.bf16 %v3536_v33, %v3535_v30  ;;  %v7805_v33 = vld [vmem:[%s13412_s16 + $0x124] sm:$0xff] }
 0x2c5   : > { %10945 = vmatprep.mubr.msk.bf16.mxu1 %vm455_vm1, %v3253_v35  ;;  %v3571_v35 = vpack.c.bf16 %v3538_v39, %v3537_v56  ;;  %v7806_v56 = vld [vmem:[%s13412_s16 + $0x12c] sm:$0xff]  ;;  %v3579_v39 = vpack.c.bf16 %v3554_v46, %v3553_v5  ;;  %v3878_v5 = vld [vmem:[%s12767_s29 + $0x9a] sm:$0xff] }
 0x2c6   : > { %v3880_v46 = vld [vmem:[%s12767_s29 + $0xaa] sm:$0xff] }
 0x2c7   : > { %11452 = vmatmul.mubr.msk.bf16.gmra.mrb[32].mxu0 %vm455_vm1, %v7498_v58  ;;  %v3970_v58 = vsel %vm510_vm0, %v14066_v29, 0  ;;  %v3541_v29 = vld [vmem:[%s12767_s29 + $0x41] sm:$0xff] }
 0x2c8   : > { %11457 = vmatprep.mubr.msk.bf16.mxu0 %vm455_vm1, %v7807_v28  ;;  %v14213_v28 = vpack.c.bf16 %v7790_v34, %v7789_v22  ;;  %v3555_v22 = vld [vmem:[%s12767_s29 + $0xb1] sm:$0xff]  ;;  %v3556_v34 = vld [vmem:[%s12767_s29 + $0xb9] sm:$0xff] }
 0x2c9   : > { %v3580_v37 = vpack.c.bf16 %v3556_v34, %v3555_v22  ;;  %v8424_v22 = vld [vmem:[%s13412_s16 + $0x2d] sm:$0xff] }
 0x2cc   : > { %10946 = vmatmul.mubr.msk.bf16.gmra.mrb[20].mxu1 %vm455_vm1, %v3254_v62  ;;  %v3542_v62 = vld [vmem:[%s12767_s29 + $0x49] sm:$0xff] }
 0x2cd   : > { %10949 = vmatprep.mubr.msk.bf16.mxu1 %vm455_vm1, %v3255_v49  ;;  %v7794_v49 = vld [vmem:[%s13412_s16 + $0xcc] sm:$0xff]  ;;  %v3573_v31 = vpack.c.bf16 %v3542_v62, %v3541_v29  ;;  %v3560_v29 = vld [vmem:[%s12767_s29 + $0xd9] sm:$0xff]  ;;  %v3561_v62 = vld [vmem:[%s12767_s29 + $0xe1] sm:$0xff] }
 0x2ce   : > { %v14238_v43 = vpack.c.bf16 %v7794_v49, %v7793_v14  ;;  %v3582_v14 = vpack.c.bf16 %v3560_v29, %v3559_v48  ;;  %v3563_v49 = vld [vmem:[%s12767_s29 + $0xf1] sm:$0xff]  ;;  %v8426_v48 = vld [vmem:[%s13412_s16 + $0x3d] sm:$0xff] }
 0x2cf   : > { %11458 = vmatmul.mubr.msk.bf16.vlgmr.msra.gmra.mrb[0].mxu0 %vm455_vm1, %v14130_v4 }
 0x2d0   : > { %11494 = vmatpush3.bf16.msra.mxu0 %v8208_v55  ;;  %11461 = vmatprep.mubr.msk.bf16.mxu0 %vm455_vm1, %v14133_v54  ;;  %v7796_v55 = vld [vmem:[%s13412_s16 + $0xdc] sm:$0xff] }
 0x2d1   : > { %12571 = vmatprep.subr.msk.bf16.mxu0 %vm510_vm0, %v14145_v1  ;;  %v14241_v63 = vpack.c.bf16 %v7796_v55, %v7795_v53  ;;  %v3566_v53 = vld [vmem:[%s12767_s29 + $0x109] sm:$0xff] }
 0x2d4   : > { %10950 = vmatmul.mubr.msk.bf16.gmra.mrb[24].mxu1 %vm455_vm1, %v3256_v41  ;;  %v3545_v41 = vld [vmem:[%s12767_s29 + $0x61] sm:$0xff] }
 0x2d5   : > { %10953 = vmatprep.mubr.msk.bf16.mxu1 %vm455_vm1, %v3257_v7  ;;  %v7797_v7 = vld [vmem:[%s13412_s16 + $0xe4] sm:$0xff]  ;;  %v3575_v52 = vpack.c.bf16 %v3546_v6, %v3545_v41 }
 0x2d6   : > { %v14256_v8 = vpack.c.bf16 %v7798_v10, %v7797_v7  ;;  %v3859_v41 = vld [vmem:[%s12767_s29 + $0x2] sm:$0xff]  ;;  %v3860_v6 = vld [vmem:[%s12767_s29 + $0xa] sm:$0xff]  ;;  %v3862_v7 = vld [vmem:[%s12767_s29 + $0x1a] sm:$0xff] }
 0x2d7   : > { %11462 = vmatmul.mubr.msk.bf16.gmra.mrb[4].mxu0 %vm455_vm1, %v14157_v21  ;;  %v3863_v10 = vld [vmem:[%s12767_s29 + $0x22] sm:$0xff] }
 0x2d8   : > { %11465 = vmatprep.mubr.msk.bf16.mxu0 %vm455_vm1, %v14160_v57 }
 0x2dc   : > { %10954 = vmatmul.mubr.msk.bf16.gmra.mrb[28].mxu1 %vm455_vm1, %v3258_v9  ;;  %v3547_v9 = vld [vmem:[%s12767_s29 + $0x71] sm:$0xff] }
 0x2dd   : > { %10957 = vmatprep.mubr.msk.bf16.mxu1 %vm455_vm1, %v3259_v45  ;;  %v3550_v45 = vld [vmem:[%s12767_s29 + $0x89] sm:$0xff]  ;;  %v3576_v19 = vpack.c.bf16 %v3548_v36, %v3547_v9  ;;  %v12619_v36 = vld [vmem:[%s14821_s3 + $0x1a] sm:$0x3] }
 0x2de   : > { %v3577_v20 = vpack.c.bf16 %v3550_v45, %v3549_v15  ;;  %v3867_v9 = vld [vmem:[%s12767_s29 + $0x42] sm:$0xff]  ;;  %v3869_v45 = vld [vmem:[%s12767_s29 + $0x52] sm:$0xff] }
 0x2df   : > { %11466 = vmatmul.mubr.msk.bf16.gmra.mrb[8].mxu0 %vm455_vm1, %v14175_v18 }
 0x2e0   : > { %11469 = vmatprep.mubr.msk.bf16.mxu0 %vm455_vm1, %v14178_v50 }
 0x2e4   : > { %10958 = vmatmul.mubr.msk.bf16.gmra.mrb[32].mxu1 %vm455_vm1, %v3260_v12  ;;  %v14274_v12 = vpack.c.bf16 %v7802_v24, %v7801_v42  ;;  %v3872_v42 = vld [vmem:[%s12767_s29 + $0x6a] sm:$0xff] }
 0x2e5   : > { %10963 = vmatprep.mubr.msk.bf16.mxu1 %vm455_vm1, %v3569_v25  ;;  %v3552_v25 = vld [vmem:[%s12767_s29 + $0x99] sm:$0xff] }
 0x2e6   : > { %v3578_v30 = vpack.c.bf16 %v3552_v25, %v3551_v44  ;;  %v3877_v25 = vld [vmem:[%s12767_s29 + $0x92] sm:$0xff] }
 0x2e7   : > { %11470 = vmatmul.mubr.msk.bf16.gmra.mrb[12].mxu0 %vm455_vm1, %v14193_v61 }
 0x2e8   : > { %11473 = vmatprep.mubr.msk.bf16.mxu0 %vm455_vm1, %v14196_v38 }
 0x2ec   : > { %10964 = vmatmul.mubr.msk.bf16.vlgmr.msra.gmra.mrb[0].mxu1 %vm455_vm1, %v3570_v0  ;;  %v14290_v0 = vpack.c.bf16 %v7806_v56, %v7805_v33  ;;  %v8132_v33 = vld [vmem:[%s13412_s16 + $0x13c] sm:$0xff] }
 0x2ed   : > { %10967 = vmatprep.mubr.msk.bf16.mxu1 %vm455_vm1, %v3571_v35  ;;  %11000 = vmatpush3.bf16.msra.mxu1 %v3970_v58  ;;  %v3557_v35 = vld [vmem:[%s12767_s29 + $0xc1] sm:$0xff] }
 0x2ee   : > { %12557 = vmatprep.subr.msk.bf16.mxu1 %vm510_vm0, %v14218_v2  ;;  %v3581_v58 = vpack.c.bf16 %v3558_v11, %v3557_v35  ;;  %v3881_v35 = vld [vmem:[%s12767_s29 + $0xb2] sm:$0xff]  ;;  %v3883_v11 = vld [vmem:[%s12767_s29 + $0xc2] sm:$0xff] }
 0x2ef   : > { %11474 = vmatmul.mubr.msk.bf16.gmra.mrb[16].mxu0 %vm455_vm1, %v14213_v28 }
 0x2f0   : > { %11477 = vmatprep.mubr.msk.bf16.mxu0 %vm455_vm1, %v14221_v26 }
 0x2f4   : > { %10968 = vmatmul.mubr.msk.bf16.gmra.mrb[4].mxu1 %vm455_vm1, %v3572_v16  ;;  %v3562_v16 = vld [vmem:[%s12767_s29 + $0xe9] sm:$0xff] }
 0x2f5   : > { %10971 = vmatprep.mubr.msk.bf16.mxu1 %vm455_vm1, %v3573_v31  ;;  %v3583_v1 = vpack.c.bf16 %v3562_v16, %v3561_v62  ;;  %v3564_v31 = vld [vmem:[%s12767_s29 + $0xf9] sm:$0xff]  ;;  %v8427_v62 = vld [vmem:[%s13412_s16 + $0x45] sm:$0xff]  ;;  %v8428_v16 = vld [vmem:[%s13412_s16 + $0x4d] sm:$0xff] }
 0x2f7   : > { %11478 = vmatmul.mubr.msk.bf16.gmra.mrb[20].mxu0 %vm455_vm1, %v14238_v43 }
 0x2f8   : > { %11481 = vmatprep.mubr.msk.bf16.mxu0 %vm455_vm1, %v14241_v63 }
 0x2fc   : > { %10972 = vmatmul.mubr.msk.bf16.gmra.mrb[8].mxu1 %vm455_vm1, %v3574_v59  ;;  %v3861_v59 = vld [vmem:[%s12767_s29 + $0x12] sm:$0xff] }
 0x2fd   : > { %10975 = vmatprep.mubr.msk.bf16.mxu1 %vm455_vm1, %v3575_v52  ;;  %v3864_v52 = vld [vmem:[%s12767_s29 + $0x2a] sm:$0xff] }
 0x2ff   : > { %11482 = vmatmul.mubr.msk.bf16.gmra.mrb[24].mxu0 %vm455_vm1, %v14256_v8 }
 0x300   : > { %11485 = vmatprep.mubr.msk.bf16.mxu0 %vm455_vm1, %v14259_v23 }
 0x304   : > { %10976 = vmatmul.mubr.msk.bf16.gmra.mrb[12].mxu1 %vm455_vm1, %v3576_v19  ;;  %v3870_v19 = vld [vmem:[%s12767_s29 + $0x5a] sm:$0xff] }
 0x305   : > { %10979 = vmatprep.mubr.msk.bf16.mxu1 %vm455_vm1, %v3577_v20  ;;  %v14387_v24 = vpack.c.bf16 %v3870_v19, %v3869_v45  ;;  %v3873_v20 = vld [vmem:[%s12767_s29 + $0x72] sm:$0xff] }
 0x307   : > { %11486 = vmatmul.mubr.msk.bf16.gmra.mrb[28].mxu0 %vm455_vm1, %v14274_v12 }
 0x308   : > { %11489 = vmatprep.mubr.msk.bf16.mxu0 %vm455_vm1, %v14277_v51 }
 0x30c   : > { %10980 = vmatmul.mubr.msk.bf16.gmra.mrb[16].mxu1 %vm455_vm1, %v3578_v30  ;;  %v8131_v30 = vld [vmem:[%s13412_s16 + $0x134] sm:$0xff] }
 0x30d   : > { %10983 = vmatprep.mubr.msk.bf16.mxu1 %vm455_vm1, %v3579_v39  ;;  %v8423_v39 = vld [vmem:[%s13412_s16 + $0x25] sm:$0xff]  ;;  %v8150_v34 = vpack.c.bf16 %v8132_v33, %v8131_v30  ;;  %v8442_v30 = vld [vmem:[%s13412_s16 + $0xbd] sm:$0xff] }
 0x30e   : > { %v8443_v33 = vld [vmem:[%s13412_s16 + $0xc5] sm:$0xff] }
 0x30f   : > { %11490 = vmatmul.mubr.msk.bf16.gmra.mrb[32].mxu0 %vm455_vm1, %v14290_v0 }
 0x310   : > { %11495 = vmatprep.mubr.msk.bf16.mxu0 %vm455_vm1, %v14130_v4  ;;  %v14313_v4 = vld [vmem:[%s14821_s3 + $0x34] sm:$0x3] }
 0x314   : > { %10984 = vmatmul.mubr.msk.bf16.gmra.mrb[20].mxu1 %vm455_vm1, %v3580_v37  ;;  %v3884_v37 = vld [vmem:[%s12767_s29 + $0xca] sm:$0xff] }
 0x315   : > { %10987 = vmatprep.mubr.msk.bf16.mxu1 %vm455_vm1, %v3581_v58  ;;  %v14443_v29 = vpack.c.bf16 %v3884_v37, %v3883_v11  ;;  %v8451_v37 = vld [vmem:[%s13412_s16 + $0x105] sm:$0xff] }
 0x317   : > { %11496 = vmatmul.mubr.msk.bf16.vlgmr.msra.gmra.mrb[0].mxu0 %vm455_vm1, %v14133_v54  ;;  %v3565_v54 = vld [vmem:[%s12767_s29 + $0x101] sm:$0xff] }
 0x318   : > { %11532 = vmatpush3.bf16.msra.mxu0 %v8534_v40  ;;  %11499 = vmatprep.mubr.msk.bf16.mxu0 %vm455_vm1, %v14157_v21  ;;  %v3584_v21 = vpack.c.bf16 %v3564_v31, %v3563_v49  ;;  %v3585_v55 = vpack.c.bf16 %v3566_v53, %v3565_v54  ;;  %v8425_v40 = vld [vmem:[%s13412_s16 + $0x35] sm:$0xff]  ;;  %v8860_v49 = vsel %vm510_vm0, %v14313_v4, 0  ;;  %v3887_v53 = vld [vmem:[%s12767_s29 + $0xe2] sm:$0xff] }
 0x319   : > { %12572 = vmatprep.subr.msk.bf16.mxu0 %vm510_vm0, %v14313_v4  ;;  %v3885_v31 = vld [vmem:[%s12767_s29 + $0xd2] sm:$0xff]  ;;  %v3886_v54 = vld [vmem:[%s12767_s29 + $0xda] sm:$0xff] }
 0x31a   : > { %v8430_v4 = vld [vmem:[%s13412_s16 + $0x5d] sm:$0xff] }
 0x31c   : > { %10988 = vmatmul.mubr.msk.bf16.gmra.mrb[24].mxu1 %vm455_vm1, %v3582_v14  ;;  %v8460_v14 = vpack.c.bf16 %v8426_v48, %v8425_v40  ;;  %v8452_v40 = vld [vmem:[%s13412_s16 + $0x10d] sm:$0xff] }
 0x31d   : > { %10991 = vmatprep.mubr.msk.bf16.mxu1 %vm455_vm1, %v3583_v1  ;;  %v8461_v1 = vpack.c.bf16 %v8428_v16, %v8427_v62  ;;  %v8454_v62 = vld [vmem:[%s13412_s16 + $0x11d] sm:$0xff]  ;;  %v8455_v16 = vld [vmem:[%s13412_s16 + $0x125] sm:$0xff] }
 0x31f   : > { %11500 = vmatmul.mubr.msk.bf16.gmra.mrb[4].mxu0 %vm455_vm1, %v14160_v57  ;;  %v3586_v57 = vpack.c.bf16 %v3568_v60, %v3567_v13  ;;  %v8429_v13 = vld [vmem:[%s13412_s16 + $0x55] sm:$0xff] }
 0x320   : > { %11503 = vmatprep.mubr.msk.bf16.mxu0 %vm455_vm1, %v14175_v18  ;;  %v3895_v18 = vpack.c.bf16 %v3860_v6, %v3859_v41  ;;  %v8431_v41 = vld [vmem:[%s13412_s16 + $0x65] sm:$0xff]  ;;  %v8432_v6 = vld [vmem:[%s13412_s16 + $0x6d] sm:$0xff] }
 0x324   : > { %10992 = vmatmul.mubr.msk.bf16.gmra.mrb[28].mxu1 %vm455_vm1, %v3584_v21  ;;  %v3888_v21 = vld [vmem:[%s12767_s29 + $0xea] sm:$0xff] }
 0x325   : > { %10995 = vmatprep.mubr.msk.bf16.mxu1 %vm455_vm1, %v3585_v55  ;;  %v14458_v55 = vpack.c.bf16 %v3886_v54, %v3885_v31  ;;  %v14463_v60 = vpack.c.bf16 %v3888_v21, %v3887_v53  ;;  %v8749_v31 = vld [vmem:[%s13412_s16 + $0x26] sm:$0xff]  ;;  %v8750_v54 = vld [vmem:[%s13412_s16 + $0x2e] sm:$0xff]  ;;  %v8752_v21 = vld [vmem:[%s13412_s16 + $0x3e] sm:$0xff] }
 0x327   : > { %11504 = vmatmul.mubr.msk.bf16.gmra.mrb[8].mxu0 %vm455_vm1, %v14178_v50  ;;  %v14349_v50 = vpack.c.bf16 %v3862_v7, %v3861_v59  ;;  %v3889_v59 = vld [vmem:[%s12767_s29 + $0xf2] sm:$0xff]  ;;  %v3890_v7 = vld [vmem:[%s12767_s29 + $0xfa] sm:$0xff] }
 0x328   : > { %11507 = vmatprep.mubr.msk.bf16.mxu0 %vm455_vm1, %v14193_v61  ;;  %v14353_v61 = vpack.c.bf16 %v3864_v52, %v3863_v10  ;;  %v3891_v10 = vld [vmem:[%s12767_s29 + $0x102] sm:$0xff]  ;;  %v3892_v52 = vld [vmem:[%s12767_s29 + $0x10a] sm:$0xff] }
 0x32c   : > { %10996 = vmatmul.mubr.msk.bf16.gmra.mrb[32].mxu1 %vm455_vm1, %v3586_v57  ;;  %v8462_v57 = vpack.c.bf16 %v8430_v4, %v8429_v13  ;;  %v8753_v13 = vld [vmem:[%s13412_s16 + $0x46] sm:$0xff]  ;;  %v8754_v4 = vld [vmem:[%s13412_s16 + $0x4e] sm:$0xff] }
 0x32d   : > { %11001 = vmatprep.mubr.msk.bf16.mxu1 %vm455_vm1, %v3895_v18  ;;  %v8463_v18 = vpack.c.bf16 %v8432_v6, %v8431_v41  ;;  %v8756_v6 = vld [vmem:[%s13412_s16 + $0x5e] sm:$0xff] }
 0x32f   : > { %11508 = vmatmul.mubr.msk.bf16.gmra.mrb[12].mxu0 %vm455_vm1, %v14196_v38  ;;  %v3865_v38 = vld [vmem:[%s12767_s29 + $0x32] sm:$0xff] }
 0x330   : > { %11511 = vmatprep.mubr.msk.bf16.mxu0 %vm455_vm1, %v14213_v28  ;;  %v3868_v28 = vld [vmem:[%s12767_s29 + $0x4a] sm:$0xff]  ;;  %v14371_v2 = vpack.c.bf16 %v3866_v47, %v3865_v38  ;;  %v8433_v38 = vld [vmem:[%s13412_s16 + $0x75] sm:$0xff]  ;;  %v8434_v47 = vld [vmem:[%s13412_s16 + $0x7d] sm:$0xff] }
 0x331   : > { %v14375_v15 = vpack.c.bf16 %v3868_v28, %v3867_v9  ;;  %v14481_v9 = vpack.c.bf16 %v3892_v52, %v3891_v10  ;;  %v8435_v28 = vld [vmem:[%s13412_s16 + $0x85] sm:$0xff]  ;;  %v8464_v45 = vpack.c.bf16 %v8434_v47, %v8433_v38  ;;  %v8762_v52 = vld [vmem:[%s13412_s16 + $0x8e] sm:$0xff] }
 0x332   : > { %v8761_v10 = vld [vmem:[%s13412_s16 + $0x86] sm:$0xff] }
 0x333   : > { %v4220_v47 = vld [vmem:[%s12767_s29 + $0x12a] sm:$0xff] }
 0x334   : > { %11002 = vmatmul.mubr.msk.bf16.vlgmr.msra.gmra.mrb[0].mxu1 %vm455_vm1, %v14349_v50 }
 0x335   : > { %11005 = vmatprep.mubr.msk.bf16.mxu1 %vm455_vm1, %v14353_v61  ;;  %11038 = vmatpush3.bf16.msra.mxu1 %v4296_v17  ;;  %v14476_v17 = vpack.c.bf16 %v3890_v7, %v3889_v59  ;;  %v8760_v7 = vld [vmem:[%s13412_s16 + $0x7e] sm:$0xff] }
 0x336   : > { %12559 = vmatprep.subr.msk.bf16.mxu1 %vm510_vm0, %v12619_v36  ;;  %v8436_v36 = vld [vmem:[%s13412_s16 + $0x8d] sm:$0xff] }
 0x337   : > { %11512 = vmatmul.mubr.msk.bf16.gmra.mrb[16].mxu0 %vm455_vm1, %v14221_v26  ;;  %v3871_v26 = vld [vmem:[%s12767_s29 + $0x62] sm:$0xff]  ;;  %v8465_v19 = vpack.c.bf16 %v8436_v36, %v8435_v28  ;;  %v4531_v28 = vld [vmem:[%s12767_s29 + $0xb3] sm:$0xff] }
 0x338   : > { %11515 = vmatprep.mubr.msk.bf16.mxu0 %vm455_vm1, %v14238_v43  ;;  %v14391_v43 = vpack.c.bf16 %v3872_v42, %v3871_v26  ;;  %v3893_v26 = vld [vmem:[%s12767_s29 + $0x112] sm:$0xff]  ;;  %v3894_v42 = vld [vmem:[%s12767_s29 + $0x11a] sm:$0xff] }
 0x339   : > { %v4532_v36 = vld [vmem:[%s12767_s29 + $0xbb] sm:$0xff] }
 0x33c   : > { %11006 = vmatmul.mubr.msk.bf16.gmra.mrb[4].mxu1 %vm455_vm1, %v14371_v2 }
 0x33d   : > { %11009 = vmatprep.mubr.msk.bf16.mxu1 %vm455_vm1, %v14375_v15 }
 0x33f   : > { %11516 = vmatmul.mubr.msk.bf16.gmra.mrb[20].mxu0 %vm455_vm1, %v14241_v63  ;;  %v3875_v63 = vld [vmem:[%s12767_s29 + $0x82] sm:$0xff] }
 0x340   : > { %11519 = vmatprep.mubr.msk.bf16.mxu0 %vm455_vm1, %v14256_v8  ;;  %v14403_v8 = vpack.c.bf16 %v3874_v32, %v3873_v20  ;;  %v14407_v44 = vpack.c.bf16 %v3876_v27, %v3875_v63  ;;  %v14492_v20 = vpack.c.bf16 %v3894_v42, %v3893_v26  ;;  %v8437_v32 = vld [vmem:[%s13412_s16 + $0x95] sm:$0xff]  ;;  %v8438_v63 = vld [vmem:[%s13412_s16 + $0x9d] sm:$0xff]  ;;  %v8439_v27 = vld [vmem:[%s13412_s16 + $0xa5] sm:$0xff]  ;;  %v4557_v26 = vpack.c.bf16 %v4532_v36, %v4531_v28 }
 0x341   : > { %v8765_v42 = vld [vmem:[%s13412_s16 + $0xa6] sm:$0xff] }
 0x344   : > { %11010 = vmatmul.mubr.msk.bf16.gmra.mrb[8].mxu1 %vm455_vm1, %v14387_v24 }
 0x345   : > { %11013 = vmatprep.mubr.msk.bf16.mxu1 %vm455_vm1, %v14391_v43 }
 0x347   : > { %11520 = vmatmul.mubr.msk.bf16.gmra.mrb[24].mxu0 %vm455_vm1, %v14259_v23  ;;  %v3879_v23 = vld [vmem:[%s12767_s29 + $0xa2] sm:$0xff] }
 0x348   : > { %11523 = vmatprep.mubr.msk.bf16.mxu0 %vm455_vm1, %v14274_v12  ;;  %v14419_v12 = vpack.c.bf16 %v3878_v5, %v3877_v25  ;;  %v14425_v56 = vpack.c.bf16 %v3880_v46, %v3879_v23  ;;  %v8440_v25 = vld [vmem:[%s13412_s16 + $0xad] sm:$0xff]  ;;  %v8466_v5 = vpack.c.bf16 %v8438_v63, %v8437_v32  ;;  %v8441_v46 = vld [vmem:[%s13412_s16 + $0xb5] sm:$0xff] }
 0x349   : > { %v8467_v23 = vpack.c.bf16 %v8440_v25, %v8439_v27  ;;  %v4533_v27 = vld [vmem:[%s12767_s29 + $0xc3] sm:$0xff]  ;;  %v4534_v25 = vld [vmem:[%s12767_s29 + $0xcb] sm:$0xff] }
 0x34c   : > { %11014 = vmatmul.mubr.msk.bf16.gmra.mrb[12].mxu1 %vm455_vm1, %v14403_v8 }
 0x34d   : > { %11017 = vmatprep.mubr.msk.bf16.mxu1 %vm455_vm1, %v14407_v44 }
 0x34f   : > { %11524 = vmatmul.mubr.msk.bf16.gmra.mrb[28].mxu0 %vm455_vm1, %v14277_v51  ;;  %v8459_v51 = vpack.c.bf16 %v8424_v22, %v8423_v39  ;;  %v8444_v39 = vld [vmem:[%s13412_s16 + $0xcd] sm:$0xff]  ;;  %v8468_v22 = vpack.c.bf16 %v8442_v30, %v8441_v46  ;;  %v4558_v46 = vpack.c.bf16 %v4534_v25, %v4533_v27  ;;  %v8767_v30 = vld [vmem:[%s13412_s16 + $0xb6] sm:$0xff] }
 0x350   : > { %11527 = vmatprep.mubr.msk.bf16.mxu0 %vm455_vm1, %v14290_v0  ;;  %v3882_v0 = vld [vmem:[%s12767_s29 + $0xba] sm:$0xff] }
 0x351   : > { %v14438_v58 = vpack.c.bf16 %v3882_v0, %v3881_v35  ;;  %v8447_v35 = vld [vmem:[%s13412_s16 + $0xe5] sm:$0xff]  ;;  %v8448_v0 = vld [vmem:[%s13412_s16 + $0xed] sm:$0xff] }
 0x354   : > { %11018 = vmatmul.mubr.msk.bf16.gmra.mrb[16].mxu1 %vm455_vm1, %v14419_v12 }
 0x355   : > { %11021 = vmatprep.mubr.msk.bf16.mxu1 %vm455_vm1, %v14425_v56 }
 0x357   : > { %11528 = vmatmul.mubr.msk.bf16.gmra.mrb[32].mxu0 %vm455_vm1, %v8150_v34  ;;  %v8469_v34 = vpack.c.bf16 %v8444_v39, %v8443_v33  ;;  %v8768_v33 = vld [vmem:[%s13412_s16 + $0xbe] sm:$0xff] }
 0x358   : > { %11533 = vmatprep.mubr.msk.bf16.mxu0 %vm455_vm1, %v8459_v51  ;;  %v8446_v51 = vld [vmem:[%s13412_s16 + $0xdd] sm:$0xff] }
 0x35c   : > { %11022 = vmatmul.mubr.msk.bf16.gmra.mrb[20].mxu1 %vm455_vm1, %v14438_v58 }
 0x35d   : > { %11025 = vmatprep.mubr.msk.bf16.mxu1 %vm455_vm1, %v14443_v29 }
 0x35f   : > { %11534 = vmatmul.mubr.msk.bf16.vlgmr.msra.gmra.mrb[0].mxu0 %vm455_vm1, %v8460_v14  ;;  %v8456_v14 = vld [vmem:[%s13412_s16 + $0x12d] sm:$0xff] }
 0x360   : > { %11570 = vmatpush3.bf16.msra.mxu0 %v8860_v49  ;;  %11537 = vmatprep.mubr.msk.bf16.mxu0 %vm455_vm1, %v8461_v1  ;;  %v8458_v49 = vld [vmem:[%s13412_s16 + $0x13d] sm:$0xff] }
 0x364   : > { %11026 = vmatmul.mubr.msk.bf16.gmra.mrb[24].mxu1 %vm455_vm1, %v14458_v55 }
 0x365   : > { %11029 = vmatprep.mubr.msk.bf16.mxu1 %vm455_vm1, %v14463_v60 }
 0x367   : > { %11538 = vmatmul.mubr.msk.bf16.gmra.mrb[4].mxu0 %vm455_vm1, %v8462_v57  ;;  %v8757_v57 = vld [vmem:[%s13412_s16 + $0x66] sm:$0xff] }
 0x368   : > { %11541 = vmatprep.mubr.msk.bf16.mxu0 %vm455_vm1, %v8463_v18  ;;  %v8758_v18 = vld [vmem:[%s13412_s16 + $0x6e] sm:$0xff] }
 0x36c   : > { %11030 = vmatmul.mubr.msk.bf16.gmra.mrb[28].mxu1 %vm455_vm1, %v14476_v17 }
 0x36d   : > { %11033 = vmatprep.mubr.msk.bf16.mxu1 %vm455_vm1, %v14481_v9 }
 0x36f   : > { %11542 = vmatmul.mubr.msk.bf16.gmra.mrb[8].mxu0 %vm455_vm1, %v8464_v45 }
 0x370   : > { %11545 = vmatprep.mubr.msk.bf16.mxu0 %vm455_vm1, %v8465_v19  ;;  %v8763_v19 = vld [vmem:[%s13412_s16 + $0x96] sm:$0xff] }
 0x374   : > { %11034 = vmatmul.mubr.msk.bf16.gmra.mrb[32].mxu1 %vm455_vm1, %v14492_v20 }
 0x375   : > { %11039 = vmatprep.mubr.msk.bf16.mxu1 %vm455_vm1, %v14349_v50  ;;  %v8445_v50 = vld [vmem:[%s13412_s16 + $0xd5] sm:$0xff] }
 0x376   : > { %v8470_v11 = vpack.c.bf16 %v8446_v51, %v8445_v50  ;;  %v8794_v50 = vpack.c.bf16 %v8768_v33, %v8767_v30  ;;  %v14676_v30 = vld [vmem:[%s14822_s4] ss:$0 sm:$0xff] }
 0x377   : > { %11546 = vmatmul.mubr.msk.bf16.gmra.mrb[12].mxu0 %vm455_vm1, %v8466_v5  ;;  %v4535_v5 = vld [vmem:[%s12767_s29 + $0xd3] sm:$0xff] }
 0x378   : > { %11549 = vmatprep.mubr.msk.bf16.mxu0 %vm455_vm1, %v8467_v23  ;;  %v4536_v23 = vld [vmem:[%s12767_s29 + $0xdb] sm:$0xff] }
 0x379   : > { %v4559_v39 = vpack.c.bf16 %v4536_v23, %v4535_v5 }
 0x37c   : > { %11040 = vmatmul.mubr.msk.bf16.vlgmr.msra.gmra.mrb[0].mxu1 %vm455_vm1, %v14353_v61  ;;  %v8471_v61 = vpack.c.bf16 %v8448_v0, %v8447_v35  ;;  %v4537_v35 = vld [vmem:[%s12767_s29 + $0xe3] sm:$0xff]  ;;  %v4538_v0 = vld [vmem:[%s12767_s29 + $0xeb] sm:$0xff] }
 0x37d   : > { %11043 = vmatprep.mubr.msk.bf16.mxu1 %vm455_vm1, %v14371_v2  ;;  %11608 = vmatpush3.bf16.msra.mxu1 %v12732_v3  ;;  %v8449_v3 = vld [vmem:[%s13412_s16 + $0xf5] sm:$0xff]  ;;  %v8450_v2 = vld [vmem:[%s13412_s16 + $0xfd] sm:$0xff] }
 0x37e   : > { %v8472_v48 = vpack.c.bf16 %v8450_v2, %v8449_v3  ;;  %v4560_v3 = vpack.c.bf16 %v4538_v0, %v4537_v35  ;;  %v8771_v2 = vld [vmem:[%s13412_s16 + $0xd6] sm:$0xff] }
 0x37f   : > { %11550 = vmatmul.mubr.msk.bf16.gmra.mrb[16].mxu0 %vm455_vm1, %v8468_v22  ;;  %v8769_v22 = vld [vmem:[%s13412_s16 + $0xc6] sm:$0xff] }
 0x380   : > { %11553 = vmatprep.mubr.msk.bf16.mxu0 %vm455_vm1, %v8469_v34  ;;  %v8770_v34 = vld [vmem:[%s13412_s16 + $0xce] sm:$0xff] }
 0x381   : > { %v8795_v51 = vpack.c.bf16 %v8770_v34, %v8769_v22 }
 0x384   : > { %11044 = vmatmul.mubr.msk.bf16.gmra.mrb[4].mxu1 %vm455_vm1, %v14375_v15  ;;  %v8473_v15 = vpack.c.bf16 %v8452_v40, %v8451_v37  ;;  %v8772_v37 = vld [vmem:[%s13412_s16 + $0xde] sm:$0xff] }
 0x385   : > { %11047 = vmatprep.mubr.msk.bf16.mxu1 %vm455_vm1, %v14387_v24  ;;  %v8453_v24 = vld [vmem:[%s13412_s16 + $0x115] sm:$0xff] }
 0x386   : > { %v8474_v1 = vpack.c.bf16 %v8454_v62, %v8453_v24  ;;  %v8796_v24 = vpack.c.bf16 %v8772_v37, %v8771_v2 }
 0x387   : > { %11554 = vmatmul.mubr.msk.bf16.gmra.mrb[20].mxu0 %vm455_vm1, %v8470_v11  ;;  %v4539_v11 = vld [vmem:[%s12767_s29 + $0xf3] sm:$0xff] }
 0x388   : > { %11557 = vmatprep.mubr.msk.bf16.mxu0 %vm455_vm1, %v8471_v61  ;;  %v4540_v61 = vld [vmem:[%s12767_s29 + $0xfb] sm:$0xff] }
 0x389   : > { %v4561_v40 = vpack.c.bf16 %v4540_v61, %v4539_v11 }
 0x38c   : > { %11048 = vmatmul.mubr.msk.bf16.gmra.mrb[8].mxu1 %vm455_vm1, %v14391_v43  ;;  %v8475_v43 = vpack.c.bf16 %v8456_v14, %v8455_v16  ;;  %v4541_v16 = vld [vmem:[%s12767_s29 + $0x103] sm:$0xff]  ;;  %v4542_v14 = vld [vmem:[%s12767_s29 + $0x10b] sm:$0xff] }
 0x38d   : > { %11051 = vmatprep.mubr.msk.bf16.mxu1 %vm455_vm1, %v14403_v8  ;;  %v8457_v8 = vld [vmem:[%s13412_s16 + $0x135] sm:$0xff] }
 0x38e   : > { %v8476_v53 = vpack.c.bf16 %v8458_v49, %v8457_v8  ;;  %v4562_v8 = vpack.c.bf16 %v4542_v14, %v4541_v16  ;;  %v8775_v49 = vld [vmem:[%s13412_s16 + $0xf6] sm:$0xff] }
 0x38f   : > { %11558 = vmatmul.mubr.msk.bf16.gmra.mrb[24].mxu0 %vm455_vm1, %v8472_v48  ;;  %v8773_v48 = vld [vmem:[%s13412_s16 + $0xe6] sm:$0xff] }
 0x390   : > { %11561 = vmatprep.mubr.msk.bf16.mxu0 %vm455_vm1, %v8473_v15  ;;  %v8774_v15 = vld [vmem:[%s13412_s16 + $0xee] sm:$0xff] }
 0x391   : > { %v8797_v62 = vpack.c.bf16 %v8774_v15, %v8773_v48 }
 0x394   : > { %11052 = vmatmul.mubr.msk.bf16.gmra.mrb[12].mxu1 %vm455_vm1, %v14407_v44  ;;  %v8785_v44 = vpack.c.bf16 %v8750_v54, %v8749_v31  ;;  %v8776_v31 = vld [vmem:[%s13412_s16 + $0xfe] sm:$0xff] }
 0x395   : > { %11055 = vmatprep.mubr.msk.bf16.mxu1 %vm455_vm1, %v14419_v12  ;;  %v8751_v12 = vld [vmem:[%s13412_s16 + $0x36] sm:$0xff] }
 0x396   : > { %v8786_v41 = vpack.c.bf16 %v8752_v21, %v8751_v12  ;;  %v8798_v12 = vpack.c.bf16 %v8776_v31, %v8775_v49 }
 0x397   : > { %11562 = vmatmul.mubr.msk.bf16.gmra.mrb[28].mxu0 %vm455_vm1, %v8474_v1  ;;  %v4543_v1 = vld [vmem:[%s12767_s29 + $0x113] sm:$0xff] }
 0x398   : > { %11565 = vmatprep.mubr.msk.bf16.mxu0 %vm455_vm1, %v8475_v43  ;;  %v4544_v43 = vld [vmem:[%s12767_s29 + $0x11b] sm:$0xff] }
 0x399   : > { %v4563_v54 = vpack.c.bf16 %v4544_v43, %v4543_v1 }
 0x39c   : > { %11056 = vmatmul.mubr.msk.bf16.gmra.mrb[16].mxu1 %vm455_vm1, %v14425_v56  ;;  %v8787_v56 = vpack.c.bf16 %v8754_v4, %v8753_v13  ;;  %v4545_v13 = vld [vmem:[%s12767_s29 + $0x123] sm:$0xff]  ;;  %v4546_v4 = vld [vmem:[%s12767_s29 + $0x12b] sm:$0xff] }
 0x39d   : > { %11059 = vmatprep.mubr.msk.bf16.mxu1 %vm455_vm1, %v14438_v58  ;;  %v8755_v58 = vld [vmem:[%s13412_s16 + $0x56] sm:$0xff] }
 0x39e   : > { %v8788_v59 = vpack.c.bf16 %v8756_v6, %v8755_v58  ;;  %v8780_v58 = vld [vmem:[%s13412_s16 + $0x11e] sm:$0xff]  ;;  %v8781_v6 = vld [vmem:[%s13412_s16 + $0x126] sm:$0xff] }
 0x39f   : > { %11566 = vmatmul.mubr.msk.bf16.gmra.mrb[32].mxu0 %vm455_vm1, %v8476_v53  ;;  %v8777_v53 = vld [vmem:[%s13412_s16 + $0x106] sm:$0xff] }
 0x3a0   : > { %11571 = vmatprep.mubr.msk.bf16.mxu0 %vm455_vm1, %v8785_v44  ;;  %v8778_v44 = vld [vmem:[%s13412_s16 + $0x10e] sm:$0xff] }
 0x3a1   : > { %v8799_v21 = vpack.c.bf16 %v8778_v44, %v8777_v53 }
 0x3a4   : > { %11060 = vmatmul.mubr.msk.bf16.gmra.mrb[20].mxu1 %vm455_vm1, %v14443_v29  ;;  %v8789_v29 = vpack.c.bf16 %v8758_v18, %v8757_v57  ;;  %v8782_v57 = vld [vmem:[%s13412_s16 + $0x12e] sm:$0xff] }
 0x3a5   : > { %11063 = vmatprep.mubr.msk.bf16.mxu1 %vm455_vm1, %v14458_v55  ;;  %v8759_v55 = vld [vmem:[%s13412_s16 + $0x76] sm:$0xff] }
 0x3a6   : > { %v8790_v38 = vpack.c.bf16 %v8760_v7, %v8759_v55  ;;  %v8784_v55 = vld [vmem:[%s13412_s16 + $0x13e] sm:$0xff] }
 0x3a7   : > { %11572 = vmatmul.mubr.msk.bf16.vlgmr.msra.gmra.mrb[0].mxu0 %vm455_vm1, %v8786_v41  ;;  %v4564_v41 = vpack.c.bf16 %v4546_v4, %v4545_v13 }
 0x3a8   : > { %11575 = vmatprep.mubr.msk.bf16.mxu0 %vm455_vm1, %v8787_v56  ;;  %v8779_v56 = vld [vmem:[%s13412_s16 + $0x116] sm:$0xff] }
 0x3a9   : > { %v8800_v18 = vpack.c.bf16 %v8780_v58, %v8779_v56 }
 0x3ac   : > { %11064 = vmatmul.mubr.msk.bf16.gmra.mrb[24].mxu1 %vm455_vm1, %v14463_v60  ;;  %v8791_v60 = vpack.c.bf16 %v8762_v52, %v8761_v10 }
 0x3ad   : > { %11067 = vmatprep.mubr.msk.bf16.mxu1 %vm455_vm1, %v14476_v17  ;;  %v4219_v17 = vld [vmem:[%s12767_s29 + $0x122] sm:$0xff]  ;;  %s12578_s29 = smul.u32 576, %s14835_s19 }
 0x3ae   : > { %v4238_v45 = vpack.c.bf16 %v4220_v47, %v4219_v17 }
 0x3af   : > { %11576 = vmatmul.mubr.msk.bf16.gmra.mrb[4].mxu0 %vm455_vm1, %v8788_v59  ;;  %v8801_v59 = vpack.c.bf16 %v8782_v57, %v8781_v6 }
 0x3b0   : > { %11579 = vmatprep.mubr.msk.bf16.mxu0 %vm455_vm1, %v8789_v29  ;;  %v8783_v29 = vld [vmem:[%s13412_s16 + $0x136] sm:$0xff] }
 0x3b1   : > { %v8802_v7 = vpack.c.bf16 %v8784_v55, %v8783_v29 }
 0x3b4   : > { %11068 = vmatmul.mubr.msk.bf16.gmra.mrb[28].mxu1 %vm455_vm1, %v14481_v9  ;;  %v8764_v9 = vld [vmem:[%s13412_s16 + $0x9e] sm:$0xff] }
 0x3b5   : > { %11071 = vmatprep.mubr.msk.bf16.mxu1 %vm455_vm1, %v14492_v20  ;;  %v8766_v20 = vld [vmem:[%s13412_s16 + $0xae] sm:$0xff]  ;;  %v8792_v32 = vpack.c.bf16 %v8764_v9, %v8763_v19  ;;  %s12577_s16 = smul.u32 36, %s14841_s18 }
 0x3b6   : > { %v8793_v63 = vpack.c.bf16 %v8766_v20, %v8765_v42 }
 0x3b7   : > { %11580 = vmatmul.mubr.msk.bf16.gmra.mrb[8].mxu0 %vm455_vm1, %v8790_v38  ;;  %s340_s14 = sadd.s32 %s12578_s29, %s12577_s16 }
 0x3b8   : > { %11583 = vmatprep.mubr.msk.bf16.mxu0 %vm455_vm1, %v8791_v60  ;;  %s9480_s25 = sshll.u32 %s340_s14, 2 }
 0x3b9   : > { %s14684_s26 = scalar_lea.vmem %s14823_s5, %s9480_s25 }
 0x3bc   : > { %11072 = vmatmul.mubr.msk.bf16.gmra.mrb[32].mxu1 %vm455_vm1, %v4238_v45 }
 0x3bd   : > { %11097 = vmatprep.mubr.msk.bf16.mxu1 %vm455_vm1, %v4557_v26 }
 0x3bf   : > { %11584 = vmatmul.mubr.msk.bf16.gmra.mrb[12].mxu0 %vm455_vm1, %v8792_v32 }
 0x3c0   : > { %11587 = vmatprep.mubr.msk.bf16.mxu0 %vm455_vm1, %v8793_v63 }
 0x3c4   : > { %11098 = vmatmul.mubr.msk.bf16.vlgmr.msra.gmra.mrb[20].mxu1 %vm455_vm1, %v4558_v46 }
 0x3c5   : > { %11101 = vmatprep.mubr.msk.bf16.mxu1 %vm455_vm1, %v4559_v39 }
 0x3c7   : > { %11588 = vmatmul.mubr.msk.bf16.gmra.mrb[16].mxu0 %vm455_vm1, %v8794_v50 }
 0x3c8   : > { %11591 = vmatprep.mubr.msk.bf16.mxu0 %vm455_vm1, %v8795_v51 }
 0x3cc   : > { %11102 = vmatmul.mubr.msk.bf16.gmra.mrb[24].mxu1 %vm455_vm1, %v4560_v3 }
 0x3cd   : > { %11105 = vmatprep.mubr.msk.bf16.mxu1 %vm455_vm1, %v4561_v40 }
 0x3cf   : > { %11592 = vmatmul.mubr.msk.bf16.gmra.mrb[20].mxu0 %vm455_vm1, %v8796_v24 }
 0x3d0   : > { %11595 = vmatprep.mubr.msk.bf16.mxu0 %vm455_vm1, %v8797_v62 }
 0x3d4   : > { %11106 = vmatmul.mubr.msk.bf16.gmra.mrb[28].mxu1 %vm455_vm1, %v4562_v8 }
 0x3d5   : > { %11109 = vmatprep.mubr.msk.bf16.mxu1 %vm455_vm1, %v4563_v54 }
 0x3d7   : > { %11596 = vmatmul.mubr.msk.bf16.gmra.mrb[24].mxu0 %vm455_vm1, %v8798_v12 }
 0x3d8   : > { %11599 = vmatprep.mubr.msk.bf16.mxu0 %vm455_vm1, %v8799_v21 }
 0x3dc   : > { %11110 = vmatmul.mubr.msk.bf16.gmra.mrb[32].mxu1 %vm455_vm1, %v4564_v41 }
 0x3df   : > { %11600 = vmatmul.mubr.msk.bf16.gmra.mrb[28].mxu0 %vm455_vm1, %v8800_v18 }
 0x3e0   : > { %11603 = vmatprep.mubr.msk.bf16.mxu0 %vm455_vm1, %v8801_v59 }
 0x3e7   : > { %11604 = vmatmul.mubr.msk.bf16.gmra.mrb[32].mxu0 %vm455_vm1, %v8802_v7 }
 0x44f   : > { %v11041_v10 = vpop.f32.mrb[0].mxu1 }
 0x450   : > { %v4332_v52 = vpop.f32.mrb[1].mxu1 }
 0x451   : > { %v11042_v38 = vpop.f32.mrb[2].mxu1 }
 0x452   : > { %v4335_v60 = vpop.f32.mrb[3].mxu1 }
 0x457   : > { %v11045_v17 = vpop.f32.mrb[4].mxu1 }
 0x458   : > { %v4348_v47 = vpop.f32.mrb[5].mxu1 }
 0x459   : > { %v11046_v28 = vpop.f32.mrb[6].mxu1 }
 0x45a   : > { %v4351_v36 = vpop.f32.mrb[7].mxu1 }
 0x45f   : > { %v14646_v45 = vpop.f32.mrb[8].mxu1 }
 0x460   : > { %v14648_v19 = vpop.f32.mrb[9].mxu1 }
 0x461   : > { %v14650_v9 = vpop.f32.mrb[10].mxu1 }
 0x462   : > { %v14652_v26 = vpop.f32.mrb[11].mxu1 }
 0x467   : > { %v14654_v42 = vpop.f32.mrb[12].mxu1 }
 0x468   : > { %v14656_v20 = vpop.f32.mrb[13].mxu1 }
 0x469   : > { %v14658_v32 = vpop.f32.mrb[14].mxu1 }
 0x46a   : > { %v14660_v63 = vpop.f32.mrb[15].mxu1 }
 0x46f   : > { %v14663_v27 = vpop.f32.mrb[16].mxu1 }
 0x470   : > { %v14665_v25 = vpop.f32.mrb[17].mxu1 }
 0x471   : > { %v14667_v5 = vpop.f32.mrb[18].mxu1 }
 0x472   : > { %v14669_v23 = vpop.f32.mrb[19].mxu1 }
 0x47a   : > { %v11573_v46 = vpop.f32.mrb[0].mxu0 }
 0x47b   : > { %v11609_v33 = vadd.f32 %v11573_v46, %v11041_v10  ;;  %v8896_v39 = vpop.f32.mrb[1].mxu0 }
 0x47c   : > { %v11610_v22 = vadd.f32 %v8896_v39, %v4332_v52  ;;  %v11574_v34 = vpop.f32.mrb[2].mxu0 }
 0x47d   : > { %v9084_v50 = vadd.f32 %v11609_v33, %v14676_v30  ;;  %v11611_v51 = vadd.f32 %v11574_v34, %v11042_v38  ;;  %v8899_v35 = vpop.f32.mrb[3].mxu0 }
 0x47e   : > { %v9082_v0 = vadd.f32 %v11610_v22, %v14676_v30  ;;  %v11612_v11 = vadd.f32 %v8899_v35, %v4335_v60 }
 0x47f   : > { %v9120_v61 = vmax.f32 %v9084_v50, 0.0  ;;  %v9085_v3 = vadd.f32 %v11611_v51, %v14676_v30 }
 0x480   : > { %v9118_v2 = vmax.f32 %v9082_v0, 0.0  ;;  %v9083_v37 = vadd.f32 %v11612_v11, %v14676_v30 }
 0x481   : > { %v10034_v40 = vpack.c.bf16 %v9120_v61, %v9120_v61  ;;  %v9121_v48 = vmax.f32 %v9085_v3, 0.0 }
 0x482   : > { %v10032_v15 = vpack.c.bf16 %v9118_v2, %v9118_v2  ;;  %v9119_v24 = vmax.f32 %v9083_v37, 0.0  ;;  %v11577_v62 = vpop.f32.mrb[4].mxu0 }
 0x483   : > { %9301 = vst.msk [vmem:[%s14684_s26 + $0x8] sm:$0xf] %vm9298_vm2, %v10034_v40  ;;  %v10035_v16 = vpack.c.bf16 %v9121_v48, %v9121_v48  ;;  %v11613_v14 = vadd.f32 %v11577_v62, %v11045_v17  ;;  %v8912_v1 = vpop.f32.mrb[5].mxu0 }
 0x484   : > { %9299 = vst.msk [vmem:[%s14684_s26] sm:$0xf] %vm9298_vm2, %v10032_v15  ;;  %v10033_v43 = vpack.c.bf16 %v9119_v24, %v9119_v24  ;;  %v11614_v8 = vadd.f32 %v8912_v1, %v4348_v47  ;;  %v11578_v49 = vpop.f32.mrb[6].mxu0 }
 0x485   : > { %9302 = vst.msk [vmem:[%s14684_s26 + $0xc] sm:$0xf] %vm9298_vm2, %v10035_v16  ;;  %v9088_v31 = vadd.f32 %v11613_v14, %v14676_v30  ;;  %v11615_v54 = vadd.f32 %v11578_v49, %v11046_v28  ;;  %v8915_v53 = vpop.f32.mrb[7].mxu0 }
 0x486   : > { %9300 = vst.msk [vmem:[%s14684_s26 + $0x4] sm:$0xf] %vm9298_vm2, %v10033_v43  ;;  %v9086_v44 = vadd.f32 %v11614_v8, %v14676_v30  ;;  %v11616_v12 = vadd.f32 %v8915_v53, %v4351_v36 }
 0x487   : > { %v9124_v21 = vmax.f32 %v9088_v31, 0.0  ;;  %v9089_v13 = vadd.f32 %v11615_v54, %v14676_v30 }
 0x488   : > { %v9122_v4 = vmax.f32 %v9086_v44, 0.0  ;;  %v9087_v41 = vadd.f32 %v11616_v12, %v14676_v30 }
 0x489   : > { %v10038_v56 = vpack.c.bf16 %v9124_v21, %v9124_v21  ;;  %v9125_v58 = vmax.f32 %v9089_v13, 0.0 }
 0x48a   : > { %v10036_v6 = vpack.c.bf16 %v9122_v4, %v9122_v4  ;;  %v9123_v57 = vmax.f32 %v9087_v41, 0.0  ;;  %v11581_v18 = vpop.f32.mrb[8].mxu0 }
 0x48b   : > { %9305 = vst.msk [vmem:[%s14684_s26 + $0x18] sm:$0xf] %vm9298_vm2, %v10038_v56  ;;  %v10039_v59 = vpack.c.bf16 %v9125_v58, %v9125_v58  ;;  %v11617_v29 = vadd.f32 %v11581_v18, %v14646_v45  ;;  %v8928_v55 = vpop.f32.mrb[9].mxu0 }
 0x48c   : > { %9303 = vst.msk [vmem:[%s14684_s26 + $0x10] sm:$0xf] %vm9298_vm2, %v10036_v6  ;;  %v10037_v7 = vpack.c.bf16 %v9123_v57, %v9123_v57  ;;  %v11618_v10 = vadd.f32 %v8928_v55, %v14648_v19  ;;  %v11582_v52 = vpop.f32.mrb[10].mxu0 }
 0x48d   : > { %9306 = vst.msk [vmem:[%s14684_s26 + $0x1c] sm:$0xf] %vm9298_vm2, %v10039_v59  ;;  %v9092_v38 = vadd.f32 %v11617_v29, %v14676_v30  ;;  %v11619_v60 = vadd.f32 %v11582_v52, %v14650_v9  ;;  %v8931_v17 = vpop.f32.mrb[11].mxu0 }
 0x48e   : > { %9304 = vst.msk [vmem:[%s14684_s26 + $0x14] sm:$0xf] %vm9298_vm2, %v10037_v7  ;;  %v9090_v47 = vadd.f32 %v11618_v10, %v14676_v30  ;;  %v11620_v28 = vadd.f32 %v8931_v17, %v14652_v26 }
 0x48f   : > { %v9128_v36 = vmax.f32 %v9092_v38, 0.0  ;;  %v9093_v45 = vadd.f32 %v11619_v60, %v14676_v30 }
 0x490   : > { %v9126_v19 = vmax.f32 %v9090_v47, 0.0  ;;  %v9091_v46 = vadd.f32 %v11620_v28, %v14676_v30 }
 0x491   : > { %v10042_v33 = vpack.c.bf16 %v9128_v36, %v9128_v36  ;;  %v9129_v39 = vmax.f32 %v9093_v45, 0.0 }
 0x492   : > { %v10040_v22 = vpack.c.bf16 %v9126_v19, %v9126_v19  ;;  %v9127_v9 = vmax.f32 %v9091_v46, 0.0  ;;  %v11585_v34 = vpop.f32.mrb[12].mxu0 }
 0x493   : > { %9309 = vst.msk [vmem:[%s14684_s26 + $0x28] sm:$0xf] %vm9298_vm2, %v10042_v33  ;;  %v10043_v50 = vpack.c.bf16 %v9129_v39, %v9129_v39  ;;  %v11621_v51 = vadd.f32 %v11585_v34, %v14654_v42  ;;  %v8944_v35 = vpop.f32.mrb[13].mxu0 }
 0x494   : > { %9307 = vst.msk [vmem:[%s14684_s26 + $0x20] sm:$0xf] %vm9298_vm2, %v10040_v22  ;;  %v10041_v26 = vpack.c.bf16 %v9127_v9, %v9127_v9  ;;  %v11622_v0 = vadd.f32 %v8944_v35, %v14656_v20  ;;  %v11586_v11 = vpop.f32.mrb[14].mxu0 }
 0x495   : > { %9310 = vst.msk [vmem:[%s14684_s26 + $0x2c] sm:$0xf] %vm9298_vm2, %v10043_v50  ;;  %v9096_v61 = vadd.f32 %v11621_v51, %v14676_v30  ;;  %v11623_v3 = vadd.f32 %v11586_v11, %v14658_v32  ;;  %v8947_v2 = vpop.f32.mrb[15].mxu0 }
 0x496   : > { %9308 = vst.msk [vmem:[%s14684_s26 + $0x24] sm:$0xf] %vm9298_vm2, %v10041_v26  ;;  %v9094_v37 = vadd.f32 %v11622_v0, %v14676_v30  ;;  %v11624_v42 = vadd.f32 %v8947_v2, %v14660_v63 }
 0x497   : > { %v9132_v40 = vmax.f32 %v9096_v61, 0.0  ;;  %v9097_v48 = vadd.f32 %v11623_v3, %v14676_v30  ;;  %v11099_v20 = vpop.f32.mrb[20].mxu1 }
 0x498   : > { %v9130_v15 = vmax.f32 %v9094_v37, 0.0  ;;  %v9095_v24 = vadd.f32 %v11624_v42, %v14676_v30  ;;  %v4738_v62 = vpop.f32.mrb[21].mxu1 }
 0x499   : > { %v10046_v16 = vpack.c.bf16 %v9132_v40, %v9132_v40  ;;  %v9133_v32 = vmax.f32 %v9097_v48, 0.0  ;;  %v11100_v14 = vpop.f32.mrb[22].mxu1 }
 0x49a   : > { %v10044_v1 = vpack.c.bf16 %v9130_v15, %v9130_v15  ;;  %v9131_v43 = vmax.f32 %v9095_v24, 0.0  ;;  %v11589_v8 = vpop.f32.mrb[16].mxu0  ;;  %v4741_v49 = vpop.f32.mrb[23].mxu1 }
 0x49b   : > { %9313 = vst.msk [vmem:[%s14684_s26 + $0x38] sm:$0xf] %vm9298_vm2, %v10046_v16  ;;  %v10047_v63 = vpack.c.bf16 %v9133_v32, %v9133_v32  ;;  %v11625_v31 = vadd.f32 %v11589_v8, %v14663_v27  ;;  %v8960_v54 = vpop.f32.mrb[17].mxu0 }
 0x49c   : > { %9311 = vst.msk [vmem:[%s14684_s26 + $0x30] sm:$0xf] %vm9298_vm2, %v10044_v1  ;;  %v10045_v53 = vpack.c.bf16 %v9131_v43, %v9131_v43  ;;  %v11626_v44 = vadd.f32 %v8960_v54, %v14665_v25  ;;  %v11590_v12 = vpop.f32.mrb[18].mxu0 }
 0x49d   : > { %9314 = vst.msk [vmem:[%s14684_s26 + $0x3c] sm:$0xf] %vm9298_vm2, %v10047_v63  ;;  %v9100_v21 = vadd.f32 %v11625_v31, %v14676_v30  ;;  %v11627_v13 = vadd.f32 %v11590_v12, %v14667_v5  ;;  %v8963_v4 = vpop.f32.mrb[19].mxu0 }
 0x49e   : > { %9312 = vst.msk [vmem:[%s14684_s26 + $0x34] sm:$0xf] %vm9298_vm2, %v10045_v53  ;;  %v9098_v41 = vadd.f32 %v11626_v44, %v14676_v30  ;;  %v11628_v27 = vadd.f32 %v8963_v4, %v14669_v23 }
 0x49f   : > { %v9136_v56 = vmax.f32 %v9100_v21, 0.0  ;;  %v9101_v58 = vadd.f32 %v11627_v13, %v14676_v30  ;;  %v11103_v25 = vpop.f32.mrb[24].mxu1 }
 0x4a0   : > { %v9134_v6 = vmax.f32 %v9098_v41, 0.0  ;;  %v9099_v57 = vadd.f32 %v11628_v27, %v14676_v30  ;;  %v4754_v18 = vpop.f32.mrb[25].mxu1 }
 0x4a1   : > { %v10050_v59 = vpack.c.bf16 %v9136_v56, %v9136_v56  ;;  %v9137_v5 = vmax.f32 %v9101_v58, 0.0  ;;  %v11104_v29 = vpop.f32.mrb[26].mxu1 }
 0x4a2   : > { %v10048_v55 = vpack.c.bf16 %v9134_v6, %v9134_v6  ;;  %v9135_v7 = vmax.f32 %v9099_v57, 0.0  ;;  %v11593_v10 = vpop.f32.mrb[20].mxu0  ;;  %v4757_v52 = vpop.f32.mrb[27].mxu1 }
 0x4a3   : > { %9317 = vst.msk [vmem:[%s14684_s26 + $0x48] sm:$0xf] %vm9298_vm2, %v10050_v59  ;;  %v10051_v23 = vpack.c.bf16 %v9137_v5, %v9137_v5  ;;  %v11629_v38 = vadd.f32 %v11593_v10, %v11099_v20  ;;  %v8976_v60 = vpop.f32.mrb[21].mxu0 }
 0x4a4   : > { %9315 = vst.msk [vmem:[%s14684_s26 + $0x40] sm:$0xf] %vm9298_vm2, %v10048_v55  ;;  %v10049_v17 = vpack.c.bf16 %v9135_v7, %v9135_v7  ;;  %v11630_v47 = vadd.f32 %v8976_v60, %v4738_v62  ;;  %v11594_v28 = vpop.f32.mrb[22].mxu0 }
 0x4a5   : > { %9318 = vst.msk [vmem:[%s14684_s26 + $0x4c] sm:$0xf] %vm9298_vm2, %v10051_v23  ;;  %v9104_v36 = vadd.f32 %v11629_v38, %v14676_v30  ;;  %v11631_v45 = vadd.f32 %v11594_v28, %v11100_v14  ;;  %v8979_v19 = vpop.f32.mrb[23].mxu0 }
 0x4a6   : > { %9316 = vst.msk [vmem:[%s14684_s26 + $0x44] sm:$0xf] %vm9298_vm2, %v10049_v17  ;;  %v9102_v46 = vadd.f32 %v11630_v47, %v14676_v30  ;;  %v11632_v33 = vadd.f32 %v8979_v19, %v4741_v49 }
 0x4a7   : > { %v9140_v39 = vmax.f32 %v9104_v36, 0.0  ;;  %v9105_v22 = vadd.f32 %v11631_v45, %v14676_v30  ;;  %v11107_v9 = vpop.f32.mrb[28].mxu1 }
 0x4a8   : > { %v9138_v34 = vmax.f32 %v9102_v46, 0.0  ;;  %v9103_v50 = vadd.f32 %v11632_v33, %v14676_v30  ;;  %v4770_v51 = vpop.f32.mrb[29].mxu1 }
 0x4a9   : > { %v10054_v35 = vpack.c.bf16 %v9140_v39, %v9140_v39  ;;  %v9141_v26 = vmax.f32 %v9105_v22, 0.0  ;;  %v11108_v0 = vpop.f32.mrb[30].mxu1 }
 0x4aa   : > { %v10052_v11 = vpack.c.bf16 %v9138_v34, %v9138_v34  ;;  %v9139_v61 = vmax.f32 %v9103_v50, 0.0  ;;  %v11597_v3 = vpop.f32.mrb[24].mxu0  ;;  %v4773_v2 = vpop.f32.mrb[31].mxu1 }
 0x4ab   : > { %9321 = vst.msk [vmem:[%s14684_s26 + $0x58] sm:$0xf] %vm9298_vm2, %v10054_v35  ;;  %v10055_v37 = vpack.c.bf16 %v9141_v26, %v9141_v26  ;;  %v11633_v42 = vadd.f32 %v11597_v3, %v11103_v25  ;;  %v8992_v40 = vpop.f32.mrb[25].mxu0 }
 0x4ac   : > { %9319 = vst.msk [vmem:[%s14684_s26 + $0x50] sm:$0xf] %vm9298_vm2, %v10052_v11  ;;  %v10053_v48 = vpack.c.bf16 %v9139_v61, %v9139_v61  ;;  %v11634_v20 = vadd.f32 %v8992_v40, %v4754_v18  ;;  %v11598_v15 = vpop.f32.mrb[26].mxu0 }
 0x4ad   : > { %9322 = vst.msk [vmem:[%s14684_s26 + $0x5c] sm:$0xf] %vm9298_vm2, %v10055_v37  ;;  %v9108_v24 = vadd.f32 %v11633_v42, %v14676_v30  ;;  %v11635_v62 = vadd.f32 %v11598_v15, %v11104_v29  ;;  %v8995_v16 = vpop.f32.mrb[27].mxu0 }
 0x4ae   : > { %9320 = vst.msk [vmem:[%s14684_s26 + $0x54] sm:$0xf] %vm9298_vm2, %v10053_v48  ;;  %v9106_v32 = vadd.f32 %v11634_v20, %v14676_v30  ;;  %v11636_v14 = vadd.f32 %v8995_v16, %v4757_v52 }
 0x4af   : > { %v9144_v1 = vmax.f32 %v9108_v24, 0.0  ;;  %v9109_v43 = vadd.f32 %v11635_v62, %v14676_v30  ;;  %v11111_v8 = vpop.f32.mrb[32].mxu1 }
 0x4b0   : > { %v9142_v49 = vmax.f32 %v9106_v32, 0.0  ;;  %v9107_v63 = vadd.f32 %v11636_v14, %v14676_v30  ;;  %v4786_v31 = vpop.f32.mrb[33].mxu1 }
 0x4b1   : > { %v10058_v54 = vpack.c.bf16 %v9144_v1, %v9144_v1  ;;  %v9145_v53 = vmax.f32 %v9109_v43, 0.0  ;;  %v11112_v44 = vpop.f32.mrb[34].mxu1 }
 0x4b2   : > { %v10056_v12 = vpack.c.bf16 %v9142_v49, %v9142_v49  ;;  %v9143_v21 = vmax.f32 %v9107_v63, 0.0  ;;  %v11601_v13 = vpop.f32.mrb[28].mxu0  ;;  %v4789_v4 = vpop.f32.mrb[35].mxu1 }
 0x4b3   : > { %9325 = vst.msk [vmem:[%s14684_s26 + $0x68] sm:$0xf] %vm9298_vm2, %v10058_v54  ;;  %v10059_v41 = vpack.c.bf16 %v9145_v53, %v9145_v53  ;;  %v11637_v27 = vadd.f32 %v11601_v13, %v11107_v9  ;;  %v9008_v56 = vpop.f32.mrb[29].mxu0 }
 0x4b4   : > { %9323 = vst.msk [vmem:[%s14684_s26 + $0x60] sm:$0xf] %vm9298_vm2, %v10056_v12  ;;  %v10057_v58 = vpack.c.bf16 %v9143_v21, %v9143_v21  ;;  %v11638_v25 = vadd.f32 %v9008_v56, %v4770_v51  ;;  %v11602_v6 = vpop.f32.mrb[30].mxu0 }
 0x4b5   : > { %9326 = vst.msk [vmem:[%s14684_s26 + $0x6c] sm:$0xf] %vm9298_vm2, %v10059_v41  ;;  %v9112_v57 = vadd.f32 %v11637_v27, %v14676_v30  ;;  %v11639_v18 = vadd.f32 %v11602_v6, %v11108_v0  ;;  %v9011_v59 = vpop.f32.mrb[31].mxu0 }
 0x4b6   : > { %9324 = vst.msk [vmem:[%s14684_s26 + $0x64] sm:$0xf] %vm9298_vm2, %v10057_v58  ;;  %v9110_v5 = vadd.f32 %v11638_v25, %v14676_v30  ;;  %v11640_v29 = vadd.f32 %v9011_v59, %v4773_v2 }
 0x4b7   : > { %v9148_v55 = vmax.f32 %v9112_v57, 0.0  ;;  %v9113_v7 = vadd.f32 %v11639_v18, %v14676_v30 }
 0x4b8   : > { %v9146_v10 = vmax.f32 %v9110_v5, 0.0  ;;  %v9111_v52 = vadd.f32 %v11640_v29, %v14676_v30 }
 0x4b9   : > { %v10062_v23 = vpack.c.bf16 %v9148_v55, %v9148_v55  ;;  %v9149_v38 = vmax.f32 %v9113_v7, 0.0 }
 0x4ba   : > { %v10060_v60 = vpack.c.bf16 %v9146_v10, %v9146_v10  ;;  %v9147_v17 = vmax.f32 %v9111_v52, 0.0  ;;  %v11605_v47 = vpop.f32.mrb[32].mxu0 }
 0x4bb   : > { %9329 = vst.msk [vmem:[%s14684_s26 + $0x78] sm:$0xf] %vm9298_vm2, %v10062_v23  ;;  %v10063_v28 = vpack.c.bf16 %v9149_v38, %v9149_v38  ;;  %v11641_v36 = vadd.f32 %v11605_v47, %v11111_v8  ;;  %v9024_v45 = vpop.f32.mrb[33].mxu0 }
 0x4bc   : > { %9327 = vst.msk [vmem:[%s14684_s26 + $0x70] sm:$0xf] %vm9298_vm2, %v10060_v60  ;;  %v10061_v19 = vpack.c.bf16 %v9147_v17, %v9147_v17  ;;  %v11642_v46 = vadd.f32 %v9024_v45, %v4786_v31  ;;  %v11606_v33 = vpop.f32.mrb[34].mxu0 }
 0x4bd   : > { %9330 = vst.msk [vmem:[%s14684_s26 + $0x7c] sm:$0xf] %vm9298_vm2, %v10063_v28  ;;  %v9116_v39 = vadd.f32 %v11641_v36, %v14676_v30  ;;  %v11643_v22 = vadd.f32 %v11606_v33, %v11112_v44  ;;  %v9027_v9 = vpop.f32.mrb[35].mxu0 }
 0x4be   : > { %9328 = vst.msk [vmem:[%s14684_s26 + $0x74] sm:$0xf] %vm9298_vm2, %v10061_v19  ;;  %v9114_v34 = vadd.f32 %v11642_v46, %v14676_v30  ;;  %v11644_v50 = vadd.f32 %v9027_v9, %v4789_v4 }
 0x4bf   : > { %v9152_v51 = vmax.f32 %v9116_v39, 0.0  ;;  %v9117_v35 = vadd.f32 %v11643_v22, %v14676_v30 }
 0x4c0   : > { %v9150_v26 = vmax.f32 %v9114_v34, 0.0  ;;  %v9115_v0 = vadd.f32 %v11644_v50, %v14676_v30 }
 0x4c1   : > { %v10066_v11 = vpack.c.bf16 %v9152_v51, %v9152_v51  ;;  %v9153_v61 = vmax.f32 %v9117_v35, 0.0 }
 0x4c2   : > { %v10064_v3 = vpack.c.bf16 %v9150_v26, %v9150_v26  ;;  %v9151_v2 = vmax.f32 %v9115_v0, 0.0 }
 0x4c3   : > { %9333 = vst.msk [vmem:[%s14684_s26 + $0x88] sm:$0xf] %vm9298_vm2, %v10066_v11  ;;  %v10067_v37 = vpack.c.bf16 %v9153_v61, %v9153_v61 }
 0x4c4   : > { %9331 = vst.msk [vmem:[%s14684_s26 + $0x80] sm:$0xf] %vm9298_vm2, %v10064_v3  ;;  %v10065_v42 = vpack.c.bf16 %v9151_v2, %v9151_v2 }
 0x4c5   : > { %9334 = vst.msk [vmem:[%s14684_s26 + $0x8c] sm:$0xf] %vm9298_vm2, %v10067_v37 }
 0x4c6   : > { %9332 = vst.msk [vmem:[%s14684_s26 + $0x84] sm:$0xf] %vm9298_vm2, %v10065_v42 }
 0x4c7 PF: > { %s15_s22 = sadd.s32 1, %s12658_s22   ;;  %s14824_s18 = smov %s12650_s20 }
 0x4c8   : > { %p12_p10 = scmp.ge.s32.totalorder %s15_s22, 34   ;;  %s14825_s19 = smov %s12654_s21 }
 0x4c9   : > { %s14826_s20 = smov %s14829_s23  ;;  %s14827_s21 = smov %s14833_s24 }
 0x4ca   :  { %14 = sbr.rel (!%p12_p10) target bundleno = 3 (0x3), region = 102 }

// kernel: vgg3d_block_2.4
= control target key start
LH: loop header
LB: loop body
LE: loop exit
PB: predicated region body
PF: predicated region fallthrough
CT: control target
= control target key end

     0   :  { %s12690_s18 = smov 0   ;;  %s12692_s19 = smov 0   ;;  %s14818_s0 = inlined_call_operand.vmem [shape: f32[2,18,328,8], index: 0, kind: input, shape index: {}, may-alias: {0,1,2}]   ;;  %s14819_s1 = inlined_call_operand.vmem [shape: f32[2,18,328,8], index: 1, kind: input, shape index: {}, may-alias: {0,1,2}]   ;;  %s14820_s2 = inlined_call_operand.vmem [shape: f32[2,18,328,8], index: 2, kind: input, shape index: {}, may-alias: {0,1,2}]   ;;  %s14821_s3 = inlined_call_operand.vmem [shape: bf16[3,9,8,8], index: 3, kind: input, shape index: {}]   ;;  %s14822_s4 = inlined_call_operand.vmem [shape: f32[1,8], index: 4, kind: input, shape index: {}]   ;;  %s14823_s5 = inlined_call_operand.vmem [shape: bf16[2,16,288,8], index: 5, kind: output, shape index: {}]  }
   0x1   :  { %s12694_s20 = smov 0   ;;  %s12696_s21 = smov 0  }
   0x2   :  { %s12698_s22 = smov 0  }
   0x3 LB: > { %s24_s23 = sadd.s32 1, %s12650_s20  ;;  %s27_s24 = sadd.s32 1, %s12654_s21  ;;  %s12658_s22 = sphi %s12698_s22, %s15_s22   ;;  %s12654_s21 = sphi %s12696_s21, %s14827_s21   ;;  %s12650_s20 = sphi %s12694_s20, %s14826_s20   ;;  %s12646_s19 = sphi %s12692_s19, %s14825_s19   ;;  %s12642_s18 = sphi %s12690_s18, %s14824_s18  }
   0x4   : > { %p25_p0 = scmp.ge.s32.totalorder %s24_s23, 16  ;;  %p9476_p1 = scmp.ge.s32.totalorder %s12658_s22, 1 }
   0x5   : > { %p247_p2 = scmp.lt.s32.totalorder %s12658_s22, 33 }
   0x6   : > { %s14829_s23 = smov (%p25_p0, %s24_s23), 0  ;;  %s14831_s24 = smov (!%p25_p0, %s27_s24), %s12654_s21 }
   0x7   : > { %p248_p3 = pnand %p9476_p1, %p247_p2  ;;  %p29_p4 = scmp.ge.s32.totalorder %s14831_s24, 2 }
   0x8   : > { %v9481_v0 = vld [vmem:[%s14821_s3 + $0x4] sm:$0xf] (!%p248_p3)  ;;  %vm510_vm0 = vcmask (!%p248_p3), 1043456   ;;  %v9727_v1 = vld [vmem:[%s14821_s3 + $0x34] sm:$0xf] (!%p248_p3)  ;;  %p303_p5 = scmp.lt.s32.totalorder (!%p248_p3), %s12646_s19, 1 }
   0x9   : > { %s14833_s24 = smov (%p29_p4, %s14831_s24), 0  ;;  %251 = sbr.rel (%p248_p3) target bundleno = 1223 (0x4c7), region = 40 }
   0xa   : > { %12545 = vmatprep.subr.msk.bf16.mxu1 (!%p248_p3), %vm510_vm0, %v9481_v0  ;;  %12558 = vmatprep.subr.msk.bf16.mxu0 (!%p248_p3), %vm510_vm0, %v9727_v1  ;;  %v512_v2 = vsel (!%p248_p3), %vm510_vm0, %v9481_v0, 0  ;;  %v12732_v3 = vsel (!%p248_p3), %vm510_vm0, %v9727_v1, 0  ;;  %p305_p6 = scmp.lt.s32.totalorder (!%p248_p3), %s12642_s18, 17  ;;  %s312_s29 = sadd.s32 (!%p248_p3), 1, %s12642_s18  ;;  %v9746_v4 = vld [vmem:[%s14821_s3 + $0x38] sm:$0xf] (!%p248_p3) }
   0xb   : > { %10582 = vmatpush3.bf16.msra.mxu1 (!%p248_p3), %v512_v2  ;;  %11076 = vmatpush3.bf16.msra.mxu0 (!%p248_p3), %v12732_v3  ;;  %v398_v5 = vld [vmem:[%s14821_s3] sm:$0xf] (!%p248_p3)  ;;  %p315_p7 = scmp.lt.s32.totalorder (!%p248_p3), %s312_s29, 17  ;;  %vm455_vm1 = vcmask (!%p248_p3), 64512   ;;  %v12773_v16 = vld [vmem:[%s14821_s3 + $0x8] sm:$0xf] (!%p248_p3) }
   0xc   : > { %12560 = vmatprep.subr.msk.bf16.mxu0 (!%p248_p3), %vm510_vm0, %v9746_v4  ;;  %12546 = vmatprep.subr.msk.bf16.mxu1 (!%p248_p3), %vm510_vm0, %v398_v5  ;;  %v746_v15 = vsel (!%p248_p3), %vm510_vm0, %v398_v5, 0  ;;  %v4948_v25 = vsel (!%p248_p3), %vm510_vm0, %v9746_v4, 0  ;;  %v12793_v31 = vld [vmem:[%s14821_s3 + $0x3c] sm:$0xf] (!%p248_p3)  ;;  %p336_p9 = scmp.lt.s32.totalorder (!%p248_p3), %s12642_s18, 15  ;;  %vm9298_vm2 = vcmask (!%p248_p3), 60416  }
  0x10   : > { %s14835_s19 = smov (!%p303_p5, %s12646_s19), 1  ;;  %s14837_s29 = smov (!%p315_p7, %s312_s29), 17 }
  0x11   : > { %s306_s9 = scalar_select %p305_p6, %s12642_s18, 17 }
  0x12   : > { %s12749_s10 = smul.u32 738, %s14835_s19 }
  0x13   : > { %s12573_s11 = smul.u32 41, %s306_s9 }
  0x14   : > { %s12575_s14 = smul.u32 41, %s14837_s29 }
  0x15   : > { %s309_s12 = sadd.s32 %s12749_s10, %s12573_s11  ;;  %s323_s11 = sadd.s32 2, %s12642_s18 }
  0x16   : > { %s9477_s13 = sshll.u32 %s309_s12, 3  ;;  %s319_s25 = sadd.s32 %s12575_s14, %s12749_s10 }
  0x17   : > { %s12755_s17 = scalar_lea.vmem %s14818_s0, %s9477_s13  ;;  %s9478_s26 = sshll.u32 %s319_s25, 3 }
  0x18   : > { %v399_v6 = vld [vmem:[%s12755_s17 + $0x1] sm:$0xff]  ;;  %v400_v7 = vld [vmem:[%s12755_s17 + $0x9] sm:$0xff]  ;;  %v401_v8 = vld [vmem:[%s12755_s17 + $0x11] sm:$0xff]  ;;  %s12767_s29 = scalar_lea.vmem %s14819_s1, %s9478_s26  ;;  %p326_p8 = scmp.lt.s32.totalorder %s323_s11, 17 }
  0x19   : > { %v435_v9 = vpack.c.bf16 %v400_v7, %v399_v6  ;;  %v402_v10 = vld [vmem:[%s12755_s17 + $0x19] sm:$0xff]  ;;  %v403_v11 = vld [vmem:[%s12755_s17 + $0x21] sm:$0xff]  ;;  %v404_v12 = vld [vmem:[%s12755_s17 + $0x29] sm:$0xff]  ;;  %s14841_s18 = smov (!%p336_p9, %s12642_s18), 15 }
  0x1a   : > { %v436_v13 = vpack.c.bf16 %v402_v10, %v401_v8  ;;  %v437_v14 = vpack.c.bf16 %v404_v12, %v403_v11  ;;  %v4511_v17 = vld [vmem:[%s12767_s29 + $0x13] sm:$0xff]  ;;  %v4512_v18 = vld [vmem:[%s12767_s29 + $0x1b] sm:$0xff]  ;;  %v4513_v19 = vld [vmem:[%s12767_s29 + $0x23] sm:$0xff]  ;;  %s14839_s11 = smov (!%p326_p8, %s323_s11), 17 }
  0x1b   : > { %10583 = vmatprep.mubr.msk.bf16.mxu1 %vm455_vm1, %v435_v9  ;;  %v4547_v20 = vpack.c.bf16 %v4512_v18, %v4511_v17  ;;  %v4514_v21 = vld [vmem:[%s12767_s29 + $0x2b] sm:$0xff]  ;;  %v4515_v22 = vld [vmem:[%s12767_s29 + $0x33] sm:$0xff]  ;;  %v4516_v23 = vld [vmem:[%s12767_s29 + $0x3b] sm:$0xff]  ;;  %s12576_s12 = smul.u32 41, %s14839_s11 }
  0x1c   : > { %10584 = vmatmul.mubr.msk.bf16.vlgmr.msra.gmra.mrb[0].mxu1 %vm455_vm1, %v436_v13  ;;  %v4548_v24 = vpack.c.bf16 %v4514_v21, %v4513_v19  ;;  %v405_v26 = vld [vmem:[%s12755_s17 + $0x31] sm:$0xff]  ;;  %v406_v27 = vld [vmem:[%s12755_s17 + $0x39] sm:$0xff]  ;;  %v4549_v28 = vpack.c.bf16 %v4516_v23, %v4515_v22  ;;  %v407_v29 = vld [vmem:[%s12755_s17 + $0x41] sm:$0xff] }
  0x1d   : > { %10587 = vmatprep.mubr.msk.bf16.mxu1 %vm455_vm1, %v437_v14  ;;  %10620 = vmatpush3.bf16.msra.mxu1 %v746_v15  ;;  %v408_v30 = vld [vmem:[%s12755_s17 + $0x49] sm:$0xff]  ;;  %v438_v32 = vpack.c.bf16 %v406_v27, %v405_v26  ;;  %v4519_v36 = vld [vmem:[%s12767_s29 + $0x53] sm:$0xff]  ;;  %v4520_v37 = vld [vmem:[%s12767_s29 + $0x5b] sm:$0xff]  ;;  %v5274_v26 = vsel %vm510_vm0, %v12793_v31, 0  ;;  %s330_s13 = sadd.s32 %s12576_s12, %s12749_s10 }
  0x1e   : > { %11077 = vmatprep.mubr.msk.bf16.mxu0 %vm455_vm1, %v4547_v20  ;;  %12547 = vmatprep.subr.msk.bf16.mxu1 %vm510_vm0, %v12773_v16  ;;  %v4517_v33 = vld [vmem:[%s12767_s29 + $0x43] sm:$0xff]  ;;  %v4518_v34 = vld [vmem:[%s12767_s29 + $0x4b] sm:$0xff]  ;;  %v439_v35 = vpack.c.bf16 %v408_v30, %v407_v29  ;;  %v4551_v39 = vpack.c.bf16 %v4520_v37, %v4519_v36  ;;  %v410_v41 = vld [vmem:[%s12755_s17 + $0x59] sm:$0xff]  ;;  %s9479_s14 = sshll.u32 %s330_s13, 3 }
  0x1f   : > { %11078 = vmatmul.mubr.msk.bf16.vlgmr.msra.gmra.mrb[0].mxu0 %vm455_vm1, %v4548_v24  ;;  %v4550_v38 = vpack.c.bf16 %v4518_v34, %v4517_v33  ;;  %v409_v40 = vld [vmem:[%s12755_s17 + $0x51] sm:$0xff]  ;;  %v411_v42 = vld [vmem:[%s12755_s17 + $0x61] sm:$0xff]  ;;  %v412_v43 = vld [vmem:[%s12755_s17 + $0x69] sm:$0xff]  ;;  %s13412_s16 = scalar_lea.vmem %s14820_s2, %s9479_s14 }
  0x20   : > { %11114 = vmatpush3.bf16.msra.mxu0 %v4948_v25  ;;  %11081 = vmatprep.mubr.msk.bf16.mxu0 %vm455_vm1, %v4549_v28  ;;  %v440_v44 = vpack.c.bf16 %v410_v41, %v409_v40  ;;  %v4521_v45 = vld [vmem:[%s12767_s29 + $0x63] sm:$0xff]  ;;  %v4522_v46 = vld [vmem:[%s12767_s29 + $0x6b] sm:$0xff]  ;;  %v441_v47 = vpack.c.bf16 %v412_v43, %v411_v42  ;;  %v4523_v48 = vld [vmem:[%s12767_s29 + $0x73] sm:$0xff] }
  0x21   : > { %12561 = vmatprep.subr.msk.bf16.mxu0 %vm510_vm0, %v12793_v31  ;;  %v4524_v49 = vld [vmem:[%s12767_s29 + $0x7b] sm:$0xff]  ;;  %v4552_v50 = vpack.c.bf16 %v4522_v46, %v4521_v45  ;;  %v413_v52 = vld [vmem:[%s12755_s17 + $0x71] sm:$0xff]  ;;  %v416_v55 = vld [vmem:[%s12755_s17 + $0x89] sm:$0xff] }
  0x22   : > { %v4553_v51 = vpack.c.bf16 %v4524_v49, %v4523_v48  ;;  %v414_v53 = vld [vmem:[%s12755_s17 + $0x79] sm:$0xff]  ;;  %v415_v54 = vld [vmem:[%s12755_s17 + $0x81] sm:$0xff]  ;;  %v4526_v58 = vld [vmem:[%s12767_s29 + $0x8b] sm:$0xff] }
  0x23   : > { %v442_v56 = vpack.c.bf16 %v414_v53, %v413_v52  ;;  %v4525_v57 = vld [vmem:[%s12767_s29 + $0x83] sm:$0xff]  ;;  %v443_v59 = vpack.c.bf16 %v416_v55, %v415_v54  ;;  %v4527_v60 = vld [vmem:[%s12767_s29 + $0x93] sm:$0xff]  ;;  %v4528_v61 = vld [vmem:[%s12767_s29 + $0x9b] sm:$0xff] }
  0x24   : > { %10588 = vmatmul.mubr.msk.bf16.gmra.mrb[4].mxu1 %vm455_vm1, %v438_v32  ;;  %v4554_v62 = vpack.c.bf16 %v4526_v58, %v4525_v57  ;;  %v4555_v63 = vpack.c.bf16 %v4528_v61, %v4527_v60  ;;  %v417_v0 = vld [vmem:[%s12755_s17 + $0x91] sm:$0xff]  ;;  %v418_v1 = vld [vmem:[%s12755_s17 + $0x99] sm:$0xff]  ;;  %v419_v2 = vld [vmem:[%s12755_s17 + $0xa1] sm:$0xff] }
  0x25   : > { %10591 = vmatprep.mubr.msk.bf16.mxu1 %vm455_vm1, %v439_v35  ;;  %v420_v4 = vld [vmem:[%s12755_s17 + $0xa9] sm:$0xff]  ;;  %v444_v5 = vpack.c.bf16 %v418_v1, %v417_v0  ;;  %v4837_v9 = vld [vmem:[%s12767_s29 + $0x14] sm:$0xff]  ;;  %v4838_v10 = vld [vmem:[%s12767_s29 + $0x1c] sm:$0xff] }
  0x26   : > { %v4529_v6 = vld [vmem:[%s12767_s29 + $0xa3] sm:$0xff]  ;;  %v4530_v7 = vld [vmem:[%s12767_s29 + $0xab] sm:$0xff]  ;;  %v445_v8 = vpack.c.bf16 %v420_v4, %v419_v2  ;;  %v4873_v12 = vpack.c.bf16 %v4838_v10, %v4837_v9  ;;  %v422_v14 = vld [vmem:[%s12755_s17 + $0xb9] sm:$0xff] }
  0x27   : > { %11082 = vmatmul.mubr.msk.bf16.gmra.mrb[4].mxu0 %vm455_vm1, %v4550_v38  ;;  %v4556_v11 = vpack.c.bf16 %v4530_v7, %v4529_v6  ;;  %v421_v13 = vld [vmem:[%s12755_s17 + $0xb1] sm:$0xff]  ;;  %v423_v15 = vld [vmem:[%s12755_s17 + $0xc1] sm:$0xff]  ;;  %v424_v17 = vld [vmem:[%s12755_s17 + $0xc9] sm:$0xff] }
  0x28   : > { %11085 = vmatprep.mubr.msk.bf16.mxu0 %vm455_vm1, %v4551_v39  ;;  %v446_v18 = vpack.c.bf16 %v422_v14, %v421_v13  ;;  %v4839_v19 = vld [vmem:[%s12767_s29 + $0x24] sm:$0xff]  ;;  %v4840_v20 = vld [vmem:[%s12767_s29 + $0x2c] sm:$0xff]  ;;  %v447_v21 = vpack.c.bf16 %v424_v17, %v423_v15  ;;  %v4841_v22 = vld [vmem:[%s12767_s29 + $0x34] sm:$0xff] }
  0x29   : > { %v4842_v23 = vld [vmem:[%s12767_s29 + $0x3c] sm:$0xff]  ;;  %v12853_v24 = vpack.c.bf16 %v4840_v20, %v4839_v19  ;;  %v425_v27 = vld [vmem:[%s12755_s17 + $0xd1] sm:$0xff]  ;;  %v428_v30 = vld [vmem:[%s12755_s17 + $0xe9] sm:$0xff] }
  0x2a   : > { %v12856_v25 = vpack.c.bf16 %v4842_v23, %v4841_v22  ;;  %v426_v28 = vld [vmem:[%s12755_s17 + $0xd9] sm:$0xff]  ;;  %v427_v29 = vld [vmem:[%s12755_s17 + $0xe1] sm:$0xff]  ;;  %v4844_v34 = vld [vmem:[%s12767_s29 + $0x4c] sm:$0xff] }
  0x2b   : > { %v12868_v32 = vld [vmem:[%s14821_s3 + $0x40] sm:$0xf]  ;;  %v448_v31 = vpack.c.bf16 %v426_v28, %v425_v27  ;;  %v4843_v33 = vld [vmem:[%s12767_s29 + $0x44] sm:$0xff]  ;;  %v449_v35 = vpack.c.bf16 %v428_v30, %v427_v29  ;;  %v4845_v36 = vld [vmem:[%s12767_s29 + $0x54] sm:$0xff] }
  0x2c   : > { %10592 = vmatmul.mubr.msk.bf16.gmra.mrb[8].mxu1 %vm455_vm1, %v440_v44  ;;  %v4846_v37 = vld [vmem:[%s12767_s29 + $0x5c] sm:$0xff]  ;;  %v12880_v38 = vpack.c.bf16 %v4844_v34, %v4843_v33  ;;  %v429_v40 = vld [vmem:[%s12755_s17 + $0xf1] sm:$0xff]  ;;  %v432_v43 = vld [vmem:[%s12755_s17 + $0x109] sm:$0xff] }
  0x2d   : > { %10595 = vmatprep.mubr.msk.bf16.mxu1 %vm455_vm1, %v441_v47  ;;  %v12883_v39 = vpack.c.bf16 %v4846_v37, %v4845_v36  ;;  %v430_v41 = vld [vmem:[%s12755_s17 + $0xf9] sm:$0xff]  ;;  %v431_v42 = vld [vmem:[%s12755_s17 + $0x101] sm:$0xff]  ;;  %v4848_v46 = vld [vmem:[%s12767_s29 + $0x6c] sm:$0xff] }
  0x2e   : > { %v450_v44 = vpack.c.bf16 %v430_v41, %v429_v40  ;;  %v4847_v45 = vld [vmem:[%s12767_s29 + $0x64] sm:$0xff]  ;;  %v451_v47 = vpack.c.bf16 %v432_v43, %v431_v42  ;;  %v4849_v48 = vld [vmem:[%s12767_s29 + $0x74] sm:$0xff]  ;;  %v4850_v49 = vld [vmem:[%s12767_s29 + $0x7c] sm:$0xff] }
  0x2f   : > { %11086 = vmatmul.mubr.msk.bf16.gmra.mrb[8].mxu0 %vm455_vm1, %v4552_v50  ;;  %v12898_v50 = vpack.c.bf16 %v4848_v46, %v4847_v45  ;;  %v433_v52 = vld [vmem:[%s12755_s17 + $0x111] sm:$0xff]  ;;  %v434_v53 = vld [vmem:[%s12755_s17 + $0x119] sm:$0xff]  ;;  %v345_v55 = vld [vmem:[%s12755_s17 + $0x8] sm:$0xff] }
  0x30   : > { %11089 = vmatprep.mubr.msk.bf16.mxu0 %vm455_vm1, %v4553_v51  ;;  %v12901_v51 = vpack.c.bf16 %v4850_v49, %v4849_v48  ;;  %v344_v54 = vld [vmem:[%s12755_s17] sm:$0xff]  ;;  %v4852_v58 = vld [vmem:[%s12767_s29 + $0x8c] sm:$0xff]  ;;  %v4853_v60 = vld [vmem:[%s12767_s29 + $0x94] sm:$0xff] }
  0x31   : > { %v4851_v57 = vld [vmem:[%s12767_s29 + $0x84] sm:$0xff]  ;;  %v4854_v61 = vld [vmem:[%s12767_s29 + $0x9c] sm:$0xff]  ;;  %v346_v0 = vld [vmem:[%s12755_s17 + $0x10] sm:$0xff] }
  0x32   : > { %v347_v1 = vld [vmem:[%s12755_s17 + $0x18] sm:$0xff]  ;;  %v348_v2 = vld [vmem:[%s12755_s17 + $0x20] sm:$0xff]  ;;  %v349_v4 = vld [vmem:[%s12755_s17 + $0x28] sm:$0xff] }
  0x33   : > { %v4855_v6 = vld [vmem:[%s12767_s29 + $0xa4] sm:$0xff]  ;;  %v4856_v7 = vld [vmem:[%s12767_s29 + $0xac] sm:$0xff]  ;;  %v4857_v9 = vld [vmem:[%s12767_s29 + $0xb4] sm:$0xff] }
  0x34   : > { %10596 = vmatmul.mubr.msk.bf16.gmra.mrb[12].mxu1 %vm455_vm1, %v442_v56  ;;  %v452_v56 = vpack.c.bf16 %v434_v53, %v433_v52  ;;  %v4858_v10 = vld [vmem:[%s12767_s29 + $0xbc] sm:$0xff]  ;;  %v12941_v13 = vld [vmem:[%s14821_s3 + $0xc] sm:$0xf]  ;;  %v350_v15 = vld [vmem:[%s12755_s17 + $0x30] sm:$0xff] }
  0x35   : > { %10599 = vmatprep.mubr.msk.bf16.mxu1 %vm455_vm1, %v443_v59  ;;  %v380_v59 = vpack.c.bf16 %v345_v55, %v344_v54  ;;  %v12944_v14 = vpack.c.bf16 %v4858_v10, %v4857_v9  ;;  %v351_v17 = vld [vmem:[%s12755_s17 + $0x38] sm:$0xff]  ;;  %v4859_v20 = vld [vmem:[%s12767_s29 + $0xc4] sm:$0xff]  ;;  %v354_v29 = vld [vmem:[%s12755_s17 + $0x50] sm:$0xff] }
  0x36   : > { %v383_v19 = vpack.c.bf16 %v351_v17, %v350_v15  ;;  %v4861_v23 = vld [vmem:[%s12767_s29 + $0xd4] sm:$0xff]  ;;  %v357_v33 = vld [vmem:[%s12755_s17 + $0x68] sm:$0xff]  ;;  %v4866_v41 = vld [vmem:[%s12767_s29 + $0xfc] sm:$0xff]  ;;  %v5600_v15 = vsel %vm510_vm0, %v12868_v32, 0 }
  0x37   : > { %11090 = vmatmul.mubr.msk.bf16.gmra.mrb[12].mxu0 %vm455_vm1, %v4554_v62  ;;  %v12916_v62 = vpack.c.bf16 %v4852_v58, %v4851_v57  ;;  %v355_v30 = vld [vmem:[%s12755_s17 + $0x58] sm:$0xff]  ;;  %v4864_v36 = vld [vmem:[%s12767_s29 + $0xec] sm:$0xff]  ;;  %v360_v46 = vld [vmem:[%s12755_s17 + $0x80] sm:$0xff] }
  0x38   : > { %11093 = vmatprep.mubr.msk.bf16.mxu0 %vm455_vm1, %v4555_v63  ;;  %v12919_v63 = vpack.c.bf16 %v4854_v61, %v4853_v60  ;;  %v385_v34 = vpack.c.bf16 %v355_v30, %v354_v29  ;;  %v4865_v40 = vld [vmem:[%s12767_s29 + $0xf4] sm:$0xff]  ;;  %v4867_v49 = vld [vmem:[%s12767_s29 + $0x104] sm:$0xff]  ;;  %v4868_v52 = vld [vmem:[%s12767_s29 + $0x10c] sm:$0xff] }
  0x39   : > { %v12982_v43 = vpack.c.bf16 %v4866_v41, %v4865_v40  ;;  %v359_v45 = vld [vmem:[%s12755_s17 + $0x78] sm:$0xff]  ;;  %v362_v58 = vld [vmem:[%s12755_s17 + $0x90] sm:$0xff]  ;;  %v364_v60 = vld [vmem:[%s12755_s17 + $0xa0] sm:$0xff]  ;;  %v1362_v40 = vsel %vm510_vm0, %v12941_v13, 0 }
  0x3a   : > { %v4869_v54 = vld [vmem:[%s12767_s29 + $0x114] sm:$0xff]  ;;  %v4870_v55 = vld [vmem:[%s12767_s29 + $0x11c] sm:$0xff]  ;;  %v365_v61 = vld [vmem:[%s12755_s17 + $0xa8] sm:$0xff] }
  0x3b   : > { %v13000_v57 = vpack.c.bf16 %v4870_v55, %v4869_v54  ;;  %v369_v9 = vld [vmem:[%s12755_s17 + $0xc8] sm:$0xff]  ;;  %v370_v17 = vld [vmem:[%s12755_s17 + $0xd0] sm:$0xff]  ;;  %v379_v30 = vld [vmem:[%s12755_s17 + $0x118] sm:$0xff] }
  0x3c   : > { %10600 = vmatmul.mubr.msk.bf16.gmra.mrb[16].mxu1 %vm455_vm1, %v444_v5  ;;  %v381_v5 = vpack.c.bf16 %v347_v1, %v346_v0  ;;  %v4871_v1 = vld [vmem:[%s12767_s29 + $0x124] sm:$0xff]  ;;  %v378_v29 = vld [vmem:[%s12755_s17 + $0x110] sm:$0xff]  ;;  %v940_v54 = vld [vmem:[%s12755_s17 + $0x7a] sm:$0xff] }
  0x3d   : > { %10603 = vmatprep.mubr.msk.bf16.mxu1 %vm455_vm1, %v445_v8  ;;  %v382_v8 = vpack.c.bf16 %v349_v4, %v348_v2  ;;  %v4872_v2 = vld [vmem:[%s12767_s29 + $0x12c] sm:$0xff]  ;;  %v390_v4 = vpack.c.bf16 %v365_v61, %v364_v60  ;;  %v944_v60 = vld [vmem:[%s12755_s17 + $0x9a] sm:$0xff] }
  0x3e   : > { %v13083_v41 = vld [vmem:[%s14821_s3 + $0x10] sm:$0xf] }
  0x3f   : > { %11094 = vmatmul.mubr.msk.bf16.gmra.mrb[16].mxu0 %vm455_vm1, %v4556_v11  ;;  %v1036_v11 = vsel %vm510_vm0, %v12773_v16, 0  ;;  %v352_v16 = vld [vmem:[%s12755_s17 + $0x40] sm:$0xff]  ;;  %v942_v55 = vld [vmem:[%s12755_s17 + $0x8a] sm:$0xff] }
  0x40   : > { %11115 = vmatprep.mubr.msk.bf16.mxu0 %vm455_vm1, %v4873_v12  ;;  %v12936_v12 = vpack.c.bf16 %v4856_v7, %v4855_v6  ;;  %v366_v6 = vld [vmem:[%s12755_s17 + $0xb0] sm:$0xff]  ;;  %v367_v7 = vld [vmem:[%s12755_s17 + $0xb8] sm:$0xff] }
  0x41   : > { %v391_v10 = vpack.c.bf16 %v367_v7, %v366_v6  ;;  %v946_v61 = vld [vmem:[%s12755_s17 + $0xaa] sm:$0xff] }
  0x42   : > { %v5490_v6 = vld [vmem:[%s12767_s29 + $0x2d] sm:$0xff] }
  0x44   : > { %10604 = vmatmul.mubr.msk.bf16.gmra.mrb[20].mxu1 %vm455_vm1, %v446_v18  ;;  %v353_v18 = vld [vmem:[%s12755_s17 + $0x48] sm:$0xff] }
  0x45   : > { %10607 = vmatprep.mubr.msk.bf16.mxu1 %vm455_vm1, %v447_v21  ;;  %v4860_v21 = vld [vmem:[%s12767_s29 + $0xcc] sm:$0xff]  ;;  %v384_v22 = vpack.c.bf16 %v353_v18, %v352_v16  ;;  %v371_v16 = vld [vmem:[%s12755_s17 + $0xd8] sm:$0xff]  ;;  %v372_v18 = vld [vmem:[%s12755_s17 + $0xe0] sm:$0xff] }
  0x46   : > { %v12961_v27 = vpack.c.bf16 %v4860_v21, %v4859_v20  ;;  %v393_v20 = vpack.c.bf16 %v371_v16, %v370_v17  ;;  %v374_v21 = vld [vmem:[%s12755_s17 + $0xf0] sm:$0xff]  ;;  %v5492_v17 = vld [vmem:[%s12767_s29 + $0x3d] sm:$0xff] }
  0x47   : > { %11116 = vmatmul.mubr.msk.bf16.vlgmr.msra.gmra.mrb[0].mxu0 %vm455_vm1, %v12853_v24 }
  0x48   : > { %11152 = vmatpush3.bf16.msra.mxu0 %v5274_v26  ;;  %11119 = vmatprep.mubr.msk.bf16.mxu0 %vm455_vm1, %v12856_v25  ;;  %v4862_v26 = vld [vmem:[%s12767_s29 + $0xdc] sm:$0xff] }
  0x49   : > { %12562 = vmatprep.subr.msk.bf16.mxu0 %vm510_vm0, %v12868_v32  ;;  %v12964_v28 = vpack.c.bf16 %v4862_v26, %v4861_v23  ;;  %v377_v23 = vld [vmem:[%s12755_s17 + $0x108] sm:$0xff] }
  0x4c   : > { %10608 = vmatmul.mubr.msk.bf16.gmra.mrb[24].mxu1 %vm455_vm1, %v448_v31  ;;  %v356_v31 = vld [vmem:[%s12755_s17 + $0x60] sm:$0xff] }
  0x4d   : > { %10611 = vmatprep.mubr.msk.bf16.mxu1 %vm455_vm1, %v449_v35  ;;  %v4863_v35 = vld [vmem:[%s12767_s29 + $0xe4] sm:$0xff]  ;;  %v386_v37 = vpack.c.bf16 %v357_v33, %v356_v31 }
  0x4e   : > { %v12979_v42 = vpack.c.bf16 %v4864_v36, %v4863_v35  ;;  %v925_v31 = vld [vmem:[%s12755_s17 + $0x2] sm:$0xff]  ;;  %v926_v33 = vld [vmem:[%s12755_s17 + $0xa] sm:$0xff]  ;;  %v928_v35 = vld [vmem:[%s12755_s17 + $0x1a] sm:$0xff] }
  0x4f   : > { %11120 = vmatmul.mubr.msk.bf16.gmra.mrb[4].mxu0 %vm455_vm1, %v12880_v38  ;;  %v929_v36 = vld [vmem:[%s12755_s17 + $0x22] sm:$0xff] }
  0x50   : > { %11123 = vmatprep.mubr.msk.bf16.mxu0 %vm455_vm1, %v12883_v39 }
  0x54   : > { %10612 = vmatmul.mubr.msk.bf16.gmra.mrb[28].mxu1 %vm455_vm1, %v450_v44  ;;  %v358_v44 = vld [vmem:[%s12755_s17 + $0x70] sm:$0xff] }
  0x55   : > { %10615 = vmatprep.mubr.msk.bf16.mxu1 %vm455_vm1, %v451_v47  ;;  %v361_v47 = vld [vmem:[%s12755_s17 + $0x88] sm:$0xff]  ;;  %v387_v48 = vpack.c.bf16 %v359_v45, %v358_v44 }
  0x56   : > { %v388_v53 = vpack.c.bf16 %v361_v47, %v360_v46  ;;  %v933_v44 = vld [vmem:[%s12755_s17 + $0x42] sm:$0xff]  ;;  %v935_v47 = vld [vmem:[%s12755_s17 + $0x52] sm:$0xff] }
  0x57   : > { %11124 = vmatmul.mubr.msk.bf16.gmra.mrb[8].mxu0 %vm455_vm1, %v12898_v50 }
  0x58   : > { %11127 = vmatprep.mubr.msk.bf16.mxu0 %vm455_vm1, %v12901_v51 }
  0x5c   : > { %10616 = vmatmul.mubr.msk.bf16.gmra.mrb[32].mxu1 %vm455_vm1, %v452_v56  ;;  %v12997_v56 = vpack.c.bf16 %v4868_v52, %v4867_v49  ;;  %v938_v49 = vld [vmem:[%s12755_s17 + $0x6a] sm:$0xff] }
  0x5d   : > { %10621 = vmatprep.mubr.msk.bf16.mxu1 %vm455_vm1, %v380_v59  ;;  %v363_v59 = vld [vmem:[%s12755_s17 + $0x98] sm:$0xff] }
  0x5e   : > { %v389_v0 = vpack.c.bf16 %v363_v59, %v362_v58  ;;  %v943_v59 = vld [vmem:[%s12755_s17 + $0x92] sm:$0xff] }
  0x5f   : > { %11128 = vmatmul.mubr.msk.bf16.gmra.mrb[12].mxu0 %vm455_vm1, %v12916_v62 }
  0x60   : > { %11131 = vmatprep.mubr.msk.bf16.mxu0 %vm455_vm1, %v12919_v63 }
  0x64   : > { %10622 = vmatmul.mubr.msk.bf16.vlgmr.msra.gmra.mrb[0].mxu1 %vm455_vm1, %v381_v5  ;;  %v13013_v5 = vpack.c.bf16 %v4872_v2, %v4871_v1  ;;  %v5198_v1 = vld [vmem:[%s12767_s29 + $0x13c] sm:$0xff] }
  0x65   : > { %10625 = vmatprep.mubr.msk.bf16.mxu1 %vm455_vm1, %v382_v8  ;;  %10658 = vmatpush3.bf16.msra.mxu1 %v1036_v11  ;;  %v368_v8 = vld [vmem:[%s12755_s17 + $0xc0] sm:$0xff] }
  0x66   : > { %12548 = vmatprep.subr.msk.bf16.mxu1 %vm510_vm0, %v12941_v13  ;;  %v392_v11 = vpack.c.bf16 %v369_v9, %v368_v8  ;;  %v934_v13 = vld [vmem:[%s12755_s17 + $0x4a] sm:$0xff]  ;;  %v947_v8 = vld [vmem:[%s12755_s17 + $0xb2] sm:$0xff]  ;;  %v949_v9 = vld [vmem:[%s12755_s17 + $0xc2] sm:$0xff] }
  0x67   : > { %11132 = vmatmul.mubr.msk.bf16.gmra.mrb[16].mxu0 %vm455_vm1, %v12936_v12  ;;  %v13101_v46 = vpack.c.bf16 %v934_v13, %v933_v44  ;;  %v5500_v44 = vld [vmem:[%s12767_s29 + $0x7d] sm:$0xff] }
  0x68   : > { %11135 = vmatprep.mubr.msk.bf16.mxu0 %vm455_vm1, %v12944_v14 }
  0x6c   : > { %10626 = vmatmul.mubr.msk.bf16.gmra.mrb[4].mxu1 %vm455_vm1, %v383_v19  ;;  %v373_v19 = vld [vmem:[%s12755_s17 + $0xe8] sm:$0xff] }
  0x6d   : > { %10629 = vmatprep.mubr.msk.bf16.mxu1 %vm455_vm1, %v384_v22  ;;  %v394_v32 = vpack.c.bf16 %v373_v19, %v372_v18  ;;  %v375_v22 = vld [vmem:[%s12755_s17 + $0xf8] sm:$0xff]  ;;  %v5493_v18 = vld [vmem:[%s12767_s29 + $0x45] sm:$0xff]  ;;  %v5494_v19 = vld [vmem:[%s12767_s29 + $0x4d] sm:$0xff] }
  0x6f   : > { %11136 = vmatmul.mubr.msk.bf16.gmra.mrb[20].mxu0 %vm455_vm1, %v12961_v27 }
  0x70   : > { %11139 = vmatprep.mubr.msk.bf16.mxu0 %vm455_vm1, %v12964_v28 }
  0x74   : > { %10630 = vmatmul.mubr.msk.bf16.gmra.mrb[8].mxu1 %vm455_vm1, %v385_v34  ;;  %v927_v34 = vld [vmem:[%s12755_s17 + $0x12] sm:$0xff] }
  0x75   : > { %10633 = vmatprep.mubr.msk.bf16.mxu1 %vm455_vm1, %v386_v37  ;;  %v930_v37 = vld [vmem:[%s12755_s17 + $0x2a] sm:$0xff] }
  0x77   : > { %11140 = vmatmul.mubr.msk.bf16.gmra.mrb[24].mxu0 %vm455_vm1, %v12979_v42 }
  0x78   : > { %11143 = vmatprep.mubr.msk.bf16.mxu0 %vm455_vm1, %v12982_v43 }
  0x7c   : > { %10634 = vmatmul.mubr.msk.bf16.gmra.mrb[12].mxu1 %vm455_vm1, %v387_v48  ;;  %v936_v48 = vld [vmem:[%s12755_s17 + $0x5a] sm:$0xff] }
  0x7d   : > { %10637 = vmatprep.mubr.msk.bf16.mxu1 %vm455_vm1, %v388_v53  ;;  %v13113_v52 = vpack.c.bf16 %v936_v48, %v935_v47  ;;  %v939_v53 = vld [vmem:[%s12755_s17 + $0x72] sm:$0xff]  ;;  %v5501_v47 = vld [vmem:[%s12767_s29 + $0x85] sm:$0xff] }
  0x7e   : > { %v5502_v48 = vld [vmem:[%s12767_s29 + $0x8d] sm:$0xff] }
  0x7f   : > { %11144 = vmatmul.mubr.msk.bf16.gmra.mrb[28].mxu0 %vm455_vm1, %v12997_v56 }
  0x80   : > { %11147 = vmatprep.mubr.msk.bf16.mxu0 %vm455_vm1, %v13000_v57 }
  0x84   : > { %10638 = vmatmul.mubr.msk.bf16.gmra.mrb[16].mxu1 %vm455_vm1, %v389_v0  ;;  %v5197_v0 = vld [vmem:[%s12767_s29 + $0x134] sm:$0xff] }
  0x85   : > { %10641 = vmatprep.mubr.msk.bf16.mxu1 %vm455_vm1, %v390_v4  ;;  %v5489_v4 = vld [vmem:[%s12767_s29 + $0x25] sm:$0xff]  ;;  %v5216_v7 = vpack.c.bf16 %v5198_v1, %v5197_v0  ;;  %v5507_v1 = vld [vmem:[%s12767_s29 + $0xb5] sm:$0xff] }
  0x87   : > { %11148 = vmatmul.mubr.msk.bf16.gmra.mrb[32].mxu0 %vm455_vm1, %v13013_v5 }
  0x88   : > { %11153 = vmatprep.mubr.msk.bf16.mxu0 %vm455_vm1, %v12853_v24  ;;  %v13036_v24 = vld [vmem:[%s14821_s3 + $0x44] sm:$0xf] }
  0x8c   : > { %10642 = vmatmul.mubr.msk.bf16.gmra.mrb[20].mxu1 %vm455_vm1, %v391_v10  ;;  %v950_v10 = vld [vmem:[%s12755_s17 + $0xca] sm:$0xff] }
  0x8d   : > { %10645 = vmatprep.mubr.msk.bf16.mxu1 %vm455_vm1, %v392_v11  ;;  %v13169_v16 = vpack.c.bf16 %v950_v10, %v949_v9  ;;  %v5512_v9 = vld [vmem:[%s12767_s29 + $0xdd] sm:$0xff]  ;;  %v5513_v10 = vld [vmem:[%s12767_s29 + $0xe5] sm:$0xff] }
  0x8f   : > { %11154 = vmatmul.mubr.msk.bf16.vlgmr.msra.gmra.mrb[0].mxu0 %vm455_vm1, %v12856_v25  ;;  %v376_v25 = vld [vmem:[%s12755_s17 + $0x100] sm:$0xff] }
  0x90   : > { %11190 = vmatpush3.bf16.msra.mxu0 %v5600_v15  ;;  %11157 = vmatprep.mubr.msk.bf16.mxu0 %vm455_vm1, %v12880_v38  ;;  %v395_v38 = vpack.c.bf16 %v375_v22, %v374_v21  ;;  %v396_v26 = vpack.c.bf16 %v377_v23, %v376_v25  ;;  %v5491_v15 = vld [vmem:[%s12767_s29 + $0x35] sm:$0xff]  ;;  %v5926_v21 = vsel %vm510_vm0, %v13036_v24, 0  ;;  %v953_v23 = vld [vmem:[%s12755_s17 + $0xe2] sm:$0xff] }
  0x91   : > { %12563 = vmatprep.subr.msk.bf16.mxu0 %vm510_vm0, %v13036_v24  ;;  %v951_v22 = vld [vmem:[%s12755_s17 + $0xd2] sm:$0xff]  ;;  %v952_v25 = vld [vmem:[%s12755_s17 + $0xda] sm:$0xff] }
  0x92   : > { %v13189_v24 = vpack.c.bf16 %v952_v25, %v951_v22  ;;  %v5521_v22 = vld [vmem:[%s12767_s29 + $0x125] sm:$0xff]  ;;  %v5522_v25 = vld [vmem:[%s12767_s29 + $0x12d] sm:$0xff] }
  0x94   : > { %10646 = vmatmul.mubr.msk.bf16.gmra.mrb[24].mxu1 %vm455_vm1, %v393_v20  ;;  %v5526_v20 = vpack.c.bf16 %v5492_v17, %v5491_v15  ;;  %v5515_v17 = vld [vmem:[%s12767_s29 + $0xf5] sm:$0xff] }
  0x95   : > { %10649 = vmatprep.mubr.msk.bf16.mxu1 %vm455_vm1, %v394_v32  ;;  %v5527_v32 = vpack.c.bf16 %v5494_v19, %v5493_v18  ;;  %v5516_v18 = vld [vmem:[%s12767_s29 + $0xfd] sm:$0xff]  ;;  %v5517_v19 = vld [vmem:[%s12767_s29 + $0x105] sm:$0xff] }
  0x97   : > { %11158 = vmatmul.mubr.msk.bf16.gmra.mrb[4].mxu0 %vm455_vm1, %v12883_v39  ;;  %v397_v39 = vpack.c.bf16 %v379_v30, %v378_v29  ;;  %v5495_v29 = vld [vmem:[%s12767_s29 + $0x55] sm:$0xff]  ;;  %v5496_v30 = vld [vmem:[%s12767_s29 + $0x5d] sm:$0xff] }
  0x98   : > { %11161 = vmatprep.mubr.msk.bf16.mxu0 %vm455_vm1, %v12898_v50  ;;  %v961_v50 = vpack.c.bf16 %v926_v33, %v925_v31  ;;  %v5497_v33 = vld [vmem:[%s12767_s29 + $0x65] sm:$0xff] }
  0x9c   : > { %10650 = vmatmul.mubr.msk.bf16.gmra.mrb[28].mxu1 %vm455_vm1, %v395_v38  ;;  %v954_v38 = vld [vmem:[%s12755_s17 + $0xea] sm:$0xff] }
  0x9d   : > { %10653 = vmatprep.mubr.msk.bf16.mxu1 %vm455_vm1, %v396_v26  ;;  %v13186_v26 = vld [vmem:[%s14821_s3 + $0x48] sm:$0xf]  ;;  %v13194_v31 = vpack.c.bf16 %v954_v38, %v953_v23  ;;  %v5524_v38 = vld [vmem:[%s12767_s29 + $0x13d] sm:$0xff] }
  0x9f   : > { %11162 = vmatmul.mubr.msk.bf16.gmra.mrb[8].mxu0 %vm455_vm1, %v12901_v51  ;;  %v13072_v51 = vpack.c.bf16 %v928_v35, %v927_v34  ;;  %v955_v35 = vld [vmem:[%s12755_s17 + $0xf2] sm:$0xff] }
  0xa0   : > { %11165 = vmatprep.mubr.msk.bf16.mxu0 %vm455_vm1, %v12916_v62  ;;  %v13076_v62 = vpack.c.bf16 %v930_v37, %v929_v36  ;;  %v956_v36 = vld [vmem:[%s12755_s17 + $0xfa] sm:$0xff]  ;;  %v957_v37 = vld [vmem:[%s12755_s17 + $0x102] sm:$0xff] }
  0xa4   : > { %10654 = vmatmul.mubr.msk.bf16.gmra.mrb[32].mxu1 %vm455_vm1, %v397_v39  ;;  %v5498_v39 = vld [vmem:[%s12767_s29 + $0x6d] sm:$0xff] }
  0xa5   : > { %10659 = vmatprep.mubr.msk.bf16.mxu1 %vm455_vm1, %v961_v50  ;;  %v5528_v50 = vpack.c.bf16 %v5496_v30, %v5495_v29  ;;  %v5529_v34 = vpack.c.bf16 %v5498_v39, %v5497_v33  ;;  %v5815_v29 = vld [vmem:[%s12767_s29 + $0x26] sm:$0xff]  ;;  %v5816_v30 = vld [vmem:[%s12767_s29 + $0x2e] sm:$0xff]  ;;  %v5818_v39 = vld [vmem:[%s12767_s29 + $0x3e] sm:$0xff] }
  0xa7   : > { %11166 = vmatmul.mubr.msk.bf16.gmra.mrb[12].mxu0 %vm455_vm1, %v12919_v63  ;;  %v931_v63 = vld [vmem:[%s12755_s17 + $0x32] sm:$0xff] }
  0xa8   : > { %11169 = vmatprep.mubr.msk.bf16.mxu0 %vm455_vm1, %v12936_v12  ;;  %v932_v12 = vld [vmem:[%s12755_s17 + $0x3a] sm:$0xff] }
  0xa9   : > { %v13097_v45 = vpack.c.bf16 %v932_v12, %v931_v63  ;;  %v13209_v63 = vpack.c.bf16 %v956_v36, %v955_v35  ;;  %v5499_v12 = vld [vmem:[%s12767_s29 + $0x75] sm:$0xff]  ;;  %v13310_v36 = vld [vmem:[%s14821_s3 + $0x4c] sm:$0xf] }
  0xac   : > { %10660 = vmatmul.mubr.msk.bf16.vlgmr.msra.gmra.mrb[0].mxu1 %vm455_vm1, %v13072_v51 }
  0xad   : > { %10663 = vmatprep.mubr.msk.bf16.mxu1 %vm455_vm1, %v13076_v62  ;;  %10696 = vmatpush3.bf16.msra.mxu1 %v1362_v40  ;;  %v958_v40 = vld [vmem:[%s12755_s17 + $0x10a] sm:$0xff] }
  0xae   : > { %12549 = vmatprep.subr.msk.bf16.mxu1 %vm510_vm0, %v13083_v41  ;;  %v13214_v13 = vpack.c.bf16 %v958_v40, %v957_v37  ;;  %v5822_v37 = vld [vmem:[%s12767_s29 + $0x5e] sm:$0xff]  ;;  %v5824_v40 = vld [vmem:[%s12767_s29 + $0x6e] sm:$0xff] }
  0xaf   : > { %11170 = vmatmul.mubr.msk.bf16.gmra.mrb[16].mxu0 %vm455_vm1, %v12944_v14  ;;  %v937_v14 = vld [vmem:[%s12755_s17 + $0x62] sm:$0xff] }
  0xb0   : > { %11173 = vmatprep.mubr.msk.bf16.mxu0 %vm455_vm1, %v12961_v27  ;;  %v13117_v27 = vpack.c.bf16 %v938_v49, %v937_v14  ;;  %v5530_v14 = vpack.c.bf16 %v5500_v44, %v5499_v12  ;;  %v5531_v49 = vpack.c.bf16 %v5502_v48, %v5501_v47  ;;  %v5825_v44 = vld [vmem:[%s12767_s29 + $0x76] sm:$0xff]  ;;  %v5826_v47 = vld [vmem:[%s12767_s29 + $0x7e] sm:$0xff]  ;;  %v5827_v48 = vld [vmem:[%s12767_s29 + $0x86] sm:$0xff] }
  0xb4   : > { %10664 = vmatmul.mubr.msk.bf16.gmra.mrb[4].mxu1 %vm455_vm1, %v13097_v45 }
  0xb5   : > { %10667 = vmatprep.mubr.msk.bf16.mxu1 %vm455_vm1, %v13101_v46 }
  0xb7   : > { %11174 = vmatmul.mubr.msk.bf16.gmra.mrb[20].mxu0 %vm455_vm1, %v12964_v28  ;;  %v941_v28 = vld [vmem:[%s12755_s17 + $0x82] sm:$0xff] }
  0xb8   : > { %11177 = vmatprep.mubr.msk.bf16.mxu0 %vm455_vm1, %v12979_v42  ;;  %v13129_v42 = vpack.c.bf16 %v940_v54, %v939_v53  ;;  %v13133_v58 = vpack.c.bf16 %v942_v55, %v941_v28  ;;  %v959_v53 = vld [vmem:[%s12755_s17 + $0x112] sm:$0xff]  ;;  %v960_v54 = vld [vmem:[%s12755_s17 + $0x11a] sm:$0xff] }
  0xb9   : > { %v13225_v28 = vpack.c.bf16 %v960_v54, %v959_v53  ;;  %v5503_v55 = vld [vmem:[%s12767_s29 + $0x95] sm:$0xff]  ;;  %v1286_v53 = vld [vmem:[%s12755_s17 + $0x12a] sm:$0xff] }
  0xba   : > { %v1577_v54 = vld [vmem:[%s12755_s17 + $0x13] sm:$0xff] }
  0xbc   : > { %10668 = vmatmul.mubr.msk.bf16.gmra.mrb[8].mxu1 %vm455_vm1, %v13113_v52 }
  0xbd   : > { %10671 = vmatprep.mubr.msk.bf16.mxu1 %vm455_vm1, %v13117_v27 }
  0xbf   : > { %11178 = vmatmul.mubr.msk.bf16.gmra.mrb[24].mxu0 %vm455_vm1, %v12982_v43  ;;  %v945_v43 = vld [vmem:[%s12755_s17 + $0xa2] sm:$0xff] }
  0xc0   : > { %11181 = vmatprep.mubr.msk.bf16.mxu0 %vm455_vm1, %v12997_v56  ;;  %v13145_v56 = vpack.c.bf16 %v944_v60, %v943_v59  ;;  %v13151_v2 = vpack.c.bf16 %v946_v61, %v945_v43  ;;  %v5504_v59 = vld [vmem:[%s12767_s29 + $0x9d] sm:$0xff]  ;;  %v5505_v60 = vld [vmem:[%s12767_s29 + $0xa5] sm:$0xff]  ;;  %v5506_v43 = vld [vmem:[%s12767_s29 + $0xad] sm:$0xff] }
  0xc1   : > { %v5532_v61 = vpack.c.bf16 %v5504_v59, %v5503_v55  ;;  %v5533_v0 = vpack.c.bf16 %v5506_v43, %v5505_v60  ;;  %v1578_v55 = vld [vmem:[%s12755_s17 + $0x1b] sm:$0xff] }
  0xc2   : > { %v5829_v60 = vld [vmem:[%s12767_s29 + $0x96] sm:$0xff]  ;;  %v1613_v43 = vpack.c.bf16 %v1578_v55, %v1577_v54 }
  0xc3   : > { %v1597_v54 = vld [vmem:[%s12755_s17 + $0xb3] sm:$0xff]  ;;  %v1598_v55 = vld [vmem:[%s12755_s17 + $0xbb] sm:$0xff] }
  0xc4   : > { %10672 = vmatmul.mubr.msk.bf16.gmra.mrb[12].mxu1 %vm455_vm1, %v13129_v42 }
  0xc5   : > { %10675 = vmatprep.mubr.msk.bf16.mxu1 %vm455_vm1, %v13133_v58 }
  0xc7   : > { %11182 = vmatmul.mubr.msk.bf16.gmra.mrb[28].mxu0 %vm455_vm1, %v13000_v57  ;;  %v5525_v57 = vpack.c.bf16 %v5490_v6, %v5489_v4  ;;  %v5508_v4 = vld [vmem:[%s12767_s29 + $0xbd] sm:$0xff]  ;;  %v5509_v6 = vld [vmem:[%s12767_s29 + $0xc5] sm:$0xff] }
  0xc8   : > { %11185 = vmatprep.mubr.msk.bf16.mxu0 %vm455_vm1, %v13013_v5  ;;  %v948_v5 = vld [vmem:[%s12755_s17 + $0xba] sm:$0xff] }
  0xc9   : > { %v13164_v11 = vpack.c.bf16 %v948_v5, %v947_v8  ;;  %v5534_v8 = vpack.c.bf16 %v5508_v4, %v5507_v1  ;;  %v1579_v4 = vld [vmem:[%s12755_s17 + $0x23] sm:$0xff] }
  0xcc   : > { %10676 = vmatmul.mubr.msk.bf16.gmra.mrb[16].mxu1 %vm455_vm1, %v13145_v56 }
  0xcd   : > { %10679 = vmatprep.mubr.msk.bf16.mxu1 %vm455_vm1, %v13151_v2 }
  0xcf   : > { %11186 = vmatmul.mubr.msk.bf16.gmra.mrb[32].mxu0 %vm455_vm1, %v5216_v7  ;;  %v5510_v7 = vld [vmem:[%s12767_s29 + $0xcd] sm:$0xff] }
  0xd0   : > { %11191 = vmatprep.mubr.msk.bf16.mxu0 %vm455_vm1, %v5525_v57  ;;  %v1688_v57 = vsel %vm510_vm0, %v13083_v41, 0  ;;  %v5535_v5 = vpack.c.bf16 %v5510_v7, %v5509_v6  ;;  %v5511_v41 = vld [vmem:[%s12767_s29 + $0xd5] sm:$0xff]  ;;  %v1580_v6 = vld [vmem:[%s12755_s17 + $0x2b] sm:$0xff] }
  0xd1   : > { %v5536_v15 = vpack.c.bf16 %v5512_v9, %v5511_v41  ;;  %v1581_v7 = vld [vmem:[%s12755_s17 + $0x33] sm:$0xff]  ;;  %v5834_v41 = vld [vmem:[%s12767_s29 + $0xbe] sm:$0xff] }
  0xd4   : > { %10680 = vmatmul.mubr.msk.bf16.gmra.mrb[20].mxu1 %vm455_vm1, %v13164_v11 }
  0xd5   : > { %10683 = vmatprep.mubr.msk.bf16.mxu1 %vm455_vm1, %v13169_v16 }
  0xd7   : > { %11192 = vmatmul.mubr.msk.bf16.vlgmr.msra.gmra.mrb[0].mxu0 %vm455_vm1, %v5526_v20  ;;  %v5518_v20 = vld [vmem:[%s12767_s29 + $0x10d] sm:$0xff] }
  0xd8   : > { %11228 = vmatpush3.bf16.msra.mxu0 %v5926_v21  ;;  %11195 = vmatprep.mubr.msk.bf16.mxu0 %vm455_vm1, %v5527_v32  ;;  %v5538_v32 = vpack.c.bf16 %v5516_v18, %v5515_v17  ;;  %v5520_v21 = vld [vmem:[%s12767_s29 + $0x11d] sm:$0xff]  ;;  %v13361_v17 = vld [vmem:[%s14821_s3 + $0x18] sm:$0xf] }
  0xd9   : > { %12564 = vmatprep.subr.msk.bf16.mxu0 %vm510_vm0, %v13186_v26 }
  0xdc   : > { %10684 = vmatmul.mubr.msk.bf16.gmra.mrb[24].mxu1 %vm455_vm1, %v13189_v24 }
  0xdd   : > { %10687 = vmatprep.mubr.msk.bf16.mxu1 %vm455_vm1, %v13194_v31 }
  0xdf   : > { %11196 = vmatmul.mubr.msk.bf16.gmra.mrb[4].mxu0 %vm455_vm1, %v5528_v50  ;;  %v5819_v50 = vld [vmem:[%s12767_s29 + $0x46] sm:$0xff] }
  0xe0   : > { %11199 = vmatprep.mubr.msk.bf16.mxu0 %vm455_vm1, %v5529_v34  ;;  %v5820_v34 = vld [vmem:[%s12767_s29 + $0x4e] sm:$0xff] }
  0xe4   : > { %10688 = vmatmul.mubr.msk.bf16.gmra.mrb[28].mxu1 %vm455_vm1, %v13209_v63 }
  0xe5   : > { %10691 = vmatprep.mubr.msk.bf16.mxu1 %vm455_vm1, %v13214_v13 }
  0xe7   : > { %11200 = vmatmul.mubr.msk.bf16.gmra.mrb[8].mxu0 %vm455_vm1, %v5530_v14  ;;  %v5828_v14 = vld [vmem:[%s12767_s29 + $0x8e] sm:$0xff] }
  0xe8   : > { %11203 = vmatprep.mubr.msk.bf16.mxu0 %vm455_vm1, %v5531_v49  ;;  %v5856_v49 = vpack.c.bf16 %v5826_v47, %v5825_v44  ;;  %v5846_v44 = vld [vmem:[%s12767_s29 + $0x11e] sm:$0xff] }
  0xec   : > { %10692 = vmatmul.mubr.msk.bf16.gmra.mrb[32].mxu1 %vm455_vm1, %v13225_v28 }
  0xed   : > { %10697 = vmatprep.mubr.msk.bf16.mxu1 %vm455_vm1, %v13072_v51  ;;  %v13247_v51 = vld [vmem:[%s14821_s3 + $0x14] sm:$0xf] }
  0xef   : > { %11204 = vmatmul.mubr.msk.bf16.gmra.mrb[12].mxu0 %vm455_vm1, %v5532_v61  ;;  %v5831_v61 = vld [vmem:[%s12767_s29 + $0xa6] sm:$0xff] }
  0xf0   : > { %11207 = vmatprep.mubr.msk.bf16.mxu0 %vm455_vm1, %v5533_v0 }
  0xf4   : > { %10698 = vmatmul.mubr.msk.bf16.vlgmr.msra.gmra.mrb[0].mxu1 %vm455_vm1, %v13076_v62  ;;  %v5514_v62 = vld [vmem:[%s12767_s29 + $0xed] sm:$0xff] }
  0xf5   : > { %10701 = vmatprep.mubr.msk.bf16.mxu1 %vm455_vm1, %v13097_v45  ;;  %10734 = vmatpush3.bf16.msra.mxu1 %v1688_v57  ;;  %v5537_v45 = vpack.c.bf16 %v5514_v62, %v5513_v10  ;;  %v1582_v57 = vld [vmem:[%s12755_s17 + $0x3b] sm:$0xff]  ;;  %v5835_v10 = vld [vmem:[%s12767_s29 + $0xc6] sm:$0xff]  ;;  %v5836_v62 = vld [vmem:[%s12767_s29 + $0xce] sm:$0xff] }
  0xf6   : > { %12550 = vmatprep.subr.msk.bf16.mxu1 %vm510_vm0, %v13247_v51  ;;  %v1615_v9 = vpack.c.bf16 %v1582_v57, %v1581_v7  ;;  %v5861_v18 = vpack.c.bf16 %v5836_v62, %v5835_v10  ;;  %v1601_v7 = vld [vmem:[%s12755_s17 + $0xd3] sm:$0xff]  ;;  %v1602_v57 = vld [vmem:[%s12755_s17 + $0xdb] sm:$0xff]  ;;  %v6146_v62 = vld [vmem:[%s13412_s16 + $0x28] sm:$0xff] }
  0xf7   : > { %11208 = vmatmul.mubr.msk.bf16.gmra.mrb[16].mxu0 %vm455_vm1, %v5534_v8  ;;  %v1614_v8 = vpack.c.bf16 %v1580_v6, %v1579_v4  ;;  %v1599_v4 = vld [vmem:[%s12755_s17 + $0xc3] sm:$0xff]  ;;  %v1600_v6 = vld [vmem:[%s12755_s17 + $0xcb] sm:$0xff] }
  0xf8   : > { %11211 = vmatprep.mubr.msk.bf16.mxu0 %vm455_vm1, %v5535_v5  ;;  %v5833_v5 = vld [vmem:[%s12767_s29 + $0xb6] sm:$0xff]  ;;  %v6145_v10 = vld [vmem:[%s13412_s16 + $0x20] sm:$0xff] }
  0xfc   : > { %10702 = vmatmul.mubr.msk.bf16.gmra.mrb[4].mxu1 %vm455_vm1, %v13101_v46  ;;  %v5539_v46 = vpack.c.bf16 %v5518_v20, %v5517_v19  ;;  %v1583_v19 = vld [vmem:[%s12755_s17 + $0x43] sm:$0xff]  ;;  %v1584_v20 = vld [vmem:[%s12755_s17 + $0x4b] sm:$0xff] }
  0xfd   : > { %10705 = vmatprep.mubr.msk.bf16.mxu1 %vm455_vm1, %v13113_v52  ;;  %v5519_v52 = vld [vmem:[%s12767_s29 + $0x115] sm:$0xff] }
  0xfe   : > { %v5540_v23 = vpack.c.bf16 %v5520_v21, %v5519_v52  ;;  %v5837_v52 = vld [vmem:[%s12767_s29 + $0xd6] sm:$0xff]  ;;  %v5838_v21 = vld [vmem:[%s12767_s29 + $0xde] sm:$0xff] }
  0xff   : > { %11212 = vmatmul.mubr.msk.bf16.gmra.mrb[20].mxu0 %vm455_vm1, %v5536_v15  ;;  %v2014_v15 = vsel %vm510_vm0, %v13247_v51, 0  ;;  %v1586_v51 = vld [vmem:[%s12755_s17 + $0x5b] sm:$0xff] }
 0x100   : > { %11215 = vmatprep.mubr.msk.bf16.mxu0 %vm455_vm1, %v5537_v45  ;;  %v5860_v45 = vpack.c.bf16 %v5834_v41, %v5833_v5  ;;  %v6143_v5 = vld [vmem:[%s13412_s16 + $0x10] sm:$0xff]  ;;  %v6144_v41 = vld [vmem:[%s13412_s16 + $0x18] sm:$0xff] }
 0x104   : > { %10706 = vmatmul.mubr.msk.bf16.gmra.mrb[8].mxu1 %vm455_vm1, %v13117_v27  ;;  %v5541_v27 = vpack.c.bf16 %v5522_v25, %v5521_v22  ;;  %v5839_v25 = vld [vmem:[%s12767_s29 + $0xe6] sm:$0xff] }
 0x105   : > { %10709 = vmatprep.mubr.msk.bf16.mxu1 %vm455_vm1, %v13129_v42  ;;  %v5523_v42 = vld [vmem:[%s12767_s29 + $0x135] sm:$0xff] }
 0x106   : > { %v5542_v33 = vpack.c.bf16 %v5524_v38, %v5523_v42  ;;  %v1587_v38 = vld [vmem:[%s12755_s17 + $0x63] sm:$0xff] }
 0x107   : > { %11216 = vmatmul.mubr.msk.bf16.gmra.mrb[24].mxu0 %vm455_vm1, %v5538_v32  ;;  %v1585_v32 = vld [vmem:[%s12755_s17 + $0x53] sm:$0xff] }
 0x108   : > { %11219 = vmatprep.mubr.msk.bf16.mxu0 %vm455_vm1, %v5539_v46  ;;  %v1616_v46 = vpack.c.bf16 %v1584_v20, %v1583_v19  ;;  %v1617_v22 = vpack.c.bf16 %v1586_v51, %v1585_v32  ;;  %v1603_v19 = vld [vmem:[%s12755_s17 + $0xe3] sm:$0xff]  ;;  %v1604_v20 = vld [vmem:[%s12755_s17 + $0xeb] sm:$0xff]  ;;  %v1605_v32 = vld [vmem:[%s12755_s17 + $0xf3] sm:$0xff] }
 0x109   : > { %v1606_v51 = vld [vmem:[%s12755_s17 + $0xfb] sm:$0xff] }
 0x10c   : > { %10710 = vmatmul.mubr.msk.bf16.gmra.mrb[12].mxu1 %vm455_vm1, %v13133_v58  ;;  %v5851_v58 = vpack.c.bf16 %v5816_v30, %v5815_v29  ;;  %v1588_v29 = vld [vmem:[%s12755_s17 + $0x6b] sm:$0xff]  ;;  %v1589_v30 = vld [vmem:[%s12755_s17 + $0x73] sm:$0xff] }
 0x10d   : > { %10713 = vmatprep.mubr.msk.bf16.mxu1 %vm455_vm1, %v13145_v56  ;;  %v5817_v56 = vld [vmem:[%s12767_s29 + $0x36] sm:$0xff] }
 0x10e   : > { %v5852_v35 = vpack.c.bf16 %v5818_v39, %v5817_v56  ;;  %v5841_v56 = vld [vmem:[%s12767_s29 + $0xf6] sm:$0xff]  ;;  %v5842_v39 = vld [vmem:[%s12767_s29 + $0xfe] sm:$0xff] }
 0x10f   : > { %11220 = vmatmul.mubr.msk.bf16.gmra.mrb[28].mxu0 %vm455_vm1, %v5540_v23  ;;  %v5840_v23 = vld [vmem:[%s12767_s29 + $0xee] sm:$0xff] }
 0x110   : > { %11223 = vmatprep.mubr.msk.bf16.mxu0 %vm455_vm1, %v5541_v27  ;;  %v5862_v27 = vpack.c.bf16 %v5838_v21, %v5837_v52  ;;  %v5863_v42 = vpack.c.bf16 %v5840_v23, %v5839_v25  ;;  %v1626_v52 = vpack.c.bf16 %v1604_v20, %v1603_v19  ;;  %v6148_v21 = vld [vmem:[%s13412_s16 + $0x38] sm:$0xff]  ;;  %v6149_v25 = vld [vmem:[%s13412_s16 + $0x40] sm:$0xff]  ;;  %v6150_v23 = vld [vmem:[%s13412_s16 + $0x48] sm:$0xff] }
 0x111   : > { %v1913_v19 = vld [vmem:[%s12755_s17 + $0x64] sm:$0xff]  ;;  %v1914_v20 = vld [vmem:[%s12755_s17 + $0x6c] sm:$0xff] }
 0x114   : > { %10714 = vmatmul.mubr.msk.bf16.gmra.mrb[16].mxu1 %vm455_vm1, %v13151_v2  ;;  %v5853_v2 = vpack.c.bf16 %v5820_v34, %v5819_v50  ;;  %v5843_v34 = vld [vmem:[%s12767_s29 + $0x106] sm:$0xff] }
 0x115   : > { %10717 = vmatprep.mubr.msk.bf16.mxu1 %vm455_vm1, %v13164_v11  ;;  %v6252_v11 = vsel %vm510_vm0, %v13186_v26, 0  ;;  %v5823_v26 = vld [vmem:[%s12767_s29 + $0x66] sm:$0xff] }
 0x116   : > { %v5855_v12 = vpack.c.bf16 %v5824_v40, %v5823_v26  ;;  %v1593_v26 = vld [vmem:[%s12755_s17 + $0x93] sm:$0xff]  ;;  %v1594_v40 = vld [vmem:[%s12755_s17 + $0x9b] sm:$0xff] }
 0x117   : > { %11224 = vmatmul.mubr.msk.bf16.gmra.mrb[32].mxu0 %vm455_vm1, %v5542_v33  ;;  %v1590_v33 = vld [vmem:[%s12755_s17 + $0x7b] sm:$0xff]  ;;  %v1621_v47 = vpack.c.bf16 %v1594_v40, %v1593_v26 }
 0x118   : > { %11229 = vmatprep.mubr.msk.bf16.mxu0 %vm455_vm1, %v5851_v58  ;;  %v1618_v58 = vpack.c.bf16 %v1588_v29, %v1587_v38  ;;  %v1619_v50 = vpack.c.bf16 %v1590_v33, %v1589_v30  ;;  %v1607_v38 = vld [vmem:[%s12755_s17 + $0x103] sm:$0xff]  ;;  %v1608_v29 = vld [vmem:[%s12755_s17 + $0x10b] sm:$0xff]  ;;  %v1609_v30 = vld [vmem:[%s12755_s17 + $0x113] sm:$0xff] }
 0x119   : > { %v1610_v33 = vld [vmem:[%s12755_s17 + $0x11b] sm:$0xff] }
 0x11a   : > { %v1903_v26 = vld [vmem:[%s12755_s17 + $0x14] sm:$0xff]  ;;  %v1904_v40 = vld [vmem:[%s12755_s17 + $0x1c] sm:$0xff] }
 0x11c   : > { %10718 = vmatmul.mubr.msk.bf16.gmra.mrb[20].mxu1 %vm455_vm1, %v13169_v16  ;;  %v5821_v16 = vld [vmem:[%s12767_s29 + $0x56] sm:$0xff] }
 0x11d   : > { %10721 = vmatprep.mubr.msk.bf16.mxu1 %vm455_vm1, %v13189_v24  ;;  %v5854_v24 = vpack.c.bf16 %v5822_v37, %v5821_v16  ;;  %v1591_v16 = vld [vmem:[%s12755_s17 + $0x83] sm:$0xff]  ;;  %v1592_v37 = vld [vmem:[%s12755_s17 + $0x8b] sm:$0xff] }
 0x11f   : > { %11230 = vmatmul.mubr.msk.bf16.vlgmr.msra.gmra.mrb[0].mxu0 %vm455_vm1, %v5852_v35  ;;  %v5844_v35 = vld [vmem:[%s12767_s29 + $0x10e] sm:$0xff] }
 0x120   : > { %11266 = vmatpush3.bf16.msra.mxu0 %v6252_v11  ;;  %11233 = vmatprep.mubr.msk.bf16.mxu0 %vm455_vm1, %v5853_v2  ;;  %v5864_v2 = vpack.c.bf16 %v5842_v39, %v5841_v56  ;;  %v5865_v11 = vpack.c.bf16 %v5844_v35, %v5843_v34  ;;  %v6151_v56 = vld [vmem:[%s13412_s16 + $0x50] sm:$0xff]  ;;  %v6152_v39 = vld [vmem:[%s13412_s16 + $0x58] sm:$0xff]  ;;  %v6153_v34 = vld [vmem:[%s13412_s16 + $0x60] sm:$0xff] }
 0x121   : > { %12565 = vmatprep.subr.msk.bf16.mxu0 %vm510_vm0, %v13310_v36  ;;  %v6154_v35 = vld [vmem:[%s13412_s16 + $0x68] sm:$0xff] }
 0x124   : > { %10722 = vmatmul.mubr.msk.bf16.gmra.mrb[24].mxu1 %vm455_vm1, %v13194_v31  ;;  %v5857_v31 = vpack.c.bf16 %v5828_v14, %v5827_v48  ;;  %v5847_v48 = vld [vmem:[%s12767_s29 + $0x126] sm:$0xff]  ;;  %v5848_v14 = vld [vmem:[%s12767_s29 + $0x12e] sm:$0xff] }
 0x125   : > { %10725 = vmatprep.mubr.msk.bf16.mxu1 %vm455_vm1, %v13209_v63  ;;  %v1285_v63 = vld [vmem:[%s12755_s17 + $0x122] sm:$0xff] }
 0x126   : > { %v1304_v59 = vpack.c.bf16 %v1286_v53, %v1285_v63  ;;  %v1595_v63 = vld [vmem:[%s12755_s17 + $0xa3] sm:$0xff]  ;;  %v1596_v53 = vld [vmem:[%s12755_s17 + $0xab] sm:$0xff] }
 0x127   : > { %11234 = vmatmul.mubr.msk.bf16.gmra.mrb[4].mxu0 %vm455_vm1, %v5854_v24  ;;  %v1620_v24 = vpack.c.bf16 %v1592_v37, %v1591_v16  ;;  %v1611_v16 = vld [vmem:[%s12755_s17 + $0x123] sm:$0xff]  ;;  %v1612_v37 = vld [vmem:[%s12755_s17 + $0x12b] sm:$0xff] }
 0x128   : > { %11237 = vmatprep.mubr.msk.bf16.mxu0 %vm455_vm1, %v5855_v12  ;;  %v5845_v12 = vld [vmem:[%s12767_s29 + $0x116] sm:$0xff] }
 0x12c   : > { %10726 = vmatmul.mubr.msk.bf16.gmra.mrb[28].mxu1 %vm455_vm1, %v13214_v13  ;;  %v5830_v13 = vld [vmem:[%s12767_s29 + $0x9e] sm:$0xff] }
 0x12d   : > { %10729 = vmatprep.mubr.msk.bf16.mxu1 %vm455_vm1, %v13225_v28  ;;  %v5832_v28 = vld [vmem:[%s12767_s29 + $0xae] sm:$0xff]  ;;  %v5858_v0 = vpack.c.bf16 %v5830_v13, %v5829_v60  ;;  %v5849_v60 = vld [vmem:[%s12767_s29 + $0x136] sm:$0xff]  ;;  %v5850_v13 = vld [vmem:[%s12767_s29 + $0x13e] sm:$0xff] }
 0x12e   : > { %v5859_v1 = vpack.c.bf16 %v5832_v28, %v5831_v61  ;;  %v6141_v61 = vld [vmem:[%s13412_s16] sm:$0xff]  ;;  %v6142_v28 = vld [vmem:[%s13412_s16 + $0x8] sm:$0xff] }
 0x12f   : > { %11238 = vmatmul.mubr.msk.bf16.gmra.mrb[8].mxu0 %vm455_vm1, %v5856_v49  ;;  %v5866_v49 = vpack.c.bf16 %v5846_v44, %v5845_v12  ;;  %v6155_v12 = vld [vmem:[%s13412_s16 + $0x70] sm:$0xff]  ;;  %v6156_v44 = vld [vmem:[%s13412_s16 + $0x78] sm:$0xff] }
 0x130   : > { %11241 = vmatprep.mubr.msk.bf16.mxu0 %vm455_vm1, %v5857_v31  ;;  %v5867_v31 = vpack.c.bf16 %v5848_v14, %v5847_v48  ;;  %v6157_v48 = vld [vmem:[%s13412_s16 + $0x80] sm:$0xff]  ;;  %v6158_v14 = vld [vmem:[%s13412_s16 + $0x88] sm:$0xff] }
 0x134   : > { %10730 = vmatmul.mubr.msk.bf16.gmra.mrb[32].mxu1 %vm455_vm1, %v1304_v59  ;;  %v1622_v59 = vpack.c.bf16 %v1596_v53, %v1595_v63  ;;  %v1905_v63 = vld [vmem:[%s12755_s17 + $0x24] sm:$0xff]  ;;  %v1906_v53 = vld [vmem:[%s12755_s17 + $0x2c] sm:$0xff] }
 0x135   : > { %10735 = vmatprep.mubr.msk.bf16.mxu1 %vm455_vm1, %v1613_v43  ;;  %v1623_v43 = vpack.c.bf16 %v1598_v55, %v1597_v54  ;;  %v1907_v54 = vld [vmem:[%s12755_s17 + $0x34] sm:$0xff]  ;;  %v1908_v55 = vld [vmem:[%s12755_s17 + $0x3c] sm:$0xff] }
 0x137   : > { %11242 = vmatmul.mubr.msk.bf16.gmra.mrb[12].mxu0 %vm455_vm1, %v5858_v0  ;;  %v5868_v0 = vpack.c.bf16 %v5850_v13, %v5849_v60  ;;  %v6159_v60 = vld [vmem:[%s13412_s16 + $0x90] sm:$0xff]  ;;  %v6160_v13 = vld [vmem:[%s13412_s16 + $0x98] sm:$0xff] }
 0x138   : > { %11245 = vmatprep.mubr.msk.bf16.mxu0 %vm455_vm1, %v5859_v1  ;;  %v6177_v1 = vpack.c.bf16 %v6142_v28, %v6141_v61  ;;  %v6161_v61 = vld [vmem:[%s13412_s16 + $0xa0] sm:$0xff]  ;;  %v6162_v28 = vld [vmem:[%s13412_s16 + $0xa8] sm:$0xff] }
 0x13c   : > { %10736 = vmatmul.mubr.msk.bf16.vlgmr.msra.gmra.mrb[0].mxu1 %vm455_vm1, %v1614_v8  ;;  %v1624_v8 = vpack.c.bf16 %v1600_v6, %v1599_v4  ;;  %v13498_v4 = vld [vmem:[%s14821_s3 + $0x1c] sm:$0xf]  ;;  %v6187_v6 = vpack.c.bf16 %v6162_v28, %v6161_v61 }
 0x13d   : > { %10739 = vmatprep.mubr.msk.bf16.mxu1 %vm455_vm1, %v1615_v9  ;;  %10772 = vmatpush3.bf16.msra.mxu1 %v2014_v15  ;;  %v1625_v9 = vpack.c.bf16 %v1602_v57, %v1601_v7  ;;  %v6178_v15 = vpack.c.bf16 %v6144_v41, %v6143_v5  ;;  %v1909_v7 = vld [vmem:[%s12755_s17 + $0x44] sm:$0xff]  ;;  %v1910_v57 = vld [vmem:[%s12755_s17 + $0x4c] sm:$0xff]  ;;  %v6470_v61 = vld [vmem:[%s13412_s16 + $0x19] sm:$0xff] }
 0x13e   : > { %12551 = vmatprep.subr.msk.bf16.mxu1 %vm510_vm0, %v13361_v17  ;;  %v13511_v5 = vpack.c.bf16 %v1910_v57, %v1909_v7  ;;  %v6163_v41 = vld [vmem:[%s13412_s16 + $0xb0] sm:$0xff] }
 0x13f   : > { %11246 = vmatmul.mubr.msk.bf16.gmra.mrb[16].mxu0 %vm455_vm1, %v5860_v45  ;;  %v6179_v45 = vpack.c.bf16 %v6146_v62, %v6145_v10  ;;  %v6165_v62 = vld [vmem:[%s13412_s16 + $0xc0] sm:$0xff] }
 0x140   : > { %11249 = vmatprep.mubr.msk.bf16.mxu0 %vm455_vm1, %v5861_v18  ;;  %v6578_v18 = vsel %vm510_vm0, %v13310_v36, 0  ;;  %v6147_v36 = vld [vmem:[%s13412_s16 + $0x30] sm:$0xff] }
 0x144   : > { %10740 = vmatmul.mubr.msk.bf16.gmra.mrb[4].mxu1 %vm455_vm1, %v1616_v46  ;;  %v13443_v46 = vld [vmem:[%s14821_s3 + $0x50] sm:$0xf] }
 0x145   : > { %10743 = vmatprep.mubr.msk.bf16.mxu1 %vm455_vm1, %v1617_v22  ;;  %v1627_v22 = vpack.c.bf16 %v1606_v51, %v1605_v32  ;;  %v1915_v32 = vld [vmem:[%s12755_s17 + $0x74] sm:$0xff]  ;;  %v1916_v51 = vld [vmem:[%s12755_s17 + $0x7c] sm:$0xff]  ;;  %v6904_v57 = vsel %vm510_vm0, %v13443_v46, 0 }
 0x147   : > { %11250 = vmatmul.mubr.msk.bf16.gmra.mrb[20].mxu0 %vm455_vm1, %v5862_v27  ;;  %v6180_v27 = vpack.c.bf16 %v6148_v21, %v6147_v36  ;;  %v6167_v36 = vld [vmem:[%s13412_s16 + $0xd0] sm:$0xff]  ;;  %v6168_v21 = vld [vmem:[%s13412_s16 + $0xd8] sm:$0xff] }
 0x148   : > { %11253 = vmatprep.mubr.msk.bf16.mxu0 %vm455_vm1, %v5863_v42  ;;  %v6181_v42 = vpack.c.bf16 %v6150_v23, %v6149_v25  ;;  %v6169_v25 = vld [vmem:[%s13412_s16 + $0xe0] sm:$0xff]  ;;  %v6170_v23 = vld [vmem:[%s13412_s16 + $0xe8] sm:$0xff] }
 0x14c   : > { %10744 = vmatmul.mubr.msk.bf16.gmra.mrb[8].mxu1 %vm455_vm1, %v1618_v58  ;;  %v1628_v58 = vpack.c.bf16 %v1608_v29, %v1607_v38  ;;  %v1917_v38 = vld [vmem:[%s12755_s17 + $0x84] sm:$0xff]  ;;  %v1918_v29 = vld [vmem:[%s12755_s17 + $0x8c] sm:$0xff] }
 0x14d   : > { %10747 = vmatprep.mubr.msk.bf16.mxu1 %vm455_vm1, %v1619_v50  ;;  %v1629_v50 = vpack.c.bf16 %v1610_v33, %v1609_v30  ;;  %v1919_v30 = vld [vmem:[%s12755_s17 + $0x94] sm:$0xff]  ;;  %v1920_v33 = vld [vmem:[%s12755_s17 + $0x9c] sm:$0xff] }
 0x14f   : > { %11254 = vmatmul.mubr.msk.bf16.gmra.mrb[24].mxu0 %vm455_vm1, %v5864_v2  ;;  %v6182_v2 = vpack.c.bf16 %v6152_v39, %v6151_v56  ;;  %v6171_v56 = vld [vmem:[%s13412_s16 + $0xf0] sm:$0xff]  ;;  %v6172_v39 = vld [vmem:[%s13412_s16 + $0xf8] sm:$0xff] }
 0x150   : > { %11257 = vmatprep.mubr.msk.bf16.mxu0 %vm455_vm1, %v5865_v11  ;;  %v6183_v11 = vpack.c.bf16 %v6154_v35, %v6153_v34  ;;  %v6173_v34 = vld [vmem:[%s13412_s16 + $0x100] sm:$0xff]  ;;  %v6174_v35 = vld [vmem:[%s13412_s16 + $0x108] sm:$0xff] }
 0x154   : > { %10748 = vmatmul.mubr.msk.bf16.gmra.mrb[12].mxu1 %vm455_vm1, %v1620_v24  ;;  %v1630_v24 = vpack.c.bf16 %v1612_v37, %v1611_v16  ;;  %v1921_v16 = vld [vmem:[%s12755_s17 + $0xa4] sm:$0xff]  ;;  %v1922_v37 = vld [vmem:[%s12755_s17 + $0xac] sm:$0xff] }
 0x155   : > { %10751 = vmatprep.mubr.msk.bf16.mxu1 %vm455_vm1, %v1621_v47  ;;  %v1939_v47 = vpack.c.bf16 %v1904_v40, %v1903_v26  ;;  %v1923_v26 = vld [vmem:[%s12755_s17 + $0xb4] sm:$0xff]  ;;  %v1924_v40 = vld [vmem:[%s12755_s17 + $0xbc] sm:$0xff] }
 0x157   : > { %11258 = vmatmul.mubr.msk.bf16.gmra.mrb[28].mxu0 %vm455_vm1, %v5866_v49  ;;  %v6184_v49 = vpack.c.bf16 %v6156_v44, %v6155_v12  ;;  %v6175_v12 = vld [vmem:[%s13412_s16 + $0x110] sm:$0xff]  ;;  %v6176_v44 = vld [vmem:[%s13412_s16 + $0x118] sm:$0xff] }
 0x158   : > { %11261 = vmatprep.mubr.msk.bf16.mxu0 %vm455_vm1, %v5867_v31  ;;  %v6185_v31 = vpack.c.bf16 %v6158_v14, %v6157_v48  ;;  %v6467_v48 = vld [vmem:[%s13412_s16 + $0x1] sm:$0xff]  ;;  %v6468_v14 = vld [vmem:[%s13412_s16 + $0x9] sm:$0xff] }
 0x15c   : > { %10752 = vmatmul.mubr.msk.bf16.gmra.mrb[16].mxu1 %vm455_vm1, %v1622_v59  ;;  %v13484_v59 = vpack.c.bf16 %v1906_v53, %v1905_v63  ;;  %v1925_v63 = vld [vmem:[%s12755_s17 + $0xc4] sm:$0xff]  ;;  %v1926_v53 = vld [vmem:[%s12755_s17 + $0xcc] sm:$0xff] }
 0x15d   : > { %10755 = vmatprep.mubr.msk.bf16.mxu1 %vm455_vm1, %v1623_v43  ;;  %v13489_v43 = vpack.c.bf16 %v1908_v55, %v1907_v54  ;;  %v1927_v54 = vld [vmem:[%s12755_s17 + $0xd4] sm:$0xff]  ;;  %v1928_v55 = vld [vmem:[%s12755_s17 + $0xdc] sm:$0xff] }
 0x15e   : > { %v13588_v28 = vpack.c.bf16 %v1928_v55, %v1927_v54  ;;  %v6490_v54 = vld [vmem:[%s13412_s16 + $0xb9] sm:$0xff]  ;;  %v6491_v55 = vld [vmem:[%s13412_s16 + $0xc1] sm:$0xff] }
 0x15f   : > { %11262 = vmatmul.mubr.msk.bf16.gmra.mrb[32].mxu0 %vm455_vm1, %v5868_v0  ;;  %v2340_v0 = vsel %vm510_vm0, %v13361_v17, 0  ;;  %v1911_v17 = vld [vmem:[%s12755_s17 + $0x54] sm:$0xff] }
 0x160   : > { %11267 = vmatprep.mubr.msk.bf16.mxu0 %vm455_vm1, %v6177_v1  ;;  %v6186_v1 = vpack.c.bf16 %v6160_v13, %v6159_v60  ;;  %v13583_v60 = vpack.c.bf16 %v1926_v53, %v1925_v63  ;;  %v6469_v13 = vld [vmem:[%s13412_s16 + $0x11] sm:$0xff] }
 0x164   : > { %10756 = vmatmul.mubr.msk.bf16.gmra.mrb[20].mxu1 %vm455_vm1, %v1624_v8  ;;  %v1912_v8 = vld [vmem:[%s12755_s17 + $0x5c] sm:$0xff] }
 0x165   : > { %10759 = vmatprep.mubr.msk.bf16.mxu1 %vm455_vm1, %v1625_v9  ;;  %v6164_v9 = vld [vmem:[%s13412_s16 + $0xb8] sm:$0xff]  ;;  %v13516_v10 = vpack.c.bf16 %v1912_v8, %v1911_v17  ;;  %v1929_v17 = vld [vmem:[%s12755_s17 + $0xe4] sm:$0xff]  ;;  %v1930_v8 = vld [vmem:[%s12755_s17 + $0xec] sm:$0xff] }
 0x167   : > { %11268 = vmatmul.mubr.msk.bf16.vlgmr.msra.gmra.mrb[0].mxu0 %vm455_vm1, %v6178_v15  ;;  %v6166_v15 = vld [vmem:[%s13412_s16 + $0xc8] sm:$0xff] }
 0x168   : > { %11304 = vmatpush3.bf16.msra.mxu0 %v6578_v18  ;;  %11271 = vmatprep.mubr.msk.bf16.mxu0 %vm455_vm1, %v6179_v45  ;;  %v6188_v45 = vpack.c.bf16 %v6164_v9, %v6163_v41  ;;  %v6189_v18 = vpack.c.bf16 %v6166_v15, %v6165_v62  ;;  %v1931_v41 = vld [vmem:[%s12755_s17 + $0xf4] sm:$0xff]  ;;  %v1932_v9 = vld [vmem:[%s12755_s17 + $0xfc] sm:$0xff] }
 0x169   : > { %12566 = vmatprep.subr.msk.bf16.mxu0 %vm510_vm0, %v13443_v46  ;;  %v13605_v62 = vld [vmem:[%s14821_s3 + $0x54] sm:$0xf]  ;;  %v13608_v46 = vpack.c.bf16 %v1930_v8, %v1929_v17  ;;  %v6499_v17 = vld [vmem:[%s13412_s16 + $0x101] sm:$0xff]  ;;  %v6500_v8 = vld [vmem:[%s13412_s16 + $0x109] sm:$0xff] }
 0x16a   : > { %v6473_v15 = vld [vmem:[%s13412_s16 + $0x31] sm:$0xff] }
 0x16c   : > { %10760 = vmatmul.mubr.msk.bf16.gmra.mrb[24].mxu1 %vm455_vm1, %v1626_v52  ;;  %v13529_v52 = vpack.c.bf16 %v1914_v20, %v1913_v19  ;;  %v6475_v19 = vld [vmem:[%s13412_s16 + $0x41] sm:$0xff]  ;;  %v6476_v20 = vld [vmem:[%s13412_s16 + $0x49] sm:$0xff] }
 0x16d   : > { %10763 = vmatprep.mubr.msk.bf16.mxu1 %vm455_vm1, %v1627_v22  ;;  %v13534_v22 = vpack.c.bf16 %v1916_v51, %v1915_v32  ;;  %v6507_v51 = vpack.c.bf16 %v6476_v20, %v6475_v19  ;;  %v6796_v20 = vld [vmem:[%s13412_s16 + $0x1a] sm:$0xff] }
 0x16f   : > { %11272 = vmatmul.mubr.msk.bf16.gmra.mrb[4].mxu0 %vm455_vm1, %v6180_v27  ;;  %v6190_v27 = vpack.c.bf16 %v6168_v21, %v6167_v36  ;;  %v1933_v36 = vld [vmem:[%s12755_s17 + $0x104] sm:$0xff]  ;;  %v1934_v21 = vld [vmem:[%s12755_s17 + $0x10c] sm:$0xff] }
 0x170   : > { %11275 = vmatprep.mubr.msk.bf16.mxu0 %vm455_vm1, %v6181_v42  ;;  %v6191_v42 = vpack.c.bf16 %v6170_v23, %v6169_v25  ;;  %v1935_v25 = vld [vmem:[%s12755_s17 + $0x114] sm:$0xff]  ;;  %v1936_v23 = vld [vmem:[%s12755_s17 + $0x11c] sm:$0xff] }
 0x174   : > { %10764 = vmatmul.mubr.msk.bf16.gmra.mrb[28].mxu1 %vm455_vm1, %v1628_v58  ;;  %v13547_v58 = vpack.c.bf16 %v1918_v29, %v1917_v38  ;;  %v6478_v38 = vld [vmem:[%s13412_s16 + $0x59] sm:$0xff]  ;;  %v13633_v29 = vpack.c.bf16 %v1936_v23, %v1935_v25  ;;  %v6801_v25 = vld [vmem:[%s13412_s16 + $0x42] sm:$0xff] }
 0x175   : > { %10767 = vmatprep.mubr.msk.bf16.mxu1 %vm455_vm1, %v1629_v50  ;;  %v13552_v50 = vpack.c.bf16 %v1920_v33, %v1919_v30  ;;  %v6479_v30 = vld [vmem:[%s13412_s16 + $0x61] sm:$0xff]  ;;  %v6480_v33 = vld [vmem:[%s13412_s16 + $0x69] sm:$0xff] }
 0x177   : > { %11276 = vmatmul.mubr.msk.bf16.gmra.mrb[8].mxu0 %vm455_vm1, %v6182_v2  ;;  %v6192_v2 = vpack.c.bf16 %v6172_v39, %v6171_v56  ;;  %v6509_v39 = vpack.c.bf16 %v6480_v33, %v6479_v30  ;;  %v6804_v30 = vld [vmem:[%s13412_s16 + $0x5a] sm:$0xff]  ;;  %v6805_v33 = vld [vmem:[%s13412_s16 + $0x62] sm:$0xff] }
 0x178   : > { %11279 = vmatprep.mubr.msk.bf16.mxu0 %vm455_vm1, %v6183_v11  ;;  %v6193_v11 = vpack.c.bf16 %v6174_v35, %v6173_v34  ;;  %v1937_v34 = vld [vmem:[%s12755_s17 + $0x124] sm:$0xff]  ;;  %v1938_v35 = vld [vmem:[%s12755_s17 + $0x12c] sm:$0xff] }
 0x17c   : > { %10768 = vmatmul.mubr.msk.bf16.gmra.mrb[32].mxu1 %vm455_vm1, %v1630_v24  ;;  %v13565_v24 = vpack.c.bf16 %v1922_v37, %v1921_v16  ;;  %v6482_v16 = vld [vmem:[%s13412_s16 + $0x79] sm:$0xff]  ;;  %v6483_v37 = vld [vmem:[%s13412_s16 + $0x81] sm:$0xff] }
 0x17d   : > { %10773 = vmatprep.mubr.msk.bf16.mxu1 %vm455_vm1, %v1939_v47  ;;  %v13570_v47 = vpack.c.bf16 %v1924_v40, %v1923_v26  ;;  %v6484_v26 = vld [vmem:[%s13412_s16 + $0x89] sm:$0xff] }
 0x17f   : > { %11280 = vmatmul.mubr.msk.bf16.gmra.mrb[12].mxu0 %vm455_vm1, %v6184_v49  ;;  %v6194_v49 = vpack.c.bf16 %v6176_v44, %v6175_v12  ;;  %v6511_v12 = vpack.c.bf16 %v6484_v26, %v6483_v37  ;;  %v6485_v44 = vld [vmem:[%s13412_s16 + $0x91] sm:$0xff]  ;;  %v6808_v37 = vld [vmem:[%s13412_s16 + $0x7a] sm:$0xff]  ;;  %v6809_v26 = vld [vmem:[%s13412_s16 + $0x82] sm:$0xff] }
 0x180   : > { %11283 = vmatprep.mubr.msk.bf16.mxu0 %vm455_vm1, %v6185_v31  ;;  %v6503_v31 = vpack.c.bf16 %v6468_v14, %v6467_v48  ;;  %v6486_v48 = vld [vmem:[%s13412_s16 + $0x99] sm:$0xff]  ;;  %v6487_v14 = vld [vmem:[%s13412_s16 + $0xa1] sm:$0xff] }
 0x181   : > { %v6512_v63 = vpack.c.bf16 %v6486_v48, %v6485_v44  ;;  %v2557_v48 = vld [vmem:[%s12755_s17 + $0x35] sm:$0xff] }
 0x184   : > { %10774 = vmatmul.mubr.msk.bf16.vlgmr.msra.gmra.mrb[0].mxu1 %vm455_vm1, %v13484_v59 }
 0x185   : > { %10777 = vmatprep.mubr.msk.bf16.mxu1 %vm455_vm1, %v13489_v43  ;;  %10810 = vmatpush3.bf16.msra.mxu1 %v2340_v0  ;;  %v6471_v0 = vld [vmem:[%s13412_s16 + $0x21] sm:$0xff] }
 0x186   : > { %12552 = vmatprep.subr.msk.bf16.mxu1 %vm510_vm0, %v13498_v4 }
 0x187   : > { %11284 = vmatmul.mubr.msk.bf16.gmra.mrb[16].mxu0 %vm455_vm1, %v6186_v1  ;;  %v6472_v1 = vld [vmem:[%s13412_s16 + $0x29] sm:$0xff] }
 0x188   : > { %11287 = vmatprep.mubr.msk.bf16.mxu0 %vm455_vm1, %v6187_v6  ;;  %v6504_v6 = vpack.c.bf16 %v6470_v61, %v6469_v13  ;;  %v6505_v7 = vpack.c.bf16 %v6472_v1, %v6471_v0  ;;  %v6493_v61 = vld [vmem:[%s13412_s16 + $0xd1] sm:$0xff]  ;;  %v6494_v0 = vld [vmem:[%s13412_s16 + $0xd9] sm:$0xff]  ;;  %v6495_v1 = vld [vmem:[%s13412_s16 + $0xe1] sm:$0xff] }
 0x18c   : > { %10778 = vmatmul.mubr.msk.bf16.gmra.mrb[4].mxu1 %vm455_vm1, %v13511_v5 }
 0x18d   : > { %10781 = vmatprep.mubr.msk.bf16.mxu1 %vm455_vm1, %v13516_v10 }
 0x18f   : > { %11288 = vmatmul.mubr.msk.bf16.gmra.mrb[20].mxu0 %vm455_vm1, %v6188_v45  ;;  %v6474_v45 = vld [vmem:[%s13412_s16 + $0x39] sm:$0xff] }
 0x190   : > { %11291 = vmatprep.mubr.msk.bf16.mxu0 %vm455_vm1, %v6189_v18  ;;  %v13613_v18 = vpack.c.bf16 %v1932_v9, %v1931_v41  ;;  %v6506_v32 = vpack.c.bf16 %v6474_v45, %v6473_v15  ;;  %v6502_v9 = vld [vmem:[%s13412_s16 + $0x119] sm:$0xff]  ;;  %v6793_v15 = vld [vmem:[%s13412_s16 + $0x2] sm:$0xff]  ;;  %v6794_v45 = vld [vmem:[%s13412_s16 + $0xa] sm:$0xff] }
 0x194   : > { %10782 = vmatmul.mubr.msk.bf16.gmra.mrb[8].mxu1 %vm455_vm1, %v13529_v52 }
 0x195   : > { %10785 = vmatprep.mubr.msk.bf16.mxu1 %vm455_vm1, %v13534_v22 }
 0x197   : > { %11292 = vmatmul.mubr.msk.bf16.gmra.mrb[24].mxu0 %vm455_vm1, %v6190_v27  ;;  %v13628_v27 = vpack.c.bf16 %v1934_v21, %v1933_v36  ;;  %v13733_v21 = vld [vmem:[%s14821_s3 + $0x58] sm:$0xf] }
 0x198   : > { %11295 = vmatprep.mubr.msk.bf16.mxu0 %vm455_vm1, %v6191_v42  ;;  %v6477_v42 = vld [vmem:[%s13412_s16 + $0x51] sm:$0xff] }
 0x199   : > { %v6508_v56 = vpack.c.bf16 %v6478_v38, %v6477_v42  ;;  %v6803_v38 = vld [vmem:[%s13412_s16 + $0x52] sm:$0xff] }
 0x19c   : > { %10786 = vmatmul.mubr.msk.bf16.gmra.mrb[12].mxu1 %vm455_vm1, %v13547_v58 }
 0x19d   : > { %10789 = vmatprep.mubr.msk.bf16.mxu1 %vm455_vm1, %v13552_v50 }
 0x19f   : > { %11296 = vmatmul.mubr.msk.bf16.gmra.mrb[28].mxu0 %vm455_vm1, %v6192_v2  ;;  %v13644_v2 = vpack.c.bf16 %v1938_v35, %v1937_v34  ;;  %v2264_v34 = vld [vmem:[%s12755_s17 + $0x13c] sm:$0xff]  ;;  %v2555_v35 = vld [vmem:[%s12755_s17 + $0x25] sm:$0xff] }
 0x1a0   : > { %11299 = vmatprep.mubr.msk.bf16.mxu0 %vm455_vm1, %v6193_v11  ;;  %v6481_v11 = vld [vmem:[%s13412_s16 + $0x71] sm:$0xff] }
 0x1a1   : > { %v6510_v40 = vpack.c.bf16 %v6482_v16, %v6481_v11  ;;  %v2556_v11 = vld [vmem:[%s12755_s17 + $0x2d] sm:$0xff] }
 0x1a4   : > { %10790 = vmatmul.mubr.msk.bf16.gmra.mrb[16].mxu1 %vm455_vm1, %v13565_v24 }
 0x1a5   : > { %10793 = vmatprep.mubr.msk.bf16.mxu1 %vm455_vm1, %v13570_v47 }
 0x1a7   : > { %11300 = vmatmul.mubr.msk.bf16.gmra.mrb[32].mxu0 %vm455_vm1, %v6194_v49  ;;  %v6488_v49 = vld [vmem:[%s13412_s16 + $0xa9] sm:$0xff] }
 0x1a8   : > { %11305 = vmatprep.mubr.msk.bf16.mxu0 %vm455_vm1, %v6503_v31  ;;  %v2666_v31 = vsel %vm510_vm0, %v13498_v4, 0  ;;  %v6513_v53 = vpack.c.bf16 %v6488_v49, %v6487_v14  ;;  %v6489_v4 = vld [vmem:[%s13412_s16 + $0xb1] sm:$0xff]  ;;  %v2558_v14 = vld [vmem:[%s12755_s17 + $0x3d] sm:$0xff]  ;;  %v2559_v49 = vld [vmem:[%s12755_s17 + $0x45] sm:$0xff] }
 0x1a9   : > { %v6514_v13 = vpack.c.bf16 %v6490_v54, %v6489_v4  ;;  %v6812_v4 = vld [vmem:[%s13412_s16 + $0x9a] sm:$0xff] }
 0x1ac   : > { %10794 = vmatmul.mubr.msk.bf16.gmra.mrb[20].mxu1 %vm455_vm1, %v13583_v60 }
 0x1ad   : > { %10797 = vmatprep.mubr.msk.bf16.mxu1 %vm455_vm1, %v13588_v28 }
 0x1af   : > { %11306 = vmatmul.mubr.msk.bf16.vlgmr.msra.gmra.mrb[0].mxu0 %vm455_vm1, %v6504_v6  ;;  %v6496_v6 = vld [vmem:[%s13412_s16 + $0xe9] sm:$0xff] }
 0x1b0   : > { %11342 = vmatpush3.bf16.msra.mxu0 %v6904_v57  ;;  %11309 = vmatprep.mubr.msk.bf16.mxu0 %vm455_vm1, %v6505_v7  ;;  %v6516_v7 = vpack.c.bf16 %v6494_v0, %v6493_v61  ;;  %v6498_v57 = vld [vmem:[%s13412_s16 + $0xf9] sm:$0xff]  ;;  %v13806_v61 = vld [vmem:[%s14821_s3 + $0x24] sm:$0xf] }
 0x1b1   : > { %12567 = vmatprep.subr.msk.bf16.mxu0 %vm510_vm0, %v13605_v62 }
 0x1b4   : > { %10798 = vmatmul.mubr.msk.bf16.gmra.mrb[24].mxu1 %vm455_vm1, %v13608_v46 }
 0x1b5   : > { %10801 = vmatprep.mubr.msk.bf16.mxu1 %vm455_vm1, %v13613_v18 }
 0x1b7   : > { %11310 = vmatmul.mubr.msk.bf16.gmra.mrb[4].mxu0 %vm455_vm1, %v6506_v32  ;;  %v6797_v32 = vld [vmem:[%s13412_s16 + $0x22] sm:$0xff] }
 0x1b8   : > { %11313 = vmatprep.mubr.msk.bf16.mxu0 %vm455_vm1, %v6507_v51  ;;  %v6798_v51 = vld [vmem:[%s13412_s16 + $0x2a] sm:$0xff] }
 0x1bc   : > { %10802 = vmatmul.mubr.msk.bf16.gmra.mrb[28].mxu1 %vm455_vm1, %v13628_v27 }
 0x1bd   : > { %10805 = vmatprep.mubr.msk.bf16.mxu1 %vm455_vm1, %v13633_v29 }
 0x1bf   : > { %11314 = vmatmul.mubr.msk.bf16.gmra.mrb[8].mxu0 %vm455_vm1, %v6508_v56  ;;  %v6806_v56 = vld [vmem:[%s13412_s16 + $0x6a] sm:$0xff] }
 0x1c0   : > { %11317 = vmatprep.mubr.msk.bf16.mxu0 %vm455_vm1, %v6509_v39  ;;  %v2263_v39 = vld [vmem:[%s12755_s17 + $0x134] sm:$0xff] }
 0x1c1   : > { %v2282_v16 = vpack.c.bf16 %v2264_v34, %v2263_v39  ;;  %v6824_v39 = vld [vmem:[%s13412_s16 + $0xfa] sm:$0xff] }
 0x1c4   : > { %10806 = vmatmul.mubr.msk.bf16.gmra.mrb[32].mxu1 %vm455_vm1, %v13644_v2 }
 0x1c5   : > { %10811 = vmatprep.mubr.msk.bf16.mxu1 %vm455_vm1, %v13484_v59  ;;  %v13666_v59 = vld [vmem:[%s14821_s3 + $0x20] sm:$0xf] }
 0x1c7   : > { %11318 = vmatmul.mubr.msk.bf16.gmra.mrb[12].mxu0 %vm455_vm1, %v6510_v40  ;;  %v6810_v40 = vld [vmem:[%s13412_s16 + $0x8a] sm:$0xff] }
 0x1c8   : > { %11321 = vmatprep.mubr.msk.bf16.mxu0 %vm455_vm1, %v6511_v12  ;;  %v13784_v44 = vpack.c.bf16 %v6810_v40, %v6809_v26  ;;  %v2575_v26 = vld [vmem:[%s12755_s17 + $0xc5] sm:$0xff]  ;;  %v2576_v40 = vld [vmem:[%s12755_s17 + $0xcd] sm:$0xff] }
 0x1cc   : > { %10812 = vmatmul.mubr.msk.bf16.vlgmr.msra.gmra.mrb[0].mxu1 %vm455_vm1, %v13489_v43  ;;  %v6492_v43 = vld [vmem:[%s13412_s16 + $0xc9] sm:$0xff] }
 0x1cd   : > { %10815 = vmatprep.mubr.msk.bf16.mxu1 %vm455_vm1, %v13511_v5  ;;  %10848 = vmatpush3.bf16.msra.mxu1 %v2666_v31  ;;  %v6515_v5 = vpack.c.bf16 %v6492_v43, %v6491_v55  ;;  %v2560_v31 = vld [vmem:[%s12755_s17 + $0x4d] sm:$0xff]  ;;  %v6813_v55 = vld [vmem:[%s13412_s16 + $0xa2] sm:$0xff] }
 0x1ce   : > { %12553 = vmatprep.subr.msk.bf16.mxu1 %vm510_vm0, %v13666_v59  ;;  %v2593_v54 = vpack.c.bf16 %v2560_v31, %v2559_v49  ;;  %v6814_v43 = vld [vmem:[%s13412_s16 + $0xaa] sm:$0xff]  ;;  %v6828_v49 = vld [vmem:[%s13412_s16 + $0x11a] sm:$0xff]  ;;  %v2601_v31 = vpack.c.bf16 %v2576_v40, %v2575_v26 }
 0x1cf   : > { %11322 = vmatmul.mubr.msk.bf16.gmra.mrb[16].mxu0 %vm455_vm1, %v6512_v63  ;;  %v2592_v63 = vpack.c.bf16 %v2558_v14, %v2557_v48  ;;  %v13809_v0 = vpack.c.bf16 %v6814_v43, %v6813_v55  ;;  %v6827_v14 = vld [vmem:[%s13412_s16 + $0x112] sm:$0xff]  ;;  %v2900_v26 = vld [vmem:[%s12755_s17 + $0xbe] sm:$0xff]  ;;  %v2901_v40 = vld [vmem:[%s12755_s17 + $0xc6] sm:$0xff] }
 0x1d0   : > { %11325 = vmatprep.mubr.msk.bf16.mxu0 %vm455_vm1, %v6513_v53  ;;  %v6811_v53 = vld [vmem:[%s13412_s16 + $0x92] sm:$0xff] }
 0x1d1   : > { %v2580_v55 = vld [vmem:[%s12755_s17 + $0xed] sm:$0xff] }
 0x1d4   : > { %10816 = vmatmul.mubr.msk.bf16.gmra.mrb[4].mxu1 %vm455_vm1, %v13516_v10  ;;  %v6517_v10 = vpack.c.bf16 %v6496_v6, %v6495_v1  ;;  %v2561_v1 = vld [vmem:[%s12755_s17 + $0x55] sm:$0xff]  ;;  %v2562_v6 = vld [vmem:[%s12755_s17 + $0x5d] sm:$0xff] }
 0x1d5   : > { %10819 = vmatprep.mubr.msk.bf16.mxu1 %vm455_vm1, %v13529_v52  ;;  %v6497_v52 = vld [vmem:[%s13412_s16 + $0xf1] sm:$0xff] }
 0x1d6   : > { %v6518_v41 = vpack.c.bf16 %v6498_v57, %v6497_v52  ;;  %v6815_v52 = vld [vmem:[%s13412_s16 + $0xb2] sm:$0xff]  ;;  %v6816_v57 = vld [vmem:[%s13412_s16 + $0xba] sm:$0xff] }
 0x1d7   : > { %11326 = vmatmul.mubr.msk.bf16.gmra.mrb[20].mxu0 %vm455_vm1, %v6514_v13  ;;  %v2992_v13 = vsel %vm510_vm0, %v13666_v59, 0  ;;  %v2563_v59 = vld [vmem:[%s12755_s17 + $0x65] sm:$0xff] }
 0x1d8   : > { %11329 = vmatprep.mubr.msk.bf16.mxu0 %vm455_vm1, %v6515_v5  ;;  %v13801_v5 = vpack.c.bf16 %v6812_v4, %v6811_v53  ;;  %v2577_v53 = vld [vmem:[%s12755_s17 + $0xd5] sm:$0xff]  ;;  %v2578_v4 = vld [vmem:[%s12755_s17 + $0xdd] sm:$0xff] }
 0x1d9   : > { %v2602_v43 = vpack.c.bf16 %v2578_v4, %v2577_v53  ;;  %v7446_v53 = vld [vmem:[%s13412_s16 + $0x1b] sm:$0xff] }
 0x1dc   : > { %10820 = vmatmul.mubr.msk.bf16.gmra.mrb[8].mxu1 %vm455_vm1, %v13534_v22  ;;  %v6519_v22 = vpack.c.bf16 %v6500_v8, %v6499_v17  ;;  %v6817_v8 = vld [vmem:[%s13412_s16 + $0xc2] sm:$0xff] }
 0x1dd   : > { %10823 = vmatprep.mubr.msk.bf16.mxu1 %vm455_vm1, %v13547_v58  ;;  %v6501_v58 = vld [vmem:[%s13412_s16 + $0x111] sm:$0xff] }
 0x1de   : > { %v6520_v19 = vpack.c.bf16 %v6502_v9, %v6501_v58  ;;  %v2565_v9 = vld [vmem:[%s12755_s17 + $0x75] sm:$0xff] }
 0x1df   : > { %11330 = vmatmul.mubr.msk.bf16.gmra.mrb[24].mxu0 %vm455_vm1, %v6516_v7  ;;  %v2564_v7 = vld [vmem:[%s12755_s17 + $0x6d] sm:$0xff] }
 0x1e0   : > { %11333 = vmatprep.mubr.msk.bf16.mxu0 %vm455_vm1, %v6517_v10  ;;  %v2594_v10 = vpack.c.bf16 %v2562_v6, %v2561_v1  ;;  %v2595_v17 = vpack.c.bf16 %v2564_v7, %v2563_v59  ;;  %v7556_v1 = vsel %vm510_vm0, %v13733_v21, 0  ;;  %v2581_v6 = vld [vmem:[%s12755_s17 + $0xf5] sm:$0xff]  ;;  %v2582_v59 = vld [vmem:[%s12755_s17 + $0xfd] sm:$0xff]  ;;  %v2583_v7 = vld [vmem:[%s12755_s17 + $0x105] sm:$0xff] }
 0x1e4   : > { %10824 = vmatmul.mubr.msk.bf16.gmra.mrb[12].mxu1 %vm455_vm1, %v13552_v50  ;;  %v6829_v50 = vpack.c.bf16 %v6794_v45, %v6793_v15  ;;  %v2566_v15 = vld [vmem:[%s12755_s17 + $0x7d] sm:$0xff]  ;;  %v2567_v45 = vld [vmem:[%s12755_s17 + $0x85] sm:$0xff] }
 0x1e5   : > { %10827 = vmatprep.mubr.msk.bf16.mxu1 %vm455_vm1, %v13565_v24  ;;  %v6795_v24 = vld [vmem:[%s13412_s16 + $0x12] sm:$0xff] }
 0x1e6   : > { %v13720_v36 = vpack.c.bf16 %v6796_v20, %v6795_v24  ;;  %v6819_v24 = vld [vmem:[%s13412_s16 + $0xd2] sm:$0xff]  ;;  %v6820_v20 = vld [vmem:[%s13412_s16 + $0xda] sm:$0xff] }
 0x1e7   : > { %11334 = vmatmul.mubr.msk.bf16.gmra.mrb[28].mxu0 %vm455_vm1, %v6518_v41  ;;  %v6818_v41 = vld [vmem:[%s13412_s16 + $0xca] sm:$0xff] }
 0x1e8   : > { %11337 = vmatprep.mubr.msk.bf16.mxu0 %vm455_vm1, %v6519_v22  ;;  %v13826_v22 = vpack.c.bf16 %v6816_v57, %v6815_v52  ;;  %v13829_v58 = vpack.c.bf16 %v6818_v41, %v6817_v8  ;;  %v2604_v52 = vpack.c.bf16 %v2582_v59, %v2581_v6  ;;  %v2585_v57 = vld [vmem:[%s12755_s17 + $0x115] sm:$0xff]  ;;  %v2588_v8 = vld [vmem:[%s12755_s17 + $0x12d] sm:$0xff] }
 0x1e9   : > { %v7448_v6 = vld [vmem:[%s13412_s16 + $0x2b] sm:$0xff] }
 0x1ec   : > { %10828 = vmatmul.mubr.msk.bf16.gmra.mrb[16].mxu1 %vm455_vm1, %v13570_v47  ;;  %v13724_v47 = vpack.c.bf16 %v6798_v51, %v6797_v32  ;;  %v6821_v51 = vld [vmem:[%s13412_s16 + $0xe2] sm:$0xff] }
 0x1ed   : > { %10831 = vmatprep.mubr.msk.bf16.mxu1 %vm455_vm1, %v13583_v60  ;;  %v7230_v60 = vsel %vm510_vm0, %v13605_v62, 0  ;;  %v6800_v62 = vld [vmem:[%s13412_s16 + $0x3a] sm:$0xff] }
 0x1ef   : > { %11338 = vmatmul.mubr.msk.bf16.gmra.mrb[32].mxu0 %vm455_vm1, %v6520_v19  ;;  %v2568_v19 = vld [vmem:[%s12755_s17 + $0x8d] sm:$0xff] }
 0x1f0   : > { %11343 = vmatprep.mubr.msk.bf16.mxu0 %vm455_vm1, %v6829_v50  ;;  %v2596_v50 = vpack.c.bf16 %v2566_v15, %v2565_v9  ;;  %v2597_v32 = vpack.c.bf16 %v2568_v19, %v2567_v45  ;;  %v2589_v9 = vld [vmem:[%s12755_s17 + $0x135] sm:$0xff]  ;;  %v2590_v15 = vld [vmem:[%s12755_s17 + $0x13d] sm:$0xff]  ;;  %v2881_v45 = vld [vmem:[%s12755_s17 + $0x26] sm:$0xff] }
 0x1f1   : > { %v2882_v19 = vld [vmem:[%s12755_s17 + $0x2e] sm:$0xff] }
 0x1f4   : > { %10832 = vmatmul.mubr.msk.bf16.gmra.mrb[20].mxu1 %vm455_vm1, %v13588_v28  ;;  %v6799_v28 = vld [vmem:[%s13412_s16 + $0x32] sm:$0xff] }
 0x1f5   : > { %10835 = vmatprep.mubr.msk.bf16.mxu1 %vm455_vm1, %v13608_v46  ;;  %v6802_v46 = vld [vmem:[%s13412_s16 + $0x4a] sm:$0xff]  ;;  %v13745_v23 = vpack.c.bf16 %v6800_v62, %v6799_v28  ;;  %v13844_v28 = vpack.c.bf16 %v6820_v20, %v6819_v24  ;;  %v2884_v24 = vld [vmem:[%s12755_s17 + $0x3e] sm:$0xff] }
 0x1f6   : > { %v13749_v42 = vpack.c.bf16 %v6802_v46, %v6801_v25  ;;  %v2569_v25 = vld [vmem:[%s12755_s17 + $0x95] sm:$0xff]  ;;  %v2570_v46 = vld [vmem:[%s12755_s17 + $0x9d] sm:$0xff]  ;;  %v2885_v20 = vld [vmem:[%s12755_s17 + $0x46] sm:$0xff] }
 0x1f7   : > { %11344 = vmatmul.mubr.msk.bf16.vlgmr.msra.gmra.mrb[0].mxu0 %vm455_vm1, %v13720_v36 }
 0x1f8   : > { %11380 = vmatpush3.bf16.msra.mxu0 %v7230_v60  ;;  %11347 = vmatprep.mubr.msk.bf16.mxu0 %vm455_vm1, %v13724_v47  ;;  %v6822_v60 = vld [vmem:[%s13412_s16 + $0xea] sm:$0xff] }
 0x1f9   : > { %12568 = vmatprep.subr.msk.bf16.mxu0 %vm510_vm0, %v13733_v21  ;;  %v13847_v62 = vpack.c.bf16 %v6822_v60, %v6821_v51  ;;  %v3318_v51 = vsel %vm510_vm0, %v13806_v61, 0  ;;  %v13944_v60 = vld [vmem:[%s14821_s3 + $0x28] sm:$0xf] }
 0x1fc   : > { %10836 = vmatmul.mubr.msk.bf16.gmra.mrb[24].mxu1 %vm455_vm1, %v13613_v18  ;;  %v13761_v18 = vpack.c.bf16 %v6804_v30, %v6803_v38  ;;  %v2571_v38 = vld [vmem:[%s12755_s17 + $0xa5] sm:$0xff]  ;;  %v2572_v30 = vld [vmem:[%s12755_s17 + $0xad] sm:$0xff] }
 0x1fd   : > { %10839 = vmatprep.mubr.msk.bf16.mxu1 %vm455_vm1, %v13628_v27  ;;  %v13765_v27 = vpack.c.bf16 %v6806_v56, %v6805_v33  ;;  %v2598_v33 = vpack.c.bf16 %v2570_v46, %v2569_v25  ;;  %v6823_v56 = vld [vmem:[%s13412_s16 + $0xf2] sm:$0xff]  ;;  %v2599_v34 = vpack.c.bf16 %v2572_v30, %v2571_v38  ;;  %v2888_v25 = vld [vmem:[%s12755_s17 + $0x5e] sm:$0xff] }
 0x1fe   : > { %v2890_v46 = vld [vmem:[%s12755_s17 + $0x6e] sm:$0xff]  ;;  %v2891_v30 = vld [vmem:[%s12755_s17 + $0x76] sm:$0xff] }
 0x1ff   : > { %11348 = vmatmul.mubr.msk.bf16.gmra.mrb[4].mxu0 %vm455_vm1, %v13745_v23 }
 0x200   : > { %11351 = vmatprep.mubr.msk.bf16.mxu0 %vm455_vm1, %v13749_v42 }
 0x204   : > { %10840 = vmatmul.mubr.msk.bf16.gmra.mrb[28].mxu1 %vm455_vm1, %v13633_v29  ;;  %v6807_v29 = vld [vmem:[%s13412_s16 + $0x72] sm:$0xff] }
 0x205   : > { %10843 = vmatprep.mubr.msk.bf16.mxu1 %vm455_vm1, %v13644_v2  ;;  %v2591_v2 = vpack.c.bf16 %v2556_v11, %v2555_v35  ;;  %v13781_v12 = vpack.c.bf16 %v6808_v37, %v6807_v29  ;;  %v6825_v35 = vld [vmem:[%s13412_s16 + $0x102] sm:$0xff]  ;;  %v6826_v11 = vld [vmem:[%s13412_s16 + $0x10a] sm:$0xff]  ;;  %v2573_v37 = vld [vmem:[%s12755_s17 + $0xb5] sm:$0xff] }
 0x206   : > { %v13865_v29 = vpack.c.bf16 %v6826_v11, %v6825_v35  ;;  %v2896_v35 = vld [vmem:[%s12755_s17 + $0x9e] sm:$0xff]  ;;  %v2897_v11 = vld [vmem:[%s12755_s17 + $0xa6] sm:$0xff] }
 0x207   : > { %11352 = vmatmul.mubr.msk.bf16.gmra.mrb[8].mxu0 %vm455_vm1, %v13761_v18 }
 0x208   : > { %11355 = vmatprep.mubr.msk.bf16.mxu0 %vm455_vm1, %v13765_v27 }
 0x20c   : > { %10844 = vmatmul.mubr.msk.bf16.gmra.mrb[32].mxu1 %vm455_vm1, %v2282_v16  ;;  %v13862_v16 = vpack.c.bf16 %v6824_v39, %v6823_v56  ;;  %v2893_v56 = vld [vmem:[%s12755_s17 + $0x86] sm:$0xff]  ;;  %v2894_v39 = vld [vmem:[%s12755_s17 + $0x8e] sm:$0xff] }
 0x20d   : > { %10849 = vmatprep.mubr.msk.bf16.mxu1 %vm455_vm1, %v2591_v2  ;;  %v2574_v2 = vld [vmem:[%s12755_s17 + $0xbd] sm:$0xff] }
 0x20e   : > { %v2600_v48 = vpack.c.bf16 %v2574_v2, %v2573_v37  ;;  %v2898_v37 = vld [vmem:[%s12755_s17 + $0xae] sm:$0xff]  ;;  %v2899_v2 = vld [vmem:[%s12755_s17 + $0xb6] sm:$0xff] }
 0x20f   : > { %11356 = vmatmul.mubr.msk.bf16.gmra.mrb[12].mxu0 %vm455_vm1, %v13781_v12 }
 0x210   : > { %11359 = vmatprep.mubr.msk.bf16.mxu0 %vm455_vm1, %v13784_v44 }
 0x214   : > { %10850 = vmatmul.mubr.msk.bf16.vlgmr.msra.gmra.mrb[0].mxu1 %vm455_vm1, %v2592_v63  ;;  %v13878_v63 = vpack.c.bf16 %v6828_v49, %v6827_v14  ;;  %v7154_v14 = vld [vmem:[%s13412_s16 + $0x12a] sm:$0xff] }
 0x215   : > { %10853 = vmatprep.mubr.msk.bf16.mxu1 %vm455_vm1, %v2593_v54  ;;  %10886 = vmatpush3.bf16.msra.mxu1 %v2992_v13  ;;  %v2579_v54 = vld [vmem:[%s12755_s17 + $0xe5] sm:$0xff] }
 0x216   : > { %12554 = vmatprep.subr.msk.bf16.mxu1 %vm510_vm0, %v13806_v61  ;;  %v2603_v13 = vpack.c.bf16 %v2580_v55, %v2579_v54  ;;  %v2904_v55 = vld [vmem:[%s12755_s17 + $0xde] sm:$0xff] }
 0x217   : > { %11360 = vmatmul.mubr.msk.bf16.gmra.mrb[16].mxu0 %vm455_vm1, %v13801_v5 }
 0x218   : > { %11363 = vmatprep.mubr.msk.bf16.mxu0 %vm455_vm1, %v13809_v0 }
 0x21c   : > { %10854 = vmatmul.mubr.msk.bf16.gmra.mrb[4].mxu1 %vm455_vm1, %v2594_v10  ;;  %v2584_v10 = vld [vmem:[%s12755_s17 + $0x10d] sm:$0xff] }
 0x21d   : > { %10857 = vmatprep.mubr.msk.bf16.mxu1 %vm455_vm1, %v2595_v17  ;;  %v2605_v21 = vpack.c.bf16 %v2584_v10, %v2583_v7  ;;  %v2586_v17 = vld [vmem:[%s12755_s17 + $0x11d] sm:$0xff]  ;;  %v7449_v7 = vld [vmem:[%s13412_s16 + $0x33] sm:$0xff] }
 0x21e   : > { %v7450_v10 = vld [vmem:[%s13412_s16 + $0x3b] sm:$0xff] }
 0x21f   : > { %11364 = vmatmul.mubr.msk.bf16.gmra.mrb[20].mxu0 %vm455_vm1, %v13826_v22 }
 0x220   : > { %11367 = vmatprep.mubr.msk.bf16.mxu0 %vm455_vm1, %v13829_v58 }
 0x224   : > { %10858 = vmatmul.mubr.msk.bf16.gmra.mrb[8].mxu1 %vm455_vm1, %v2596_v50  ;;  %v2883_v50 = vld [vmem:[%s12755_s17 + $0x36] sm:$0xff] }
 0x225   : > { %10861 = vmatprep.mubr.msk.bf16.mxu1 %vm455_vm1, %v2597_v32  ;;  %v2886_v32 = vld [vmem:[%s12755_s17 + $0x4e] sm:$0xff] }
 0x227   : > { %11368 = vmatmul.mubr.msk.bf16.gmra.mrb[24].mxu0 %vm455_vm1, %v13844_v28 }
 0x228   : > { %11371 = vmatprep.mubr.msk.bf16.mxu0 %vm455_vm1, %v13847_v62 }
 0x22c   : > { %10862 = vmatmul.mubr.msk.bf16.gmra.mrb[12].mxu1 %vm455_vm1, %v2598_v33  ;;  %v2892_v33 = vld [vmem:[%s12755_s17 + $0x7e] sm:$0xff] }
 0x22d   : > { %10865 = vmatprep.mubr.msk.bf16.mxu1 %vm455_vm1, %v2599_v34  ;;  %v2895_v34 = vld [vmem:[%s12755_s17 + $0x96] sm:$0xff] }
 0x22f   : > { %11372 = vmatmul.mubr.msk.bf16.gmra.mrb[28].mxu0 %vm455_vm1, %v13862_v16 }
 0x230   : > { %11375 = vmatprep.mubr.msk.bf16.mxu0 %vm455_vm1, %v13865_v29 }
 0x234   : > { %10866 = vmatmul.mubr.msk.bf16.gmra.mrb[16].mxu1 %vm455_vm1, %v2600_v48  ;;  %v2902_v48 = vld [vmem:[%s12755_s17 + $0xce] sm:$0xff] }
 0x235   : > { %10869 = vmatprep.mubr.msk.bf16.mxu1 %vm455_vm1, %v2601_v31  ;;  %v2927_v49 = vpack.c.bf16 %v2902_v48, %v2901_v40  ;;  %v7445_v31 = vld [vmem:[%s13412_s16 + $0x13] sm:$0xff]  ;;  %v3211_v40 = vld [vmem:[%s12767_s29 + $0x20] sm:$0xff]  ;;  %v3212_v48 = vld [vmem:[%s12767_s29 + $0x28] sm:$0xff] }
 0x236   : > { %v7481_v54 = vpack.c.bf16 %v7446_v53, %v7445_v31  ;;  %v7465_v31 = vld [vmem:[%s13412_s16 + $0xb3] sm:$0xff]  ;;  %v7466_v53 = vld [vmem:[%s13412_s16 + $0xbb] sm:$0xff] }
 0x237   : > { %11376 = vmatmul.mubr.msk.bf16.gmra.mrb[32].mxu0 %vm455_vm1, %v13878_v63 }
 0x238   : > { %11381 = vmatprep.mubr.msk.bf16.mxu0 %vm455_vm1, %v13720_v36  ;;  %v13901_v36 = vld [vmem:[%s14821_s3 + $0x5c] sm:$0xf] }
 0x23c   : > { %10870 = vmatmul.mubr.msk.bf16.gmra.mrb[20].mxu1 %vm455_vm1, %v2602_v43  ;;  %v2905_v43 = vld [vmem:[%s12755_s17 + $0xe6] sm:$0xff] }
 0x23d   : > { %10873 = vmatprep.mubr.msk.bf16.mxu1 %vm455_vm1, %v2603_v13 }
 0x23f   : > { %11382 = vmatmul.mubr.msk.bf16.vlgmr.msra.gmra.mrb[0].mxu0 %vm455_vm1, %v13724_v47  ;;  %v2587_v47 = vld [vmem:[%s12755_s17 + $0x125] sm:$0xff] }
 0x240   : > { %11418 = vmatpush3.bf16.msra.mxu0 %v7556_v1  ;;  %11385 = vmatprep.mubr.msk.bf16.mxu0 %vm455_vm1, %v13745_v23  ;;  %v2606_v23 = vpack.c.bf16 %v2586_v17, %v2585_v57  ;;  %v2607_v41 = vpack.c.bf16 %v2588_v8, %v2587_v47  ;;  %v7447_v1 = vld [vmem:[%s13412_s16 + $0x23] sm:$0xff]  ;;  %v7882_v57 = vsel %vm510_vm0, %v13901_v36, 0  ;;  %v2907_v17 = vld [vmem:[%s12755_s17 + $0xf6] sm:$0xff] }
 0x241   : > { %12569 = vmatprep.subr.msk.bf16.mxu0 %vm510_vm0, %v13901_v36  ;;  %v2908_v47 = vld [vmem:[%s12755_s17 + $0xfe] sm:$0xff]  ;;  %v2909_v8 = vld [vmem:[%s12755_s17 + $0x106] sm:$0xff] }
 0x242   : > { %v7451_v36 = vld [vmem:[%s13412_s16 + $0x43] sm:$0xff] }
 0x244   : > { %10874 = vmatmul.mubr.msk.bf16.gmra.mrb[24].mxu1 %vm455_vm1, %v2604_v52  ;;  %v7482_v52 = vpack.c.bf16 %v7448_v6, %v7447_v1  ;;  %v7467_v6 = vld [vmem:[%s13412_s16 + $0xc3] sm:$0xff] }
 0x245   : > { %10877 = vmatprep.mubr.msk.bf16.mxu1 %vm455_vm1, %v2605_v21  ;;  %v7483_v21 = vpack.c.bf16 %v7450_v10, %v7449_v7  ;;  %v7469_v10 = vld [vmem:[%s13412_s16 + $0xd3] sm:$0xff] }
 0x247   : > { %11386 = vmatmul.mubr.msk.bf16.gmra.mrb[4].mxu0 %vm455_vm1, %v13749_v42  ;;  %v2608_v42 = vpack.c.bf16 %v2590_v15, %v2589_v9  ;;  %v2930_v9 = vpack.c.bf16 %v2908_v47, %v2907_v17  ;;  %v7452_v15 = vld [vmem:[%s13412_s16 + $0x4b] sm:$0xff]  ;;  %v3218_v47 = vld [vmem:[%s12767_s29 + $0x58] sm:$0xff] }
 0x248   : > { %11389 = vmatprep.mubr.msk.bf16.mxu0 %vm455_vm1, %v13761_v18  ;;  %v2917_v18 = vpack.c.bf16 %v2882_v19, %v2881_v45  ;;  %v7453_v19 = vld [vmem:[%s13412_s16 + $0x53] sm:$0xff] }
 0x249   : > { %v3217_v17 = vld [vmem:[%s12767_s29 + $0x50] sm:$0xff] }
 0x24c   : > { %10878 = vmatmul.mubr.msk.bf16.gmra.mrb[28].mxu1 %vm455_vm1, %v2606_v23  ;;  %v2910_v23 = vld [vmem:[%s12755_s17 + $0x10e] sm:$0xff] }
 0x24d   : > { %10881 = vmatprep.mubr.msk.bf16.mxu1 %vm455_vm1, %v2607_v41  ;;  %v14015_v41 = vld [vmem:[%s14821_s3 + $0x60] sm:$0xf]  ;;  %v2931_v45 = vpack.c.bf16 %v2910_v23, %v2909_v8  ;;  %v3220_v23 = vld [vmem:[%s12767_s29 + $0x68] sm:$0xff] }
 0x24e   : > { %v3219_v8 = vld [vmem:[%s12767_s29 + $0x60] sm:$0xff] }
 0x24f   : > { %11390 = vmatmul.mubr.msk.bf16.gmra.mrb[8].mxu0 %vm455_vm1, %v13765_v27  ;;  %v2918_v27 = vpack.c.bf16 %v2884_v24, %v2883_v50  ;;  %v2911_v24 = vld [vmem:[%s12755_s17 + $0x116] sm:$0xff] }
 0x250   : > { %11393 = vmatprep.mubr.msk.bf16.mxu0 %vm455_vm1, %v13781_v12  ;;  %v2919_v12 = vpack.c.bf16 %v2886_v32, %v2885_v20  ;;  %v2912_v20 = vld [vmem:[%s12755_s17 + $0x11e] sm:$0xff]  ;;  %v2913_v32 = vld [vmem:[%s12755_s17 + $0x126] sm:$0xff] }
 0x254   : > { %10882 = vmatmul.mubr.msk.bf16.gmra.mrb[32].mxu1 %vm455_vm1, %v2608_v42  ;;  %v7454_v42 = vld [vmem:[%s13412_s16 + $0x5b] sm:$0xff] }
 0x255   : > { %10887 = vmatprep.mubr.msk.bf16.mxu1 %vm455_vm1, %v2917_v18  ;;  %v7484_v18 = vpack.c.bf16 %v7452_v15, %v7451_v36  ;;  %v7485_v50 = vpack.c.bf16 %v7454_v42, %v7453_v19  ;;  %v7471_v36 = vld [vmem:[%s13412_s16 + $0xe3] sm:$0xff]  ;;  %v7472_v15 = vld [vmem:[%s13412_s16 + $0xeb] sm:$0xff]  ;;  %v7473_v19 = vld [vmem:[%s13412_s16 + $0xf3] sm:$0xff] }
 0x256   : > { %v7474_v42 = vld [vmem:[%s13412_s16 + $0xfb] sm:$0xff] }
 0x257   : > { %11394 = vmatmul.mubr.msk.bf16.gmra.mrb[12].mxu0 %vm455_vm1, %v13784_v44  ;;  %v2887_v44 = vld [vmem:[%s12755_s17 + $0x56] sm:$0xff] }
 0x258   : > { %11397 = vmatprep.mubr.msk.bf16.mxu0 %vm455_vm1, %v13801_v5  ;;  %v2889_v5 = vld [vmem:[%s12755_s17 + $0x66] sm:$0xff]  ;;  %v2920_v61 = vpack.c.bf16 %v2888_v25, %v2887_v44 }
 0x259   : > { %v2921_v38 = vpack.c.bf16 %v2890_v46, %v2889_v5  ;;  %v7456_v44 = vld [vmem:[%s13412_s16 + $0x6b] sm:$0xff]  ;;  %v7457_v5 = vld [vmem:[%s13412_s16 + $0x73] sm:$0xff]  ;;  %v7458_v46 = vld [vmem:[%s13412_s16 + $0x7b] sm:$0xff] }
 0x25c   : > { %10888 = vmatmul.mubr.msk.bf16.vlgmr.msra.gmra.mrb[0].mxu1 %vm455_vm1, %v2918_v27  ;;  %v2914_v27 = vld [vmem:[%s12755_s17 + $0x12e] sm:$0xff] }
 0x25d   : > { %10891 = vmatprep.mubr.msk.bf16.mxu1 %vm455_vm1, %v2919_v12  ;;  %10924 = vmatpush3.bf16.msra.mxu1 %v3318_v51  ;;  %v2932_v12 = vpack.c.bf16 %v2912_v20, %v2911_v24  ;;  %v7455_v51 = vld [vmem:[%s13412_s16 + $0x63] sm:$0xff]  ;;  %v2933_v25 = vpack.c.bf16 %v2914_v27, %v2913_v32  ;;  %v3221_v24 = vld [vmem:[%s12767_s29 + $0x70] sm:$0xff]  ;;  %v3222_v20 = vld [vmem:[%s12767_s29 + $0x78] sm:$0xff] }
 0x25e   : > { %12555 = vmatprep.subr.msk.bf16.mxu1 %vm510_vm0, %v13944_v60  ;;  %v3223_v32 = vld [vmem:[%s12767_s29 + $0x80] sm:$0xff]  ;;  %v3224_v27 = vld [vmem:[%s12767_s29 + $0x88] sm:$0xff] }
 0x25f   : > { %11398 = vmatmul.mubr.msk.bf16.gmra.mrb[16].mxu0 %vm455_vm1, %v13809_v0  ;;  %v2922_v0 = vpack.c.bf16 %v2892_v33, %v2891_v30  ;;  %v2915_v30 = vld [vmem:[%s12755_s17 + $0x136] sm:$0xff]  ;;  %v2916_v33 = vld [vmem:[%s12755_s17 + $0x13e] sm:$0xff] }
 0x260   : > { %11401 = vmatprep.mubr.msk.bf16.mxu0 %vm455_vm1, %v13826_v22  ;;  %v2923_v22 = vpack.c.bf16 %v2894_v39, %v2893_v56  ;;  %v3207_v56 = vld [vmem:[%s12767_s29] sm:$0xff]  ;;  %v3208_v39 = vld [vmem:[%s12767_s29 + $0x8] sm:$0xff] }
 0x264   : > { %10892 = vmatmul.mubr.msk.bf16.gmra.mrb[4].mxu1 %vm455_vm1, %v2920_v61  ;;  %v7486_v61 = vpack.c.bf16 %v7456_v44, %v7455_v51  ;;  %v7475_v51 = vld [vmem:[%s13412_s16 + $0x103] sm:$0xff]  ;;  %v7476_v44 = vld [vmem:[%s13412_s16 + $0x10b] sm:$0xff] }
 0x265   : > { %10895 = vmatprep.mubr.msk.bf16.mxu1 %vm455_vm1, %v2921_v38  ;;  %v7487_v38 = vpack.c.bf16 %v7458_v46, %v7457_v5  ;;  %v7477_v5 = vld [vmem:[%s13412_s16 + $0x113] sm:$0xff]  ;;  %v7478_v46 = vld [vmem:[%s13412_s16 + $0x11b] sm:$0xff] }
 0x267   : > { %11402 = vmatmul.mubr.msk.bf16.gmra.mrb[20].mxu0 %vm455_vm1, %v13829_v58  ;;  %v2924_v58 = vpack.c.bf16 %v2896_v35, %v2895_v34  ;;  %v7460_v34 = vld [vmem:[%s13412_s16 + $0x8b] sm:$0xff]  ;;  %v3243_v35 = vpack.c.bf16 %v3208_v39, %v3207_v56  ;;  %v3227_v56 = vld [vmem:[%s12767_s29 + $0xa0] sm:$0xff] }
 0x268   : > { %11405 = vmatprep.mubr.msk.bf16.mxu0 %vm455_vm1, %v13844_v28  ;;  %v2925_v28 = vpack.c.bf16 %v2898_v37, %v2897_v11  ;;  %v7461_v11 = vld [vmem:[%s13412_s16 + $0x93] sm:$0xff]  ;;  %v7462_v37 = vld [vmem:[%s13412_s16 + $0x9b] sm:$0xff]  ;;  %v3228_v39 = vld [vmem:[%s12767_s29 + $0xa8] sm:$0xff] }
 0x26c   : > { %10896 = vmatmul.mubr.msk.bf16.gmra.mrb[8].mxu1 %vm455_vm1, %v2922_v0  ;;  %v2934_v0 = vpack.c.bf16 %v2916_v33, %v2915_v30  ;;  %v3225_v30 = vld [vmem:[%s12767_s29 + $0x90] sm:$0xff]  ;;  %v3226_v33 = vld [vmem:[%s12767_s29 + $0x98] sm:$0xff] }
 0x26d   : > { %10899 = vmatprep.mubr.msk.bf16.mxu1 %vm455_vm1, %v2923_v22  ;;  %v7459_v22 = vld [vmem:[%s13412_s16 + $0x83] sm:$0xff] }
 0x26f   : > { %11406 = vmatmul.mubr.msk.bf16.gmra.mrb[24].mxu0 %vm455_vm1, %v13847_v62  ;;  %v2926_v62 = vpack.c.bf16 %v2900_v26, %v2899_v2  ;;  %v3209_v2 = vld [vmem:[%s12767_s29 + $0x10] sm:$0xff]  ;;  %v3210_v26 = vld [vmem:[%s12767_s29 + $0x18] sm:$0xff] }
 0x270   : > { %11409 = vmatprep.mubr.msk.bf16.mxu0 %vm455_vm1, %v13862_v16  ;;  %v7153_v16 = vld [vmem:[%s13412_s16 + $0x122] sm:$0xff] }
 0x271   : > { %v7172_v4 = vpack.c.bf16 %v7154_v14, %v7153_v16  ;;  %v7463_v16 = vld [vmem:[%s13412_s16 + $0xa3] sm:$0xff]  ;;  %v7464_v14 = vld [vmem:[%s13412_s16 + $0xab] sm:$0xff] }
 0x274   : > { %10900 = vmatmul.mubr.msk.bf16.gmra.mrb[12].mxu1 %vm455_vm1, %v2924_v58  ;;  %v7488_v58 = vpack.c.bf16 %v7460_v34, %v7459_v22  ;;  %v7479_v22 = vld [vmem:[%s13412_s16 + $0x123] sm:$0xff]  ;;  %v7480_v34 = vld [vmem:[%s13412_s16 + $0x12b] sm:$0xff] }
 0x275   : > { %10903 = vmatprep.mubr.msk.bf16.mxu1 %vm455_vm1, %v2925_v28  ;;  %v7489_v28 = vpack.c.bf16 %v7462_v37, %v7461_v11  ;;  %v7771_v11 = vld [vmem:[%s13412_s16 + $0x14] sm:$0xff]  ;;  %v7772_v37 = vld [vmem:[%s13412_s16 + $0x1c] sm:$0xff] }
 0x277   : > { %11410 = vmatmul.mubr.msk.bf16.gmra.mrb[28].mxu0 %vm455_vm1, %v13865_v29  ;;  %v2903_v29 = vld [vmem:[%s12755_s17 + $0xd6] sm:$0xff] }
 0x278   : > { %11413 = vmatprep.mubr.msk.bf16.mxu0 %vm455_vm1, %v13878_v63  ;;  %v2906_v63 = vld [vmem:[%s12755_s17 + $0xee] sm:$0xff]  ;;  %v2928_v13 = vpack.c.bf16 %v2904_v55, %v2903_v29  ;;  %v7491_v55 = vpack.c.bf16 %v7466_v53, %v7465_v31  ;;  %v7776_v53 = vld [vmem:[%s13412_s16 + $0x3c] sm:$0xff] }
 0x279   : > { %v2929_v59 = vpack.c.bf16 %v2906_v63, %v2905_v43  ;;  %v14066_v29 = vld [vmem:[%s14821_s3 + $0x2c] sm:$0xf]  ;;  %v3213_v43 = vld [vmem:[%s12767_s29 + $0x30] sm:$0xff]  ;;  %v3214_v63 = vld [vmem:[%s12767_s29 + $0x38] sm:$0xff] }
 0x27a   : > { %v3246_v1 = vpack.c.bf16 %v3214_v63, %v3213_v43  ;;  %v7775_v31 = vld [vmem:[%s13412_s16 + $0x34] sm:$0xff] }
 0x27b   : > { %v3233_v43 = vld [vmem:[%s12767_s29 + $0xd0] sm:$0xff]  ;;  %v3234_v63 = vld [vmem:[%s12767_s29 + $0xd8] sm:$0xff] }
 0x27c   : > { %10904 = vmatmul.mubr.msk.bf16.gmra.mrb[16].mxu1 %vm455_vm1, %v2926_v62  ;;  %v3244_v62 = vpack.c.bf16 %v3210_v26, %v3209_v2  ;;  %v3229_v2 = vld [vmem:[%s12767_s29 + $0xb0] sm:$0xff]  ;;  %v3230_v26 = vld [vmem:[%s12767_s29 + $0xb8] sm:$0xff] }
 0x27d   : > { %10907 = vmatprep.mubr.msk.bf16.mxu1 %vm455_vm1, %v2927_v49  ;;  %v3245_v49 = vpack.c.bf16 %v3212_v48, %v3211_v40  ;;  %v3231_v40 = vld [vmem:[%s12767_s29 + $0xc0] sm:$0xff]  ;;  %v3232_v48 = vld [vmem:[%s12767_s29 + $0xc8] sm:$0xff] }
 0x27f   : > { %11414 = vmatmul.mubr.msk.bf16.gmra.mrb[32].mxu0 %vm455_vm1, %v7172_v4  ;;  %v3644_v4 = vsel %vm510_vm0, %v13944_v60, 0  ;;  %v3216_v60 = vld [vmem:[%s12767_s29 + $0x48] sm:$0xff] }
 0x280   : > { %11419 = vmatprep.mubr.msk.bf16.mxu0 %vm455_vm1, %v7481_v54  ;;  %v7490_v54 = vpack.c.bf16 %v7464_v14, %v7463_v16  ;;  %v7773_v16 = vld [vmem:[%s13412_s16 + $0x24] sm:$0xff]  ;;  %v7774_v14 = vld [vmem:[%s13412_s16 + $0x2c] sm:$0xff] }
 0x284   : > { %10908 = vmatmul.mubr.msk.bf16.gmra.mrb[20].mxu1 %vm455_vm1, %v2928_v13  ;;  %v3215_v13 = vld [vmem:[%s12767_s29 + $0x40] sm:$0xff] }
 0x285   : > { %10911 = vmatprep.mubr.msk.bf16.mxu1 %vm455_vm1, %v2929_v59  ;;  %v7468_v59 = vld [vmem:[%s13412_s16 + $0xcb] sm:$0xff]  ;;  %v3247_v7 = vpack.c.bf16 %v3216_v60, %v3215_v13  ;;  %v3235_v13 = vld [vmem:[%s12767_s29 + $0xe0] sm:$0xff] }
 0x286   : > { %v3236_v60 = vld [vmem:[%s12767_s29 + $0xe8] sm:$0xff] }
 0x287   : > { %11420 = vmatmul.mubr.msk.bf16.vlgmr.msra.gmra.mrb[0].mxu0 %vm455_vm1, %v7482_v52  ;;  %v7470_v52 = vld [vmem:[%s13412_s16 + $0xdb] sm:$0xff] }
 0x288   : > { %11456 = vmatpush3.bf16.msra.mxu0 %v7882_v57  ;;  %11423 = vmatprep.mubr.msk.bf16.mxu0 %vm455_vm1, %v7483_v21  ;;  %v7492_v21 = vpack.c.bf16 %v7468_v59, %v7467_v6  ;;  %v7493_v57 = vpack.c.bf16 %v7470_v52, %v7469_v10  ;;  %v7777_v6 = vld [vmem:[%s13412_s16 + $0x44] sm:$0xff]  ;;  %v7778_v59 = vld [vmem:[%s13412_s16 + $0x4c] sm:$0xff]  ;;  %v7779_v10 = vld [vmem:[%s13412_s16 + $0x54] sm:$0xff] }
 0x289   : > { %12570 = vmatprep.subr.msk.bf16.mxu0 %vm510_vm0, %v14015_v41  ;;  %v7780_v52 = vld [vmem:[%s13412_s16 + $0x5c] sm:$0xff] }
 0x28c   : > { %10912 = vmatmul.mubr.msk.bf16.gmra.mrb[24].mxu1 %vm455_vm1, %v2930_v9  ;;  %v3248_v9 = vpack.c.bf16 %v3218_v47, %v3217_v17  ;;  %v3237_v17 = vld [vmem:[%s12767_s29 + $0xf0] sm:$0xff]  ;;  %v3238_v47 = vld [vmem:[%s12767_s29 + $0xf8] sm:$0xff] }
 0x28d   : > { %10915 = vmatprep.mubr.msk.bf16.mxu1 %vm455_vm1, %v2931_v45  ;;  %v3249_v45 = vpack.c.bf16 %v3220_v23, %v3219_v8  ;;  %v3239_v8 = vld [vmem:[%s12767_s29 + $0x100] sm:$0xff]  ;;  %v3240_v23 = vld [vmem:[%s12767_s29 + $0x108] sm:$0xff] }
 0x28f   : > { %11424 = vmatmul.mubr.msk.bf16.gmra.mrb[4].mxu0 %vm455_vm1, %v7484_v18  ;;  %v7494_v18 = vpack.c.bf16 %v7472_v15, %v7471_v36  ;;  %v7781_v36 = vld [vmem:[%s13412_s16 + $0x64] sm:$0xff]  ;;  %v7782_v15 = vld [vmem:[%s13412_s16 + $0x6c] sm:$0xff] }
 0x290   : > { %11427 = vmatprep.mubr.msk.bf16.mxu0 %vm455_vm1, %v7485_v50  ;;  %v7495_v50 = vpack.c.bf16 %v7474_v42, %v7473_v19  ;;  %v7783_v19 = vld [vmem:[%s13412_s16 + $0x74] sm:$0xff]  ;;  %v7784_v42 = vld [vmem:[%s13412_s16 + $0x7c] sm:$0xff] }
 0x294   : > { %10916 = vmatmul.mubr.msk.bf16.gmra.mrb[28].mxu1 %vm455_vm1, %v2932_v12  ;;  %v3250_v12 = vpack.c.bf16 %v3222_v20, %v3221_v24  ;;  %v3241_v24 = vld [vmem:[%s12767_s29 + $0x110] sm:$0xff]  ;;  %v3242_v20 = vld [vmem:[%s12767_s29 + $0x118] sm:$0xff] }
 0x295   : > { %10919 = vmatprep.mubr.msk.bf16.mxu1 %vm455_vm1, %v2933_v25  ;;  %v3251_v25 = vpack.c.bf16 %v3224_v27, %v3223_v32  ;;  %v3533_v32 = vld [vmem:[%s12767_s29 + $0x1] sm:$0xff]  ;;  %v3534_v27 = vld [vmem:[%s12767_s29 + $0x9] sm:$0xff] }
 0x297   : > { %11428 = vmatmul.mubr.msk.bf16.gmra.mrb[8].mxu0 %vm455_vm1, %v7486_v61  ;;  %v7496_v61 = vpack.c.bf16 %v7476_v44, %v7475_v51  ;;  %v7785_v51 = vld [vmem:[%s13412_s16 + $0x84] sm:$0xff]  ;;  %v7786_v44 = vld [vmem:[%s13412_s16 + $0x8c] sm:$0xff] }
 0x298   : > { %11431 = vmatprep.mubr.msk.bf16.mxu0 %vm455_vm1, %v7487_v38  ;;  %v7497_v38 = vpack.c.bf16 %v7478_v46, %v7477_v5  ;;  %v7787_v5 = vld [vmem:[%s13412_s16 + $0x94] sm:$0xff]  ;;  %v7788_v46 = vld [vmem:[%s13412_s16 + $0x9c] sm:$0xff] }
 0x29c   : > { %10920 = vmatmul.mubr.msk.bf16.gmra.mrb[32].mxu1 %vm455_vm1, %v2934_v0  ;;  %v3252_v0 = vpack.c.bf16 %v3226_v33, %v3225_v30  ;;  %v3535_v30 = vld [vmem:[%s12767_s29 + $0x11] sm:$0xff]  ;;  %v3536_v33 = vld [vmem:[%s12767_s29 + $0x19] sm:$0xff] }
 0x29d   : > { %10925 = vmatprep.mubr.msk.bf16.mxu1 %vm455_vm1, %v3243_v35  ;;  %v3253_v35 = vpack.c.bf16 %v3228_v39, %v3227_v56  ;;  %v3537_v56 = vld [vmem:[%s12767_s29 + $0x21] sm:$0xff]  ;;  %v3538_v39 = vld [vmem:[%s12767_s29 + $0x29] sm:$0xff] }
 0x29f   : > { %11432 = vmatmul.mubr.msk.bf16.gmra.mrb[12].mxu0 %vm455_vm1, %v7488_v58  ;;  %v7498_v58 = vpack.c.bf16 %v7480_v34, %v7479_v22  ;;  %v7789_v22 = vld [vmem:[%s13412_s16 + $0xa4] sm:$0xff]  ;;  %v7790_v34 = vld [vmem:[%s13412_s16 + $0xac] sm:$0xff] }
 0x2a0   : > { %11435 = vmatprep.mubr.msk.bf16.mxu0 %vm455_vm1, %v7489_v28  ;;  %v7807_v28 = vpack.c.bf16 %v7772_v37, %v7771_v11  ;;  %v7791_v11 = vld [vmem:[%s13412_s16 + $0xb4] sm:$0xff]  ;;  %v7792_v37 = vld [vmem:[%s13412_s16 + $0xbc] sm:$0xff] }
 0x2a4   : > { %10926 = vmatmul.mubr.msk.bf16.vlgmr.msra.gmra.mrb[0].mxu1 %vm455_vm1, %v3244_v62  ;;  %v3254_v62 = vpack.c.bf16 %v3230_v26, %v3229_v2  ;;  %v14218_v2 = vld [vmem:[%s14821_s3 + $0x30] sm:$0xf]  ;;  %v14221_v26 = vpack.c.bf16 %v7792_v37, %v7791_v11 }
 0x2a5   : > { %10929 = vmatprep.mubr.msk.bf16.mxu1 %vm455_vm1, %v3245_v49  ;;  %10962 = vmatpush3.bf16.msra.mxu1 %v3644_v4  ;;  %v3255_v49 = vpack.c.bf16 %v3232_v48, %v3231_v40  ;;  %v14130_v4 = vpack.c.bf16 %v7774_v14, %v7773_v16  ;;  %v3539_v40 = vld [vmem:[%s12767_s29 + $0x31] sm:$0xff]  ;;  %v3540_v48 = vld [vmem:[%s12767_s29 + $0x39] sm:$0xff]  ;;  %v7793_v14 = vld [vmem:[%s13412_s16 + $0xc4] sm:$0xff] }
 0x2a6   : > { %12556 = vmatprep.subr.msk.bf16.mxu1 %vm510_vm0, %v14066_v29  ;;  %v3572_v16 = vpack.c.bf16 %v3540_v48, %v3539_v40  ;;  %v3558_v11 = vld [vmem:[%s12767_s29 + $0xc9] sm:$0xff]  ;;  %v3559_v48 = vld [vmem:[%s12767_s29 + $0xd1] sm:$0xff] }
 0x2a7   : > { %11436 = vmatmul.mubr.msk.bf16.gmra.mrb[16].mxu0 %vm455_vm1, %v7490_v54  ;;  %v14133_v54 = vpack.c.bf16 %v7776_v53, %v7775_v31  ;;  %v7795_v53 = vld [vmem:[%s13412_s16 + $0xd4] sm:$0xff] }
 0x2a8   : > { %11439 = vmatprep.mubr.msk.bf16.mxu0 %vm455_vm1, %v7491_v55  ;;  %v8208_v55 = vsel %vm510_vm0, %v14015_v41, 0  ;;  %v3256_v41 = vpack.c.bf16 %v3234_v63, %v3233_v43 }
 0x2ac   : > { %10930 = vmatmul.mubr.msk.bf16.gmra.mrb[4].mxu1 %vm455_vm1, %v3246_v1  ;;  %v14145_v1 = vld [vmem:[%s14821_s3 + $0x64] sm:$0xf] }
 0x2ad   : > { %10933 = vmatprep.mubr.msk.bf16.mxu1 %vm455_vm1, %v3247_v7  ;;  %v3257_v7 = vpack.c.bf16 %v3236_v60, %v3235_v13  ;;  %v3543_v13 = vld [vmem:[%s12767_s29 + $0x51] sm:$0xff]  ;;  %v3544_v60 = vld [vmem:[%s12767_s29 + $0x59] sm:$0xff]  ;;  %v8534_v40 = vsel %vm510_vm0, %v14145_v1, 0 }
 0x2af   : > { %11440 = vmatmul.mubr.msk.bf16.gmra.mrb[20].mxu0 %vm455_vm1, %v7492_v21  ;;  %v14157_v21 = vpack.c.bf16 %v7778_v59, %v7777_v6  ;;  %v3546_v6 = vld [vmem:[%s12767_s29 + $0x69] sm:$0xff]  ;;  %v3574_v59 = vpack.c.bf16 %v3544_v60, %v3543_v13  ;;  %v3567_v13 = vld [vmem:[%s12767_s29 + $0x111] sm:$0xff]  ;;  %v3568_v60 = vld [vmem:[%s12767_s29 + $0x119] sm:$0xff] }
 0x2b0   : > { %11443 = vmatprep.mubr.msk.bf16.mxu0 %vm455_vm1, %v7493_v57  ;;  %v14160_v57 = vpack.c.bf16 %v7780_v52, %v7779_v10  ;;  %v7798_v10 = vld [vmem:[%s13412_s16 + $0xec] sm:$0xff] }
 0x2b4   : > { %10934 = vmatmul.mubr.msk.bf16.gmra.mrb[8].mxu1 %vm455_vm1, %v3248_v9  ;;  %v3258_v9 = vpack.c.bf16 %v3238_v47, %v3237_v17  ;;  %v7799_v17 = vld [vmem:[%s13412_s16 + $0xf4] sm:$0xff]  ;;  %v7800_v47 = vld [vmem:[%s13412_s16 + $0xfc] sm:$0xff] }
 0x2b5   : > { %10937 = vmatprep.mubr.msk.bf16.mxu1 %vm455_vm1, %v3249_v45  ;;  %v3259_v45 = vpack.c.bf16 %v3240_v23, %v3239_v8  ;;  %v14259_v23 = vpack.c.bf16 %v7800_v47, %v7799_v17  ;;  %v4296_v17 = vsel %vm510_vm0, %v14218_v2, 0  ;;  %v3866_v47 = vld [vmem:[%s12767_s29 + $0x3a] sm:$0xff] }
 0x2b7   : > { %11444 = vmatmul.mubr.msk.bf16.gmra.mrb[24].mxu0 %vm455_vm1, %v7494_v18  ;;  %v14175_v18 = vpack.c.bf16 %v7782_v15, %v7781_v36  ;;  %v3548_v36 = vld [vmem:[%s12767_s29 + $0x79] sm:$0xff]  ;;  %v3549_v15 = vld [vmem:[%s12767_s29 + $0x81] sm:$0xff] }
 0x2b8   : > { %11447 = vmatprep.mubr.msk.bf16.mxu0 %vm455_vm1, %v7495_v50  ;;  %v14178_v50 = vpack.c.bf16 %v7784_v42, %v7783_v19  ;;  %v7801_v42 = vld [vmem:[%s13412_s16 + $0x104] sm:$0xff] }
 0x2bc   : > { %10938 = vmatmul.mubr.msk.bf16.gmra.mrb[12].mxu1 %vm455_vm1, %v3250_v12  ;;  %v3260_v12 = vpack.c.bf16 %v3242_v20, %v3241_v24  ;;  %v7802_v24 = vld [vmem:[%s13412_s16 + $0x10c] sm:$0xff] }
 0x2bd   : > { %10941 = vmatprep.mubr.msk.bf16.mxu1 %vm455_vm1, %v3251_v25  ;;  %v3569_v25 = vpack.c.bf16 %v3534_v27, %v3533_v32  ;;  %v7803_v32 = vld [vmem:[%s13412_s16 + $0x114] sm:$0xff]  ;;  %v7804_v27 = vld [vmem:[%s13412_s16 + $0x11c] sm:$0xff] }
 0x2bf   : > { %11448 = vmatmul.mubr.msk.bf16.gmra.mrb[28].mxu0 %vm455_vm1, %v7496_v61  ;;  %v14193_v61 = vpack.c.bf16 %v7786_v44, %v7785_v51  ;;  %v14277_v51 = vpack.c.bf16 %v7804_v27, %v7803_v32  ;;  %v3551_v44 = vld [vmem:[%s12767_s29 + $0x91] sm:$0xff]  ;;  %v3874_v32 = vld [vmem:[%s12767_s29 + $0x7a] sm:$0xff] }
 0x2c0   : > { %11451 = vmatprep.mubr.msk.bf16.mxu0 %vm455_vm1, %v7497_v38  ;;  %v14196_v38 = vpack.c.bf16 %v7788_v46, %v7787_v5  ;;  %v3553_v5 = vld [vmem:[%s12767_s29 + $0xa1] sm:$0xff]  ;;  %v3554_v46 = vld [vmem:[%s12767_s29 + $0xa9] sm:$0xff] }
 0x2c1   : > { %v3876_v27 = vld [vmem:[%s12767_s29 + $0x8a] sm:$0xff] }
 0x2c4   : > { %10942 = vmatmul.mubr.msk.bf16.gmra.mrb[16].mxu1 %vm455_vm1, %v3252_v0  ;;  %v3570_v0 = vpack.c.bf16 %v3536_v33, %v3535_v30  ;;  %v7805_v33 = vld [vmem:[%s13412_s16 + $0x124] sm:$0xff] }
 0x2c5   : > { %10945 = vmatprep.mubr.msk.bf16.mxu1 %vm455_vm1, %v3253_v35  ;;  %v3571_v35 = vpack.c.bf16 %v3538_v39, %v3537_v56  ;;  %v7806_v56 = vld [vmem:[%s13412_s16 + $0x12c] sm:$0xff]  ;;  %v3579_v39 = vpack.c.bf16 %v3554_v46, %v3553_v5  ;;  %v3878_v5 = vld [vmem:[%s12767_s29 + $0x9a] sm:$0xff] }
 0x2c6   : > { %v3880_v46 = vld [vmem:[%s12767_s29 + $0xaa] sm:$0xff] }
 0x2c7   : > { %11452 = vmatmul.mubr.msk.bf16.gmra.mrb[32].mxu0 %vm455_vm1, %v7498_v58  ;;  %v3970_v58 = vsel %vm510_vm0, %v14066_v29, 0  ;;  %v3541_v29 = vld [vmem:[%s12767_s29 + $0x41] sm:$0xff] }
 0x2c8   : > { %11457 = vmatprep.mubr.msk.bf16.mxu0 %vm455_vm1, %v7807_v28  ;;  %v14213_v28 = vpack.c.bf16 %v7790_v34, %v7789_v22  ;;  %v3555_v22 = vld [vmem:[%s12767_s29 + $0xb1] sm:$0xff]  ;;  %v3556_v34 = vld [vmem:[%s12767_s29 + $0xb9] sm:$0xff] }
 0x2c9   : > { %v3580_v37 = vpack.c.bf16 %v3556_v34, %v3555_v22  ;;  %v8424_v22 = vld [vmem:[%s13412_s16 + $0x2d] sm:$0xff] }
 0x2cc   : > { %10946 = vmatmul.mubr.msk.bf16.gmra.mrb[20].mxu1 %vm455_vm1, %v3254_v62  ;;  %v3542_v62 = vld [vmem:[%s12767_s29 + $0x49] sm:$0xff] }
 0x2cd   : > { %10949 = vmatprep.mubr.msk.bf16.mxu1 %vm455_vm1, %v3255_v49  ;;  %v7794_v49 = vld [vmem:[%s13412_s16 + $0xcc] sm:$0xff]  ;;  %v3573_v31 = vpack.c.bf16 %v3542_v62, %v3541_v29  ;;  %v3560_v29 = vld [vmem:[%s12767_s29 + $0xd9] sm:$0xff]  ;;  %v3561_v62 = vld [vmem:[%s12767_s29 + $0xe1] sm:$0xff] }
 0x2ce   : > { %v14238_v43 = vpack.c.bf16 %v7794_v49, %v7793_v14  ;;  %v3582_v14 = vpack.c.bf16 %v3560_v29, %v3559_v48  ;;  %v3563_v49 = vld [vmem:[%s12767_s29 + $0xf1] sm:$0xff]  ;;  %v8426_v48 = vld [vmem:[%s13412_s16 + $0x3d] sm:$0xff] }
 0x2cf   : > { %11458 = vmatmul.mubr.msk.bf16.vlgmr.msra.gmra.mrb[0].mxu0 %vm455_vm1, %v14130_v4 }
 0x2d0   : > { %11494 = vmatpush3.bf16.msra.mxu0 %v8208_v55  ;;  %11461 = vmatprep.mubr.msk.bf16.mxu0 %vm455_vm1, %v14133_v54  ;;  %v7796_v55 = vld [vmem:[%s13412_s16 + $0xdc] sm:$0xff] }
 0x2d1   : > { %12571 = vmatprep.subr.msk.bf16.mxu0 %vm510_vm0, %v14145_v1  ;;  %v14241_v63 = vpack.c.bf16 %v7796_v55, %v7795_v53  ;;  %v3566_v53 = vld [vmem:[%s12767_s29 + $0x109] sm:$0xff] }
 0x2d4   : > { %10950 = vmatmul.mubr.msk.bf16.gmra.mrb[24].mxu1 %vm455_vm1, %v3256_v41  ;;  %v3545_v41 = vld [vmem:[%s12767_s29 + $0x61] sm:$0xff] }
 0x2d5   : > { %10953 = vmatprep.mubr.msk.bf16.mxu1 %vm455_vm1, %v3257_v7  ;;  %v7797_v7 = vld [vmem:[%s13412_s16 + $0xe4] sm:$0xff]  ;;  %v3575_v52 = vpack.c.bf16 %v3546_v6, %v3545_v41 }
 0x2d6   : > { %v14256_v8 = vpack.c.bf16 %v7798_v10, %v7797_v7  ;;  %v3859_v41 = vld [vmem:[%s12767_s29 + $0x2] sm:$0xff]  ;;  %v3860_v6 = vld [vmem:[%s12767_s29 + $0xa] sm:$0xff]  ;;  %v3862_v7 = vld [vmem:[%s12767_s29 + $0x1a] sm:$0xff] }
 0x2d7   : > { %11462 = vmatmul.mubr.msk.bf16.gmra.mrb[4].mxu0 %vm455_vm1, %v14157_v21  ;;  %v3863_v10 = vld [vmem:[%s12767_s29 + $0x22] sm:$0xff] }
 0x2d8   : > { %11465 = vmatprep.mubr.msk.bf16.mxu0 %vm455_vm1, %v14160_v57 }
 0x2dc   : > { %10954 = vmatmul.mubr.msk.bf16.gmra.mrb[28].mxu1 %vm455_vm1, %v3258_v9  ;;  %v3547_v9 = vld [vmem:[%s12767_s29 + $0x71] sm:$0xff] }
 0x2dd   : > { %10957 = vmatprep.mubr.msk.bf16.mxu1 %vm455_vm1, %v3259_v45  ;;  %v3550_v45 = vld [vmem:[%s12767_s29 + $0x89] sm:$0xff]  ;;  %v3576_v19 = vpack.c.bf16 %v3548_v36, %v3547_v9  ;;  %v12619_v36 = vld [vmem:[%s14821_s3 + $0x34] sm:$0xf] }
 0x2de   : > { %v3577_v20 = vpack.c.bf16 %v3550_v45, %v3549_v15  ;;  %v3867_v9 = vld [vmem:[%s12767_s29 + $0x42] sm:$0xff]  ;;  %v3869_v45 = vld [vmem:[%s12767_s29 + $0x52] sm:$0xff] }
 0x2df   : > { %11466 = vmatmul.mubr.msk.bf16.gmra.mrb[8].mxu0 %vm455_vm1, %v14175_v18 }
 0x2e0   : > { %11469 = vmatprep.mubr.msk.bf16.mxu0 %vm455_vm1, %v14178_v50 }
 0x2e4   : > { %10958 = vmatmul.mubr.msk.bf16.gmra.mrb[32].mxu1 %vm455_vm1, %v3260_v12  ;;  %v14274_v12 = vpack.c.bf16 %v7802_v24, %v7801_v42  ;;  %v3872_v42 = vld [vmem:[%s12767_s29 + $0x6a] sm:$0xff] }
 0x2e5   : > { %10963 = vmatprep.mubr.msk.bf16.mxu1 %vm455_vm1, %v3569_v25  ;;  %v3552_v25 = vld [vmem:[%s12767_s29 + $0x99] sm:$0xff] }
 0x2e6   : > { %v3578_v30 = vpack.c.bf16 %v3552_v25, %v3551_v44  ;;  %v3877_v25 = vld [vmem:[%s12767_s29 + $0x92] sm:$0xff] }
 0x2e7   : > { %11470 = vmatmul.mubr.msk.bf16.gmra.mrb[12].mxu0 %vm455_vm1, %v14193_v61 }
 0x2e8   : > { %11473 = vmatprep.mubr.msk.bf16.mxu0 %vm455_vm1, %v14196_v38 }
 0x2ec   : > { %10964 = vmatmul.mubr.msk.bf16.vlgmr.msra.gmra.mrb[0].mxu1 %vm455_vm1, %v3570_v0  ;;  %v14290_v0 = vpack.c.bf16 %v7806_v56, %v7805_v33  ;;  %v8132_v33 = vld [vmem:[%s13412_s16 + $0x13c] sm:$0xff] }
 0x2ed   : > { %10967 = vmatprep.mubr.msk.bf16.mxu1 %vm455_vm1, %v3571_v35  ;;  %11000 = vmatpush3.bf16.msra.mxu1 %v3970_v58  ;;  %v3557_v35 = vld [vmem:[%s12767_s29 + $0xc1] sm:$0xff] }
 0x2ee   : > { %12557 = vmatprep.subr.msk.bf16.mxu1 %vm510_vm0, %v14218_v2  ;;  %v3581_v58 = vpack.c.bf16 %v3558_v11, %v3557_v35  ;;  %v3881_v35 = vld [vmem:[%s12767_s29 + $0xb2] sm:$0xff]  ;;  %v3883_v11 = vld [vmem:[%s12767_s29 + $0xc2] sm:$0xff] }
 0x2ef   : > { %11474 = vmatmul.mubr.msk.bf16.gmra.mrb[16].mxu0 %vm455_vm1, %v14213_v28 }
 0x2f0   : > { %11477 = vmatprep.mubr.msk.bf16.mxu0 %vm455_vm1, %v14221_v26 }
 0x2f4   : > { %10968 = vmatmul.mubr.msk.bf16.gmra.mrb[4].mxu1 %vm455_vm1, %v3572_v16  ;;  %v3562_v16 = vld [vmem:[%s12767_s29 + $0xe9] sm:$0xff] }
 0x2f5   : > { %10971 = vmatprep.mubr.msk.bf16.mxu1 %vm455_vm1, %v3573_v31  ;;  %v3583_v1 = vpack.c.bf16 %v3562_v16, %v3561_v62  ;;  %v3564_v31 = vld [vmem:[%s12767_s29 + $0xf9] sm:$0xff]  ;;  %v8427_v62 = vld [vmem:[%s13412_s16 + $0x45] sm:$0xff]  ;;  %v8428_v16 = vld [vmem:[%s13412_s16 + $0x4d] sm:$0xff] }
 0x2f7   : > { %11478 = vmatmul.mubr.msk.bf16.gmra.mrb[20].mxu0 %vm455_vm1, %v14238_v43 }
 0x2f8   : > { %11481 = vmatprep.mubr.msk.bf16.mxu0 %vm455_vm1, %v14241_v63 }
 0x2fc   : > { %10972 = vmatmul.mubr.msk.bf16.gmra.mrb[8].mxu1 %vm455_vm1, %v3574_v59  ;;  %v3861_v59 = vld [vmem:[%s12767_s29 + $0x12] sm:$0xff] }
 0x2fd   : > { %10975 = vmatprep.mubr.msk.bf16.mxu1 %vm455_vm1, %v3575_v52  ;;  %v3864_v52 = vld [vmem:[%s12767_s29 + $0x2a] sm:$0xff] }
 0x2ff   : > { %11482 = vmatmul.mubr.msk.bf16.gmra.mrb[24].mxu0 %vm455_vm1, %v14256_v8 }
 0x300   : > { %11485 = vmatprep.mubr.msk.bf16.mxu0 %vm455_vm1, %v14259_v23 }
 0x304   : > { %10976 = vmatmul.mubr.msk.bf16.gmra.mrb[12].mxu1 %vm455_vm1, %v3576_v19  ;;  %v3870_v19 = vld [vmem:[%s12767_s29 + $0x5a] sm:$0xff] }
 0x305   : > { %10979 = vmatprep.mubr.msk.bf16.mxu1 %vm455_vm1, %v3577_v20  ;;  %v14387_v24 = vpack.c.bf16 %v3870_v19, %v3869_v45  ;;  %v3873_v20 = vld [vmem:[%s12767_s29 + $0x72] sm:$0xff] }
 0x307   : > { %11486 = vmatmul.mubr.msk.bf16.gmra.mrb[28].mxu0 %vm455_vm1, %v14274_v12 }
 0x308   : > { %11489 = vmatprep.mubr.msk.bf16.mxu0 %vm455_vm1, %v14277_v51 }
 0x30c   : > { %10980 = vmatmul.mubr.msk.bf16.gmra.mrb[16].mxu1 %vm455_vm1, %v3578_v30  ;;  %v8131_v30 = vld [vmem:[%s13412_s16 + $0x134] sm:$0xff] }
 0x30d   : > { %10983 = vmatprep.mubr.msk.bf16.mxu1 %vm455_vm1, %v3579_v39  ;;  %v8423_v39 = vld [vmem:[%s13412_s16 + $0x25] sm:$0xff]  ;;  %v8150_v34 = vpack.c.bf16 %v8132_v33, %v8131_v30  ;;  %v8442_v30 = vld [vmem:[%s13412_s16 + $0xbd] sm:$0xff] }
 0x30e   : > { %v8443_v33 = vld [vmem:[%s13412_s16 + $0xc5] sm:$0xff] }
 0x30f   : > { %11490 = vmatmul.mubr.msk.bf16.gmra.mrb[32].mxu0 %vm455_vm1, %v14290_v0 }
 0x310   : > { %11495 = vmatprep.mubr.msk.bf16.mxu0 %vm455_vm1, %v14130_v4  ;;  %v14313_v4 = vld [vmem:[%s14821_s3 + $0x68] sm:$0xf] }
 0x314   : > { %10984 = vmatmul.mubr.msk.bf16.gmra.mrb[20].mxu1 %vm455_vm1, %v3580_v37  ;;  %v3884_v37 = vld [vmem:[%s12767_s29 + $0xca] sm:$0xff] }
 0x315   : > { %10987 = vmatprep.mubr.msk.bf16.mxu1 %vm455_vm1, %v3581_v58  ;;  %v14443_v29 = vpack.c.bf16 %v3884_v37, %v3883_v11  ;;  %v8451_v37 = vld [vmem:[%s13412_s16 + $0x105] sm:$0xff] }
 0x317   : > { %11496 = vmatmul.mubr.msk.bf16.vlgmr.msra.gmra.mrb[0].mxu0 %vm455_vm1, %v14133_v54  ;;  %v3565_v54 = vld [vmem:[%s12767_s29 + $0x101] sm:$0xff] }
 0x318   : > { %11532 = vmatpush3.bf16.msra.mxu0 %v8534_v40  ;;  %11499 = vmatprep.mubr.msk.bf16.mxu0 %vm455_vm1, %v14157_v21  ;;  %v3584_v21 = vpack.c.bf16 %v3564_v31, %v3563_v49  ;;  %v3585_v55 = vpack.c.bf16 %v3566_v53, %v3565_v54  ;;  %v8425_v40 = vld [vmem:[%s13412_s16 + $0x35] sm:$0xff]  ;;  %v8860_v49 = vsel %vm510_vm0, %v14313_v4, 0  ;;  %v3887_v53 = vld [vmem:[%s12767_s29 + $0xe2] sm:$0xff] }
 0x319   : > { %12572 = vmatprep.subr.msk.bf16.mxu0 %vm510_vm0, %v14313_v4  ;;  %v3885_v31 = vld [vmem:[%s12767_s29 + $0xd2] sm:$0xff]  ;;  %v3886_v54 = vld [vmem:[%s12767_s29 + $0xda] sm:$0xff] }
 0x31a   : > { %v8430_v4 = vld [vmem:[%s13412_s16 + $0x5d] sm:$0xff] }
 0x31c   : > { %10988 = vmatmul.mubr.msk.bf16.gmra.mrb[24].mxu1 %vm455_vm1, %v3582_v14  ;;  %v8460_v14 = vpack.c.bf16 %v8426_v48, %v8425_v40  ;;  %v8452_v40 = vld [vmem:[%s13412_s16 + $0x10d] sm:$0xff] }
 0x31d   : > { %10991 = vmatprep.mubr.msk.bf16.mxu1 %vm455_vm1, %v3583_v1  ;;  %v8461_v1 = vpack.c.bf16 %v8428_v16, %v8427_v62  ;;  %v8454_v62 = vld [vmem:[%s13412_s16 + $0x11d] sm:$0xff]  ;;  %v8455_v16 = vld [vmem:[%s13412_s16 + $0x125] sm:$0xff] }
 0x31f   : > { %11500 = vmatmul.mubr.msk.bf16.gmra.mrb[4].mxu0 %vm455_vm1, %v14160_v57  ;;  %v3586_v57 = vpack.c.bf16 %v3568_v60, %v3567_v13  ;;  %v8429_v13 = vld [vmem:[%s13412_s16 + $0x55] sm:$0xff] }
 0x320   : > { %11503 = vmatprep.mubr.msk.bf16.mxu0 %vm455_vm1, %v14175_v18  ;;  %v3895_v18 = vpack.c.bf16 %v3860_v6, %v3859_v41  ;;  %v8431_v41 = vld [vmem:[%s13412_s16 + $0x65] sm:$0xff]  ;;  %v8432_v6 = vld [vmem:[%s13412_s16 + $0x6d] sm:$0xff] }
 0x324   : > { %10992 = vmatmul.mubr.msk.bf16.gmra.mrb[28].mxu1 %vm455_vm1, %v3584_v21  ;;  %v3888_v21 = vld [vmem:[%s12767_s29 + $0xea] sm:$0xff] }
 0x325   : > { %10995 = vmatprep.mubr.msk.bf16.mxu1 %vm455_vm1, %v3585_v55  ;;  %v14458_v55 = vpack.c.bf16 %v3886_v54, %v3885_v31  ;;  %v14463_v60 = vpack.c.bf16 %v3888_v21, %v3887_v53  ;;  %v8749_v31 = vld [vmem:[%s13412_s16 + $0x26] sm:$0xff]  ;;  %v8750_v54 = vld [vmem:[%s13412_s16 + $0x2e] sm:$0xff]  ;;  %v8752_v21 = vld [vmem:[%s13412_s16 + $0x3e] sm:$0xff] }
 0x327   : > { %11504 = vmatmul.mubr.msk.bf16.gmra.mrb[8].mxu0 %vm455_vm1, %v14178_v50  ;;  %v14349_v50 = vpack.c.bf16 %v3862_v7, %v3861_v59  ;;  %v3889_v59 = vld [vmem:[%s12767_s29 + $0xf2] sm:$0xff]  ;;  %v3890_v7 = vld [vmem:[%s12767_s29 + $0xfa] sm:$0xff] }
 0x328   : > { %11507 = vmatprep.mubr.msk.bf16.mxu0 %vm455_vm1, %v14193_v61  ;;  %v14353_v61 = vpack.c.bf16 %v3864_v52, %v3863_v10  ;;  %v3891_v10 = vld [vmem:[%s12767_s29 + $0x102] sm:$0xff]  ;;  %v3892_v52 = vld [vmem:[%s12767_s29 + $0x10a] sm:$0xff] }
 0x32c   : > { %10996 = vmatmul.mubr.msk.bf16.gmra.mrb[32].mxu1 %vm455_vm1, %v3586_v57  ;;  %v8462_v57 = vpack.c.bf16 %v8430_v4, %v8429_v13  ;;  %v8753_v13 = vld [vmem:[%s13412_s16 + $0x46] sm:$0xff]  ;;  %v8754_v4 = vld [vmem:[%s13412_s16 + $0x4e] sm:$0xff] }
 0x32d   : > { %11001 = vmatprep.mubr.msk.bf16.mxu1 %vm455_vm1, %v3895_v18  ;;  %v8463_v18 = vpack.c.bf16 %v8432_v6, %v8431_v41  ;;  %v8756_v6 = vld [vmem:[%s13412_s16 + $0x5e] sm:$0xff] }
 0x32f   : > { %11508 = vmatmul.mubr.msk.bf16.gmra.mrb[12].mxu0 %vm455_vm1, %v14196_v38  ;;  %v3865_v38 = vld [vmem:[%s12767_s29 + $0x32] sm:$0xff] }
 0x330   : > { %11511 = vmatprep.mubr.msk.bf16.mxu0 %vm455_vm1, %v14213_v28  ;;  %v3868_v28 = vld [vmem:[%s12767_s29 + $0x4a] sm:$0xff]  ;;  %v14371_v2 = vpack.c.bf16 %v3866_v47, %v3865_v38  ;;  %v8433_v38 = vld [vmem:[%s13412_s16 + $0x75] sm:$0xff]  ;;  %v8434_v47 = vld [vmem:[%s13412_s16 + $0x7d] sm:$0xff] }
 0x331   : > { %v14375_v15 = vpack.c.bf16 %v3868_v28, %v3867_v9  ;;  %v14481_v9 = vpack.c.bf16 %v3892_v52, %v3891_v10  ;;  %v8435_v28 = vld [vmem:[%s13412_s16 + $0x85] sm:$0xff]  ;;  %v8464_v45 = vpack.c.bf16 %v8434_v47, %v8433_v38  ;;  %v8762_v52 = vld [vmem:[%s13412_s16 + $0x8e] sm:$0xff] }
 0x332   : > { %v8761_v10 = vld [vmem:[%s13412_s16 + $0x86] sm:$0xff] }
 0x333   : > { %v4220_v47 = vld [vmem:[%s12767_s29 + $0x12a] sm:$0xff] }
 0x334   : > { %11002 = vmatmul.mubr.msk.bf16.vlgmr.msra.gmra.mrb[0].mxu1 %vm455_vm1, %v14349_v50 }
 0x335   : > { %11005 = vmatprep.mubr.msk.bf16.mxu1 %vm455_vm1, %v14353_v61  ;;  %11038 = vmatpush3.bf16.msra.mxu1 %v4296_v17  ;;  %v14476_v17 = vpack.c.bf16 %v3890_v7, %v3889_v59  ;;  %v8760_v7 = vld [vmem:[%s13412_s16 + $0x7e] sm:$0xff] }
 0x336   : > { %12559 = vmatprep.subr.msk.bf16.mxu1 %vm510_vm0, %v12619_v36  ;;  %v8436_v36 = vld [vmem:[%s13412_s16 + $0x8d] sm:$0xff] }
 0x337   : > { %11512 = vmatmul.mubr.msk.bf16.gmra.mrb[16].mxu0 %vm455_vm1, %v14221_v26  ;;  %v3871_v26 = vld [vmem:[%s12767_s29 + $0x62] sm:$0xff]  ;;  %v8465_v19 = vpack.c.bf16 %v8436_v36, %v8435_v28  ;;  %v4531_v28 = vld [vmem:[%s12767_s29 + $0xb3] sm:$0xff] }
 0x338   : > { %11515 = vmatprep.mubr.msk.bf16.mxu0 %vm455_vm1, %v14238_v43  ;;  %v14391_v43 = vpack.c.bf16 %v3872_v42, %v3871_v26  ;;  %v3893_v26 = vld [vmem:[%s12767_s29 + $0x112] sm:$0xff]  ;;  %v3894_v42 = vld [vmem:[%s12767_s29 + $0x11a] sm:$0xff] }
 0x339   : > { %v4532_v36 = vld [vmem:[%s12767_s29 + $0xbb] sm:$0xff] }
 0x33c   : > { %11006 = vmatmul.mubr.msk.bf16.gmra.mrb[4].mxu1 %vm455_vm1, %v14371_v2 }
 0x33d   : > { %11009 = vmatprep.mubr.msk.bf16.mxu1 %vm455_vm1, %v14375_v15 }
 0x33f   : > { %11516 = vmatmul.mubr.msk.bf16.gmra.mrb[20].mxu0 %vm455_vm1, %v14241_v63  ;;  %v3875_v63 = vld [vmem:[%s12767_s29 + $0x82] sm:$0xff] }
 0x340   : > { %11519 = vmatprep.mubr.msk.bf16.mxu0 %vm455_vm1, %v14256_v8  ;;  %v14403_v8 = vpack.c.bf16 %v3874_v32, %v3873_v20  ;;  %v14407_v44 = vpack.c.bf16 %v3876_v27, %v3875_v63  ;;  %v14492_v20 = vpack.c.bf16 %v3894_v42, %v3893_v26  ;;  %v8437_v32 = vld [vmem:[%s13412_s16 + $0x95] sm:$0xff]  ;;  %v8438_v63 = vld [vmem:[%s13412_s16 + $0x9d] sm:$0xff]  ;;  %v8439_v27 = vld [vmem:[%s13412_s16 + $0xa5] sm:$0xff]  ;;  %v4557_v26 = vpack.c.bf16 %v4532_v36, %v4531_v28 }
 0x341   : > { %v8765_v42 = vld [vmem:[%s13412_s16 + $0xa6] sm:$0xff] }
 0x344   : > { %11010 = vmatmul.mubr.msk.bf16.gmra.mrb[8].mxu1 %vm455_vm1, %v14387_v24 }
 0x345   : > { %11013 = vmatprep.mubr.msk.bf16.mxu1 %vm455_vm1, %v14391_v43 }
 0x347   : > { %11520 = vmatmul.mubr.msk.bf16.gmra.mrb[24].mxu0 %vm455_vm1, %v14259_v23  ;;  %v3879_v23 = vld [vmem:[%s12767_s29 + $0xa2] sm:$0xff] }
 0x348   : > { %11523 = vmatprep.mubr.msk.bf16.mxu0 %vm455_vm1, %v14274_v12  ;;  %v14419_v12 = vpack.c.bf16 %v3878_v5, %v3877_v25  ;;  %v14425_v56 = vpack.c.bf16 %v3880_v46, %v3879_v23  ;;  %v8440_v25 = vld [vmem:[%s13412_s16 + $0xad] sm:$0xff]  ;;  %v8466_v5 = vpack.c.bf16 %v8438_v63, %v8437_v32  ;;  %v8441_v46 = vld [vmem:[%s13412_s16 + $0xb5] sm:$0xff] }
 0x349   : > { %v8467_v23 = vpack.c.bf16 %v8440_v25, %v8439_v27  ;;  %v4533_v27 = vld [vmem:[%s12767_s29 + $0xc3] sm:$0xff]  ;;  %v4534_v25 = vld [vmem:[%s12767_s29 + $0xcb] sm:$0xff] }
 0x34c   : > { %11014 = vmatmul.mubr.msk.bf16.gmra.mrb[12].mxu1 %vm455_vm1, %v14403_v8 }
 0x34d   : > { %11017 = vmatprep.mubr.msk.bf16.mxu1 %vm455_vm1, %v14407_v44 }
 0x34f   : > { %11524 = vmatmul.mubr.msk.bf16.gmra.mrb[28].mxu0 %vm455_vm1, %v14277_v51  ;;  %v8459_v51 = vpack.c.bf16 %v8424_v22, %v8423_v39  ;;  %v8444_v39 = vld [vmem:[%s13412_s16 + $0xcd] sm:$0xff]  ;;  %v8468_v22 = vpack.c.bf16 %v8442_v30, %v8441_v46  ;;  %v4558_v46 = vpack.c.bf16 %v4534_v25, %v4533_v27  ;;  %v8767_v30 = vld [vmem:[%s13412_s16 + $0xb6] sm:$0xff] }
 0x350   : > { %11527 = vmatprep.mubr.msk.bf16.mxu0 %vm455_vm1, %v14290_v0  ;;  %v3882_v0 = vld [vmem:[%s12767_s29 + $0xba] sm:$0xff] }
 0x351   : > { %v14438_v58 = vpack.c.bf16 %v3882_v0, %v3881_v35  ;;  %v8447_v35 = vld [vmem:[%s13412_s16 + $0xe5] sm:$0xff]  ;;  %v8448_v0 = vld [vmem:[%s13412_s16 + $0xed] sm:$0xff] }
 0x354   : > { %11018 = vmatmul.mubr.msk.bf16.gmra.mrb[16].mxu1 %vm455_vm1, %v14419_v12 }
 0x355   : > { %11021 = vmatprep.mubr.msk.bf16.mxu1 %vm455_vm1, %v14425_v56 }
 0x357   : > { %11528 = vmatmul.mubr.msk.bf16.gmra.mrb[32].mxu0 %vm455_vm1, %v8150_v34  ;;  %v8469_v34 = vpack.c.bf16 %v8444_v39, %v8443_v33  ;;  %v8768_v33 = vld [vmem:[%s13412_s16 + $0xbe] sm:$0xff] }
 0x358   : > { %11533 = vmatprep.mubr.msk.bf16.mxu0 %vm455_vm1, %v8459_v51  ;;  %v8446_v51 = vld [vmem:[%s13412_s16 + $0xdd] sm:$0xff] }
 0x35c   : > { %11022 = vmatmul.mubr.msk.bf16.gmra.mrb[20].mxu1 %vm455_vm1, %v14438_v58 }
 0x35d   : > { %11025 = vmatprep.mubr.msk.bf16.mxu1 %vm455_vm1, %v14443_v29 }
 0x35f   : > { %11534 = vmatmul.mubr.msk.bf16.vlgmr.msra.gmra.mrb[0].mxu0 %vm455_vm1, %v8460_v14  ;;  %v8456_v14 = vld [vmem:[%s13412_s16 + $0x12d] sm:$0xff] }
 0x360   : > { %11570 = vmatpush3.bf16.msra.mxu0 %v8860_v49  ;;  %11537 = vmatprep.mubr.msk.bf16.mxu0 %vm455_vm1, %v8461_v1  ;;  %v8458_v49 = vld [vmem:[%s13412_s16 + $0x13d] sm:$0xff] }
 0x364   : > { %11026 = vmatmul.mubr.msk.bf16.gmra.mrb[24].mxu1 %vm455_vm1, %v14458_v55 }
 0x365   : > { %11029 = vmatprep.mubr.msk.bf16.mxu1 %vm455_vm1, %v14463_v60 }
 0x367   : > { %11538 = vmatmul.mubr.msk.bf16.gmra.mrb[4].mxu0 %vm455_vm1, %v8462_v57  ;;  %v8757_v57 = vld [vmem:[%s13412_s16 + $0x66] sm:$0xff] }
 0x368   : > { %11541 = vmatprep.mubr.msk.bf16.mxu0 %vm455_vm1, %v8463_v18  ;;  %v8758_v18 = vld [vmem:[%s13412_s16 + $0x6e] sm:$0xff] }
 0x36c   : > { %11030 = vmatmul.mubr.msk.bf16.gmra.mrb[28].mxu1 %vm455_vm1, %v14476_v17 }
 0x36d   : > { %11033 = vmatprep.mubr.msk.bf16.mxu1 %vm455_vm1, %v14481_v9 }
 0x36f   : > { %11542 = vmatmul.mubr.msk.bf16.gmra.mrb[8].mxu0 %vm455_vm1, %v8464_v45 }
 0x370   : > { %11545 = vmatprep.mubr.msk.bf16.mxu0 %vm455_vm1, %v8465_v19  ;;  %v8763_v19 = vld [vmem:[%s13412_s16 + $0x96] sm:$0xff] }
 0x374   : > { %11034 = vmatmul.mubr.msk.bf16.gmra.mrb[32].mxu1 %vm455_vm1, %v14492_v20 }
 0x375   : > { %11039 = vmatprep.mubr.msk.bf16.mxu1 %vm455_vm1, %v14349_v50  ;;  %v8445_v50 = vld [vmem:[%s13412_s16 + $0xd5] sm:$0xff] }
 0x376   : > { %v8470_v11 = vpack.c.bf16 %v8446_v51, %v8445_v50  ;;  %v8794_v50 = vpack.c.bf16 %v8768_v33, %v8767_v30  ;;  %v14676_v30 = vld [vmem:[%s14822_s4] ss:$0 sm:$0xff] }
 0x377   : > { %11546 = vmatmul.mubr.msk.bf16.gmra.mrb[12].mxu0 %vm455_vm1, %v8466_v5  ;;  %v4535_v5 = vld [vmem:[%s12767_s29 + $0xd3] sm:$0xff] }
 0x378   : > { %11549 = vmatprep.mubr.msk.bf16.mxu0 %vm455_vm1, %v8467_v23  ;;  %v4536_v23 = vld [vmem:[%s12767_s29 + $0xdb] sm:$0xff] }
 0x379   : > { %v4559_v39 = vpack.c.bf16 %v4536_v23, %v4535_v5 }
 0x37c   : > { %11040 = vmatmul.mubr.msk.bf16.vlgmr.msra.gmra.mrb[0].mxu1 %vm455_vm1, %v14353_v61  ;;  %v8471_v61 = vpack.c.bf16 %v8448_v0, %v8447_v35  ;;  %v4537_v35 = vld [vmem:[%s12767_s29 + $0xe3] sm:$0xff]  ;;  %v4538_v0 = vld [vmem:[%s12767_s29 + $0xeb] sm:$0xff] }
 0x37d   : > { %11043 = vmatprep.mubr.msk.bf16.mxu1 %vm455_vm1, %v14371_v2  ;;  %11608 = vmatpush3.bf16.msra.mxu1 %v12732_v3  ;;  %v8449_v3 = vld [vmem:[%s13412_s16 + $0xf5] sm:$0xff]  ;;  %v8450_v2 = vld [vmem:[%s13412_s16 + $0xfd] sm:$0xff] }
 0x37e   : > { %v8472_v48 = vpack.c.bf16 %v8450_v2, %v8449_v3  ;;  %v4560_v3 = vpack.c.bf16 %v4538_v0, %v4537_v35  ;;  %v8771_v2 = vld [vmem:[%s13412_s16 + $0xd6] sm:$0xff] }
 0x37f   : > { %11550 = vmatmul.mubr.msk.bf16.gmra.mrb[16].mxu0 %vm455_vm1, %v8468_v22  ;;  %v8769_v22 = vld [vmem:[%s13412_s16 + $0xc6] sm:$0xff] }
 0x380   : > { %11553 = vmatprep.mubr.msk.bf16.mxu0 %vm455_vm1, %v8469_v34  ;;  %v8770_v34 = vld [vmem:[%s13412_s16 + $0xce] sm:$0xff] }
 0x381   : > { %v8795_v51 = vpack.c.bf16 %v8770_v34, %v8769_v22 }
 0x384   : > { %11044 = vmatmul.mubr.msk.bf16.gmra.mrb[4].mxu1 %vm455_vm1, %v14375_v15  ;;  %v8473_v15 = vpack.c.bf16 %v8452_v40, %v8451_v37  ;;  %v8772_v37 = vld [vmem:[%s13412_s16 + $0xde] sm:$0xff] }
 0x385   : > { %11047 = vmatprep.mubr.msk.bf16.mxu1 %vm455_vm1, %v14387_v24  ;;  %v8453_v24 = vld [vmem:[%s13412_s16 + $0x115] sm:$0xff] }
 0x386   : > { %v8474_v1 = vpack.c.bf16 %v8454_v62, %v8453_v24  ;;  %v8796_v24 = vpack.c.bf16 %v8772_v37, %v8771_v2 }
 0x387   : > { %11554 = vmatmul.mubr.msk.bf16.gmra.mrb[20].mxu0 %vm455_vm1, %v8470_v11  ;;  %v4539_v11 = vld [vmem:[%s12767_s29 + $0xf3] sm:$0xff] }
 0x388   : > { %11557 = vmatprep.mubr.msk.bf16.mxu0 %vm455_vm1, %v8471_v61  ;;  %v4540_v61 = vld [vmem:[%s12767_s29 + $0xfb] sm:$0xff] }
 0x389   : > { %v4561_v40 = vpack.c.bf16 %v4540_v61, %v4539_v11 }
 0x38c   : > { %11048 = vmatmul.mubr.msk.bf16.gmra.mrb[8].mxu1 %vm455_vm1, %v14391_v43  ;;  %v8475_v43 = vpack.c.bf16 %v8456_v14, %v8455_v16  ;;  %v4541_v16 = vld [vmem:[%s12767_s29 + $0x103] sm:$0xff]  ;;  %v4542_v14 = vld [vmem:[%s12767_s29 + $0x10b] sm:$0xff] }
 0x38d   : > { %11051 = vmatprep.mubr.msk.bf16.mxu1 %vm455_vm1, %v14403_v8  ;;  %v8457_v8 = vld [vmem:[%s13412_s16 + $0x135] sm:$0xff] }
 0x38e   : > { %v8476_v53 = vpack.c.bf16 %v8458_v49, %v8457_v8  ;;  %v4562_v8 = vpack.c.bf16 %v4542_v14, %v4541_v16  ;;  %v8775_v49 = vld [vmem:[%s13412_s16 + $0xf6] sm:$0xff] }
 0x38f   : > { %11558 = vmatmul.mubr.msk.bf16.gmra.mrb[24].mxu0 %vm455_vm1, %v8472_v48  ;;  %v8773_v48 = vld [vmem:[%s13412_s16 + $0xe6] sm:$0xff] }
 0x390   : > { %11561 = vmatprep.mubr.msk.bf16.mxu0 %vm455_vm1, %v8473_v15  ;;  %v8774_v15 = vld [vmem:[%s13412_s16 + $0xee] sm:$0xff] }
 0x391   : > { %v8797_v62 = vpack.c.bf16 %v8774_v15, %v8773_v48 }
 0x394   : > { %11052 = vmatmul.mubr.msk.bf16.gmra.mrb[12].mxu1 %vm455_vm1, %v14407_v44  ;;  %v8785_v44 = vpack.c.bf16 %v8750_v54, %v8749_v31  ;;  %v8776_v31 = vld [vmem:[%s13412_s16 + $0xfe] sm:$0xff] }
 0x395   : > { %11055 = vmatprep.mubr.msk.bf16.mxu1 %vm455_vm1, %v14419_v12  ;;  %v8751_v12 = vld [vmem:[%s13412_s16 + $0x36] sm:$0xff] }
 0x396   : > { %v8786_v41 = vpack.c.bf16 %v8752_v21, %v8751_v12  ;;  %v8798_v12 = vpack.c.bf16 %v8776_v31, %v8775_v49 }
 0x397   : > { %11562 = vmatmul.mubr.msk.bf16.gmra.mrb[28].mxu0 %vm455_vm1, %v8474_v1  ;;  %v4543_v1 = vld [vmem:[%s12767_s29 + $0x113] sm:$0xff] }
 0x398   : > { %11565 = vmatprep.mubr.msk.bf16.mxu0 %vm455_vm1, %v8475_v43  ;;  %v4544_v43 = vld [vmem:[%s12767_s29 + $0x11b] sm:$0xff] }
 0x399   : > { %v4563_v54 = vpack.c.bf16 %v4544_v43, %v4543_v1 }
 0x39c   : > { %11056 = vmatmul.mubr.msk.bf16.gmra.mrb[16].mxu1 %vm455_vm1, %v14425_v56  ;;  %v8787_v56 = vpack.c.bf16 %v8754_v4, %v8753_v13  ;;  %v4545_v13 = vld [vmem:[%s12767_s29 + $0x123] sm:$0xff]  ;;  %v4546_v4 = vld [vmem:[%s12767_s29 + $0x12b] sm:$0xff] }
 0x39d   : > { %11059 = vmatprep.mubr.msk.bf16.mxu1 %vm455_vm1, %v14438_v58  ;;  %v8755_v58 = vld [vmem:[%s13412_s16 + $0x56] sm:$0xff] }
 0x39e   : > { %v8788_v59 = vpack.c.bf16 %v8756_v6, %v8755_v58  ;;  %v8780_v58 = vld [vmem:[%s13412_s16 + $0x11e] sm:$0xff]  ;;  %v8781_v6 = vld [vmem:[%s13412_s16 + $0x126] sm:$0xff] }
 0x39f   : > { %11566 = vmatmul.mubr.msk.bf16.gmra.mrb[32].mxu0 %vm455_vm1, %v8476_v53  ;;  %v8777_v53 = vld [vmem:[%s13412_s16 + $0x106] sm:$0xff] }
 0x3a0   : > { %11571 = vmatprep.mubr.msk.bf16.mxu0 %vm455_vm1, %v8785_v44  ;;  %v8778_v44 = vld [vmem:[%s13412_s16 + $0x10e] sm:$0xff] }
 0x3a1   : > { %v8799_v21 = vpack.c.bf16 %v8778_v44, %v8777_v53 }
 0x3a4   : > { %11060 = vmatmul.mubr.msk.bf16.gmra.mrb[20].mxu1 %vm455_vm1, %v14443_v29  ;;  %v8789_v29 = vpack.c.bf16 %v8758_v18, %v8757_v57  ;;  %v8782_v57 = vld [vmem:[%s13412_s16 + $0x12e] sm:$0xff] }
 0x3a5   : > { %11063 = vmatprep.mubr.msk.bf16.mxu1 %vm455_vm1, %v14458_v55  ;;  %v8759_v55 = vld [vmem:[%s13412_s16 + $0x76] sm:$0xff] }
 0x3a6   : > { %v8790_v38 = vpack.c.bf16 %v8760_v7, %v8759_v55  ;;  %v8784_v55 = vld [vmem:[%s13412_s16 + $0x13e] sm:$0xff] }
 0x3a7   : > { %11572 = vmatmul.mubr.msk.bf16.vlgmr.msra.gmra.mrb[0].mxu0 %vm455_vm1, %v8786_v41  ;;  %v4564_v41 = vpack.c.bf16 %v4546_v4, %v4545_v13 }
 0x3a8   : > { %11575 = vmatprep.mubr.msk.bf16.mxu0 %vm455_vm1, %v8787_v56  ;;  %v8779_v56 = vld [vmem:[%s13412_s16 + $0x116] sm:$0xff] }
 0x3a9   : > { %v8800_v18 = vpack.c.bf16 %v8780_v58, %v8779_v56 }
 0x3ac   : > { %11064 = vmatmul.mubr.msk.bf16.gmra.mrb[24].mxu1 %vm455_vm1, %v14463_v60  ;;  %v8791_v60 = vpack.c.bf16 %v8762_v52, %v8761_v10 }
 0x3ad   : > { %11067 = vmatprep.mubr.msk.bf16.mxu1 %vm455_vm1, %v14476_v17  ;;  %v4219_v17 = vld [vmem:[%s12767_s29 + $0x122] sm:$0xff]  ;;  %s12578_s29 = smul.u32 576, %s14835_s19 }
 0x3ae   : > { %v4238_v45 = vpack.c.bf16 %v4220_v47, %v4219_v17 }
 0x3af   : > { %11576 = vmatmul.mubr.msk.bf16.gmra.mrb[4].mxu0 %vm455_vm1, %v8788_v59  ;;  %v8801_v59 = vpack.c.bf16 %v8782_v57, %v8781_v6 }
 0x3b0   : > { %11579 = vmatprep.mubr.msk.bf16.mxu0 %vm455_vm1, %v8789_v29  ;;  %v8783_v29 = vld [vmem:[%s13412_s16 + $0x136] sm:$0xff] }
 0x3b1   : > { %v8802_v7 = vpack.c.bf16 %v8784_v55, %v8783_v29 }
 0x3b4   : > { %11068 = vmatmul.mubr.msk.bf16.gmra.mrb[28].mxu1 %vm455_vm1, %v14481_v9  ;;  %v8764_v9 = vld [vmem:[%s13412_s16 + $0x9e] sm:$0xff] }
 0x3b5   : > { %11071 = vmatprep.mubr.msk.bf16.mxu1 %vm455_vm1, %v14492_v20  ;;  %v8766_v20 = vld [vmem:[%s13412_s16 + $0xae] sm:$0xff]  ;;  %v8792_v32 = vpack.c.bf16 %v8764_v9, %v8763_v19  ;;  %s12577_s16 = smul.u32 36, %s14841_s18 }
 0x3b6   : > { %v8793_v63 = vpack.c.bf16 %v8766_v20, %v8765_v42 }
 0x3b7   : > { %11580 = vmatmul.mubr.msk.bf16.gmra.mrb[8].mxu0 %vm455_vm1, %v8790_v38  ;;  %s340_s14 = sadd.s32 %s12578_s29, %s12577_s16 }
 0x3b8   : > { %11583 = vmatprep.mubr.msk.bf16.mxu0 %vm455_vm1, %v8791_v60  ;;  %s9480_s25 = sshll.u32 %s340_s14, 2 }
 0x3b9   : > { %s14684_s26 = scalar_lea.vmem %s14823_s5, %s9480_s25 }
 0x3bc   : > { %11072 = vmatmul.mubr.msk.bf16.gmra.mrb[32].mxu1 %vm455_vm1, %v4238_v45 }
 0x3bd   : > { %11097 = vmatprep.mubr.msk.bf16.mxu1 %vm455_vm1, %v4557_v26 }
 0x3bf   : > { %11584 = vmatmul.mubr.msk.bf16.gmra.mrb[12].mxu0 %vm455_vm1, %v8792_v32 }
 0x3c0   : > { %11587 = vmatprep.mubr.msk.bf16.mxu0 %vm455_vm1, %v8793_v63 }
 0x3c4   : > { %11098 = vmatmul.mubr.msk.bf16.vlgmr.msra.gmra.mrb[20].mxu1 %vm455_vm1, %v4558_v46 }
 0x3c5   : > { %11101 = vmatprep.mubr.msk.bf16.mxu1 %vm455_vm1, %v4559_v39 }
 0x3c7   : > { %11588 = vmatmul.mubr.msk.bf16.gmra.mrb[16].mxu0 %vm455_vm1, %v8794_v50 }
 0x3c8   : > { %11591 = vmatprep.mubr.msk.bf16.mxu0 %vm455_vm1, %v8795_v51 }
 0x3cc   : > { %11102 = vmatmul.mubr.msk.bf16.gmra.mrb[24].mxu1 %vm455_vm1, %v4560_v3 }
 0x3cd   : > { %11105 = vmatprep.mubr.msk.bf16.mxu1 %vm455_vm1, %v4561_v40 }
 0x3cf   : > { %11592 = vmatmul.mubr.msk.bf16.gmra.mrb[20].mxu0 %vm455_vm1, %v8796_v24 }
 0x3d0   : > { %11595 = vmatprep.mubr.msk.bf16.mxu0 %vm455_vm1, %v8797_v62 }
 0x3d4   : > { %11106 = vmatmul.mubr.msk.bf16.gmra.mrb[28].mxu1 %vm455_vm1, %v4562_v8 }
 0x3d5   : > { %11109 = vmatprep.mubr.msk.bf16.mxu1 %vm455_vm1, %v4563_v54 }
 0x3d7   : > { %11596 = vmatmul.mubr.msk.bf16.gmra.mrb[24].mxu0 %vm455_vm1, %v8798_v12 }
 0x3d8   : > { %11599 = vmatprep.mubr.msk.bf16.mxu0 %vm455_vm1, %v8799_v21 }
 0x3dc   : > { %11110 = vmatmul.mubr.msk.bf16.gmra.mrb[32].mxu1 %vm455_vm1, %v4564_v41 }
 0x3df   : > { %11600 = vmatmul.mubr.msk.bf16.gmra.mrb[28].mxu0 %vm455_vm1, %v8800_v18 }
 0x3e0   : > { %11603 = vmatprep.mubr.msk.bf16.mxu0 %vm455_vm1, %v8801_v59 }
 0x3e7   : > { %11604 = vmatmul.mubr.msk.bf16.gmra.mrb[32].mxu0 %vm455_vm1, %v8802_v7 }
 0x44f   : > { %v11041_v10 = vpop.f32.mrb[0].mxu1 }
 0x450   : > { %v4332_v52 = vpop.f32.mrb[1].mxu1 }
 0x451   : > { %v11042_v38 = vpop.f32.mrb[2].mxu1 }
 0x452   : > { %v4335_v60 = vpop.f32.mrb[3].mxu1 }
 0x457   : > { %v11045_v17 = vpop.f32.mrb[4].mxu1 }
 0x458   : > { %v4348_v47 = vpop.f32.mrb[5].mxu1 }
 0x459   : > { %v11046_v28 = vpop.f32.mrb[6].mxu1 }
 0x45a   : > { %v4351_v36 = vpop.f32.mrb[7].mxu1 }
 0x45f   : > { %v14646_v45 = vpop.f32.mrb[8].mxu1 }
 0x460   : > { %v14648_v19 = vpop.f32.mrb[9].mxu1 }
 0x461   : > { %v14650_v9 = vpop.f32.mrb[10].mxu1 }
 0x462   : > { %v14652_v26 = vpop.f32.mrb[11].mxu1 }
 0x467   : > { %v14654_v42 = vpop.f32.mrb[12].mxu1 }
 0x468   : > { %v14656_v20 = vpop.f32.mrb[13].mxu1 }
 0x469   : > { %v14658_v32 = vpop.f32.mrb[14].mxu1 }
 0x46a   : > { %v14660_v63 = vpop.f32.mrb[15].mxu1 }
 0x46f   : > { %v14663_v27 = vpop.f32.mrb[16].mxu1 }
 0x470   : > { %v14665_v25 = vpop.f32.mrb[17].mxu1 }
 0x471   : > { %v14667_v5 = vpop.f32.mrb[18].mxu1 }
 0x472   : > { %v14669_v23 = vpop.f32.mrb[19].mxu1 }
 0x47a   : > { %v11573_v46 = vpop.f32.mrb[0].mxu0 }
 0x47b   : > { %v11609_v33 = vadd.f32 %v11573_v46, %v11041_v10  ;;  %v8896_v39 = vpop.f32.mrb[1].mxu0 }
 0x47c   : > { %v11610_v22 = vadd.f32 %v8896_v39, %v4332_v52  ;;  %v11574_v34 = vpop.f32.mrb[2].mxu0 }
 0x47d   : > { %v9084_v50 = vadd.f32 %v11609_v33, %v14676_v30  ;;  %v11611_v51 = vadd.f32 %v11574_v34, %v11042_v38  ;;  %v8899_v35 = vpop.f32.mrb[3].mxu0 }
 0x47e   : > { %v9082_v0 = vadd.f32 %v11610_v22, %v14676_v30  ;;  %v11612_v11 = vadd.f32 %v8899_v35, %v4335_v60 }
 0x47f   : > { %v9120_v61 = vmax.f32 %v9084_v50, 0.0  ;;  %v9085_v3 = vadd.f32 %v11611_v51, %v14676_v30 }
 0x480   : > { %v9118_v2 = vmax.f32 %v9082_v0, 0.0  ;;  %v9083_v37 = vadd.f32 %v11612_v11, %v14676_v30 }
 0x481   : > { %v10034_v40 = vpack.c.bf16 %v9120_v61, %v9120_v61  ;;  %v9121_v48 = vmax.f32 %v9085_v3, 0.0 }
 0x482   : > { %v10032_v15 = vpack.c.bf16 %v9118_v2, %v9118_v2  ;;  %v9119_v24 = vmax.f32 %v9083_v37, 0.0  ;;  %v11577_v62 = vpop.f32.mrb[4].mxu0 }
 0x483   : > { %9301 = vst.msk [vmem:[%s14684_s26 + $0x8] sm:$0xf] %vm9298_vm2, %v10034_v40  ;;  %v10035_v16 = vpack.c.bf16 %v9121_v48, %v9121_v48  ;;  %v11613_v14 = vadd.f32 %v11577_v62, %v11045_v17  ;;  %v8912_v1 = vpop.f32.mrb[5].mxu0 }
 0x484   : > { %9299 = vst.msk [vmem:[%s14684_s26] sm:$0xf] %vm9298_vm2, %v10032_v15  ;;  %v10033_v43 = vpack.c.bf16 %v9119_v24, %v9119_v24  ;;  %v11614_v8 = vadd.f32 %v8912_v1, %v4348_v47  ;;  %v11578_v49 = vpop.f32.mrb[6].mxu0 }
 0x485   : > { %9302 = vst.msk [vmem:[%s14684_s26 + $0xc] sm:$0xf] %vm9298_vm2, %v10035_v16  ;;  %v9088_v31 = vadd.f32 %v11613_v14, %v14676_v30  ;;  %v11615_v54 = vadd.f32 %v11578_v49, %v11046_v28  ;;  %v8915_v53 = vpop.f32.mrb[7].mxu0 }
 0x486   : > { %9300 = vst.msk [vmem:[%s14684_s26 + $0x4] sm:$0xf] %vm9298_vm2, %v10033_v43  ;;  %v9086_v44 = vadd.f32 %v11614_v8, %v14676_v30  ;;  %v11616_v12 = vadd.f32 %v8915_v53, %v4351_v36 }
 0x487   : > { %v9124_v21 = vmax.f32 %v9088_v31, 0.0  ;;  %v9089_v13 = vadd.f32 %v11615_v54, %v14676_v30 }
 0x488   : > { %v9122_v4 = vmax.f32 %v9086_v44, 0.0  ;;  %v9087_v41 = vadd.f32 %v11616_v12, %v14676_v30 }
 0x489   : > { %v10038_v56 = vpack.c.bf16 %v9124_v21, %v9124_v21  ;;  %v9125_v58 = vmax.f32 %v9089_v13, 0.0 }
 0x48a   : > { %v10036_v6 = vpack.c.bf16 %v9122_v4, %v9122_v4  ;;  %v9123_v57 = vmax.f32 %v9087_v41, 0.0  ;;  %v11581_v18 = vpop.f32.mrb[8].mxu0 }
 0x48b   : > { %9305 = vst.msk [vmem:[%s14684_s26 + $0x18] sm:$0xf] %vm9298_vm2, %v10038_v56  ;;  %v10039_v59 = vpack.c.bf16 %v9125_v58, %v9125_v58  ;;  %v11617_v29 = vadd.f32 %v11581_v18, %v14646_v45  ;;  %v8928_v55 = vpop.f32.mrb[9].mxu0 }
 0x48c   : > { %9303 = vst.msk [vmem:[%s14684_s26 + $0x10] sm:$0xf] %vm9298_vm2, %v10036_v6  ;;  %v10037_v7 = vpack.c.bf16 %v9123_v57, %v9123_v57  ;;  %v11618_v10 = vadd.f32 %v8928_v55, %v14648_v19  ;;  %v11582_v52 = vpop.f32.mrb[10].mxu0 }
 0x48d   : > { %9306 = vst.msk [vmem:[%s14684_s26 + $0x1c] sm:$0xf] %vm9298_vm2, %v10039_v59  ;;  %v9092_v38 = vadd.f32 %v11617_v29, %v14676_v30  ;;  %v11619_v60 = vadd.f32 %v11582_v52, %v14650_v9  ;;  %v8931_v17 = vpop.f32.mrb[11].mxu0 }
 0x48e   : > { %9304 = vst.msk [vmem:[%s14684_s26 + $0x14] sm:$0xf] %vm9298_vm2, %v10037_v7  ;;  %v9090_v47 = vadd.f32 %v11618_v10, %v14676_v30  ;;  %v11620_v28 = vadd.f32 %v8931_v17, %v14652_v26 }
 0x48f   : > { %v9128_v36 = vmax.f32 %v9092_v38, 0.0  ;;  %v9093_v45 = vadd.f32 %v11619_v60, %v14676_v30 }
 0x490   : > { %v9126_v19 = vmax.f32 %v9090_v47, 0.0  ;;  %v9091_v46 = vadd.f32 %v11620_v28, %v14676_v30 }
 0x491   : > { %v10042_v33 = vpack.c.bf16 %v9128_v36, %v9128_v36  ;;  %v9129_v39 = vmax.f32 %v9093_v45, 0.0 }
 0x492   : > { %v10040_v22 = vpack.c.bf16 %v9126_v19, %v9126_v19  ;;  %v9127_v9 = vmax.f32 %v9091_v46, 0.0  ;;  %v11585_v34 = vpop.f32.mrb[12].mxu0 }
 0x493   : > { %9309 = vst.msk [vmem:[%s14684_s26 + $0x28] sm:$0xf] %vm9298_vm2, %v10042_v33  ;;  %v10043_v50 = vpack.c.bf16 %v9129_v39, %v9129_v39  ;;  %v11621_v51 = vadd.f32 %v11585_v34, %v14654_v42  ;;  %v8944_v35 = vpop.f32.mrb[13].mxu0 }
 0x494   : > { %9307 = vst.msk [vmem:[%s14684_s26 + $0x20] sm:$0xf] %vm9298_vm2, %v10040_v22  ;;  %v10041_v26 = vpack.c.bf16 %v9127_v9, %v9127_v9  ;;  %v11622_v0 = vadd.f32 %v8944_v35, %v14656_v20  ;;  %v11586_v11 = vpop.f32.mrb[14].mxu0 }
 0x495   : > { %9310 = vst.msk [vmem:[%s14684_s26 + $0x2c] sm:$0xf] %vm9298_vm2, %v10043_v50  ;;  %v9096_v61 = vadd.f32 %v11621_v51, %v14676_v30  ;;  %v11623_v3 = vadd.f32 %v11586_v11, %v14658_v32  ;;  %v8947_v2 = vpop.f32.mrb[15].mxu0 }
 0x496   : > { %9308 = vst.msk [vmem:[%s14684_s26 + $0x24] sm:$0xf] %vm9298_vm2, %v10041_v26  ;;  %v9094_v37 = vadd.f32 %v11622_v0, %v14676_v30  ;;  %v11624_v42 = vadd.f32 %v8947_v2, %v14660_v63 }
 0x497   : > { %v9132_v40 = vmax.f32 %v9096_v61, 0.0  ;;  %v9097_v48 = vadd.f32 %v11623_v3, %v14676_v30  ;;  %v11099_v20 = vpop.f32.mrb[20].mxu1 }
 0x498   : > { %v9130_v15 = vmax.f32 %v9094_v37, 0.0  ;;  %v9095_v24 = vadd.f32 %v11624_v42, %v14676_v30  ;;  %v4738_v62 = vpop.f32.mrb[21].mxu1 }
 0x499   : > { %v10046_v16 = vpack.c.bf16 %v9132_v40, %v9132_v40  ;;  %v9133_v32 = vmax.f32 %v9097_v48, 0.0  ;;  %v11100_v14 = vpop.f32.mrb[22].mxu1 }
 0x49a   : > { %v10044_v1 = vpack.c.bf16 %v9130_v15, %v9130_v15  ;;  %v9131_v43 = vmax.f32 %v9095_v24, 0.0  ;;  %v11589_v8 = vpop.f32.mrb[16].mxu0  ;;  %v4741_v49 = vpop.f32.mrb[23].mxu1 }
 0x49b   : > { %9313 = vst.msk [vmem:[%s14684_s26 + $0x38] sm:$0xf] %vm9298_vm2, %v10046_v16  ;;  %v10047_v63 = vpack.c.bf16 %v9133_v32, %v9133_v32  ;;  %v11625_v31 = vadd.f32 %v11589_v8, %v14663_v27  ;;  %v8960_v54 = vpop.f32.mrb[17].mxu0 }
 0x49c   : > { %9311 = vst.msk [vmem:[%s14684_s26 + $0x30] sm:$0xf] %vm9298_vm2, %v10044_v1  ;;  %v10045_v53 = vpack.c.bf16 %v9131_v43, %v9131_v43  ;;  %v11626_v44 = vadd.f32 %v8960_v54, %v14665_v25  ;;  %v11590_v12 = vpop.f32.mrb[18].mxu0 }
 0x49d   : > { %9314 = vst.msk [vmem:[%s14684_s26 + $0x3c] sm:$0xf] %vm9298_vm2, %v10047_v63  ;;  %v9100_v21 = vadd.f32 %v11625_v31, %v14676_v30  ;;  %v11627_v13 = vadd.f32 %v11590_v12, %v14667_v5  ;;  %v8963_v4 = vpop.f32.mrb[19].mxu0 }
 0x49e   : > { %9312 = vst.msk [vmem:[%s14684_s26 + $0x34] sm:$0xf] %vm9298_vm2, %v10045_v53  ;;  %v9098_v41 = vadd.f32 %v11626_v44, %v14676_v30  ;;  %v11628_v27 = vadd.f32 %v8963_v4, %v14669_v23 }
 0x49f   : > { %v9136_v56 = vmax.f32 %v9100_v21, 0.0  ;;  %v9101_v58 = vadd.f32 %v11627_v13, %v14676_v30  ;;  %v11103_v25 = vpop.f32.mrb[24].mxu1 }
 0x4a0   : > { %v9134_v6 = vmax.f32 %v9098_v41, 0.0  ;;  %v9099_v57 = vadd.f32 %v11628_v27, %v14676_v30  ;;  %v4754_v18 = vpop.f32.mrb[25].mxu1 }
 0x4a1   : > { %v10050_v59 = vpack.c.bf16 %v9136_v56, %v9136_v56  ;;  %v9137_v5 = vmax.f32 %v9101_v58, 0.0  ;;  %v11104_v29 = vpop.f32.mrb[26].mxu1 }
 0x4a2   : > { %v10048_v55 = vpack.c.bf16 %v9134_v6, %v9134_v6  ;;  %v9135_v7 = vmax.f32 %v9099_v57, 0.0  ;;  %v11593_v10 = vpop.f32.mrb[20].mxu0  ;;  %v4757_v52 = vpop.f32.mrb[27].mxu1 }
 0x4a3   : > { %9317 = vst.msk [vmem:[%s14684_s26 + $0x48] sm:$0xf] %vm9298_vm2, %v10050_v59  ;;  %v10051_v23 = vpack.c.bf16 %v9137_v5, %v9137_v5  ;;  %v11629_v38 = vadd.f32 %v11593_v10, %v11099_v20  ;;  %v8976_v60 = vpop.f32.mrb[21].mxu0 }
 0x4a4   : > { %9315 = vst.msk [vmem:[%s14684_s26 + $0x40] sm:$0xf] %vm9298_vm2, %v10048_v55  ;;  %v10049_v17 = vpack.c.bf16 %v9135_v7, %v9135_v7  ;;  %v11630_v47 = vadd.f32 %v8976_v60, %v4738_v62  ;;  %v11594_v28 = vpop.f32.mrb[22].mxu0 }
 0x4a5   : > { %9318 = vst.msk [vmem:[%s14684_s26 + $0x4c] sm:$0xf] %vm9298_vm2, %v10051_v23  ;;  %v9104_v36 = vadd.f32 %v11629_v38, %v14676_v30  ;;  %v11631_v45 = vadd.f32 %v11594_v28, %v11100_v14  ;;  %v8979_v19 = vpop.f32.mrb[23].mxu0 }
 0x4a6   : > { %9316 = vst.msk [vmem:[%s14684_s26 + $0x44] sm:$0xf] %vm9298_vm2, %v10049_v17  ;;  %v9102_v46 = vadd.f32 %v11630_v47, %v14676_v30  ;;  %v11632_v33 = vadd.f32 %v8979_v19, %v4741_v49 }
 0x4a7   : > { %v9140_v39 = vmax.f32 %v9104_v36, 0.0  ;;  %v9105_v22 = vadd.f32 %v11631_v45, %v14676_v30  ;;  %v11107_v9 = vpop.f32.mrb[28].mxu1 }
 0x4a8   : > { %v9138_v34 = vmax.f32 %v9102_v46, 0.0  ;;  %v9103_v50 = vadd.f32 %v11632_v33, %v14676_v30  ;;  %v4770_v51 = vpop.f32.mrb[29].mxu1 }
 0x4a9   : > { %v10054_v35 = vpack.c.bf16 %v9140_v39, %v9140_v39  ;;  %v9141_v26 = vmax.f32 %v9105_v22, 0.0  ;;  %v11108_v0 = vpop.f32.mrb[30].mxu1 }
 0x4aa   : > { %v10052_v11 = vpack.c.bf16 %v9138_v34, %v9138_v34  ;;  %v9139_v61 = vmax.f32 %v9103_v50, 0.0  ;;  %v11597_v3 = vpop.f32.mrb[24].mxu0  ;;  %v4773_v2 = vpop.f32.mrb[31].mxu1 }
 0x4ab   : > { %9321 = vst.msk [vmem:[%s14684_s26 + $0x58] sm:$0xf] %vm9298_vm2, %v10054_v35  ;;  %v10055_v37 = vpack.c.bf16 %v9141_v26, %v9141_v26  ;;  %v11633_v42 = vadd.f32 %v11597_v3, %v11103_v25  ;;  %v8992_v40 = vpop.f32.mrb[25].mxu0 }
 0x4ac   : > { %9319 = vst.msk [vmem:[%s14684_s26 + $0x50] sm:$0xf] %vm9298_vm2, %v10052_v11  ;;  %v10053_v48 = vpack.c.bf16 %v9139_v61, %v9139_v61  ;;  %v11634_v20 = vadd.f32 %v8992_v40, %v4754_v18  ;;  %v11598_v15 = vpop.f32.mrb[26].mxu0 }
 0x4ad   : > { %9322 = vst.msk [vmem:[%s14684_s26 + $0x5c] sm:$0xf] %vm9298_vm2, %v10055_v37  ;;  %v9108_v24 = vadd.f32 %v11633_v42, %v14676_v30  ;;  %v11635_v62 = vadd.f32 %v11598_v15, %v11104_v29  ;;  %v8995_v16 = vpop.f32.mrb[27].mxu0 }
 0x4ae   : > { %9320 = vst.msk [vmem:[%s14684_s26 + $0x54] sm:$0xf] %vm9298_vm2, %v10053_v48  ;;  %v9106_v32 = vadd.f32 %v11634_v20, %v14676_v30  ;;  %v11636_v14 = vadd.f32 %v8995_v16, %v4757_v52 }
 0x4af   : > { %v9144_v1 = vmax.f32 %v9108_v24, 0.0  ;;  %v9109_v43 = vadd.f32 %v11635_v62, %v14676_v30  ;;  %v11111_v8 = vpop.f32.mrb[32].mxu1 }
 0x4b0   : > { %v9142_v49 = vmax.f32 %v9106_v32, 0.0  ;;  %v9107_v63 = vadd.f32 %v11636_v14, %v14676_v30  ;;  %v4786_v31 = vpop.f32.mrb[33].mxu1 }
 0x4b1   : > { %v10058_v54 = vpack.c.bf16 %v9144_v1, %v9144_v1  ;;  %v9145_v53 = vmax.f32 %v9109_v43, 0.0  ;;  %v11112_v44 = vpop.f32.mrb[34].mxu1 }
 0x4b2   : > { %v10056_v12 = vpack.c.bf16 %v9142_v49, %v9142_v49  ;;  %v9143_v21 = vmax.f32 %v9107_v63, 0.0  ;;  %v11601_v13 = vpop.f32.mrb[28].mxu0  ;;  %v4789_v4 = vpop.f32.mrb[35].mxu1 }
 0x4b3   : > { %9325 = vst.msk [vmem:[%s14684_s26 + $0x68] sm:$0xf] %vm9298_vm2, %v10058_v54  ;;  %v10059_v41 = vpack.c.bf16 %v9145_v53, %v9145_v53  ;;  %v11637_v27 = vadd.f32 %v11601_v13, %v11107_v9  ;;  %v9008_v56 = vpop.f32.mrb[29].mxu0 }
 0x4b4   : > { %9323 = vst.msk [vmem:[%s14684_s26 + $0x60] sm:$0xf] %vm9298_vm2, %v10056_v12  ;;  %v10057_v58 = vpack.c.bf16 %v9143_v21, %v9143_v21  ;;  %v11638_v25 = vadd.f32 %v9008_v56, %v4770_v51  ;;  %v11602_v6 = vpop.f32.mrb[30].mxu0 }
 0x4b5   : > { %9326 = vst.msk [vmem:[%s14684_s26 + $0x6c] sm:$0xf] %vm9298_vm2, %v10059_v41  ;;  %v9112_v57 = vadd.f32 %v11637_v27, %v14676_v30  ;;  %v11639_v18 = vadd.f32 %v11602_v6, %v11108_v0  ;;  %v9011_v59 = vpop.f32.mrb[31].mxu0 }
 0x4b6   : > { %9324 = vst.msk [vmem:[%s14684_s26 + $0x64] sm:$0xf] %vm9298_vm2, %v10057_v58  ;;  %v9110_v5 = vadd.f32 %v11638_v25, %v14676_v30  ;;  %v11640_v29 = vadd.f32 %v9011_v59, %v4773_v2 }
 0x4b7   : > { %v9148_v55 = vmax.f32 %v9112_v57, 0.0  ;;  %v9113_v7 = vadd.f32 %v11639_v18, %v14676_v30 }
 0x4b8   : > { %v9146_v10 = vmax.f32 %v9110_v5, 0.0  ;;  %v9111_v52 = vadd.f32 %v11640_v29, %v14676_v30 }
 0x4b9   : > { %v10062_v23 = vpack.c.bf16 %v9148_v55, %v9148_v55  ;;  %v9149_v38 = vmax.f32 %v9113_v7, 0.0 }
 0x4ba   : > { %v10060_v60 = vpack.c.bf16 %v9146_v10, %v9146_v10  ;;  %v9147_v17 = vmax.f32 %v9111_v52, 0.0  ;;  %v11605_v47 = vpop.f32.mrb[32].mxu0 }
 0x4bb   : > { %9329 = vst.msk [vmem:[%s14684_s26 + $0x78] sm:$0xf] %vm9298_vm2, %v10062_v23  ;;  %v10063_v28 = vpack.c.bf16 %v9149_v38, %v9149_v38  ;;  %v11641_v36 = vadd.f32 %v11605_v47, %v11111_v8  ;;  %v9024_v45 = vpop.f32.mrb[33].mxu0 }
 0x4bc   : > { %9327 = vst.msk [vmem:[%s14684_s26 + $0x70] sm:$0xf] %vm9298_vm2, %v10060_v60  ;;  %v10061_v19 = vpack.c.bf16 %v9147_v17, %v9147_v17  ;;  %v11642_v46 = vadd.f32 %v9024_v45, %v4786_v31  ;;  %v11606_v33 = vpop.f32.mrb[34].mxu0 }
 0x4bd   : > { %9330 = vst.msk [vmem:[%s14684_s26 + $0x7c] sm:$0xf] %vm9298_vm2, %v10063_v28  ;;  %v9116_v39 = vadd.f32 %v11641_v36, %v14676_v30  ;;  %v11643_v22 = vadd.f32 %v11606_v33, %v11112_v44  ;;  %v9027_v9 = vpop.f32.mrb[35].mxu0 }
 0x4be   : > { %9328 = vst.msk [vmem:[%s14684_s26 + $0x74] sm:$0xf] %vm9298_vm2, %v10061_v19  ;;  %v9114_v34 = vadd.f32 %v11642_v46, %v14676_v30  ;;  %v11644_v50 = vadd.f32 %v9027_v9, %v4789_v4 }
 0x4bf   : > { %v9152_v51 = vmax.f32 %v9116_v39, 0.0  ;;  %v9117_v35 = vadd.f32 %v11643_v22, %v14676_v30 }
 0x4c0   : > { %v9150_v26 = vmax.f32 %v9114_v34, 0.0  ;;  %v9115_v0 = vadd.f32 %v11644_v50, %v14676_v30 }
 0x4c1   : > { %v10066_v11 = vpack.c.bf16 %v9152_v51, %v9152_v51  ;;  %v9153_v61 = vmax.f32 %v9117_v35, 0.0 }
 0x4c2   : > { %v10064_v3 = vpack.c.bf16 %v9150_v26, %v9150_v26  ;;  %v9151_v2 = vmax.f32 %v9115_v0, 0.0 }
 0x4c3   : > { %9333 = vst.msk [vmem:[%s14684_s26 + $0x88] sm:$0xf] %vm9298_vm2, %v10066_v11  ;;  %v10067_v37 = vpack.c.bf16 %v9153_v61, %v9153_v61 }
 0x4c4   : > { %9331 = vst.msk [vmem:[%s14684_s26 + $0x80] sm:$0xf] %vm9298_vm2, %v10064_v3  ;;  %v10065_v42 = vpack.c.bf16 %v9151_v2, %v9151_v2 }
 0x4c5   : > { %9334 = vst.msk [vmem:[%s14684_s26 + $0x8c] sm:$0xf] %vm9298_vm2, %v10067_v37 }
 0x4c6   : > { %9332 = vst.msk [vmem:[%s14684_s26 + $0x84] sm:$0xf] %vm9298_vm2, %v10065_v42 }
 0x4c7 PF: > { %s15_s22 = sadd.s32 1, %s12658_s22   ;;  %s14824_s18 = smov %s12650_s20 }
 0x4c8   : > { %p12_p10 = scmp.ge.s32.totalorder %s15_s22, 34   ;;  %s14825_s19 = smov %s12654_s21 }
 0x4c9   : > { %s14826_s20 = smov %s14829_s23  ;;  %s14827_s21 = smov %s14833_s24 }
 0x4ca   :  { %14 = sbr.rel (!%p12_p10) target bundleno = 3 (0x3), region = 102 }

// kernel: vgg3d_block_2.5
= control target key start
LH: loop header
LB: loop body
LE: loop exit
PB: predicated region body
PF: predicated region fallthrough
CT: control target
= control target key end

     0   :  { %s2337_s9 = smov 0   ;;  %s2339_s10 = smov 0   ;;  %s2603_s0 = inlined_call_operand.vmem [shape: bf16[2,16,16,18,8], index: 0, kind: input, shape index: {}]   ;;  %s2604_s1 = inlined_call_operand.vmem [shape: f32[2,8,18], index: 1, kind: input, shape index: {}]   ;;  %s2605_s2 = inlined_call_operand.vmem [shape: f32[2,8,8,8,8], index: 2, kind: output, shape index: {}]  }
   0x1   :  { %s2341_s11 = smov 0   ;;  %s2343_s12 = smov 0  }
   0x2   :  { %s2345_s13 = smov 0  }
   0x3 LB: > { %s21_s14 = sadd.s32 1, %s2309_s11  ;;  %s24_s15 = sadd.s32 1, %s2313_s12  ;;  %s2317_s13 = sphi %s2345_s13, %s12_s13   ;;  %s2313_s12 = sphi %s2343_s12, %s2609_s12   ;;  %s2309_s11 = sphi %s2341_s11, %s2608_s11   ;;  %s2305_s10 = sphi %s2339_s10, %s2607_s10   ;;  %s2301_s9 = sphi %s2337_s9, %s2606_s9  }
   0x4   : > { %p22_p0 = scmp.ge.s32.totalorder %s21_s14, 8  ;;  %p1758_p1 = scmp.ge.s32.totalorder %s2317_s13, 1 }
   0x5   : > { %p134_p2 = scmp.lt.s32.totalorder %s2317_s13, 17 }
   0x6   : > { %s2611_s14 = smov (%p22_p0, %s21_s14), 0  ;;  %s2613_s15 = smov (!%p22_p0, %s24_s15), %s2313_s12 }
   0x7   : > { %p135_p3 = pnand %p1758_p1, %p134_p2  ;;  %p26_p4 = scmp.ge.s32.totalorder %s2613_s15, 2 }
   0x8   : > { %s1759_s16 = sshll.u32 (!%p135_p3), %s2301_s9, 1  ;;  %p166_p5 = scmp.lt.s32.totalorder (!%p135_p3), %s2305_s10, 1  ;;  %v2319_v0 = vmov (!%p135_p3), 0.0|0.0   ;;  %vm2320_vm0 = vmmov (!%p135_p3), 0   ;;  %v2321_v1 = vmov (!%p135_p3), 0.0   ;;  %vm228_vm1 = vcmask (!%p135_p3), 1041408  }
   0x9   : > { %s2615_s15 = smov (%p26_p4, %s2613_s15), 0  ;;  %138 = sbr.rel (%p135_p3) target bundleno = 303 (0x12f), region = 28 }
   0xa   : > { %2186 = vmatprep.subr.bf16.mxu0 (!%p135_p3), %v2319_v0  ;;  %2189 = vmatprep.subr.bf16.mxu1 (!%p135_p3), %v2319_v0  ;;  %p168_p6 = scmp.lt.s32.totalorder (!%p135_p3), %s1759_s16, 15  ;;  %vm224_vm2 = vcmask (!%p135_p3), 146432   ;;  %p178_p7 = scmp.lt.s32.totalorder (!%p135_p3), %s2301_s9, 7  ;;  %vm376_vm3 = vcmask (!%p135_p3), 64512  }
   0xb   : > { %2048 = vmatprep.mubr.msk.f32.mxu0 (!%p135_p3), %vm2320_vm0, %v2321_v1  ;;  %2057 = vmatprep.mubr.msk.f32.mxu1 (!%p135_p3), %vm2320_vm0, %v2321_v1 }
  0x10   : > { %s2617_s10 = smov (!%p166_p5, %s2305_s10), 1  ;;  %s2619_s16 = smov (!%p168_p6, %s1759_s16), 15 }
  0x11   : > { %s2235_s17 = smul.u32 768, %s2617_s10  ;;  %s2621_s9 = smov (!%p178_p7, %s2301_s9), 7 }
  0x12   : > { %s2234_s18 = smul.u32 48, %s2619_s16  ;;  %s1761_s28 = sshll.u32 %s2621_s9, 3 }
  0x13   : > { %s1762_s29 = sshll.u32 %s2617_s10, 6 }
  0x14   : > { %s172_s19 = sadd.s32 %s2235_s17, %s2234_s18  ;;  %s182_s30 = sadd.s32 %s1762_s29, %s1761_s28 }
  0x15   : > { %s1760_s20 = sshll.u32 %s172_s19, 2  ;;  %s1763_s3 = sshll.u32 %s182_s30, 3 }
  0x16   : > { %s2382_s23 = scalar_lea.vmem %s2603_s0, %s1760_s20  ;;  %s2570_s6 = scalar_lea.vmem %s2605_s2, %s1763_s3 }
  0x17   : > { %v1900_v2 = vld [vmem:[%s2382_s23] sm:$0xff]   ;;  %v1765_v3 = vld [vmem:[%s2382_s23 + $0xc] sm:$0xff]   ;;  %v190_v10 = vld [vmem:[%s2382_s23 + $0x8] sm:$0x1] }
  0x18   : > { %v1963_v4 = vld [vmem:[%s2382_s23 + $0xc0] sm:$0xff]   ;;  %v1901_v5 = vunpack.c.l.bf16 %v1900_v2  ;;  %v1902_v6 = vunpack.c.h.bf16 %v1900_v2  ;;  %v198_v7 = vunpack.c.l.bf16 %v1765_v3  ;;  %v199_v8 = vunpack.c.h.bf16 %v1765_v3  ;;  %v1771_v9 = vld [vmem:[%s2382_s23 + $0xcc] sm:$0xff]   ;;  %v1767_v11 = vld [vmem:[%s2382_s23 + $0x14] sm:$0x1] }
  0x19   : > { %v1905_v12 = vunpack.c.l.bf16 %v1963_v4  ;;  %v1906_v13 = vunpack.c.h.bf16 %v1963_v4  ;;  %v218_v14 = vunpack.c.l.bf16 %v1771_v9  ;;  %v219_v15 = vunpack.c.h.bf16 %v1771_v9  ;;  %v1770_v16 = vld [vmem:[%s2382_s23 + $0xc8] sm:$0x1]  ;;  %v1773_v17 = vld [vmem:[%s2382_s23 + $0xd4] sm:$0x1]  ;;  %v1964_v18 = vld [vmem:[%s2382_s23 + $0x18] sm:$0xff]  }
  0x1a   : > { %v201_v19 = vmax.f32 %v1901_v5, %v198_v7  ;;  %v202_v20 = vmax.f32 %v1902_v6, %v199_v8  ;;  %v193_v21 = vunpack.c.l.bf16 %v190_v10  ;;  %v200_v22 = vunpack.c.l.bf16 %v1767_v11  ;;  %v1781_v23 = vld [vmem:[%s2382_s23 + $0x24] sm:$0xff]   ;;  %v1965_v24 = vld [vmem:[%s2382_s23 + $0xd8] sm:$0xff]   ;;  %v1780_v34 = vld [vmem:[%s2382_s23 + $0x20] sm:$0x1] }
  0x1b   : > { %v1787_v25 = vld [vmem:[%s2382_s23 + $0xe4] sm:$0xff]   ;;  %v210_v26 = vunpack.c.l.bf16 %v1770_v16  ;;  %v220_v27 = vunpack.c.l.bf16 %v1773_v17  ;;  %v1909_v28 = vunpack.c.l.bf16 %v1964_v18  ;;  %v1910_v29 = vunpack.c.h.bf16 %v1964_v18  ;;  %v1783_v35 = vld [vmem:[%s2382_s23 + $0x2c] sm:$0x1]  ;;  %v1786_v44 = vld [vmem:[%s2382_s23 + $0xe0] sm:$0x1] }
  0x1c   : > { %v211_v30 = vmax.f32 %v201_v19, %v1905_v12  ;;  %v212_v31 = vmax.f32 %v202_v20, %v1906_v13  ;;  %v203_v32 = vmax.f32 %v193_v21, %v200_v22  ;;  %v389_v33 = vunpack.c.l.bf16 %v1781_v23  ;;  %v1966_v45 = vld [vmem:[%s2382_s23 + $0x30] sm:$0xff]   ;;  %v1798_v50 = vld [vmem:[%s2382_s23 + $0x3c] sm:$0xff]   ;;  %v1789_v54 = vld [vmem:[%s2382_s23 + $0xec] sm:$0x1] }
  0x1d   : > { %v390_v36 = vunpack.c.h.bf16 %v1781_v23  ;;  %v1913_v37 = vunpack.c.l.bf16 %v1965_v24  ;;  %v1914_v38 = vunpack.c.h.bf16 %v1965_v24  ;;  %v409_v39 = vunpack.c.l.bf16 %v1787_v25  ;;  %v1967_v55 = vld [vmem:[%s2382_s23 + $0xf0] sm:$0xff]   ;;  %v1804_v60 = vld [vmem:[%s2382_s23 + $0xfc] sm:$0xff]   ;;  %v1797_v3 = vld [vmem:[%s2382_s23 + $0x38] sm:$0x1] }
  0x1e   : > { %v221_v40 = vmax.f32 %v211_v30, %v218_v14  ;;  %v222_v41 = vmax.f32 %v212_v31, %v219_v15  ;;  %v213_v42 = vmax.f32 %v203_v32, %v210_v26  ;;  %v392_v43 = vmax.f32 %v1909_v28, %v389_v33  ;;  %v1800_v4 = vld [vmem:[%s2382_s23 + $0x44] sm:$0x1]  ;;  %v1803_v10 = vld [vmem:[%s2382_s23 + $0xf8] sm:$0x1]  ;;  %v2417_v11 = vld [vmem:[%s2604_s1 + $0x8] sm:$0xff] }
  0x1f   : > { %v393_v46 = vmax.f32 %v1910_v29, %v390_v36  ;;  %v410_v47 = vunpack.c.h.bf16 %v1787_v25  ;;  %v384_v48 = vunpack.c.l.bf16 %v1780_v34  ;;  %v391_v49 = vunpack.c.l.bf16 %v1783_v35  ;;  %v2411_v5 = vld [vmem:[%s2604_s1] sm:$0xff]  ;;  %v1968_v16 = vld [vmem:[%s2382_s23 + $0x48] sm:$0xff]   ;;  %v1815_v17 = vld [vmem:[%s2382_s23 + $0x54] sm:$0xff]  }
  0x20   : > { %v2187_v51 = vpack.c.bf16 %v222_v41, %v221_v40  ;;  %v223_v52 = vmax.f32 %v213_v42, %v220_v27  ;;  %v402_v53 = vmax.f32 %v392_v43, %v1913_v37  ;;  %v401_v58 = vunpack.c.l.bf16 %v1786_v44  ;;  %v1969_v22 = vld [vmem:[%s2382_s23 + $0x108] sm:$0xff]   ;;  %v1806_v27 = vld [vmem:[%s2382_s23 + $0x104] sm:$0x1]  ;;  %v1821_v31 = vld [vmem:[%s2382_s23 + $0x114] sm:$0xff]  }
  0x21   : > { %v403_v56 = vmax.f32 %v393_v46, %v1914_v38  ;;  %v394_v57 = vmax.f32 %v384_v48, %v391_v49  ;;  %v1917_v59 = vunpack.c.l.bf16 %v1966_v45  ;;  %v1918_v62 = vunpack.c.h.bf16 %v1966_v45  ;;  %v1814_v32 = vld [vmem:[%s2382_s23 + $0x50] sm:$0x1]  ;;  %v1817_v37 = vld [vmem:[%s2382_s23 + $0x5c] sm:$0x1]  ;;  %v1970_v41 = vld [vmem:[%s2382_s23 + $0x60] sm:$0xff]  }
  0x22   : > { %2188 = vmatpush3.bf16.msra.mxu0 %v2187_v51  ;;  %2191 = vmatpush3.bf16.msra.mxu1 %v2187_v51  ;;  %v412_v61 = vmax.f32 %v402_v53, %v409_v39  ;;  %v572_v63 = vunpack.c.l.bf16 %v1798_v50  ;;  %v573_v2 = vunpack.c.h.bf16 %v1798_v50  ;;  %v411_v7 = vunpack.c.l.bf16 %v1789_v54  ;;  %v1832_v46 = vld [vmem:[%s2382_s23 + $0x6c] sm:$0xff]   ;;  %v1971_v51 = vld [vmem:[%s2382_s23 + $0x120] sm:$0xff]  }
  0x23   : > { %2046 = vmatprep.subr.mxu0 %v2321_v1  ;;  %2055 = vmatprep.subr.mxu1 %v2321_v1  ;;  %v413_v6 = vmax.f32 %v403_v56, %v410_v47  ;;  %v1921_v8 = vunpack.c.l.bf16 %v1967_v55  ;;  %v1922_v9 = vunpack.c.h.bf16 %v1967_v55  ;;  %v592_v14 = vunpack.c.l.bf16 %v1804_v60  ;;  %v1820_v54 = vld [vmem:[%s2382_s23 + $0x110] sm:$0x1] }
  0x24   : > { %v575_v12 = vmax.f32 %v1917_v59, %v572_v63  ;;  %v576_v13 = vmax.f32 %v1918_v62, %v573_v2  ;;  %v593_v15 = vunpack.c.h.bf16 %v1804_v60  ;;  %v404_v19 = vmax.f32 %v394_v57, %v401_v58  ;;  %v1838_v59 = vld [vmem:[%s2382_s23 + $0x12c] sm:$0xff]   ;;  %v1831_v2 = vld [vmem:[%s2382_s23 + $0x68] sm:$0x1] }
  0x25   : > { %v2193_v18 = vpack.c.bf16 %v413_v6, %v412_v61  ;;  %v567_v20 = vunpack.c.l.bf16 %v1797_v3  ;;  %v574_v21 = vunpack.c.l.bf16 %v1800_v4  ;;  %v584_v25 = vunpack.c.l.bf16 %v1803_v10  ;;  %v1834_v3 = vld [vmem:[%s2382_s23 + $0x74] sm:$0x1]  ;;  %v1849_v10 = vld [vmem:[%s2382_s23 + $0x84] sm:$0xff]  }
  0x26   : > { %2047 = vmatpush3.msk.msra.mxu0 %vm228_vm1, %v223_v52  ;;  %2056 = vmatpush3.msk.msra.mxu1 %vm228_vm1, %v223_v52  ;;  %v585_v23 = vmax.f32 %v575_v12, %v1921_v8  ;;  %v586_v24 = vmax.f32 %v576_v13, %v1922_v9  ;;  %v1925_v28 = vunpack.c.l.bf16 %v1968_v16  ;;  %v1926_v29 = vunpack.c.h.bf16 %v1968_v16  ;;  %v1972_v9 = vld [vmem:[%s2382_s23 + $0x78] sm:$0xff]  }
  0x27   : > { %2049 = vmatmul.mubr.msk.f32.vlgmr.msra.gmra.mrb[0].mxu0 %vm224_vm2, %v2411_v5  ;;  %2058 = vmatmul.mubr.msk.f32.vlgmr.msra.gmra.mrb[0].mxu1 %vm224_vm2, %v2417_v11  ;;  %v577_v26 = vmax.f32 %v567_v20, %v574_v21  ;;  %v755_v30 = vunpack.c.l.bf16 %v1815_v17  ;;  %v756_v35 = vunpack.c.h.bf16 %v1815_v17  ;;  %v1929_v36 = vunpack.c.l.bf16 %v1969_v22  ;;  %v1823_v13 = vld [vmem:[%s2382_s23 + $0x11c] sm:$0x1] }
  0x28   : > { %2192 = vmatprep.subr.bf16.mxu0 %v2319_v0  ;;  %2195 = vmatprep.subr.bf16.mxu1 %v2319_v0  ;;  %v595_v33 = vmax.f32 %v585_v23, %v592_v14  ;;  %v596_v34 = vmax.f32 %v586_v24, %v593_v15  ;;  %v414_v38 = vmax.f32 %v404_v19, %v411_v7  ;;  %v1930_v40 = vunpack.c.h.bf16 %v1969_v22  ;;  %v1973_v23 = vld [vmem:[%s2382_s23 + $0x138] sm:$0xff]  }
  0x29   : > { %2194 = vmatpush3.bf16.msra.mxu0 %v2193_v18  ;;  %2197 = vmatpush3.bf16.msra.mxu1 %v2193_v18  ;;  %v758_v39 = vmax.f32 %v1925_v28, %v755_v30  ;;  %v594_v42 = vunpack.c.l.bf16 %v1806_v27  ;;  %v759_v43 = vmax.f32 %v1926_v29, %v756_v35  ;;  %v775_v44 = vunpack.c.l.bf16 %v1821_v31  ;;  %v1837_v27 = vld [vmem:[%s2382_s23 + $0x128] sm:$0x1]  ;;  %v1866_v35 = vld [vmem:[%s2382_s23 + $0x9c] sm:$0xff]  }
  0x2a   : > { %2064 = vmatprep.subr.mxu0 %v2321_v1  ;;  %2073 = vmatprep.subr.mxu1 %v2321_v1  ;;  %v750_v45 = vunpack.c.l.bf16 %v1814_v32  ;;  %v587_v47 = vmax.f32 %v577_v26, %v584_v25  ;;  %v776_v49 = vunpack.c.h.bf16 %v1821_v31  ;;  %v757_v50 = vunpack.c.l.bf16 %v1817_v37  ;;  %v1855_v29 = vld [vmem:[%s2382_s23 + $0x144] sm:$0xff]  }
  0x2b   : > { %2066 = vmatprep.mubr.msk.f32.mxu0 %vm2320_vm0, %v2321_v1  ;;  %2075 = vmatprep.mubr.msk.f32.mxu1 %vm2320_vm0, %v2321_v1  ;;  %v768_v48 = vmax.f32 %v758_v39, %v1929_v36  ;;  %v2199_v52 = vpack.c.bf16 %v596_v34, %v595_v33  ;;  %v769_v53 = vmax.f32 %v759_v43, %v1930_v40  ;;  %v1933_v55 = vunpack.c.l.bf16 %v1970_v41  ;;  %v1974_v34 = vld [vmem:[%s2382_s23 + $0x90] sm:$0xff]   ;;  %v1848_v40 = vld [vmem:[%s2382_s23 + $0x80] sm:$0x1] }
  0x2c   : > { %v1934_v56 = vunpack.c.h.bf16 %v1970_v41  ;;  %v938_v57 = vunpack.c.l.bf16 %v1832_v46  ;;  %v939_v58 = vunpack.c.h.bf16 %v1832_v46  ;;  %v760_v61 = vmax.f32 %v750_v45, %v757_v50  ;;  %v1851_v41 = vld [vmem:[%s2382_s23 + $0x8c] sm:$0x1]  ;;  %v1840_v43 = vld [vmem:[%s2382_s23 + $0x134] sm:$0x1] }
  0x2d   : > { %2065 = vmatpush3.msk.msra.mxu0 %vm228_vm1, %v414_v38  ;;  %2074 = vmatpush3.msk.msra.mxu1 %vm228_vm1, %v414_v38  ;;  %v778_v60 = vmax.f32 %v768_v48, %v775_v44  ;;  %v1937_v62 = vunpack.c.l.bf16 %v1971_v51  ;;  %v1938_v63 = vunpack.c.h.bf16 %v1971_v51  ;;  %v779_v4 = vmax.f32 %v769_v53, %v776_v49 }
  0x2e   : > { %2067 = vmatmul.mubr.msk.f32.vlgmr.msra.gmra.mrb[2].mxu0 %vm224_vm2, %v2411_v5  ;;  %2076 = vmatmul.mubr.msk.f32.vlgmr.msra.gmra.mrb[2].mxu1 %vm224_vm2, %v2417_v11  ;;  %v767_v6 = vunpack.c.l.bf16 %v1820_v54  ;;  %v941_v7 = vmax.f32 %v1933_v55, %v938_v57  ;;  %v942_v8 = vmax.f32 %v1934_v56, %v939_v58  ;;  %v597_v12 = vmax.f32 %v587_v47, %v594_v42  ;;  %v1975_v54 = vld [vmem:[%s2382_s23 + $0x150] sm:$0xff]   ;;  %v1854_v58 = vld [vmem:[%s2382_s23 + $0x140] sm:$0x1] }
  0x2f   : > { %2198 = vmatprep.subr.bf16.mxu0 %v2319_v0  ;;  %2201 = vmatprep.subr.bf16.mxu1 %v2319_v0  ;;  %v958_v14 = vunpack.c.l.bf16 %v1838_v59  ;;  %v959_v16 = vunpack.c.h.bf16 %v1838_v59  ;;  %v933_v17 = vunpack.c.l.bf16 %v1831_v2  ;;  %v940_v18 = vunpack.c.l.bf16 %v1834_v3  ;;  %v1872_v59 = vld [vmem:[%s2382_s23 + $0x15c] sm:$0xff]   ;;  %v1976_v2 = vld [vmem:[%s2382_s23 + $0xa8] sm:$0xff]   ;;  %v1883_v3 = vld [vmem:[%s2382_s23 + $0xb4] sm:$0xff]  }
  0x30   : > { %2200 = vmatpush3.bf16.msra.mxu0 %v2199_v52  ;;  %2203 = vmatpush3.bf16.msra.mxu1 %v2199_v52  ;;  %v951_v15 = vmax.f32 %v941_v7, %v1937_v62  ;;  %v952_v19 = vmax.f32 %v942_v8, %v1938_v63  ;;  %v1941_v20 = vunpack.c.l.bf16 %v1972_v9  ;;  %v1942_v21 = vunpack.c.h.bf16 %v1972_v9  ;;  %v1865_v9 = vld [vmem:[%s2382_s23 + $0x98] sm:$0x1] }
  0x31   : > { %2082 = vmatprep.subr.mxu0 %v2321_v1  ;;  %2091 = vmatprep.subr.mxu1 %v2321_v1  ;;  %v1121_v22 = vunpack.c.l.bf16 %v1849_v10  ;;  %v2205_v24 = vpack.c.bf16 %v779_v4, %v778_v60  ;;  %v770_v25 = vmax.f32 %v760_v61, %v767_v6  ;;  %v777_v26 = vunpack.c.l.bf16 %v1823_v13  ;;  %v1857_v13 = vld [vmem:[%s2382_s23 + $0x14c] sm:$0x1] }
  0x32   : > { %2084 = vmatprep.mubr.msk.f32.mxu0 %vm2320_vm0, %v2321_v1  ;;  %2093 = vmatprep.mubr.msk.f32.mxu1 %vm2320_vm0, %v2321_v1  ;;  %v1122_v28 = vunpack.c.h.bf16 %v1849_v10  ;;  %v1945_v32 = vunpack.c.l.bf16 %v1973_v23  ;;  %v1946_v33 = vunpack.c.h.bf16 %v1973_v23  ;;  %v961_v36 = vmax.f32 %v951_v15, %v958_v14  ;;  %v1868_v10 = vld [vmem:[%s2382_s23 + $0xa4] sm:$0x1] }
  0x33   : > { %v1124_v30 = vmax.f32 %v1941_v20, %v1121_v22  ;;  %v962_v37 = vmax.f32 %v952_v19, %v959_v16  ;;  %v943_v38 = vmax.f32 %v933_v17, %v940_v18  ;;  %v950_v39 = vunpack.c.l.bf16 %v1837_v27 }
  0x34   : > { %2083 = vmatpush3.msk.msra.mxu0 %vm228_vm1, %v597_v12  ;;  %2092 = vmatpush3.msk.msra.mxu1 %vm228_vm1, %v597_v12  ;;  %v1125_v31 = vmax.f32 %v1942_v21, %v1122_v28  ;;  %v780_v42 = vmax.f32 %v770_v25, %v777_v26  ;;  %v1141_v44 = vunpack.c.l.bf16 %v1855_v29  ;;  %v1142_v45 = vunpack.c.h.bf16 %v1855_v29  ;;  %v1871_v28 = vld [vmem:[%s2382_s23 + $0x158] sm:$0x1] }
  0x35   : > { %2085 = vmatmul.mubr.msk.f32.vlgmr.msra.gmra.mrb[4].mxu0 %vm224_vm2, %v2411_v5  ;;  %2094 = vmatmul.mubr.msk.f32.vlgmr.msra.gmra.mrb[4].mxu1 %vm224_vm2, %v2417_v11  ;;  %v1949_v46 = vunpack.c.l.bf16 %v1974_v34  ;;  %v1950_v47 = vunpack.c.h.bf16 %v1974_v34  ;;  %v1304_v48 = vunpack.c.l.bf16 %v1866_v35  ;;  %v1305_v49 = vunpack.c.h.bf16 %v1866_v35 }
  0x36   : > { %2204 = vmatprep.subr.bf16.mxu0 %v2319_v0  ;;  %2207 = vmatprep.subr.bf16.mxu1 %v2319_v0  ;;  %v1134_v50 = vmax.f32 %v1124_v30, %v1945_v32  ;;  %v1135_v51 = vmax.f32 %v1125_v31, %v1946_v33  ;;  %v1116_v52 = vunpack.c.l.bf16 %v1848_v40  ;;  %v1123_v53 = vunpack.c.l.bf16 %v1851_v41  ;;  %v1889_v33 = vld [vmem:[%s2382_s23 + $0x174] sm:$0xff]   ;;  %v1874_v41 = vld [vmem:[%s2382_s23 + $0x164] sm:$0x1] }
  0x37   : > { %2206 = vmatpush3.bf16.msra.mxu0 %v2205_v24  ;;  %2209 = vmatpush3.bf16.msra.mxu1 %v2205_v24  ;;  %v2211_v55 = vpack.c.bf16 %v962_v37, %v961_v36  ;;  %v953_v56 = vmax.f32 %v943_v38, %v950_v39  ;;  %v960_v57 = vunpack.c.l.bf16 %v1840_v43  ;;  %v1307_v60 = vmax.f32 %v1949_v46, %v1304_v48  ;;  %v1977_v24 = vld [vmem:[%s2382_s23 + $0x168] sm:$0xff]   ;;  %v1882_v38 = vld [vmem:[%s2382_s23 + $0xb0] sm:$0x1]  ;;  %v1885_v39 = vld [vmem:[%s2382_s23 + $0xbc] sm:$0x1] }
  0x38   : > { %2100 = vmatprep.subr.mxu0 %v2321_v1  ;;  %2109 = vmatprep.subr.mxu1 %v2321_v1  ;;  %v1308_v61 = vmax.f32 %v1950_v47, %v1305_v49  ;;  %v1953_v62 = vunpack.c.l.bf16 %v1975_v54  ;;  %v1954_v63 = vunpack.c.h.bf16 %v1975_v54  ;;  %v1144_v4 = vmax.f32 %v1134_v50, %v1141_v44 }
  0x39   : > { %2102 = vmatprep.mubr.msk.f32.mxu0 %vm2320_vm0, %v2321_v1  ;;  %2111 = vmatprep.mubr.msk.f32.mxu1 %vm2320_vm0, %v2321_v1  ;;  %v1145_v6 = vmax.f32 %v1135_v51, %v1142_v45  ;;  %v1126_v7 = vmax.f32 %v1116_v52, %v1123_v53  ;;  %v1133_v8 = vunpack.c.l.bf16 %v1854_v58  ;;  %v963_v12 = vmax.f32 %v953_v56, %v960_v57  ;;  %v1888_v51 = vld [vmem:[%s2382_s23 + $0x170] sm:$0x1]  ;;  %v1891_v57 = vld [vmem:[%s2382_s23 + $0x17c] sm:$0x1] }
  0x3a   : > { %v1324_v14 = vunpack.c.l.bf16 %v1872_v59  ;;  %v1325_v15 = vunpack.c.h.bf16 %v1872_v59  ;;  %v1957_v16 = vunpack.c.l.bf16 %v1976_v2  ;;  %v1958_v17 = vunpack.c.h.bf16 %v1976_v2 }
  0x3b   : > { %2101 = vmatpush3.msk.msra.mxu0 %vm228_vm1, %v780_v42  ;;  %2110 = vmatpush3.msk.msra.mxu1 %vm228_vm1, %v780_v42  ;;  %v1487_v18 = vunpack.c.l.bf16 %v1883_v3  ;;  %v1488_v19 = vunpack.c.h.bf16 %v1883_v3  ;;  %v1317_v20 = vmax.f32 %v1307_v60, %v1953_v62  ;;  %v1318_v21 = vmax.f32 %v1308_v61, %v1954_v63 }
  0x3c   : > { %2103 = vmatmul.mubr.msk.f32.vlgmr.msra.gmra.mrb[6].mxu0 %vm224_vm2, %v2411_v5  ;;  %2112 = vmatmul.mubr.msk.f32.vlgmr.msra.gmra.mrb[6].mxu1 %vm224_vm2, %v2417_v11  ;;  %v1299_v22 = vunpack.c.l.bf16 %v1865_v9  ;;  %v1306_v23 = vunpack.c.l.bf16 %v1868_v10  ;;  %v2217_v25 = vpack.c.bf16 %v1145_v6, %v1144_v4  ;;  %v1136_v26 = vmax.f32 %v1126_v7, %v1133_v8 }
  0x3d   : > { %2210 = vmatprep.subr.bf16.mxu0 %v2319_v0  ;;  %2213 = vmatprep.subr.bf16.mxu1 %v2319_v0  ;;  %v1143_v27 = vunpack.c.l.bf16 %v1857_v13  ;;  %v1490_v29 = vmax.f32 %v1957_v16, %v1487_v18  ;;  %v1491_v30 = vmax.f32 %v1958_v17, %v1488_v19  ;;  %v1961_v31 = vunpack.c.l.bf16 %v1977_v24 }
  0x3e   : > { %2212 = vmatpush3.bf16.msra.mxu0 %v2211_v55  ;;  %2215 = vmatpush3.bf16.msra.mxu1 %v2211_v55  ;;  %v1962_v32 = vunpack.c.h.bf16 %v1977_v24  ;;  %v1327_v34 = vmax.f32 %v1317_v20, %v1324_v14  ;;  %v1328_v35 = vmax.f32 %v1318_v21, %v1325_v15  ;;  %v1309_v36 = vmax.f32 %v1299_v22, %v1306_v23 }
  0x3f   : > { %2118 = vmatprep.subr.mxu0 %v2321_v1  ;;  %2127 = vmatprep.subr.mxu1 %v2321_v1  ;;  %v1316_v37 = vunpack.c.l.bf16 %v1871_v28  ;;  %v1146_v40 = vmax.f32 %v1136_v26, %v1143_v27  ;;  %v1507_v42 = vunpack.c.l.bf16 %v1889_v33  ;;  %v1508_v43 = vunpack.c.h.bf16 %v1889_v33 }
  0x40   : > { %2120 = vmatprep.mubr.msk.f32.mxu0 %vm2320_vm0, %v2321_v1  ;;  %2129 = vmatprep.mubr.msk.f32.mxu1 %vm2320_vm0, %v2321_v1  ;;  %v1500_v44 = vmax.f32 %v1490_v29, %v1961_v31  ;;  %v1501_v45 = vmax.f32 %v1491_v30, %v1962_v32  ;;  %v1482_v46 = vunpack.c.l.bf16 %v1882_v38  ;;  %v1489_v47 = vunpack.c.l.bf16 %v1885_v39 }
  0x41   : > { %v2223_v48 = vpack.c.bf16 %v1328_v35, %v1327_v34  ;;  %v1319_v49 = vmax.f32 %v1309_v36, %v1316_v37  ;;  %v1326_v50 = vunpack.c.l.bf16 %v1874_v41  ;;  %v1499_v55 = vunpack.c.l.bf16 %v1888_v51 }
  0x42   : > { %2119 = vmatpush3.msk.msra.mxu0 %vm228_vm1, %v963_v12  ;;  %2128 = vmatpush3.msk.msra.mxu1 %vm228_vm1, %v963_v12  ;;  %v1510_v52 = vmax.f32 %v1500_v44, %v1507_v42  ;;  %v1511_v53 = vmax.f32 %v1501_v45, %v1508_v43  ;;  %v1492_v54 = vmax.f32 %v1482_v46, %v1489_v47  ;;  %v1509_v60 = vunpack.c.l.bf16 %v1891_v57 }
  0x43   : > { %2121 = vmatmul.mubr.msk.f32.vlgmr.msra.gmra.mrb[8].mxu0 %vm224_vm2, %v2411_v5  ;;  %2130 = vmatmul.mubr.msk.f32.vlgmr.msra.gmra.mrb[8].mxu1 %vm224_vm2, %v2417_v11  ;;  %v1329_v56 = vmax.f32 %v1319_v49, %v1326_v50 }
  0x44   : > { %2216 = vmatprep.subr.bf16.mxu0 %v2319_v0  ;;  %2219 = vmatprep.subr.bf16.mxu1 %v2319_v0  ;;  %v2229_v58 = vpack.c.bf16 %v1511_v53, %v1510_v52  ;;  %v1502_v59 = vmax.f32 %v1492_v54, %v1499_v55 }
  0x45   : > { %2218 = vmatpush3.bf16.msra.mxu0 %v2217_v25  ;;  %2221 = vmatpush3.bf16.msra.mxu1 %v2217_v25 }
  0x46   : > { %2136 = vmatprep.subr.mxu0 %v2321_v1  ;;  %2145 = vmatprep.subr.mxu1 %v2321_v1  ;;  %v1512_v61 = vmax.f32 %v1502_v59, %v1509_v60 }
  0x47   : > { %2138 = vmatprep.mubr.msk.f32.mxu0 %vm2320_vm0, %v2321_v1  ;;  %2147 = vmatprep.mubr.msk.f32.mxu1 %vm2320_vm0, %v2321_v1 }
  0x49   : > { %2137 = vmatpush3.msk.msra.mxu0 %vm228_vm1, %v1146_v40  ;;  %2146 = vmatpush3.msk.msra.mxu1 %vm228_vm1, %v1146_v40 }
  0x4a   : > { %2139 = vmatmul.mubr.msk.f32.vlgmr.msra.gmra.mrb[10].mxu0 %vm224_vm2, %v2411_v5  ;;  %2148 = vmatmul.mubr.msk.f32.vlgmr.msra.gmra.mrb[10].mxu1 %vm224_vm2, %v2417_v11 }
  0x4b   : > { %2222 = vmatprep.subr.bf16.mxu0 %v2319_v0  ;;  %2225 = vmatprep.subr.bf16.mxu1 %v2319_v0 }
  0x4c   : > { %2224 = vmatpush3.bf16.msra.mxu0 %v2223_v48  ;;  %2227 = vmatpush3.bf16.msra.mxu1 %v2223_v48 }
  0x4d   : > { %2154 = vmatprep.subr.mxu0 %v2321_v1  ;;  %2163 = vmatprep.subr.mxu1 %v2321_v1 }
  0x4e   : > { %2156 = vmatprep.mubr.msk.f32.mxu0 %vm2320_vm0, %v2321_v1  ;;  %2165 = vmatprep.mubr.msk.f32.mxu1 %vm2320_vm0, %v2321_v1 }
  0x50   : > { %2155 = vmatpush3.msk.msra.mxu0 %vm228_vm1, %v1329_v56  ;;  %2164 = vmatpush3.msk.msra.mxu1 %vm228_vm1, %v1329_v56 }
  0x51   : > { %2157 = vmatmul.mubr.msk.f32.vlgmr.msra.gmra.mrb[12].mxu0 %vm224_vm2, %v2411_v5  ;;  %2166 = vmatmul.mubr.msk.f32.vlgmr.msra.gmra.mrb[12].mxu1 %vm224_vm2, %v2417_v11 }
  0x52   : > { %2228 = vmatprep.subr.bf16.mxu0 %v2319_v0  ;;  %2231 = vmatprep.subr.bf16.mxu1 %v2319_v0 }
  0x53   : > { %2230 = vmatpush3.bf16.msra.mxu0 %v2229_v58  ;;  %2233 = vmatpush3.bf16.msra.mxu1 %v2229_v58 }
  0x54   : > { %2172 = vmatprep.subr.mxu0 %v2321_v1  ;;  %2181 = vmatprep.subr.mxu1 %v2321_v1 }
  0x55   : > { %2174 = vmatprep.mubr.msk.f32.mxu0 %vm2320_vm0, %v2321_v1  ;;  %2183 = vmatprep.mubr.msk.f32.mxu1 %vm2320_vm0, %v2321_v1 }
  0x57   : > { %2173 = vmatpush3.msk.msra.mxu0 %vm228_vm1, %v1512_v61  ;;  %2182 = vmatpush3.msk.msra.mxu1 %vm228_vm1, %v1512_v61 }
  0x58   : > { %2175 = vmatmul.mubr.msk.f32.vlgmr.msra.gmra.mrb[14].mxu0 %vm224_vm2, %v2411_v5  ;;  %2184 = vmatmul.mubr.msk.f32.vlgmr.msra.gmra.mrb[14].mxu1 %vm224_vm2, %v2417_v11 }
  0xfa   : > { %v298_v0 = vpop.f32.mrb[0].mxu0  ;;  %v371_v1 = vpop.f32.mrb[0].mxu1 }
  0xfb   : > { %v375_v5 = vmax.f32 %v298_v0, %v371_v1  ;;  %v2050_v62 = vpop.f32.mrb[1].mxu0  ;;  %v2059_v11 = vpop.f32.mrb[1].mxu1 }
  0xfd   : > { %377 = vst.msk [vmem:[%s2570_s6] sm:$0xff] %vm376_vm3, %v375_v5 }
 0x101   : > { %v484_v63 = vpop.f32.mrb[2].mxu0  ;;  %v554_v2 = vpop.f32.mrb[2].mxu1 }
 0x102   : > { %v558_v3 = vmax.f32 %v484_v63, %v554_v2  ;;  %v2068_v4 = vpop.f32.mrb[3].mxu0  ;;  %v2077_v6 = vpop.f32.mrb[3].mxu1 }
 0x104   : > { %1794 = vst.msk [vmem:[%s2570_s6 + $0x8] sm:$0xff] %vm376_vm3, %v558_v3 }
 0x108   : > { %v667_v7 = vpop.f32.mrb[4].mxu0  ;;  %v737_v8 = vpop.f32.mrb[4].mxu1 }
 0x109   : > { %v741_v9 = vmax.f32 %v667_v7, %v737_v8  ;;  %v2086_v10 = vpop.f32.mrb[5].mxu0  ;;  %v2095_v12 = vpop.f32.mrb[5].mxu1 }
 0x10b   : > { %1811 = vst.msk [vmem:[%s2570_s6 + $0x10] sm:$0xff] %vm376_vm3, %v741_v9 }
 0x10f   : > { %v850_v13 = vpop.f32.mrb[6].mxu0  ;;  %v920_v14 = vpop.f32.mrb[6].mxu1 }
 0x110   : > { %v924_v15 = vmax.f32 %v850_v13, %v920_v14  ;;  %v2104_v16 = vpop.f32.mrb[7].mxu0  ;;  %v2113_v17 = vpop.f32.mrb[7].mxu1 }
 0x112   : > { %1828 = vst.msk [vmem:[%s2570_s6 + $0x18] sm:$0xff] %vm376_vm3, %v924_v15 }
 0x116   : > { %v1033_v18 = vpop.f32.mrb[8].mxu0  ;;  %v1103_v19 = vpop.f32.mrb[8].mxu1 }
 0x117   : > { %v1107_v20 = vmax.f32 %v1033_v18, %v1103_v19  ;;  %v2122_v21 = vpop.f32.mrb[9].mxu0  ;;  %v2131_v22 = vpop.f32.mrb[9].mxu1 }
 0x119   : > { %1845 = vst.msk [vmem:[%s2570_s6 + $0x20] sm:$0xff] %vm376_vm3, %v1107_v20 }
 0x11d   : > { %v1216_v23 = vpop.f32.mrb[10].mxu0  ;;  %v1286_v24 = vpop.f32.mrb[10].mxu1 }
 0x11e   : > { %v1290_v25 = vmax.f32 %v1216_v23, %v1286_v24  ;;  %v2140_v26 = vpop.f32.mrb[11].mxu0  ;;  %v2149_v27 = vpop.f32.mrb[11].mxu1 }
 0x120   : > { %1862 = vst.msk [vmem:[%s2570_s6 + $0x28] sm:$0xff] %vm376_vm3, %v1290_v25 }
 0x124   : > { %v1399_v28 = vpop.f32.mrb[12].mxu0  ;;  %v1469_v29 = vpop.f32.mrb[12].mxu1 }
 0x125   : > { %v1473_v30 = vmax.f32 %v1399_v28, %v1469_v29  ;;  %v2158_v31 = vpop.f32.mrb[13].mxu0  ;;  %v2167_v32 = vpop.f32.mrb[13].mxu1 }
 0x127   : > { %1879 = vst.msk [vmem:[%s2570_s6 + $0x30] sm:$0xff] %vm376_vm3, %v1473_v30 }
 0x12b   : > { %v1582_v33 = vpop.f32.mrb[14].mxu0  ;;  %v1652_v34 = vpop.f32.mrb[14].mxu1 }
 0x12c   : > { %v1656_v35 = vmax.f32 %v1582_v33, %v1652_v34  ;;  %v2176_v36 = vpop.f32.mrb[15].mxu0  ;;  %v2185_v37 = vpop.f32.mrb[15].mxu1 }
 0x12e   : > { %1896 = vst.msk [vmem:[%s2570_s6 + $0x38] sm:$0xff] %vm376_vm3, %v1656_v35 }
 0x12f PF: > { %s12_s13 = sadd.s32 1, %s2317_s13   ;;  %s2606_s9 = smov %s2309_s11 }
 0x130   : > { %p9_p8 = scmp.ge.s32.totalorder %s12_s13, 18   ;;  %s2607_s10 = smov %s2313_s12 }
 0x131   : > { %s2608_s11 = smov %s2611_s14  ;;  %s2609_s12 = smov %s2615_s15 }
 0x132   :  { %11 = sbr.rel (!%p9_p8) target bundleno = 3 (0x3), region = 97 }

</bundles_post_ra>
